<compile_context>
chip_gen: v5e
topology: v5e:2x2
jax: 0.10.0
libtpu: 0.0.40
codegen_flags: <defaults>
</compile_context>

<pallas_src>
import numpy as np
import jax
import jax.numpy as jnp
from jax.experimental import pallas as pl
from jax.experimental.pallas import tpu as pltpu


# --------------------------------------------------------------------------
# helpers
# --------------------------------------------------------------------------
def make_divisible(v, divisor=8, min_value=None):
    if min_value is None:
        min_value = divisor
    new_v = max(min_value, int(v + divisor / 2) // divisor * divisor)
    if new_v < 0.9 * v:
        new_v += divisor
    return new_v


def _pick_tile(m, cap=1024):
    for t in (1024, 512, 256, 128, 64, 32, 16, 8):
        if t <= cap and t <= m and m % t == 0:
            return t
    return m


def _relu6(x):
    return jnp.minimum(jnp.maximum(x, 0.0), 6.0)


_PARALLEL = pltpu.CompilerParams(dimension_semantics=("parallel",))


# --------------------------------------------------------------------------
# spatial layout helpers (wrapper-side, operate only on narrow Cin tensors)
# --------------------------------------------------------------------------
def _spatial_geom(H, W, K, stride):
    p = K // 2
    Hp, Wp = H + 2 * p, W + 2 * p
    Ho = (Hp - K) // stride + 1
    Wo = (Wp - K) // stride + 1
    if stride == 1:
        G, Hq, Wq = 1, Hp, Wp
    else:
        assert stride == 2 and Hp % 2 == 0 and Wp % 2 == 0
        G, Hq, Wq = 4, Hp // 2, Wp // 2
    R = (Hq + 1) * Wq  # one extra zero "image row" so tap over-reads stay in-bounds
    return p, Hp, Wp, Ho, Wo, G, Hq, Wq, R


def _prep_input(x_nhwc, K, stride):
    """Zero-pad, split into stride-parity planes (stride 2) and flatten
    spatial to rows.  Returns (N, G, R, C) bf16 plus geometry."""
    N, H, W, C = x_nhwc.shape
    p, Hp, Wp, Ho, Wo, G, Hq, Wq, R = _spatial_geom(H, W, K, stride)
    xp = jnp.pad(x_nhwc, ((0, 0), (p, p), (p, p), (0, 0)))
    if stride == 1:
        planes = [xp]
    else:
        planes = [xp[:, py::2, px::2, :] for py in (0, 1) for px in (0, 1)]
    xg = jnp.stack(planes, axis=1).reshape(N, G, Hq * Wq, C)
    xg = jnp.pad(xg, ((0, 0), (0, 0), (0, Wq), (0, 0)))  # extra zero rows
    return xg.astype(jnp.bfloat16), (G, R, Hq, Wq, Ho, Wo)


def _tap_table(K, stride, Wq):
    """(group, flat-row offset) per (dy, dx) tap."""
    taps = []
    for dy in range(K):
        for dx in range(K):
            if stride == 1:
                taps.append((0, dy * Wq + dx))
            else:
                taps.append(((dy % 2) * 2 + (dx % 2), (dy // 2) * Wq + dx // 2))
    return taps


def _interior_mask(H, W, K, stride):
    """(G, R, 1) f32: 1 at positions mapping to real pixels, 0 on zero-pad.
    Needed because expand+bias+ReLU6 of a zero-pad pixel is not zero."""
    p, Hp, Wp, Ho, Wo, G, Hq, Wq, R = _spatial_geom(H, W, K, stride)
    m = np.zeros((G, R, 1), np.float32)
    for g in range(G):
        py, px = (g // 2, g % 2) if stride == 2 else (0, 0)
        yy = np.arange(Hq) * stride + py
        xx = np.arange(Wq) * stride + px
        valid = ((yy >= p) & (yy < p + H))[:, None] & ((xx >= p) & (xx < p + W))[None, :]
        m[g, :Hq * Wq, 0] = valid.reshape(-1).astype(np.float32)
    return jnp.asarray(m)


# --------------------------------------------------------------------------
# Pallas kernels
# --------------------------------------------------------------------------
def _make_bottleneck_kernel(*, taps, Wq, Ho, Wo, Cin, Cdw, Cout,
                            has_expand, has_shortcut, G):
    """Fused expand(1x1)+BN+ReLU6 -> depthwise KxK+BN+ReLU6 -> project(1x1)+BN
    (+ residual on first Cin channels) for one image (grid step = batch n)."""
    Mo = Ho * Wq

    def kernel(*refs):
        it = iter(refs)
        x_ref = next(it)                                   # (1, G, R, Cin) bf16
        if has_expand:
            mask_ref = next(it)                            # (G, R, 1) f32
            w_exp_ref = next(it)                           # (Cin, Cdw) bf16
            b_exp_ref = next(it)                           # (1, Cdw) f32
        w_dw_ref = next(it)                                # (K*K, Cdw) f32
        b_dw_ref = next(it)                                # (1, Cdw) f32
        w_prj_ref = next(it)                               # (Cdw, Cout) bf16
        b_prj_ref = next(it)                               # (1, Cout) f32
        if has_shortcut:
            xres_ref = next(it)                            # (1, H*W, Cin) bf16
        o_ref = next(it)                                   # (1, Ho*Wo, Cout) bf16
        exp_ref = next(it)                                 # VMEM (G, R, Cdw) bf16
        dwc_ref = next(it)                                 # VMEM (Ho*Wo, Cdw) bf16

        # ---- stage 1: expand 1x1 (MXU) into the padded VMEM scratch --------
        if has_expand:
            w_exp = w_exp_ref[...]
            b_exp = b_exp_ref[...]
            for g in range(G):
                e = jnp.dot(x_ref[0, g, :, :], w_exp,
                            preferred_element_type=jnp.float32)
                e = _relu6(e + b_exp) * mask_ref[g, :, :]
                exp_ref[g, :, :] = e.astype(exp_ref.dtype)
        else:
            exp_ref[...] = x_ref[0, :, :, :]

        # ---- stage 2: depthwise KxK as shifted-row MACs (VPU) ---------------
        w_dw = w_dw_ref[...]
        acc = jnp.zeros((Mo, Cdw), jnp.float32)
        for t, (g, off) in enumerate(taps):
            tap = exp_ref[g, off:off + Mo, :].astype(jnp.float32)
            acc = acc + tap * w_dw[t:t + 1, :]
        act = _relu6(acc + b_dw_ref[...])
        # drop the wrap/garbage columns -> compact rows for the project matmul
        for y in range(Ho):
            dwc_ref[y * Wo:(y + 1) * Wo, :] = \
                act[y * Wq:y * Wq + Wo, :].astype(dwc_ref.dtype)

        # ---- stage 3: project 1x1 (MXU) + residual on first Cin channels ----
        out = jnp.dot(dwc_ref[...], w_prj_ref[...],
                      preferred_element_type=jnp.float32) + b_prj_ref[...]
        if has_shortcut:
            r = xres_ref[0, :, :].astype(jnp.float32)
            if Cin == Cout:
                out = out + r
            else:
                out = jnp.concatenate([out[:, :Cin] + r, out[:, Cin:]], axis=1)
        o_ref[0, :, :] = out.astype(o_ref.dtype)

    return kernel


def _make_stem_kernel(*, taps, Wq, Ho, Wo, Cout):
    """Dense 3x3 stride-2 conv + BN + ReLU6 as 9 tap matmuls (no im2col)."""
    Mo = Ho * Wq

    def kernel(x_ref, w_ref, b_ref, o_ref):
        acc = jnp.zeros((Mo, Cout), jnp.float32)
        for t, (g, off) in enumerate(taps):
            acc = acc + jnp.dot(x_ref[0, g, off:off + Mo, :], w_ref[t, :, :],
                                preferred_element_type=jnp.float32)
        act = _relu6(acc + b_ref[...])
        for y in range(Ho):
            o_ref[0, y * Wo:(y + 1) * Wo, :] = \
                act[y * Wq:y * Wq + Wo, :].astype(o_ref.dtype)

    return kernel


def _pw_kernel(x_ref, w_ref, b_ref, o_ref):
    acc = jnp.dot(x_ref[...], w_ref[...], preferred_element_type=jnp.float32)
    o_ref[...] = _relu6(acc + b_ref[...]).astype(o_ref.dtype)


# --------------------------------------------------------------------------
# layer wrappers
# --------------------------------------------------------------------------
def stem_conv(x_nhwc, p, *, K, stride):
    N, H, W, Cin = x_nhwc.shape
    Cout = p["w"].shape[-1]
    xg, (G, R, Hq, Wq, Ho, Wo) = _prep_input(x_nhwc, K, stride)
    taps = _tap_table(K, stride, Wq)
    kernel = _make_stem_kernel(taps=taps, Wq=Wq, Ho=Ho, Wo=Wo, Cout=Cout)
    out = pl.pallas_call(
        kernel,
        out_shape=jax.ShapeDtypeStruct((N, Ho * Wo, Cout), jnp.bfloat16),
        grid=(N,),
        in_specs=[pl.BlockSpec((1, G, R, Cin), lambda n: (n, 0, 0, 0)),
                  pl.BlockSpec((K * K, Cin, Cout), lambda n: (0, 0, 0)),
                  pl.BlockSpec((1, Cout), lambda n: (0, 0))],
        out_specs=pl.BlockSpec((1, Ho * Wo, Cout), lambda n: (n, 0, 0)),
        compiler_params=_PARALLEL,
    )(xg, p["w"], p["b"])
    return out.reshape(N, Ho, Wo, Cout)


def linear_bottleneck(x_nhwc, p, *, in_c, out_c, t, K, stride):
    N, H, W, Cin = x_nhwc.shape
    has_expand = (t != 1)
    Cdw = in_c * t if has_expand else in_c
    has_shortcut = (stride == 1) and (in_c <= out_c)

    xg, (G, R, Hq, Wq, Ho, Wo) = _prep_input(x_nhwc, K, stride)
    taps = _tap_table(K, stride, Wq)

    inputs = [xg]
    in_specs = [pl.BlockSpec((1, G, R, Cin), lambda n: (n, 0, 0, 0))]
    if has_expand:
        inputs += [_interior_mask(H, W, K, stride),
                   p["expand"]["w"], p["expand"]["b"]]
        in_specs += [pl.BlockSpec((G, R, 1), lambda n: (0, 0, 0)),
                     pl.BlockSpec((Cin, Cdw), lambda n: (0, 0)),
                     pl.BlockSpec((1, Cdw), lambda n: (0, 0))]
    inputs += [p["dw"]["w"], p["dw"]["b"], p["project"]["w"], p["project"]["b"]]
    in_specs += [pl.BlockSpec((K * K, Cdw), lambda n: (0, 0)),
                 pl.BlockSpec((1, Cdw), lambda n: (0, 0)),
                 pl.BlockSpec((Cdw, out_c), lambda n: (0, 0)),
                 pl.BlockSpec((1, out_c), lambda n: (0, 0))]
    if has_shortcut:
        inputs.append(x_nhwc.reshape(N, H * W, Cin))
        in_specs.append(pl.BlockSpec((1, H * W, Cin), lambda n: (n, 0, 0)))

    kernel = _make_bottleneck_kernel(taps=taps, Wq=Wq, Ho=Ho, Wo=Wo, Cin=in_c,
                                     Cdw=Cdw, Cout=out_c, has_expand=has_expand,
                                     has_shortcut=has_shortcut, G=G)
    out = pl.pallas_call(
        kernel,
        out_shape=jax.ShapeDtypeStruct((N, Ho * Wo, out_c), jnp.bfloat16),
        grid=(N,),
        in_specs=in_specs,
        out_specs=pl.BlockSpec((1, Ho * Wo, out_c), lambda n: (n, 0, 0)),
        scratch_shapes=[pltpu.VMEM((G, R, Cdw), jnp.bfloat16),
                        pltpu.VMEM((Ho * Wo, Cdw), jnp.bfloat16)],
        compiler_params=_PARALLEL,
    )(*inputs)
    return out.reshape(N, Ho, Wo, out_c)


def head_conv(x_nhwc, p):
    N, H, W, Cin = x_nhwc.shape
    Cout = p["w"].shape[-1]
    M = N * H * W
    TM = _pick_tile(M)
    out = pl.pallas_call(
        _pw_kernel,
        out_shape=jax.ShapeDtypeStruct((M, Cout), jnp.bfloat16),
        grid=(M // TM,),
        in_specs=[pl.BlockSpec((TM, Cin), lambda i: (i, 0)),
                  pl.BlockSpec((Cin, Cout), lambda i: (0, 0)),
                  pl.BlockSpec((1, Cout), lambda i: (0, 0))],
        out_specs=pl.BlockSpec((TM, Cout), lambda i: (i, 0)),
        compiler_params=_PARALLEL,
    )(x_nhwc.reshape(M, Cin), p["w"], p["b"])
    return out.reshape(N, H, W, Cout)


# --------------------------------------------------------------------------
# ReXNetV1_lite config + deterministic (folded-BN) parameter init
# --------------------------------------------------------------------------
def build_rexnet_lite(fix_head_stem=False, divisible_value=8, input_ch=16,
                      final_ch=164, multiplier=1.0, kernel_conf="333333", seed=0):
    out_indices = [1, 4, 10, 16]
    layers = [1, 2, 2, 3, 3, 5]
    strides = [1, 2, 2, 2, 1, 2]
    kernel_sizes = [int(e) for e in kernel_conf]
    strides = sum([[e] + [1] * (layers[i] - 1) for i, e in enumerate(strides)], [])
    ts = [1] * layers[0] + [6] * sum(layers[1:])
    kernel_sizes = sum([[e] * layers[i] for i, e in enumerate(kernel_sizes)], [])
    num_convblocks = sum(layers)

    inplanes = input_ch / multiplier if multiplier < 1.0 else input_ch
    first_channel = 32 / multiplier if multiplier < 1.0 or fix_head_stem else 32
    first_channel = make_divisible(int(round(first_channel * multiplier)), divisible_value)

    in_group, ch_group = [], []
    for i in range(num_convblocks):
        inplanes_div = make_divisible(int(round(inplanes * multiplier)), divisible_value)
        if i == 0:
            in_group.append(first_channel)
            ch_group.append(inplanes_div)
        else:
            in_group.append(inplanes_div)
            inplanes += final_ch / (num_convblocks - 1 * 1.0)
            inplanes_div = make_divisible(int(round(inplanes * multiplier)), divisible_value)
            ch_group.append(inplanes_div)
    pen_channels = int(1280 * multiplier) if multiplier > 1 and not fix_head_stem else 1280

    key = jax.random.PRNGKey(seed)

    def _bn(k, cout):
        k2, k3 = jax.random.split(k)
        scale = 1.0 + 0.1 * jax.random.normal(k2, (cout,), jnp.float32)
        bias = 0.05 * jax.random.normal(k3, (cout,), jnp.float32)
        return scale, bias

    def init_pw(k, cin, cout):
        k1, kb = jax.random.split(k)
        std = (2.0 / cin) ** 0.5
        w = std * jax.random.normal(k1, (cin, cout), jnp.float32)
        scale, bias = _bn(kb, cout)
        return {"w": (w * scale[None, :]).astype(jnp.bfloat16),  # BN scale folded
                "b": bias.reshape(1, cout)}

    def init_dw(k, c, ks):
        k1, kb = jax.random.split(k)
        std = (2.0 / (ks * ks)) ** 0.5
        w = std * jax.random.normal(k1, (ks * ks, c), jnp.float32)
        scale, bias = _bn(kb, c)
        return {"w": w * scale[None, :], "b": bias.reshape(1, c)}

    def init_dense(k, cin, cout, ks):
        k1, kb = jax.random.split(k)
        std = (2.0 / (cin * ks * ks)) ** 0.5
        w = std * jax.random.normal(k1, (ks * ks, cin, cout), jnp.float32)
        scale, bias = _bn(kb, cout)
        return {"w": (w * scale[None, None, :]).astype(jnp.bfloat16),
                "b": bias.reshape(1, cout)}

    features = []
    key, sk = jax.random.split(key)
    features.append(("stem", init_dense(sk, 3, first_channel, 3),
                     {"K": 3, "stride": 2}))

    for in_c, c, t, k, s in zip(in_group, ch_group, ts, kernel_sizes, strides):
        dw_c = in_c * t if t != 1 else in_c
        p = {}
        if t != 1:
            key, sk = jax.random.split(key)
            p["expand"] = init_pw(sk, in_c, dw_c)
        key, sk = jax.random.split(key)
        p["dw"] = init_dw(sk, dw_c, k)
        key, sk = jax.random.split(key)
        p["project"] = init_pw(sk, dw_c, c)
        features.append(("bottleneck", p,
                         {"in_c": in_c, "out_c": c, "t": t, "K": k, "stride": s}))

    key, sk = jax.random.split(key)
    features.append(("head", init_pw(sk, ch_group[-1], pen_channels), {}))

    return {"features": features, "out_indices": out_indices}


def rexnet_lite_forward(x_nchw, model):
    # NCHW f32 -> NHWC bf16 (activations carried in bf16 end-to-end)
    x = jnp.transpose(x_nchw.astype(jnp.float32), (0, 2, 3, 1)).astype(jnp.bfloat16)
    outs = []
    for i, (ftype, p, cfg) in enumerate(model["features"]):
        if ftype == "stem":
            x = stem_conv(x, p, **cfg)
        elif ftype == "bottleneck":
            x = linear_bottleneck(x, p, **cfg)
        else:  # "head": computed (matches the PyTorch module), not collected
            x = head_conv(x, p)
        if i in model["out_indices"]:
            outs.append(jnp.transpose(x.astype(jnp.float32), (0, 3, 1, 2)))
    return outs


# --------------------------------------------------------------------------
if __name__ == "__main__":
    model = build_rexnet_lite()
    x = jax.random.normal(jax.random.PRNGKey(0), (2, 3, 64, 64), jnp.float32)
    outs = rexnet_lite_forward(x, model)
    outs = [jax.block_until_ready(o) for o in outs]
    expected_channels = [16, 48, 112, 184]
    assert len(outs) == 4
    for o, c in zip(outs, expected_channels):
        assert o.shape[0] == 2 and o.shape[1] == c, o.shape
        assert bool(jnp.all(jnp.isfinite(o)))
    print("KERNEL_OK")
</pallas_src>

<mosaic_0001>
module attributes {stable_mosaic.version = 11 : i64} {
  func.func @kernel(%arg0: i32, %arg1: memref<1x4x1122x3xbf16, #tpu.memory_space<vmem>>, %arg2: memref<9x3x32xbf16, #tpu.memory_space<vmem>>, %arg3: memref<1x32xf32, #tpu.memory_space<vmem>>, %arg4: memref<1x1024x32xbf16, #tpu.memory_space<vmem>>) attributes {dimension_semantics = [#tpu.dimension_semantics<parallel>], iteration_bounds = array<i64: 2>, scalar_prefetch = 0 : i64, scratch_operands = 0 : i64, tpu.core_type = #tpu.core_type<tc>, window_params = [{transform_indices = @transform_0, window_bounds = array<i64: 1, 4, 1122, 3>}, {pipeline_mode = #tpu.pipeline_mode<synchronous>, transform_indices = @transform_1, window_bounds = array<i64: 9, 3, 32>}, {pipeline_mode = #tpu.pipeline_mode<synchronous>, transform_indices = @transform_2, window_bounds = array<i64: 1, 32>}, {transform_indices = @transform_3, window_bounds = array<i64: 1, 1024, 32>}]} {
    %cst = arith.constant 0.000000e+00 : f32
    %0 = vector.broadcast %cst : f32 to vector<1056x32xf32>
    %c0 = arith.constant 0 : index
    %c0_0 = arith.constant 0 : index
    %c0_1 = arith.constant 0 : index
    %c0_2 = arith.constant 0 : index
    %1 = vector.load %arg1[%c0, %c0_0, %c0_1, %c0_2] : memref<1x4x1122x3xbf16, #tpu.memory_space<vmem>>, vector<1x1x1056x3xbf16>
    %2 = vector.shape_cast %1 : vector<1x1x1056x3xbf16> to vector<1056x3xbf16>
    %c0_3 = arith.constant 0 : index
    %c0_4 = arith.constant 0 : index
    %c0_5 = arith.constant 0 : index
    %3 = vector.load %arg2[%c0_3, %c0_4, %c0_5] : memref<9x3x32xbf16, #tpu.memory_space<vmem>>, vector<1x3x32xbf16>
    %4 = vector.shape_cast %3 : vector<1x3x32xbf16> to vector<3x32xbf16>
    %cst_6 = arith.constant dense<0.000000e+00> : vector<1056x32xf32>
    %5 = tpu.matmul %2, %4, %cst_6 {dimension_numbers = #tpu.dot_dimension_numbers<[1], [0], [0], [1], [0, 0, 1, 1], [], []>} : vector<1056x3xbf16>, vector<3x32xbf16>, vector<1056x32xf32> -> vector<1056x32xf32>
    %6 = arith.addf %0, %5 : vector<1056x32xf32>
    %c0_7 = arith.constant 0 : index
    %c1 = arith.constant 1 : index
    %c0_8 = arith.constant 0 : index
    %c0_9 = arith.constant 0 : index
    %7 = vector.load %arg1[%c0_7, %c1, %c0_8, %c0_9] : memref<1x4x1122x3xbf16, #tpu.memory_space<vmem>>, vector<1x1x1056x3xbf16>
    %8 = vector.shape_cast %7 : vector<1x1x1056x3xbf16> to vector<1056x3xbf16>
    %c1_10 = arith.constant 1 : index
    %c0_11 = arith.constant 0 : index
    %c0_12 = arith.constant 0 : index
    %9 = vector.load %arg2[%c1_10, %c0_11, %c0_12] : memref<9x3x32xbf16, #tpu.memory_space<vmem>>, vector<1x3x32xbf16>
    %10 = vector.shape_cast %9 : vector<1x3x32xbf16> to vector<3x32xbf16>
    %cst_13 = arith.constant dense<0.000000e+00> : vector<1056x32xf32>
    %11 = tpu.matmul %8, %10, %cst_13 {dimension_numbers = #tpu.dot_dimension_numbers<[1], [0], [0], [1], [0, 0, 1, 1], [], []>} : vector<1056x3xbf16>, vector<3x32xbf16>, vector<1056x32xf32> -> vector<1056x32xf32>
    %12 = arith.addf %6, %11 : vector<1056x32xf32>
    %c0_14 = arith.constant 0 : index
    %c0_15 = arith.constant 0 : index
    %c1_16 = arith.constant 1 : index
    %c0_17 = arith.constant 0 : index
    %13 = vector.load %arg1[%c0_14, %c0_15, %c1_16, %c0_17] : memref<1x4x1122x3xbf16, #tpu.memory_space<vmem>>, vector<1x1x1056x3xbf16>
    %14 = vector.shape_cast %13 : vector<1x1x1056x3xbf16> to vector<1056x3xbf16>
    %c2 = arith.constant 2 : index
    %c0_18 = arith.constant 0 : index
    %c0_19 = arith.constant 0 : index
    %15 = vector.load %arg2[%c2, %c0_18, %c0_19] : memref<9x3x32xbf16, #tpu.memory_space<vmem>>, vector<1x3x32xbf16>
    %16 = vector.shape_cast %15 : vector<1x3x32xbf16> to vector<3x32xbf16>
    %cst_20 = arith.constant dense<0.000000e+00> : vector<1056x32xf32>
    %17 = tpu.matmul %14, %16, %cst_20 {dimension_numbers = #tpu.dot_dimension_numbers<[1], [0], [0], [1], [0, 0, 1, 1], [], []>} : vector<1056x3xbf16>, vector<3x32xbf16>, vector<1056x32xf32> -> vector<1056x32xf32>
    %18 = arith.addf %12, %17 : vector<1056x32xf32>
    %c0_21 = arith.constant 0 : index
    %c2_22 = arith.constant 2 : index
    %c0_23 = arith.constant 0 : index
    %c0_24 = arith.constant 0 : index
    %19 = vector.load %arg1[%c0_21, %c2_22, %c0_23, %c0_24] : memref<1x4x1122x3xbf16, #tpu.memory_space<vmem>>, vector<1x1x1056x3xbf16>
    %20 = vector.shape_cast %19 : vector<1x1x1056x3xbf16> to vector<1056x3xbf16>
    %c3 = arith.constant 3 : index
    %c0_25 = arith.constant 0 : index
    %c0_26 = arith.constant 0 : index
    %21 = vector.load %arg2[%c3, %c0_25, %c0_26] : memref<9x3x32xbf16, #tpu.memory_space<vmem>>, vector<1x3x32xbf16>
    %22 = vector.shape_cast %21 : vector<1x3x32xbf16> to vector<3x32xbf16>
    %cst_27 = arith.constant dense<0.000000e+00> : vector<1056x32xf32>
    %23 = tpu.matmul %20, %22, %cst_27 {dimension_numbers = #tpu.dot_dimension_numbers<[1], [0], [0], [1], [0, 0, 1, 1], [], []>} : vector<1056x3xbf16>, vector<3x32xbf16>, vector<1056x32xf32> -> vector<1056x32xf32>
    %24 = arith.addf %18, %23 : vector<1056x32xf32>
    %c0_28 = arith.constant 0 : index
    %c3_29 = arith.constant 3 : index
    %c0_30 = arith.constant 0 : index
    %c0_31 = arith.constant 0 : index
    %25 = vector.load %arg1[%c0_28, %c3_29, %c0_30, %c0_31] : memref<1x4x1122x3xbf16, #tpu.memory_space<vmem>>, vector<1x1x1056x3xbf16>
    %26 = vector.shape_cast %25 : vector<1x1x1056x3xbf16> to vector<1056x3xbf16>
    %c4 = arith.constant 4 : index
    %c0_32 = arith.constant 0 : index
    %c0_33 = arith.constant 0 : index
    %27 = vector.load %arg2[%c4, %c0_32, %c0_33] : memref<9x3x32xbf16, #tpu.memory_space<vmem>>, vector<1x3x32xbf16>
    %28 = vector.shape_cast %27 : vector<1x3x32xbf16> to vector<3x32xbf16>
    %cst_34 = arith.constant dense<0.000000e+00> : vector<1056x32xf32>
    %29 = tpu.matmul %26, %28, %cst_34 {dimension_numbers = #tpu.dot_dimension_numbers<[1], [0], [0], [1], [0, 0, 1, 1], [], []>} : vector<1056x3xbf16>, vector<3x32xbf16>, vector<1056x32xf32> -> vector<1056x32xf32>
    %30 = arith.addf %24, %29 : vector<1056x32xf32>
    %c0_35 = arith.constant 0 : index
    %c2_36 = arith.constant 2 : index
    %c1_37 = arith.constant 1 : index
    %c0_38 = arith.constant 0 : index
    %31 = vector.load %arg1[%c0_35, %c2_36, %c1_37, %c0_38] : memref<1x4x1122x3xbf16, #tpu.memory_space<vmem>>, vector<1x1x1056x3xbf16>
    %32 = vector.shape_cast %31 : vector<1x1x1056x3xbf16> to vector<1056x3xbf16>
    %c5 = arith.constant 5 : index
    %c0_39 = arith.constant 0 : index
    %c0_40 = arith.constant 0 : index
    %33 = vector.load %arg2[%c5, %c0_39, %c0_40] : memref<9x3x32xbf16, #tpu.memory_space<vmem>>, vector<1x3x32xbf16>
    %34 = vector.shape_cast %33 : vector<1x3x32xbf16> to vector<3x32xbf16>
    %cst_41 = arith.constant dense<0.000000e+00> : vector<1056x32xf32>
    %35 = tpu.matmul %32, %34, %cst_41 {dimension_numbers = #tpu.dot_dimension_numbers<[1], [0], [0], [1], [0, 0, 1, 1], [], []>} : vector<1056x3xbf16>, vector<3x32xbf16>, vector<1056x32xf32> -> vector<1056x32xf32>
    %36 = arith.addf %30, %35 : vector<1056x32xf32>
    %c0_42 = arith.constant 0 : index
    %c0_43 = arith.constant 0 : index
    %c33 = arith.constant 33 : index
    %c0_44 = arith.constant 0 : index
    %37 = vector.load %arg1[%c0_42, %c0_43, %c33, %c0_44] : memref<1x4x1122x3xbf16, #tpu.memory_space<vmem>>, vector<1x1x1056x3xbf16>
    %38 = vector.shape_cast %37 : vector<1x1x1056x3xbf16> to vector<1056x3xbf16>
    %c6 = arith.constant 6 : index
    %c0_45 = arith.constant 0 : index
    %c0_46 = arith.constant 0 : index
    %39 = vector.load %arg2[%c6, %c0_45, %c0_46] : memref<9x3x32xbf16, #tpu.memory_space<vmem>>, vector<1x3x32xbf16>
    %40 = vector.shape_cast %39 : vector<1x3x32xbf16> to vector<3x32xbf16>
    %cst_47 = arith.constant dense<0.000000e+00> : vector<1056x32xf32>
    %41 = tpu.matmul %38, %40, %cst_47 {dimension_numbers = #tpu.dot_dimension_numbers<[1], [0], [0], [1], [0, 0, 1, 1], [], []>} : vector<1056x3xbf16>, vector<3x32xbf16>, vector<1056x32xf32> -> vector<1056x32xf32>
    %42 = arith.addf %36, %41 : vector<1056x32xf32>
    %c0_48 = arith.constant 0 : index
    %c1_49 = arith.constant 1 : index
    %c33_50 = arith.constant 33 : index
    %c0_51 = arith.constant 0 : index
    %43 = vector.load %arg1[%c0_48, %c1_49, %c33_50, %c0_51] : memref<1x4x1122x3xbf16, #tpu.memory_space<vmem>>, vector<1x1x1056x3xbf16>
    %44 = vector.shape_cast %43 : vector<1x1x1056x3xbf16> to vector<1056x3xbf16>
    %c7 = arith.constant 7 : index
    %c0_52 = arith.constant 0 : index
    %c0_53 = arith.constant 0 : index
    %45 = vector.load %arg2[%c7, %c0_52, %c0_53] : memref<9x3x32xbf16, #tpu.memory_space<vmem>>, vector<1x3x32xbf16>
    %46 = vector.shape_cast %45 : vector<1x3x32xbf16> to vector<3x32xbf16>
    %cst_54 = arith.constant dense<0.000000e+00> : vector<1056x32xf32>
    %47 = tpu.matmul %44, %46, %cst_54 {dimension_numbers = #tpu.dot_dimension_numbers<[1], [0], [0], [1], [0, 0, 1, 1], [], []>} : vector<1056x3xbf16>, vector<3x32xbf16>, vector<1056x32xf32> -> vector<1056x32xf32>
    %48 = arith.addf %42, %47 : vector<1056x32xf32>
    %c0_55 = arith.constant 0 : index
    %c0_56 = arith.constant 0 : index
    %c34 = arith.constant 34 : index
    %c0_57 = arith.constant 0 : index
    %49 = vector.load %arg1[%c0_55, %c0_56, %c34, %c0_57] : memref<1x4x1122x3xbf16, #tpu.memory_space<vmem>>, vector<1x1x1056x3xbf16>
    %50 = vector.shape_cast %49 : vector<1x1x1056x3xbf16> to vector<1056x3xbf16>
    %c8 = arith.constant 8 : index
    %c0_58 = arith.constant 0 : index
    %c0_59 = arith.constant 0 : index
    %51 = vector.load %arg2[%c8, %c0_58, %c0_59] : memref<9x3x32xbf16, #tpu.memory_space<vmem>>, vector<1x3x32xbf16>
    %52 = vector.shape_cast %51 : vector<1x3x32xbf16> to vector<3x32xbf16>
    %cst_60 = arith.constant dense<0.000000e+00> : vector<1056x32xf32>
    %53 = tpu.matmul %50, %52, %cst_60 {dimension_numbers = #tpu.dot_dimension_numbers<[1], [0], [0], [1], [0, 0, 1, 1], [], []>} : vector<1056x3xbf16>, vector<3x32xbf16>, vector<1056x32xf32> -> vector<1056x32xf32>
    %54 = arith.addf %48, %53 : vector<1056x32xf32>
    %c0_61 = arith.constant 0 : index
    %c0_62 = arith.constant 0 : index
    %55 = vector.load %arg3[%c0_61, %c0_62] : memref<1x32xf32, #tpu.memory_space<vmem>>, vector<1x32xf32>
    %56 = vector.broadcast %55 : vector<1x32xf32> to vector<1056x32xf32>
    %57 = arith.addf %54, %56 : vector<1056x32xf32>
    %cst_63 = arith.constant 0.000000e+00 : f32
    %58 = vector.broadcast %cst_63 : f32 to vector<1056x32xf32>
    %59 = arith.maximumf %57, %58 : vector<1056x32xf32>
    %cst_64 = arith.constant 6.000000e+00 : f32
    %60 = vector.broadcast %cst_64 : f32 to vector<1056x32xf32>
    %61 = arith.minimumf %59, %60 : vector<1056x32xf32>
    %62 = vector.extract_strided_slice %61 {offsets = [0, 0], sizes = [32, 32], strides = [1, 1]} : vector<1056x32xf32> to vector<32x32xf32>
    %63 = arith.truncf %62 : vector<32x32xf32> to vector<32x32xbf16>
    %c0_65 = arith.constant 0 : index
    %c0_66 = arith.constant 0 : index
    %c0_67 = arith.constant 0 : index
    %64 = vector.load %arg4[%c0_65, %c0_66, %c0_67] : memref<1x1024x32xbf16, #tpu.memory_space<vmem>>, vector<1x32x32xbf16>
    %65 = vector.shape_cast %64 : vector<1x32x32xbf16> to vector<32x32xbf16>
    %66 = vector.shape_cast %63 : vector<32x32xbf16> to vector<1x32x32xbf16>
    tpu.vector_store %arg4[%c0_65, %c0_66, %c0_67], %66 {strides = array<i32>} : memref<1x1024x32xbf16, #tpu.memory_space<vmem>>, vector<1x32x32xbf16>,
    %67 = vector.extract_strided_slice %61 {offsets = [33, 0], sizes = [32, 32], strides = [1, 1]} : vector<1056x32xf32> to vector<32x32xf32>
    %68 = arith.truncf %67 : vector<32x32xf32> to vector<32x32xbf16>
    %c0_68 = arith.constant 0 : index
    %c32 = arith.constant 32 : index
    %c0_69 = arith.constant 0 : index
    %69 = vector.load %arg4[%c0_68, %c32, %c0_69] : memref<1x1024x32xbf16, #tpu.memory_space<vmem>>, vector<1x32x32xbf16>
    %70 = vector.shape_cast %69 : vector<1x32x32xbf16> to vector<32x32xbf16>
    %71 = vector.shape_cast %68 : vector<32x32xbf16> to vector<1x32x32xbf16>
    tpu.vector_store %arg4[%c0_68, %c32, %c0_69], %71 {strides = array<i32>} : memref<1x1024x32xbf16, #tpu.memory_space<vmem>>, vector<1x32x32xbf16>,
    %72 = vector.extract_strided_slice %61 {offsets = [66, 0], sizes = [32, 32], strides = [1, 1]} : vector<1056x32xf32> to vector<32x32xf32>
    %73 = arith.truncf %72 : vector<32x32xf32> to vector<32x32xbf16>
    %c0_70 = arith.constant 0 : index
    %c64 = arith.constant 64 : index
    %c0_71 = arith.constant 0 : index
    %74 = vector.load %arg4[%c0_70, %c64, %c0_71] : memref<1x1024x32xbf16, #tpu.memory_space<vmem>>, vector<1x32x32xbf16>
    %75 = vector.shape_cast %74 : vector<1x32x32xbf16> to vector<32x32xbf16>
    %76 = vector.shape_cast %73 : vector<32x32xbf16> to vector<1x32x32xbf16>
    tpu.vector_store %arg4[%c0_70, %c64, %c0_71], %76 {strides = array<i32>} : memref<1x1024x32xbf16, #tpu.memory_space<vmem>>, vector<1x32x32xbf16>,
    %77 = vector.extract_strided_slice %61 {offsets = [99, 0], sizes = [32, 32], strides = [1, 1]} : vector<1056x32xf32> to vector<32x32xf32>
    %78 = arith.truncf %77 : vector<32x32xf32> to vector<32x32xbf16>
    %c0_72 = arith.constant 0 : index
    %c96 = arith.constant 96 : index
    %c0_73 = arith.constant 0 : index
    %79 = vector.load %arg4[%c0_72, %c96, %c0_73] : memref<1x1024x32xbf16, #tpu.memory_space<vmem>>, vector<1x32x32xbf16>
    %80 = vector.shape_cast %79 : vector<1x32x32xbf16> to vector<32x32xbf16>
    %81 = vector.shape_cast %78 : vector<32x32xbf16> to vector<1x32x32xbf16>
    tpu.vector_store %arg4[%c0_72, %c96, %c0_73], %81 {strides = array<i32>} : memref<1x1024x32xbf16, #tpu.memory_space<vmem>>, vector<1x32x32xbf16>,
    %82 = vector.extract_strided_slice %61 {offsets = [132, 0], sizes = [32, 32], strides = [1, 1]} : vector<1056x32xf32> to vector<32x32xf32>
    %83 = arith.truncf %82 : vector<32x32xf32> to vector<32x32xbf16>
    %c0_74 = arith.constant 0 : index
    %c128 = arith.constant 128 : index
    %c0_75 = arith.constant 0 : index
    %84 = vector.load %arg4[%c0_74, %c128, %c0_75] : memref<1x1024x32xbf16, #tpu.memory_space<vmem>>, vector<1x32x32xbf16>
    %85 = vector.shape_cast %84 : vector<1x32x32xbf16> to vector<32x32xbf16>
    %86 = vector.shape_cast %83 : vector<32x32xbf16> to vector<1x32x32xbf16>
    tpu.vector_store %arg4[%c0_74, %c128, %c0_75], %86 {strides = array<i32>} : memref<1x1024x32xbf16, #tpu.memory_space<vmem>>, vector<1x32x32xbf16>,
    %87 = vector.extract_strided_slice %61 {offsets = [165, 0], sizes = [32, 32], strides = [1, 1]} : vector<1056x32xf32> to vector<32x32xf32>
    %88 = arith.truncf %87 : vector<32x32xf32> to vector<32x32xbf16>
    %c0_76 = arith.constant 0 : index
    %c160 = arith.constant 160 : index
    %c0_77 = arith.constant 0 : index
    %89 = vector.load %arg4[%c0_76, %c160, %c0_77] : memref<1x1024x32xbf16, #tpu.memory_space<vmem>>, vector<1x32x32xbf16>
    %90 = vector.shape_cast %89 : vector<1x32x32xbf16> to vector<32x32xbf16>
    %91 = vector.shape_cast %88 : vector<32x32xbf16> to vector<1x32x32xbf16>
    tpu.vector_store %arg4[%c0_76, %c160, %c0_77], %91 {strides = array<i32>} : memref<1x1024x32xbf16, #tpu.memory_space<vmem>>, vector<1x32x32xbf16>,
    %92 = vector.extract_strided_slice %61 {offsets = [198, 0], sizes = [32, 32], strides = [1, 1]} : vector<1056x32xf32> to vector<32x32xf32>
    %93 = arith.truncf %92 : vector<32x32xf32> to vector<32x32xbf16>
    %c0_78 = arith.constant 0 : index
    %c192 = arith.constant 192 : index
    %c0_79 = arith.constant 0 : index
    %94 = vector.load %arg4[%c0_78, %c192, %c0_79] : memref<1x1024x32xbf16, #tpu.memory_space<vmem>>, vector<1x32x32xbf16>
    %95 = vector.shape_cast %94 : vector<1x32x32xbf16> to vector<32x32xbf16>
    %96 = vector.shape_cast %93 : vector<32x32xbf16> to vector<1x32x32xbf16>
    tpu.vector_store %arg4[%c0_78, %c192, %c0_79], %96 {strides = array<i32>} : memref<1x1024x32xbf16, #tpu.memory_space<vmem>>, vector<1x32x32xbf16>,
    %97 = vector.extract_strided_slice %61 {offsets = [231, 0], sizes = [32, 32], strides = [1, 1]} : vector<1056x32xf32> to vector<32x32xf32>
    %98 = arith.truncf %97 : vector<32x32xf32> to vector<32x32xbf16>
    %c0_80 = arith.constant 0 : index
    %c224 = arith.constant 224 : index
    %c0_81 = arith.constant 0 : index
    %99 = vector.load %arg4[%c0_80, %c224, %c0_81] : memref<1x1024x32xbf16, #tpu.memory_space<vmem>>, vector<1x32x32xbf16>
    %100 = vector.shape_cast %99 : vector<1x32x32xbf16> to vector<32x32xbf16>
    %101 = vector.shape_cast %98 : vector<32x32xbf16> to vector<1x32x32xbf16>
    tpu.vector_store %arg4[%c0_80, %c224, %c0_81], %101 {strides = array<i32>} : memref<1x1024x32xbf16, #tpu.memory_space<vmem>>, vector<1x32x32xbf16>,
    %102 = vector.extract_strided_slice %61 {offsets = [264, 0], sizes = [32, 32], strides = [1, 1]} : vector<1056x32xf32> to vector<32x32xf32>
    %103 = arith.truncf %102 : vector<32x32xf32> to vector<32x32xbf16>
    %c0_82 = arith.constant 0 : index
    %c256 = arith.constant 256 : index
    %c0_83 = arith.constant 0 : index
    %104 = vector.load %arg4[%c0_82, %c256, %c0_83] : memref<1x1024x32xbf16, #tpu.memory_space<vmem>>, vector<1x32x32xbf16>
    %105 = vector.shape_cast %104 : vector<1x32x32xbf16> to vector<32x32xbf16>
    %106 = vector.shape_cast %103 : vector<32x32xbf16> to vector<1x32x32xbf16>
    tpu.vector_store %arg4[%c0_82, %c256, %c0_83], %106 {strides = array<i32>} : memref<1x1024x32xbf16, #tpu.memory_space<vmem>>, vector<1x32x32xbf16>,
    %107 = vector.extract_strided_slice %61 {offsets = [297, 0], sizes = [32, 32], strides = [1, 1]} : vector<1056x32xf32> to vector<32x32xf32>
    %108 = arith.truncf %107 : vector<32x32xf32> to vector<32x32xbf16>
    %c0_84 = arith.constant 0 : index
    %c288 = arith.constant 288 : index
    %c0_85 = arith.constant 0 : index
    %109 = vector.load %arg4[%c0_84, %c288, %c0_85] : memref<1x1024x32xbf16, #tpu.memory_space<vmem>>, vector<1x32x32xbf16>
    %110 = vector.shape_cast %109 : vector<1x32x32xbf16> to vector<32x32xbf16>
    %111 = vector.shape_cast %108 : vector<32x32xbf16> to vector<1x32x32xbf16>
    tpu.vector_store %arg4[%c0_84, %c288, %c0_85], %111 {strides = array<i32>} : memref<1x1024x32xbf16, #tpu.memory_space<vmem>>, vector<1x32x32xbf16>,
    %112 = vector.extract_strided_slice %61 {offsets = [330, 0], sizes = [32, 32], strides = [1, 1]} : vector<1056x32xf32> to vector<32x32xf32>
    %113 = arith.truncf %112 : vector<32x32xf32> to vector<32x32xbf16>
    %c0_86 = arith.constant 0 : index
    %c320 = arith.constant 320 : index
    %c0_87 = arith.constant 0 : index
    %114 = vector.load %arg4[%c0_86, %c320, %c0_87] : memref<1x1024x32xbf16, #tpu.memory_space<vmem>>, vector<1x32x32xbf16>
    %115 = vector.shape_cast %114 : vector<1x32x32xbf16> to vector<32x32xbf16>
    %116 = vector.shape_cast %113 : vector<32x32xbf16> to vector<1x32x32xbf16>
    tpu.vector_store %arg4[%c0_86, %c320, %c0_87], %116 {strides = array<i32>} : memref<1x1024x32xbf16, #tpu.memory_space<vmem>>, vector<1x32x32xbf16>,
    %117 = vector.extract_strided_slice %61 {offsets = [363, 0], sizes = [32, 32], strides = [1, 1]} : vector<1056x32xf32> to vector<32x32xf32>
    %118 = arith.truncf %117 : vector<32x32xf32> to vector<32x32xbf16>
    %c0_88 = arith.constant 0 : index
    %c352 = arith.constant 352 : index
    %c0_89 = arith.constant 0 : index
    %119 = vector.load %arg4[%c0_88, %c352, %c0_89] : memref<1x1024x32xbf16, #tpu.memory_space<vmem>>, vector<1x32x32xbf16>
    %120 = vector.shape_cast %119 : vector<1x32x32xbf16> to vector<32x32xbf16>
    %121 = vector.shape_cast %118 : vector<32x32xbf16> to vector<1x32x32xbf16>
    tpu.vector_store %arg4[%c0_88, %c352, %c0_89], %121 {strides = array<i32>} : memref<1x1024x32xbf16, #tpu.memory_space<vmem>>, vector<1x32x32xbf16>,
    %122 = vector.extract_strided_slice %61 {offsets = [396, 0], sizes = [32, 32], strides = [1, 1]} : vector<1056x32xf32> to vector<32x32xf32>
    %123 = arith.truncf %122 : vector<32x32xf32> to vector<32x32xbf16>
    %c0_90 = arith.constant 0 : index
    %c384 = arith.constant 384 : index
    %c0_91 = arith.constant 0 : index
    %124 = vector.load %arg4[%c0_90, %c384, %c0_91] : memref<1x1024x32xbf16, #tpu.memory_space<vmem>>, vector<1x32x32xbf16>
    %125 = vector.shape_cast %124 : vector<1x32x32xbf16> to vector<32x32xbf16>
    %126 = vector.shape_cast %123 : vector<32x32xbf16> to vector<1x32x32xbf16>
    tpu.vector_store %arg4[%c0_90, %c384, %c0_91], %126 {strides = array<i32>} : memref<1x1024x32xbf16, #tpu.memory_space<vmem>>, vector<1x32x32xbf16>,
    %127 = vector.extract_strided_slice %61 {offsets = [429, 0], sizes = [32, 32], strides = [1, 1]} : vector<1056x32xf32> to vector<32x32xf32>
    %128 = arith.truncf %127 : vector<32x32xf32> to vector<32x32xbf16>
    %c0_92 = arith.constant 0 : index
    %c416 = arith.constant 416 : index
    %c0_93 = arith.constant 0 : index
    %129 = vector.load %arg4[%c0_92, %c416, %c0_93] : memref<1x1024x32xbf16, #tpu.memory_space<vmem>>, vector<1x32x32xbf16>
    %130 = vector.shape_cast %129 : vector<1x32x32xbf16> to vector<32x32xbf16>
    %131 = vector.shape_cast %128 : vector<32x32xbf16> to vector<1x32x32xbf16>
    tpu.vector_store %arg4[%c0_92, %c416, %c0_93], %131 {strides = array<i32>} : memref<1x1024x32xbf16, #tpu.memory_space<vmem>>, vector<1x32x32xbf16>,
    %132 = vector.extract_strided_slice %61 {offsets = [462, 0], sizes = [32, 32], strides = [1, 1]} : vector<1056x32xf32> to vector<32x32xf32>
    %133 = arith.truncf %132 : vector<32x32xf32> to vector<32x32xbf16>
    %c0_94 = arith.constant 0 : index
    %c448 = arith.constant 448 : index
    %c0_95 = arith.constant 0 : index
    %134 = vector.load %arg4[%c0_94, %c448, %c0_95] : memref<1x1024x32xbf16, #tpu.memory_space<vmem>>, vector<1x32x32xbf16>
    %135 = vector.shape_cast %134 : vector<1x32x32xbf16> to vector<32x32xbf16>
    %136 = vector.shape_cast %133 : vector<32x32xbf16> to vector<1x32x32xbf16>
    tpu.vector_store %arg4[%c0_94, %c448, %c0_95], %136 {strides = array<i32>} : memref<1x1024x32xbf16, #tpu.memory_space<vmem>>, vector<1x32x32xbf16>,
    %137 = vector.extract_strided_slice %61 {offsets = [495, 0], sizes = [32, 32], strides = [1, 1]} : vector<1056x32xf32> to vector<32x32xf32>
    %138 = arith.truncf %137 : vector<32x32xf32> to vector<32x32xbf16>
    %c0_96 = arith.constant 0 : index
    %c480 = arith.constant 480 : index
    %c0_97 = arith.constant 0 : index
    %139 = vector.load %arg4[%c0_96, %c480, %c0_97] : memref<1x1024x32xbf16, #tpu.memory_space<vmem>>, vector<1x32x32xbf16>
    %140 = vector.shape_cast %139 : vector<1x32x32xbf16> to vector<32x32xbf16>
    %141 = vector.shape_cast %138 : vector<32x32xbf16> to vector<1x32x32xbf16>
    tpu.vector_store %arg4[%c0_96, %c480, %c0_97], %141 {strides = array<i32>} : memref<1x1024x32xbf16, #tpu.memory_space<vmem>>, vector<1x32x32xbf16>,
    %142 = vector.extract_strided_slice %61 {offsets = [528, 0], sizes = [32, 32], strides = [1, 1]} : vector<1056x32xf32> to vector<32x32xf32>
    %143 = arith.truncf %142 : vector<32x32xf32> to vector<32x32xbf16>
    %c0_98 = arith.constant 0 : index
    %c512 = arith.constant 512 : index
    %c0_99 = arith.constant 0 : index
    %144 = vector.load %arg4[%c0_98, %c512, %c0_99] : memref<1x1024x32xbf16, #tpu.memory_space<vmem>>, vector<1x32x32xbf16>
    %145 = vector.shape_cast %144 : vector<1x32x32xbf16> to vector<32x32xbf16>
    %146 = vector.shape_cast %143 : vector<32x32xbf16> to vector<1x32x32xbf16>
    tpu.vector_store %arg4[%c0_98, %c512, %c0_99], %146 {strides = array<i32>} : memref<1x1024x32xbf16, #tpu.memory_space<vmem>>, vector<1x32x32xbf16>,
    %147 = vector.extract_strided_slice %61 {offsets = [561, 0], sizes = [32, 32], strides = [1, 1]} : vector<1056x32xf32> to vector<32x32xf32>
    %148 = arith.truncf %147 : vector<32x32xf32> to vector<32x32xbf16>
    %c0_100 = arith.constant 0 : index
    %c544 = arith.constant 544 : index
    %c0_101 = arith.constant 0 : index
    %149 = vector.load %arg4[%c0_100, %c544, %c0_101] : memref<1x1024x32xbf16, #tpu.memory_space<vmem>>, vector<1x32x32xbf16>
    %150 = vector.shape_cast %149 : vector<1x32x32xbf16> to vector<32x32xbf16>
    %151 = vector.shape_cast %148 : vector<32x32xbf16> to vector<1x32x32xbf16>
    tpu.vector_store %arg4[%c0_100, %c544, %c0_101], %151 {strides = array<i32>} : memref<1x1024x32xbf16, #tpu.memory_space<vmem>>, vector<1x32x32xbf16>,
    %152 = vector.extract_strided_slice %61 {offsets = [594, 0], sizes = [32, 32], strides = [1, 1]} : vector<1056x32xf32> to vector<32x32xf32>
    %153 = arith.truncf %152 : vector<32x32xf32> to vector<32x32xbf16>
    %c0_102 = arith.constant 0 : index
    %c576 = arith.constant 576 : index
    %c0_103 = arith.constant 0 : index
    %154 = vector.load %arg4[%c0_102, %c576, %c0_103] : memref<1x1024x32xbf16, #tpu.memory_space<vmem>>, vector<1x32x32xbf16>
    %155 = vector.shape_cast %154 : vector<1x32x32xbf16> to vector<32x32xbf16>
    %156 = vector.shape_cast %153 : vector<32x32xbf16> to vector<1x32x32xbf16>
    tpu.vector_store %arg4[%c0_102, %c576, %c0_103], %156 {strides = array<i32>} : memref<1x1024x32xbf16, #tpu.memory_space<vmem>>, vector<1x32x32xbf16>,
    %157 = vector.extract_strided_slice %61 {offsets = [627, 0], sizes = [32, 32], strides = [1, 1]} : vector<1056x32xf32> to vector<32x32xf32>
    %158 = arith.truncf %157 : vector<32x32xf32> to vector<32x32xbf16>
    %c0_104 = arith.constant 0 : index
    %c608 = arith.constant 608 : index
    %c0_105 = arith.constant 0 : index
    %159 = vector.load %arg4[%c0_104, %c608, %c0_105] : memref<1x1024x32xbf16, #tpu.memory_space<vmem>>, vector<1x32x32xbf16>
    %160 = vector.shape_cast %159 : vector<1x32x32xbf16> to vector<32x32xbf16>
    %161 = vector.shape_cast %158 : vector<32x32xbf16> to vector<1x32x32xbf16>
    tpu.vector_store %arg4[%c0_104, %c608, %c0_105], %161 {strides = array<i32>} : memref<1x1024x32xbf16, #tpu.memory_space<vmem>>, vector<1x32x32xbf16>,
    %162 = vector.extract_strided_slice %61 {offsets = [660, 0], sizes = [32, 32], strides = [1, 1]} : vector<1056x32xf32> to vector<32x32xf32>
    %163 = arith.truncf %162 : vector<32x32xf32> to vector<32x32xbf16>
    %c0_106 = arith.constant 0 : index
    %c640 = arith.constant 640 : index
    %c0_107 = arith.constant 0 : index
    %164 = vector.load %arg4[%c0_106, %c640, %c0_107] : memref<1x1024x32xbf16, #tpu.memory_space<vmem>>, vector<1x32x32xbf16>
    %165 = vector.shape_cast %164 : vector<1x32x32xbf16> to vector<32x32xbf16>
    %166 = vector.shape_cast %163 : vector<32x32xbf16> to vector<1x32x32xbf16>
    tpu.vector_store %arg4[%c0_106, %c640, %c0_107], %166 {strides = array<i32>} : memref<1x1024x32xbf16, #tpu.memory_space<vmem>>, vector<1x32x32xbf16>,
    %167 = vector.extract_strided_slice %61 {offsets = [693, 0], sizes = [32, 32], strides = [1, 1]} : vector<1056x32xf32> to vector<32x32xf32>
    %168 = arith.truncf %167 : vector<32x32xf32> to vector<32x32xbf16>
    %c0_108 = arith.constant 0 : index
    %c672 = arith.constant 672 : index
    %c0_109 = arith.constant 0 : index
    %169 = vector.load %arg4[%c0_108, %c672, %c0_109] : memref<1x1024x32xbf16, #tpu.memory_space<vmem>>, vector<1x32x32xbf16>
    %170 = vector.shape_cast %169 : vector<1x32x32xbf16> to vector<32x32xbf16>
    %171 = vector.shape_cast %168 : vector<32x32xbf16> to vector<1x32x32xbf16>
    tpu.vector_store %arg4[%c0_108, %c672, %c0_109], %171 {strides = array<i32>} : memref<1x1024x32xbf16, #tpu.memory_space<vmem>>, vector<1x32x32xbf16>,
    %172 = vector.extract_strided_slice %61 {offsets = [726, 0], sizes = [32, 32], strides = [1, 1]} : vector<1056x32xf32> to vector<32x32xf32>
    %173 = arith.truncf %172 : vector<32x32xf32> to vector<32x32xbf16>
    %c0_110 = arith.constant 0 : index
    %c704 = arith.constant 704 : index
    %c0_111 = arith.constant 0 : index
    %174 = vector.load %arg4[%c0_110, %c704, %c0_111] : memref<1x1024x32xbf16, #tpu.memory_space<vmem>>, vector<1x32x32xbf16>
    %175 = vector.shape_cast %174 : vector<1x32x32xbf16> to vector<32x32xbf16>
    %176 = vector.shape_cast %173 : vector<32x32xbf16> to vector<1x32x32xbf16>
    tpu.vector_store %arg4[%c0_110, %c704, %c0_111], %176 {strides = array<i32>} : memref<1x1024x32xbf16, #tpu.memory_space<vmem>>, vector<1x32x32xbf16>,
    %177 = vector.extract_strided_slice %61 {offsets = [759, 0], sizes = [32, 32], strides = [1, 1]} : vector<1056x32xf32> to vector<32x32xf32>
    %178 = arith.truncf %177 : vector<32x32xf32> to vector<32x32xbf16>
    %c0_112 = arith.constant 0 : index
    %c736 = arith.constant 736 : index
    %c0_113 = arith.constant 0 : index
    %179 = vector.load %arg4[%c0_112, %c736, %c0_113] : memref<1x1024x32xbf16, #tpu.memory_space<vmem>>, vector<1x32x32xbf16>
    %180 = vector.shape_cast %179 : vector<1x32x32xbf16> to vector<32x32xbf16>
    %181 = vector.shape_cast %178 : vector<32x32xbf16> to vector<1x32x32xbf16>
    tpu.vector_store %arg4[%c0_112, %c736, %c0_113], %181 {strides = array<i32>} : memref<1x1024x32xbf16, #tpu.memory_space<vmem>>, vector<1x32x32xbf16>,
    %182 = vector.extract_strided_slice %61 {offsets = [792, 0], sizes = [32, 32], strides = [1, 1]} : vector<1056x32xf32> to vector<32x32xf32>
    %183 = arith.truncf %182 : vector<32x32xf32> to vector<32x32xbf16>
    %c0_114 = arith.constant 0 : index
    %c768 = arith.constant 768 : index
    %c0_115 = arith.constant 0 : index
    %184 = vector.load %arg4[%c0_114, %c768, %c0_115] : memref<1x1024x32xbf16, #tpu.memory_space<vmem>>, vector<1x32x32xbf16>
    %185 = vector.shape_cast %184 : vector<1x32x32xbf16> to vector<32x32xbf16>
    %186 = vector.shape_cast %183 : vector<32x32xbf16> to vector<1x32x32xbf16>
    tpu.vector_store %arg4[%c0_114, %c768, %c0_115], %186 {strides = array<i32>} : memref<1x1024x32xbf16, #tpu.memory_space<vmem>>, vector<1x32x32xbf16>,
    %187 = vector.extract_strided_slice %61 {offsets = [825, 0], sizes = [32, 32], strides = [1, 1]} : vector<1056x32xf32> to vector<32x32xf32>
    %188 = arith.truncf %187 : vector<32x32xf32> to vector<32x32xbf16>
    %c0_116 = arith.constant 0 : index
    %c800 = arith.constant 800 : index
    %c0_117 = arith.constant 0 : index
    %189 = vector.load %arg4[%c0_116, %c800, %c0_117] : memref<1x1024x32xbf16, #tpu.memory_space<vmem>>, vector<1x32x32xbf16>
    %190 = vector.shape_cast %189 : vector<1x32x32xbf16> to vector<32x32xbf16>
    %191 = vector.shape_cast %188 : vector<32x32xbf16> to vector<1x32x32xbf16>
    tpu.vector_store %arg4[%c0_116, %c800, %c0_117], %191 {strides = array<i32>} : memref<1x1024x32xbf16, #tpu.memory_space<vmem>>, vector<1x32x32xbf16>,
    %192 = vector.extract_strided_slice %61 {offsets = [858, 0], sizes = [32, 32], strides = [1, 1]} : vector<1056x32xf32> to vector<32x32xf32>
    %193 = arith.truncf %192 : vector<32x32xf32> to vector<32x32xbf16>
    %c0_118 = arith.constant 0 : index
    %c832 = arith.constant 832 : index
    %c0_119 = arith.constant 0 : index
    %194 = vector.load %arg4[%c0_118, %c832, %c0_119] : memref<1x1024x32xbf16, #tpu.memory_space<vmem>>, vector<1x32x32xbf16>
    %195 = vector.shape_cast %194 : vector<1x32x32xbf16> to vector<32x32xbf16>
    %196 = vector.shape_cast %193 : vector<32x32xbf16> to vector<1x32x32xbf16>
    tpu.vector_store %arg4[%c0_118, %c832, %c0_119], %196 {strides = array<i32>} : memref<1x1024x32xbf16, #tpu.memory_space<vmem>>, vector<1x32x32xbf16>,
    %197 = vector.extract_strided_slice %61 {offsets = [891, 0], sizes = [32, 32], strides = [1, 1]} : vector<1056x32xf32> to vector<32x32xf32>
    %198 = arith.truncf %197 : vector<32x32xf32> to vector<32x32xbf16>
    %c0_120 = arith.constant 0 : index
    %c864 = arith.constant 864 : index
    %c0_121 = arith.constant 0 : index
    %199 = vector.load %arg4[%c0_120, %c864, %c0_121] : memref<1x1024x32xbf16, #tpu.memory_space<vmem>>, vector<1x32x32xbf16>
    %200 = vector.shape_cast %199 : vector<1x32x32xbf16> to vector<32x32xbf16>
    %201 = vector.shape_cast %198 : vector<32x32xbf16> to vector<1x32x32xbf16>
    tpu.vector_store %arg4[%c0_120, %c864, %c0_121], %201 {strides = array<i32>} : memref<1x1024x32xbf16, #tpu.memory_space<vmem>>, vector<1x32x32xbf16>,
    %202 = vector.extract_strided_slice %61 {offsets = [924, 0], sizes = [32, 32], strides = [1, 1]} : vector<1056x32xf32> to vector<32x32xf32>
    %203 = arith.truncf %202 : vector<32x32xf32> to vector<32x32xbf16>
    %c0_122 = arith.constant 0 : index
    %c896 = arith.constant 896 : index
    %c0_123 = arith.constant 0 : index
    %204 = vector.load %arg4[%c0_122, %c896, %c0_123] : memref<1x1024x32xbf16, #tpu.memory_space<vmem>>, vector<1x32x32xbf16>
    %205 = vector.shape_cast %204 : vector<1x32x32xbf16> to vector<32x32xbf16>
    %206 = vector.shape_cast %203 : vector<32x32xbf16> to vector<1x32x32xbf16>
    tpu.vector_store %arg4[%c0_122, %c896, %c0_123], %206 {strides = array<i32>} : memref<1x1024x32xbf16, #tpu.memory_space<vmem>>, vector<1x32x32xbf16>,
    %207 = vector.extract_strided_slice %61 {offsets = [957, 0], sizes = [32, 32], strides = [1, 1]} : vector<1056x32xf32> to vector<32x32xf32>
    %208 = arith.truncf %207 : vector<32x32xf32> to vector<32x32xbf16>
    %c0_124 = arith.constant 0 : index
    %c928 = arith.constant 928 : index
    %c0_125 = arith.constant 0 : index
    %209 = vector.load %arg4[%c0_124, %c928, %c0_125] : memref<1x1024x32xbf16, #tpu.memory_space<vmem>>, vector<1x32x32xbf16>
    %210 = vector.shape_cast %209 : vector<1x32x32xbf16> to vector<32x32xbf16>
    %211 = vector.shape_cast %208 : vector<32x32xbf16> to vector<1x32x32xbf16>
    tpu.vector_store %arg4[%c0_124, %c928, %c0_125], %211 {strides = array<i32>} : memref<1x1024x32xbf16, #tpu.memory_space<vmem>>, vector<1x32x32xbf16>,
    %212 = vector.extract_strided_slice %61 {offsets = [990, 0], sizes = [32, 32], strides = [1, 1]} : vector<1056x32xf32> to vector<32x32xf32>
    %213 = arith.truncf %212 : vector<32x32xf32> to vector<32x32xbf16>
    %c0_126 = arith.constant 0 : index
    %c960 = arith.constant 960 : index
    %c0_127 = arith.constant 0 : index
    %214 = vector.load %arg4[%c0_126, %c960, %c0_127] : memref<1x1024x32xbf16, #tpu.memory_space<vmem>>, vector<1x32x32xbf16>
    %215 = vector.shape_cast %214 : vector<1x32x32xbf16> to vector<32x32xbf16>
    %216 = vector.shape_cast %213 : vector<32x32xbf16> to vector<1x32x32xbf16>
    tpu.vector_store %arg4[%c0_126, %c960, %c0_127], %216 {strides = array<i32>} : memref<1x1024x32xbf16, #tpu.memory_space<vmem>>, vector<1x32x32xbf16>,
    %217 = vector.extract_strided_slice %61 {offsets = [1023, 0], sizes = [32, 32], strides = [1, 1]} : vector<1056x32xf32> to vector<32x32xf32>
    %218 = arith.truncf %217 : vector<32x32xf32> to vector<32x32xbf16>
    %c0_128 = arith.constant 0 : index
    %c992 = arith.constant 992 : index
    %c0_129 = arith.constant 0 : index
    %219 = vector.load %arg4[%c0_128, %c992, %c0_129] : memref<1x1024x32xbf16, #tpu.memory_space<vmem>>, vector<1x32x32xbf16>
    %220 = vector.shape_cast %219 : vector<1x32x32xbf16> to vector<32x32xbf16>
    %221 = vector.shape_cast %218 : vector<32x32xbf16> to vector<1x32x32xbf16>
    tpu.vector_store %arg4[%c0_128, %c992, %c0_129], %221 {strides = array<i32>} : memref<1x1024x32xbf16, #tpu.memory_space<vmem>>, vector<1x32x32xbf16>,
    return
  }
  func.func @transform_0(%arg0: i32) -> (i32, i32, i32, i32) {
    %c0_i32 = arith.constant 0 : i32
    %c0_i32_0 = arith.constant 0 : i32
    %c0_i32_1 = arith.constant 0 : i32
    %c0_i32_2 = arith.constant 0 : i32
    return %arg0, %c0_i32, %c0_i32_0, %c0_i32_1 : i32, i32, i32, i32
  }
  func.func @transform_1(%arg0: i32) -> (i32, i32, i32) {
    %c0_i32 = arith.constant 0 : i32
    %c0_i32_0 = arith.constant 0 : i32
    %c0_i32_1 = arith.constant 0 : i32
    %c0_i32_2 = arith.constant 0 : i32
    return %c0_i32, %c0_i32_0, %c0_i32_1 : i32, i32, i32
  }
  func.func @transform_2(%arg0: i32) -> (i32, i32) {
    %c0_i32 = arith.constant 0 : i32
    %c0_i32_0 = arith.constant 0 : i32
    %c0_i32_1 = arith.constant 0 : i32
    return %c0_i32, %c0_i32_0 : i32, i32
  }
  func.func @transform_3(%arg0: i32) -> (i32, i32, i32) {
    %c0_i32 = arith.constant 0 : i32
    %c0_i32_0 = arith.constant 0 : i32
    %c0_i32_1 = arith.constant 0 : i32
    return %arg0, %c0_i32, %c0_i32_0 : i32, i32, i32
  }
}

</mosaic_0001>

<bundles_post_ra>
// kernel: tpu_custom_call.1
= control target key start
LH: loop header
LB: loop body
LE: loop exit
PB: predicated region body
PF: predicated region fallthrough
CT: control target
= control target key end

     0   :  { %s17729_s12 = smov 0   ;;  %s22330_s0 = inlined_call_operand.vmem [shape: bf16[2,4,1122,3], index: 0, kind: input, shape index: {}]   ;;  %s22331_s1 = inlined_call_operand.vmem [shape: bf16[9,3,32], index: 1, kind: input, shape index: {}]   ;;  %s22332_s2 = inlined_call_operand.vmem [shape: f32[1,32], index: 2, kind: input, shape index: {}]   ;;  %s22333_s3 = inlined_call_operand.vmem [shape: bf16[2,1024,32], index: 3, kind: output, shape index: {}]  }
   0x1 LB: > { %s13745_s13 = sadd.s32 4294967295, %s17706_s12   ;;  %p13749_p0 = scmp.ge.s32.totalorder %s17706_s12, 1  ;;  %s17706_s12 = sphi %s17729_s12, %s13_s12  }
   0x2   : > { %p137_p1 = scmp.lt.s32.totalorder %s17706_s12, 3 }
   0x4   : > { %p138_p2 = pnand %p13749_p0, %p137_p1 }
   0x6   : > { %141 = sbr.rel (%p138_p2) target bundleno = 2549 (0x9f5), region = 32 }
   0xb   : > { %v13885_v0 = vld [vmem:[%s22331_s1 + $0x2] sm:$0x3]  ;;  %vm969_vm0 = vcmask 1040384   ;;  %vm970_vm1 = vcmask 1041408   ;;  %v17708_v1 = vmov 65535   ;;  %p161_p3 = scmp.lt.s32.totalorder %s13745_s13, 1 }
   0xc   : > { %v971_v2 = vsel %vm969_vm0, 4294967295, %v17708_v1  ;;  %v14546_v3 = vld [vmem:[%s22331_s1 + $0x4] sm:$0x3]  ;;  %v304_v5 = vld [vmem:[%s22331_s1] sm:$0x3]  ;;  %vm770_vm2 = vcmask 23552  }
   0xd   : > { %v17745_v4 = vsel %vm970_vm1, %v971_v2, 0  ;;  %v15472_v6 = vld [vmem:[%s22331_s1 + $0x8] sm:$0x3]  ;;  %s22745_s13 = smov (!%p161_p3, %s13745_s13), 1  ;;  %v15009_v15 = vld [vmem:[%s22331_s1 + $0x6] sm:$0x3] }
   0xe   : > { %v974_v7 = vand.u32 %v13885_v0, %v17745_v4  ;;  %v3385_v8 = vand.u32 %v14546_v3, %v17745_v4  ;;  %v1844_v9 = vand.u32 %v17745_v4, %v304_v5  ;;  %v5659_v10 = vand.u32 %v15472_v6, %v17745_v4  ;;  %s17682_s22 = smul.u32 2256, %s22745_s13  ;;  %s17143_s11 = sshll.u32 %s22745_s13, 9 }
   0xf   : > { %v4522_v16 = vand.u32 %v15009_v15, %v17745_v4  ;;  %vm2653_vm3 = vsmask.f32 7424  ;;  %vm11154_vm4 = vcmask 1046528   ;;  %s19450_s15 = scalar_lea.vmem %s22333_s3, %s17143_s11  ;;  %vm12364_vm5 = vcmask 257024  }
  0x10   : > { %17679 = vmatpush.bf16.msra.mxu1 %v974_v7  ;;  %17680 = vmatpush.bf16.msra.mxu2 %v974_v7  ;;  %s17763_s25 = scalar_lea.vmem %s22330_s0, %s17682_s22  ;;  %vm12374_vm6 = vsmask.f32 3328  ;;  %vm12375_vm7 = vsmask.f32 7440  ;;  %vm12438_vm9 = vcmask 1042432   ;;  %vm12439_vm10 = vcmask 1046532  }
  0x11   : > { %983 = vmatpush.bf16.msra.mxu0 %v974_v7  ;;  %v17227_v11 = vld [vmem:[%s17763_s25 + $0x2bc] sm:$0xff]  ;;  %v17244_v12 = vld [vmem:[%s17763_s25 + $0x344] sm:$0xff]  ;;  %v17210_v13 = vld [vmem:[%s17763_s25 + $0x234] sm:$0xff]  ;;  %17681 = vmatpush.bf16.msra.mxu3 %v974_v7  ;;  %vm12466_vm12 = vsmask.f32 2304  ;;  %vm12535_vm15 = vcmask 1045508  }
  0x12   : > { %v17261_v14 = vld [vmem:[%s17763_s25 + $0x3cc] sm:$0xff]  ;;  %v17228_v17 = vld [vmem:[%s17763_s25 + $0x2c4] sm:$0xff]  ;;  %v17211_v19 = vld [vmem:[%s17763_s25 + $0x23c] sm:$0xff]  ;;  %vm12467_vm13 = vsmask.f32 6416 }
  0x13   : > { %14167 = vmatmul.msk.bf16.vlgmr.msra.gmra.mxu1 %vm770_vm2, %v17227_v11  ;;  %14184 = vmatmul.msk.bf16.vlgmr.msra.gmra.mxu2 %vm770_vm2, %v17244_v12  ;;  %v17245_v18 = vld [vmem:[%s17763_s25 + $0x34c] sm:$0xff]  ;;  %v17262_v20 = vld [vmem:[%s17763_s25 + $0x3d4] sm:$0xff]  ;;  %v17212_v23 = vld [vmem:[%s17763_s25 + $0x244] sm:$0xff] }
  0x14   : > { %3394 = vmatpush.bf16.msrb.mxu2 %v3385_v8  ;;  %1853 = vmatpush.bf16.msrb.mxu1 %v1844_v9  ;;  %v17229_v21 = vld [vmem:[%s17763_s25 + $0x2cc] sm:$0xff]  ;;  %v17246_v22 = vld [vmem:[%s17763_s25 + $0x354] sm:$0xff]  ;;  %v17263_v24 = vld [vmem:[%s17763_s25 + $0x3dc] sm:$0xff] }
  0x15   : > { %5668 = vmatpush.bf16.msrb.mxu0 %v5659_v10  ;;  %14201 = vmatmul.msk.bf16.vlgmr.msra.gmra.mxu3 %vm770_vm2, %v17261_v14  ;;  %v17230_v25 = vld [vmem:[%s17763_s25 + $0x2d4] sm:$0xff]  ;;  %v17247_v26 = vld [vmem:[%s17763_s25 + $0x35c] sm:$0xff]  ;;  %v17213_v27 = vld [vmem:[%s17763_s25 + $0x24c] sm:$0xff] }
  0x16   : > { %14150 = vmatmul.msk.bf16.vlgmr.msra.gmra.mxu0 %vm770_vm2, %v17210_v13  ;;  %4531 = vmatpush.bf16.msrb.mxu3 %v4522_v16  ;;  %v17264_v28 = vld [vmem:[%s17763_s25 + $0x3e4] sm:$0xff]  ;;  %v17231_v29 = vld [vmem:[%s17763_s25 + $0x2dc] sm:$0xff]  ;;  %v17214_v31 = vld [vmem:[%s17763_s25 + $0x254] sm:$0xff] }
  0x17   : > { %v17248_v30 = vld [vmem:[%s17763_s25 + $0x364] sm:$0xff]  ;;  %v17265_v32 = vld [vmem:[%s17763_s25 + $0x3ec] sm:$0xff]  ;;  %v17215_v35 = vld [vmem:[%s17763_s25 + $0x25c] sm:$0xff] }
  0x18   : > { %v17232_v33 = vld [vmem:[%s17763_s25 + $0x2e4] sm:$0xff]  ;;  %v17249_v34 = vld [vmem:[%s17763_s25 + $0x36c] sm:$0xff]  ;;  %v17266_v36 = vld [vmem:[%s17763_s25 + $0x3f4] sm:$0xff] }
  0x19   : > { %v17233_v37 = vld [vmem:[%s17763_s25 + $0x2ec] sm:$0xff]  ;;  %v17250_v38 = vld [vmem:[%s17763_s25 + $0x374] sm:$0xff]  ;;  %v17216_v39 = vld [vmem:[%s17763_s25 + $0x264] sm:$0xff] }
  0x1a   : > { %v17267_v40 = vld [vmem:[%s17763_s25 + $0x3fc] sm:$0xff]  ;;  %v17234_v41 = vld [vmem:[%s17763_s25 + $0x2f4] sm:$0xff]  ;;  %v17217_v43 = vld [vmem:[%s17763_s25 + $0x26c] sm:$0xff] }
  0x1b   : > { %v17251_v42 = vld [vmem:[%s17763_s25 + $0x37c] sm:$0xff]  ;;  %v17268_v44 = vld [vmem:[%s17763_s25 + $0x404] sm:$0xff]  ;;  %v17218_v48 = vld [vmem:[%s17763_s25 + $0x274] sm:$0xff] }
  0x1c   : > { %v17235_v45 = vld [vmem:[%s17763_s25 + $0x2fc] sm:$0xff]  ;;  %v17252_v46 = vld [vmem:[%s17763_s25 + $0x384] sm:$0xff]  ;;  %v17269_v50 = vld [vmem:[%s17763_s25 + $0x40c] sm:$0xff] }
  0x1d   : > { %v17236_v56 = vld [vmem:[%s17763_s25 + $0x304] sm:$0xff]  ;;  %v17253_v57 = vld [vmem:[%s17763_s25 + $0x38c] sm:$0xff]  ;;  %v17219_v59 = vld [vmem:[%s17763_s25 + $0x27c] sm:$0xff] }
  0x1e   : > { %v17270_v62 = vld [vmem:[%s17763_s25 + $0x414] sm:$0xff]  ;;  %v17237_v5 = vld [vmem:[%s17763_s25 + $0x30c] sm:$0xff]  ;;  %v17220_v8 = vld [vmem:[%s17763_s25 + $0x284] sm:$0xff] }
  0x1f   : > { %v17254_v6 = vld [vmem:[%s17763_s25 + $0x394] sm:$0xff]  ;;  %v17271_v11 = vld [vmem:[%s17763_s25 + $0x41c] sm:$0xff]  ;;  %vm19569_vm8 = vmor %vm12374_vm6, %vm12375_vm7  ;;  %vm12563_vm7 = vsmask.f32 5392 }
  0x20   : > { %vm19674_vm11 = vmor %vm12438_vm9, %vm12439_vm10  ;;  %vm12631_vm10 = vcmask 1044484  }
  0x21   : > { %vm19782_vm14 = vmor %vm12466_vm12, %vm12467_vm13  ;;  %vm12659_vm13 = vsmask.f32 4368 }
  0x22   : > { %vm19896_vm6 = vmor %vm970_vm1, %vm12535_vm15  ;;  %vm12562_vm1 = vsmask.f32 1280 }
  0x23   : > { %14168 = vmatmul.msk.bf16.gmra.mxu1 %vm770_vm2, %v17228_v17  ;;  %14185 = vmatmul.msk.bf16.gmra.mxu2 %vm770_vm2, %v17245_v18  ;;  %v17238_v17 = vld [vmem:[%s17763_s25 + $0x314] sm:$0xff]  ;;  %v17255_v18 = vld [vmem:[%s17763_s25 + $0x39c] sm:$0xff]  ;;  %vm20007_vm9 = vmor %vm12562_vm1, %vm12563_vm7 }
  0x24   : > { %vm20116_vm12 = vmor %vm969_vm0, %vm12631_vm10  ;;  %vm12658_vm0 = vsmask.f32 256 }
  0x25   : > { %14202 = vmatmul.msk.bf16.gmra.mxu3 %vm770_vm2, %v17262_v20  ;;  %v17221_v20 = vld [vmem:[%s17763_s25 + $0x28c] sm:$0xff]  ;;  %vm20223_vm15 = vmor %vm12658_vm0, %vm12659_vm13 }
  0x26   : > { %14151 = vmatmul.msk.bf16.gmra.mxu0 %vm770_vm2, %v17211_v19 }
  0x33   : > { %14169 = vmatmul.msk.bf16.gmra.mxu1 %vm770_vm2, %v17229_v21  ;;  %14186 = vmatmul.msk.bf16.gmra.mxu2 %vm770_vm2, %v17246_v22 }
  0x35   : > { %14203 = vmatmul.msk.bf16.gmra.mxu3 %vm770_vm2, %v17263_v24 }
  0x36   : > { %14152 = vmatmul.msk.bf16.gmra.mxu0 %vm770_vm2, %v17212_v23  ;;  %v17272_v23 = vld [vmem:[%s17763_s25 + $0x424] sm:$0xff] }
  0x43   : > { %14170 = vmatmul.msk.bf16.gmra.mxu1 %vm770_vm2, %v17230_v25  ;;  %14187 = vmatmul.msk.bf16.gmra.mxu2 %vm770_vm2, %v17247_v26 }
  0x45   : > { %14204 = vmatmul.msk.bf16.gmra.mxu3 %vm770_vm2, %v17264_v28 }
  0x46   : > { %14153 = vmatmul.msk.bf16.gmra.mxu0 %vm770_vm2, %v17213_v27 }
  0x53   : > { %14171 = vmatmul.msk.bf16.gmra.mxu1 %vm770_vm2, %v17231_v29  ;;  %14188 = vmatmul.msk.bf16.gmra.mxu2 %vm770_vm2, %v17248_v30  ;;  %v17239_v29 = vld [vmem:[%s17763_s25 + $0x31c] sm:$0xff]  ;;  %v17256_v30 = vld [vmem:[%s17763_s25 + $0x3a4] sm:$0xff] }
  0x55   : > { %14205 = vmatmul.msk.bf16.gmra.mxu3 %vm770_vm2, %v17265_v32  ;;  %v17222_v32 = vld [vmem:[%s17763_s25 + $0x294] sm:$0xff] }
  0x56   : > { %14154 = vmatmul.msk.bf16.gmra.mxu0 %vm770_vm2, %v17214_v31 }
  0x63   : > { %14172 = vmatmul.msk.bf16.gmra.mxu1 %vm770_vm2, %v17232_v33  ;;  %14189 = vmatmul.msk.bf16.gmra.mxu2 %vm770_vm2, %v17249_v34 }
  0x65   : > { %14206 = vmatmul.msk.bf16.gmra.mxu3 %vm770_vm2, %v17266_v36 }
  0x66   : > { %14155 = vmatmul.msk.bf16.gmra.mxu0 %vm770_vm2, %v17215_v35  ;;  %v17273_v35 = vld [vmem:[%s17763_s25 + $0x42c] sm:$0xff] }
  0x73   : > { %14173 = vmatmul.msk.bf16.gmra.mxu1 %vm770_vm2, %v17233_v37  ;;  %14190 = vmatmul.msk.bf16.gmra.mxu2 %vm770_vm2, %v17250_v38 }
  0x75   : > { %14207 = vmatmul.msk.bf16.gmra.mxu3 %vm770_vm2, %v17267_v40 }
  0x76   : > { %14156 = vmatmul.msk.bf16.gmra.mxu0 %vm770_vm2, %v17216_v39 }
  0x83   : > { %14174 = vmatmul.msk.bf16.gmra.mxu1 %vm770_vm2, %v17234_v41  ;;  %14191 = vmatmul.msk.bf16.gmra.mxu2 %vm770_vm2, %v17251_v42  ;;  %v17240_v41 = vld [vmem:[%s17763_s25 + $0x324] sm:$0xff]  ;;  %v17257_v42 = vld [vmem:[%s17763_s25 + $0x3ac] sm:$0xff] }
  0x85   : > { %14208 = vmatmul.msk.bf16.gmra.mxu3 %vm770_vm2, %v17268_v44  ;;  %v17223_v44 = vld [vmem:[%s17763_s25 + $0x29c] sm:$0xff] }
  0x86   : > { %14157 = vmatmul.msk.bf16.gmra.mxu0 %vm770_vm2, %v17217_v43 }
  0x90   : > { %v17835_v47 = vpop.f32.mrf.mxu1 }
  0x93   : > { %v17838_v49 = vpop.f32.mrf.mxu0  ;;  %14175 = vmatmul.msk.bf16.gmra.mxu1 %vm770_vm2, %v17235_v45  ;;  %14192 = vmatmul.msk.bf16.gmra.mxu2 %vm770_vm2, %v17252_v46 }
  0x95   : > { %14209 = vmatmul.msk.bf16.gmra.mxu3 %vm770_vm2, %v17269_v50 }
  0x96   : > { %14158 = vmatmul.msk.bf16.gmra.mxu0 %vm770_vm2, %v17218_v48  ;;  %v17845_v51 = vpop.f32.mrf.mxu2  ;;  %v17274_v48 = vld [vmem:[%s17763_s25 + $0x434] sm:$0xff] }
  0x97   : > { %22334 = vst [vmem:[#allocation2_spill] sm:$0xff] %v17845_v51 }
  0x98   : > { %v17847_v52 = vpop.f32.mrf.mxu1  ;;  %v17849_v53 = vpop.f32.mrf.mxu3 }
  0x99   : > { %22335 = vst [vmem:[#allocation3_spill] sm:$0xff] %v17849_v53 }
  0x9b   : > { %v17851_v54 = vpop.f32.mrf.mxu0 }
  0x9e   : > { %v17853_v55 = vpop.f32.mrf.mxu2 }
  0x9f   : > { %22336 = vst [vmem:[#allocation4_spill] sm:$0xff] %v17853_v55 }
  0xa0   : > { %v17857_v58 = vpop.f32.mrf.mxu1  ;;  %v17860_v60 = vpop.f32.mrf.mxu3 }
  0xa1   : > { %22337 = vst [vmem:[#allocation5_spill] sm:$0xff] %v17860_v60 }
  0xa3   : > { %v17862_v61 = vpop.f32.mrf.mxu0  ;;  %14176 = vmatmul.msk.bf16.gmra.mxu1 %vm770_vm2, %v17236_v56  ;;  %14193 = vmatmul.msk.bf16.gmra.mxu2 %vm770_vm2, %v17253_v57 }
  0xa5   : > { %14210 = vmatmul.msk.bf16.gmra.mxu3 %vm770_vm2, %v17270_v62 }
  0xa6   : > { %14159 = vmatmul.msk.bf16.gmra.mxu0 %vm770_vm2, %v17219_v59  ;;  %v17869_v63 = vpop.f32.mrf.mxu2 }
  0xa7   : > { %22338 = vst [vmem:[#allocation6_spill] sm:$0xff] %v17869_v63  ;;  %v17411_v63 = vld [vmem:[%s17763_s25 + $0x6b4] sm:$0xff] }
  0xa8   : > { %v17871_v0 = vpop.f32.mrf.mxu1  ;;  %v17873_v1 = vpop.f32.mrf.mxu3 }
  0xa9   : > { %22339 = vst [vmem:[#allocation7_spill] sm:$0xff] %v17871_v0  ;;  %v17353_v0 = vld [vmem:[%s17763_s25 + $0x4c0] sm:$0xff] }
  0xaa   : > { %22340 = vst [vmem:[#allocation8_spill] sm:$0xff] %v17873_v1 }
  0xab   : > { %v17875_v2 = vpop.f32.mrf.mxu0 }
  0xae   : > { %v17877_v3 = vpop.f32.mrf.mxu2 }
  0xaf   : > { %22341 = vst [vmem:[#allocation9_spill] sm:$0xff] %v17877_v3 }
  0xb0   : > { %v17881_v7 = vpop.f32.mrf.mxu1  ;;  %v17884_v9 = vpop.f32.mrf.mxu3 }
  0xb1   : > { %22342 = vst [vmem:[#allocation10_spill] sm:$0xff] %v17881_v7 }
  0xb2   : > { %22343 = vst [vmem:[#allocation11_spill] sm:$0xff] %v17884_v9 }
  0xb3   : > { %v17886_v10 = vpop.f32.mrf.mxu0  ;;  %14177 = vmatmul.msk.bf16.gmra.mxu1 %vm770_vm2, %v17237_v5  ;;  %14194 = vmatmul.msk.bf16.gmra.mxu2 %vm770_vm2, %v17254_v6  ;;  %v17241_v5 = vld [vmem:[%s17763_s25 + $0x32c] sm:$0xff]  ;;  %v17258_v6 = vld [vmem:[%s17763_s25 + $0x3b4] sm:$0xff] }
  0xb5   : > { %14211 = vmatmul.msk.bf16.gmra.mxu3 %vm770_vm2, %v17271_v11  ;;  %v17224_v11 = vld [vmem:[%s17763_s25 + $0x2a4] sm:$0xff] }
  0xb6   : > { %14160 = vmatmul.msk.bf16.gmra.mxu0 %vm770_vm2, %v17220_v8  ;;  %v17893_v12 = vpop.f32.mrf.mxu2 }
  0xb7   : > { %22344 = vst [vmem:[#allocation12_spill] sm:$0xff] %v17893_v12 }
  0xb8   : > { %v17895_v13 = vpop.f32.mrf.mxu1  ;;  %v17897_v14 = vpop.f32.mrf.mxu3 }
  0xb9   : > { %22345 = vst [vmem:[#allocation13_spill] sm:$0xff] %v17895_v13 }
  0xba   : > { %22346 = vst [vmem:[#allocation14_spill] sm:$0xff] %v17897_v14 }
  0xbb   : > { %v17899_v15 = vpop.f32.mrf.mxu0 }
  0xbe   : > { %v17901_v16 = vpop.f32.mrf.mxu2 }
  0xbf   : > { %22347 = vst [vmem:[#allocation15_spill] sm:$0xff] %v17901_v16 }
  0xc0   : > { %v17905_v19 = vpop.f32.mrf.mxu1  ;;  %v17908_v21 = vpop.f32.mrf.mxu3 }
  0xc1   : > { %22348 = vst [vmem:[#allocation16_spill] sm:$0xff] %v17905_v19 }
  0xc2   : > { %22349 = vst [vmem:[#allocation17_spill] sm:$0xff] %v17908_v21 }
  0xc3   : > { %v17910_v22 = vpop.f32.mrf.mxu0  ;;  %14178 = vmatmul.msk.bf16.gmra.mxu1 %vm770_vm2, %v17238_v17  ;;  %14195 = vmatmul.msk.bf16.gmra.mxu2 %vm770_vm2, %v17255_v18 }
  0xc5   : > { %14212 = vmatmul.msk.bf16.gmra.mxu3 %vm770_vm2, %v17272_v23 }
  0xc6   : > { %14161 = vmatmul.msk.bf16.gmra.mxu0 %vm770_vm2, %v17221_v20  ;;  %v17917_v24 = vpop.f32.mrf.mxu2  ;;  %v17275_v20 = vld [vmem:[%s17763_s25 + $0x43c] sm:$0xff] }
  0xc7   : > { %22350 = vst [vmem:[#allocation18_spill] sm:$0xff] %v17917_v24  ;;  %v17410_v24 = vld [vmem:[%s17763_s25 + $0x6ac] sm:$0xff] }
  0xc8   : > { %v17919_v25 = vpop.f32.mrf.mxu1  ;;  %v17921_v26 = vpop.f32.mrf.mxu3 }
  0xc9   : > { %22351 = vst [vmem:[#allocation19_spill] sm:$0xff] %v17919_v25 }
  0xca   : > { %22352 = vst [vmem:[#allocation20_spill] sm:$0xff] %v17921_v26  ;;  %v17276_v26 = vld [vmem:[%s17763_s25] sm:$0xff] }
  0xcb   : > { %v17923_v27 = vpop.f32.mrf.mxu0 }
  0xce   : > { %v17925_v28 = vpop.f32.mrf.mxu2 }
  0xcf   : > { %22353 = vst [vmem:[#allocation21_spill] sm:$0xff] %v17925_v28 }
  0xd0   : > { %v17929_v31 = vpop.f32.mrf.mxu1  ;;  %v17932_v33 = vpop.f32.mrf.mxu3 }
  0xd1   : > { %22354 = vst [vmem:[#allocation22_spill] sm:$0xff] %v17929_v31 }
  0xd2   : > { %22355 = vst [vmem:[#allocation23_spill] sm:$0xff] %v17932_v33  ;;  %v17226_v33 = vld [vmem:[%s17763_s25 + $0x2b4] sm:$0xff] }
  0xd3   : > { %v17934_v34 = vpop.f32.mrf.mxu0  ;;  %14179 = vmatmul.msk.bf16.gmra.mxu1 %vm770_vm2, %v17239_v29  ;;  %14196 = vmatmul.msk.bf16.gmra.mxu2 %vm770_vm2, %v17256_v30 }
  0xd5   : > { %14213 = vmatmul.msk.bf16.gmra.mxu3 %vm770_vm2, %v17273_v35 }
  0xd6   : > { %14162 = vmatmul.msk.bf16.gmra.mxu0 %vm770_vm2, %v17222_v32  ;;  %v17941_v36 = vpop.f32.mrf.mxu2 }
  0xd7   : > { %22356 = vst [vmem:[#allocation24_spill] sm:$0xff] %v17941_v36 }
  0xd8   : > { %v17943_v37 = vpop.f32.mrf.mxu1  ;;  %v17945_v38 = vpop.f32.mrf.mxu3 }
  0xd9   : > { %22357 = vst [vmem:[#allocation25_spill] sm:$0xff] %v17943_v37 }
  0xda   : > { %22358 = vst [vmem:[#allocation26_spill] sm:$0xff] %v17945_v38 }
  0xdb   : > { %v17947_v39 = vpop.f32.mrf.mxu0 }
  0xde   : > { %v17949_v40 = vpop.f32.mrf.mxu2 }
  0xdf   : > { %22359 = vst [vmem:[#allocation27_spill] sm:$0xff] %v17949_v40 }
  0xe0   : > { %v17953_v43 = vpop.f32.mrf.mxu1  ;;  %v17956_v45 = vpop.f32.mrf.mxu3 }
  0xe1   : > { %22360 = vst [vmem:[#allocation28_spill] sm:$0xff] %v17953_v43 }
  0xe2   : > { %22361 = vst [vmem:[#allocation29_spill] sm:$0xff] %v17956_v45 }
  0xe3   : > { %v17958_v46 = vpop.f32.mrf.mxu0  ;;  %14180 = vmatmul.msk.bf16.gmra.mxu1 %vm770_vm2, %v17240_v41  ;;  %14197 = vmatmul.msk.bf16.gmra.mxu2 %vm770_vm2, %v17257_v42  ;;  %v17242_v41 = vld [vmem:[%s17763_s25 + $0x334] sm:$0xff]  ;;  %v17259_v42 = vld [vmem:[%s17763_s25 + $0x3bc] sm:$0xff] }
  0xe5   : > { %14214 = vmatmul.msk.bf16.gmra.mxu3 %vm770_vm2, %v17274_v48  ;;  %v17225_v48 = vld [vmem:[%s17763_s25 + $0x2ac] sm:$0xff] }
  0xe6   : > { %14163 = vmatmul.msk.bf16.gmra.mxu0 %vm770_vm2, %v17223_v44  ;;  %v17965_v50 = vpop.f32.mrf.mxu2 }
  0xe7   : > { %22362 = vst [vmem:[#allocation30_spill] sm:$0xff] %v17965_v50  ;;  %v17409_v50 = vld [vmem:[%s17763_s25 + $0x6a4] sm:$0xff] }
  0xe8   : > { %v17967_v56 = vpop.f32.mrf.mxu1  ;;  %v17969_v57 = vpop.f32.mrf.mxu3 }
  0xe9   : > { %22363 = vst [vmem:[#allocation31_spill] sm:$0xff] %v17967_v56 }
  0xea   : > { %22364 = vst [vmem:[#allocation32_spill] sm:$0xff] %v17969_v57 }
  0xeb   : > { %v17971_v59 = vpop.f32.mrf.mxu0 }
  0xee   : > { %v17973_v62 = vpop.f32.mrf.mxu2 }
  0xef   : > { %22365 = vst [vmem:[#allocation33_spill] sm:$0xff] %v17973_v62 }
  0xf0   : > { %v17977_v8 = vpop.f32.mrf.mxu1  ;;  %v17980_v17 = vpop.f32.mrf.mxu3 }
  0xf1   : > { %22366 = vst [vmem:[#allocation34_spill] sm:$0xff] %v17977_v8 }
  0xf2   : > { %22367 = vst [vmem:[#allocation35_spill] sm:$0xff] %v17980_v17  ;;  %v16727_v17 = vld [vmem:[%s22331_s1 + $0xe] sm:$0x3] }
  0xf3   : > { %v17982_v18 = vpop.f32.mrf.mxu0  ;;  %14181 = vmatmul.msk.bf16.gmra.mxu1 %vm770_vm2, %v17241_v5  ;;  %14198 = vmatmul.msk.bf16.gmra.mxu2 %vm770_vm2, %v17258_v6 }
  0xf5   : > { %14215 = vmatmul.msk.bf16.gmra.mxu3 %vm770_vm2, %v17275_v20  ;;  %v16267_v20 = vld [vmem:[%s22331_s1 + $0xc] sm:$0x3] }
  0xf6   : > { %14164 = vmatmul.msk.bf16.gmra.mxu0 %vm770_vm2, %v17224_v11  ;;  %v17989_v23 = vpop.f32.mrf.mxu2  ;;  %v17342_v11 = vld [vmem:[%s17763_s25 + $0x468] sm:$0xff] }
  0xf7   : > { %22368 = vst [vmem:[#allocation36_spill] sm:$0xff] %v17989_v23 }
  0xf8   : > { %v17991_v29 = vpop.f32.mrf.mxu1  ;;  %v17993_v30 = vpop.f32.mrf.mxu3 }
  0xf9   : > { %22369 = vst [vmem:[#allocation37_spill] sm:$0xff] %v17991_v29 }
  0xfa   : > { %22370 = vst [vmem:[#allocation38_spill] sm:$0xff] %v17993_v30  ;;  %v9003_v30 = vand.u32 %v16267_v20, %v17745_v4 }
  0xfb   : > { %v17995_v32 = vpop.f32.mrf.mxu0 }
  0xfc   : > { %9012 = vmatpush.bf16.msra.mxu2 %v9003_v30 }
  0xfe   : > { %v17997_v35 = vpop.f32.mrf.mxu2 }
  0xff   : > { %22371 = vst [vmem:[#allocation39_spill] sm:$0xff] %v17997_v35 }
 0x100   : > { %v18001_v44 = vpop.f32.mrf.mxu1  ;;  %v18004_v5 = vpop.f32.mrf.mxu3 }
 0x101   : > { %22372 = vst [vmem:[#allocation40_spill] sm:$0xff] %v18001_v44  ;;  %v17152_v44 = vld [vmem:[%s17763_s25 + $0x40] sm:$0xff] }
 0x102   : > { %22373 = vst [vmem:[#allocation41_spill] sm:$0xff] %v18004_v5 }
 0x103   : > { %v18006_v6 = vpop.f32.mrf.mxu0  ;;  %14182 = vmatmul.msk.bf16.gmra.mxu1 %vm770_vm2, %v17242_v41  ;;  %14199 = vmatmul.msk.bf16.gmra.mxu2 %vm770_vm2, %v17259_v42  ;;  %v10675_v41 = vand.u32 %v16727_v17, %v17745_v4  ;;  %v15936_v42 = vld [vmem:[%s22331_s1 + $0xa] sm:$0x3]  ;;  %v17058_v17 = vld [vmem:[%s22331_s1 + $0x10] sm:$0x3] }
 0x104   : > { %v11487_v30 = vand.u32 %v17058_v17, %v17745_v4  ;;  %v2657_v17 = vshll.u32 %v17276_v26, 16 }
 0x105   : > { %15274 = vmatmul.msk.bf16.vlgmr.msrb.gmra.mxu3 %vm770_vm2, %v17342_v11 }
 0x106   : > { %14165 = vmatmul.msk.bf16.gmra.mxu0 %vm770_vm2, %v17225_v48  ;;  %v18021_v5 = vpop.f32.mrf.mxu2  ;;  %10684 = vmatpush.bf16.msra.mxu3 %v10675_v41  ;;  %v7331_v48 = vand.u32 %v15936_v42, %v17745_v4  ;;  %v17243_v41 = vld [vmem:[%s17763_s25 + $0x33c] sm:$0xff]  ;;  %v17260_v42 = vld [vmem:[%s17763_s25 + $0x3c4] sm:$0xff]  ;;  %v2659_v9 = vrot.slane %v2657_v17, 1 }
 0x107   : > { %22374 = vst [vmem:[#allocation42_spill] sm:$0xff] %v18021_v5  ;;  %11496 = vmatpush.bf16.msra.mxu0 %v11487_v30  ;;  %v17277_v4 = vld [vmem:[%s17763_s25 + $0x8] sm:$0xff]  ;;  %v17408_v5 = vld [vmem:[%s17763_s25 + $0x69c] sm:$0xff] }
 0x108   : > { %v18027_v20 = vpop.f32.mrf.mxu1  ;;  %v18029_v57 = vpop.f32.mrf.mxu3  ;;  %7340 = vmatpush.bf16.msra.mxu1 %v7331_v48  ;;  %v17343_v48 = vld [vmem:[%s17763_s25 + $0x470] sm:$0xff]  ;;  %v2662_v1 = vshll.u32 %v17277_v4, 16  ;;  %v17344_v17 = vld [vmem:[%s17763_s25 + $0x478] sm:$0xff] }
 0x109   : > { %22375 = vst [vmem:[#allocation43_spill] sm:$0xff] %v18027_v20 }
 0x10a   : > { %22376 = vst [vmem:[#allocation44_spill] sm:$0xff] %v18029_v57 }
 0x10b   : > { %v18031_v11 = vpop.f32.mrf.mxu0 }
 0x10e   : > { %v18037_v45 = vpop.f32.mrf.mxu2 }
 0x10f   : > { %22377 = vst [vmem:[#allocation45_spill] sm:$0xff] %v18037_v45  ;;  %v17144_v45 = vld [vmem:[%s17763_s25] sm:$0xff] }
 0x110   : > { %v18041_v38 = vpop.f32.mrf.mxu1  ;;  %v18045_v57 = vpop.f32.mrf.mxu3 }
 0x111   : > { %22378 = vst [vmem:[#allocation46_spill] sm:$0xff] %v18041_v38 }
 0x112   : > { %22379 = vst [vmem:[#allocation47_spill] sm:$0xff] %v18045_v57  ;;  %v2655_v57 = vshrl.u32 %v17276_v26, 16 }
 0x113   : > { %v18047_v21 = vpop.f32.mrf.mxu0  ;;  %14183 = vmatmul.msk.bf16.gmra.mxu1 %vm770_vm2, %v17243_v41  ;;  %14200 = vmatmul.msk.bf16.gmra.mxu2 %vm770_vm2, %v17260_v42 }
 0x114   : > { %v2660_v42 = vor.u32 %v2659_v9, %v2655_v57 }
 0x115   : > { %15275 = vmatmul.msk.bf16.gmra.mxu3 %vm770_vm2, %v17343_v48 }
 0x116   : > { %14166 = vmatmul.msk.bf16.gmra.mxu0 %vm770_vm2, %v17226_v33  ;;  %v18055_v30 = vpop.f32.mrf.mxu2  ;;  %v2664_v33 = vrot.slane %v2662_v1, 1  ;;  %v17278_v1 = vld [vmem:[%s17763_s25 + $0x10] sm:$0xff] }
 0x117   : > { %22380 = vst [vmem:[#allocation48_spill] sm:$0xff] %v18055_v30 }
 0x118   : > { %v18057_v14 = vpop.f32.mrf.mxu1  ;;  %v18059_v60 = vpop.f32.mrf.mxu3  ;;  %v2665_v30 = vsel %vm2653_vm3, %v2660_v42, %v2664_v33  ;;  %v2666_v42 = vshrl.u32 %v17277_v4, 16  ;;  %v17345_v4 = vld [vmem:[%s17763_s25 + $0x480] sm:$0xff] }
 0x119   : > { %22381 = vst [vmem:[#allocation49_spill] sm:$0xff] %v18057_v14  ;;  %v17415_v14 = vld [vmem:[%s17763_s25 + $0x6d4] sm:$0xff] }
 0x11a   : > { %22382 = vst [vmem:[#allocation50_spill] sm:$0xff] %v18059_v60 }
 0x11b   : > { %v18061_v41 = vpop.f32.mrf.mxu0 }
 0x11e   : > { %v18063_v53 = vpop.f32.mrf.mxu2 }
 0x11f   : > { %22383 = vst [vmem:[#allocation51_spill] sm:$0xff] %v18063_v53 }
 0x120   : > { %v18066_v48 = vpop.f32.mrf.mxu1  ;;  %v18070_v35 = vpop.f32.mrf.mxu3 }
 0x121   : > { %22384 = vst [vmem:[#allocation52_spill] sm:$0xff] %v18066_v48  ;;  %v17151_v48 = vld [vmem:[%s17763_s25 + $0x38] sm:$0xff] }
 0x122   : > { %22385 = vst [vmem:[#allocation53_spill] sm:$0xff] %v18070_v35  ;;  %v2670_v35 = vshll.u32 %v17278_v1, 16 }
 0x123   : > { %v18072_v26 = vpop.f32.mrf.mxu0  ;;  %14480 = vmatmul.msk.bf16.vlgmr.msrb.gmra.mxu1 %vm770_vm2, %v17144_v45  ;;  %14811 = vmatmul.msk.bf16.vlgmr.msrb.gmra.mxu2 %vm770_vm2, %v2665_v30  ;;  %v2668_v45 = vor.u32 %v2666_v42, %v2664_v33 }
 0x124   : > { %v2672_v30 = vrot.slane %v2670_v35, 1  ;;  %v17279_v35 = vld [vmem:[%s17763_s25 + $0x18] sm:$0xff] }
 0x125   : > { %15276 = vmatmul.msk.bf16.gmra.mxu3 %vm770_vm2, %v17344_v17 }
 0x126   : > { %15737 = vmatmul.msk.bf16.vlgmr.msrb.gmra.mxu0 %vm770_vm2, %v17408_v5  ;;  %v18080_v9 = vpop.f32.mrf.mxu2  ;;  %v17145_v5 = vld [vmem:[%s17763_s25 + $0x8] sm:$0xff]  ;;  %v2673_v17 = vsel %vm2653_vm3, %v2668_v45, %v2672_v30  ;;  %v2674_v45 = vshrl.u32 %v17278_v1, 16 }
 0x127   : > { %22386 = vst [vmem:[#allocation54_spill] sm:$0xff] %v18080_v9  ;;  %v17346_v1 = vld [vmem:[%s17763_s25 + $0x488] sm:$0xff] }
 0x128   : > { %v18082_v57 = vpop.f32.mrf.mxu1  ;;  %v18084_v60 = vpop.f32.mrf.mxu3 }
 0x129   : > { %22387 = vst [vmem:[#allocation55_spill] sm:$0xff] %v18082_v57  ;;  %v17414_v57 = vld [vmem:[%s17763_s25 + $0x6cc] sm:$0xff] }
 0x12a   : > { %22388 = vst [vmem:[#allocation56_spill] sm:$0xff] %v18084_v60 }
 0x12b   : > { %v18086_v53 = vpop.f32.mrf.mxu0 }
 0x12e   : > { %v18088_v23 = vpop.f32.mrf.mxu2 }
 0x12f   : > { %22389 = vst [vmem:[#allocation57_spill] sm:$0xff] %v18088_v23 }
 0x130   : > { %v18091_v62 = vpop.f32.mrf.mxu1  ;;  %v18095_v9 = vpop.f32.mrf.mxu3 }
 0x131   : > { %22390 = vst [vmem:[#allocation58_spill] sm:$0xff] %v18091_v62 }
 0x132   : > { %22391 = vst [vmem:[#allocation59_spill] sm:$0xff] %v18095_v9  ;;  %v2678_v9 = vshll.u32 %v17279_v35, 16 }
 0x133   : > { %v18097_v40 = vpop.f32.mrf.mxu0  ;;  %14481 = vmatmul.msk.bf16.gmra.mxu1 %vm770_vm2, %v17145_v5  ;;  %14812 = vmatmul.msk.bf16.gmra.mxu2 %vm770_vm2, %v2673_v17  ;;  %v2676_v5 = vor.u32 %v2674_v45, %v2672_v30 }
 0x134   : > { %v2680_v17 = vrot.slane %v2678_v9, 1  ;;  %v17280_v9 = vld [vmem:[%s17763_s25 + $0x20] sm:$0xff] }
 0x135   : > { %15277 = vmatmul.msk.bf16.gmra.mxu3 %vm770_vm2, %v17345_v4 }
 0x136   : > { %15738 = vmatmul.msk.bf16.gmra.mxu0 %vm770_vm2, %v17409_v50  ;;  %v18105_v33 = vpop.f32.mrf.mxu2  ;;  %v17146_v50 = vld [vmem:[%s17763_s25 + $0x10] sm:$0xff]  ;;  %v2681_v4 = vsel %vm2653_vm3, %v2676_v5, %v2680_v17  ;;  %v2682_v5 = vshrl.u32 %v17279_v35, 16 }
 0x137   : > { %22392 = vst [vmem:[#allocation60_spill] sm:$0xff] %v18105_v33  ;;  %v17347_v35 = vld [vmem:[%s17763_s25 + $0x490] sm:$0xff] }
 0x138   : > { %v18107_v42 = vpop.f32.mrf.mxu1  ;;  %v18109_v60 = vpop.f32.mrf.mxu3 }
 0x139   : > { %22393 = vst [vmem:[#allocation61_spill] sm:$0xff] %v18107_v42  ;;  %v17413_v42 = vld [vmem:[%s17763_s25 + $0x6c4] sm:$0xff] }
 0x13a   : > { %22394 = vst [vmem:[#allocation62_spill] sm:$0xff] %v18109_v60 }
 0x13b   : > { %v18111_v23 = vpop.f32.mrf.mxu0 }
 0x13e   : > { %v18113_v36 = vpop.f32.mrf.mxu2 }
 0x13f   : > { %22395 = vst [vmem:[#allocation63_spill] sm:$0xff] %v18113_v36 }
 0x140   : > { %v18116_v28 = vpop.f32.mrf.mxu1  ;;  %v18120_v33 = vpop.f32.mrf.mxu3 }
 0x141   : > { %22396 = vst [vmem:[#allocation64_spill] sm:$0xff] %v18116_v28 }
 0x142   : > { %22397 = vst [vmem:[#allocation65_spill] sm:$0xff] %v18120_v33  ;;  %v2686_v33 = vshll.u32 %v17280_v9, 16 }
 0x143   : > { %v18122_v16 = vpop.f32.mrf.mxu0  ;;  %14482 = vmatmul.msk.bf16.gmra.mxu1 %vm770_vm2, %v17146_v50  ;;  %14813 = vmatmul.msk.bf16.gmra.mxu2 %vm770_vm2, %v2681_v4  ;;  %v2684_v50 = vor.u32 %v2682_v5, %v2680_v17 }
 0x144   : > { %v2688_v4 = vrot.slane %v2686_v33, 1  ;;  %v17281_v33 = vld [vmem:[%s17763_s25 + $0x28] sm:$0xff] }
 0x145   : > { %15278 = vmatmul.msk.bf16.gmra.mxu3 %vm770_vm2, %v17346_v1 }
 0x146   : > { %15739 = vmatmul.msk.bf16.gmra.mxu0 %vm770_vm2, %v17410_v24  ;;  %v18130_v30 = vpop.f32.mrf.mxu2  ;;  %v17147_v24 = vld [vmem:[%s17763_s25 + $0x18] sm:$0xff]  ;;  %v2689_v1 = vsel %vm2653_vm3, %v2684_v50, %v2688_v4  ;;  %v2690_v50 = vshrl.u32 %v17280_v9, 16 }
 0x147   : > { %22398 = vst [vmem:[#allocation66_spill] sm:$0xff] %v18130_v30  ;;  %v17348_v9 = vld [vmem:[%s17763_s25 + $0x498] sm:$0xff] }
 0x148   : > { %v18132_v45 = vpop.f32.mrf.mxu1  ;;  %v18134_v60 = vpop.f32.mrf.mxu3 }
 0x149   : > { %22399 = vst [vmem:[#allocation67_spill] sm:$0xff] %v18132_v45  ;;  %v17412_v45 = vld [vmem:[%s17763_s25 + $0x6bc] sm:$0xff] }
 0x14a   : > { %22400 = vst [vmem:[#allocation68_spill] sm:$0xff] %v18134_v60 }
 0x14b   : > { %v18136_v36 = vpop.f32.mrf.mxu0 }
 0x14e   : > { %v18138_v12 = vpop.f32.mrf.mxu2 }
 0x14f   : > { %22401 = vst [vmem:[#allocation69_spill] sm:$0xff] %v18138_v12 }
 0x150   : > { %v18141_v3 = vpop.f32.mrf.mxu1  ;;  %v18145_v30 = vpop.f32.mrf.mxu3 }
 0x151   : > { %22402 = vst [vmem:[#allocation70_spill] sm:$0xff] %v18141_v3 }
 0x152   : > { %22403 = vst [vmem:[#allocation71_spill] sm:$0xff] %v18145_v30  ;;  %v2694_v30 = vshll.u32 %v17281_v33, 16 }
 0x153   : > { %v18147_v55 = vpop.f32.mrf.mxu0  ;;  %14483 = vmatmul.msk.bf16.gmra.mxu1 %vm770_vm2, %v17147_v24  ;;  %14814 = vmatmul.msk.bf16.gmra.mxu2 %vm770_vm2, %v2689_v1  ;;  %v2692_v24 = vor.u32 %v2690_v50, %v2688_v4 }
 0x154   : > { %v2696_v1 = vrot.slane %v2694_v30, 1  ;;  %v17282_v30 = vld [vmem:[%s17763_s25 + $0x30] sm:$0xff] }
 0x155   : > { %15279 = vmatmul.msk.bf16.gmra.mxu3 %vm770_vm2, %v17347_v35 }
 0x156   : > { %15740 = vmatmul.msk.bf16.gmra.mxu0 %vm770_vm2, %v17411_v63  ;;  %v18155_v17 = vpop.f32.mrf.mxu2  ;;  %v17148_v63 = vld [vmem:[%s17763_s25 + $0x20] sm:$0xff]  ;;  %v2697_v35 = vsel %vm2653_vm3, %v2692_v24, %v2696_v1  ;;  %v2698_v24 = vshrl.u32 %v17281_v33, 16 }
 0x157   : > { %22404 = vst [vmem:[#allocation72_spill] sm:$0xff] %v18155_v17  ;;  %v17349_v33 = vld [vmem:[%s17763_s25 + $0x4a0] sm:$0xff] }
 0x158   : > { %v18157_v5 = vpop.f32.mrf.mxu1  ;;  %v18159_v60 = vpop.f32.mrf.mxu3 }
 0x159   : > { %22405 = vst [vmem:[#allocation73_spill] sm:$0xff] %v18157_v5 }
 0x15a   : > { %22406 = vst [vmem:[#allocation74_spill] sm:$0xff] %v18159_v60 }
 0x15b   : > { %v18161_v12 = vpop.f32.mrf.mxu0 }
 0x15e   : > { %v18163_v51 = vpop.f32.mrf.mxu2 }
 0x15f   : > { %22407 = vst [vmem:[#allocation75_spill] sm:$0xff] %v18163_v51 }
 0x160   : > { %v18166_v3 = vpop.f32.mrf.mxu1  ;;  %v18170_v17 = vpop.f32.mrf.mxu3 }
 0x161   : > { %22408 = vst [vmem:[#allocation76_spill] sm:$0xff] %v18166_v3 }
 0x162   : > { %22409 = vst [vmem:[#allocation77_spill] sm:$0xff] %v18170_v17  ;;  %v2702_v17 = vshll.u32 %v17282_v30, 16 }
 0x163   : > { %v18172_v5 = vpop.f32.mrf.mxu0  ;;  %14484 = vmatmul.msk.bf16.gmra.mxu1 %vm770_vm2, %v17148_v63  ;;  %14815 = vmatmul.msk.bf16.gmra.mxu2 %vm770_vm2, %v2697_v35  ;;  %v2700_v63 = vor.u32 %v2698_v24, %v2696_v1 }
 0x164   : > { %v2704_v35 = vrot.slane %v2702_v17, 1  ;;  %v17283_v17 = vld [vmem:[%s17763_s25 + $0x38] sm:$0xff] }
 0x165   : > { %15280 = vmatmul.msk.bf16.gmra.mxu3 %vm770_vm2, %v17348_v9 }
 0x166   : > { %15741 = vmatmul.msk.bf16.gmra.mxu0 %vm770_vm2, %v17412_v45  ;;  %v18180_v4 = vpop.f32.mrf.mxu2  ;;  %v17149_v45 = vld [vmem:[%s17763_s25 + $0x28] sm:$0xff]  ;;  %v2705_v9 = vsel %vm2653_vm3, %v2700_v63, %v2704_v35  ;;  %v2706_v63 = vshrl.u32 %v17282_v30, 16 }
 0x167   : > { %22410 = vst [vmem:[#allocation78_spill] sm:$0xff] %v18180_v4  ;;  %v17350_v30 = vld [vmem:[%s17763_s25 + $0x4a8] sm:$0xff] }
 0x168   : > { %v18182_v50 = vpop.f32.mrf.mxu1  ;;  %v18184_v60 = vpop.f32.mrf.mxu3 }
 0x169   : > { %22411 = vst [vmem:[#allocation79_spill] sm:$0xff] %v18182_v50 }
 0x16a   : > { %22412 = vst [vmem:[#allocation80_spill] sm:$0xff] %v18184_v60 }
 0x16b   : > { %v18186_v51 = vpop.f32.mrf.mxu0 }
 0x16e   : > { %v18188_v3 = vpop.f32.mrf.mxu2 }
 0x16f   : > { %22413 = vst [vmem:[#allocation81_spill] sm:$0xff] %v18188_v3 }
 0x170   : > { %v18191_v28 = vpop.f32.mrf.mxu1  ;;  %v18195_v4 = vpop.f32.mrf.mxu3 }
 0x171   : > { %22414 = vst [vmem:[#allocation82_spill] sm:$0xff] %v18191_v28 }
 0x172   : > { %22415 = vst [vmem:[#allocation83_spill] sm:$0xff] %v18195_v4  ;;  %v2710_v4 = vshll.u32 %v17283_v17, 16 }
 0x173   : > { %v18197_v50 = vpop.f32.mrf.mxu0  ;;  %14485 = vmatmul.msk.bf16.gmra.mxu1 %vm770_vm2, %v17149_v45  ;;  %14816 = vmatmul.msk.bf16.gmra.mxu2 %vm770_vm2, %v2705_v9  ;;  %v2708_v45 = vor.u32 %v2706_v63, %v2704_v35 }
 0x174   : > { %v2712_v9 = vrot.slane %v2710_v4, 1  ;;  %v17284_v4 = vld [vmem:[%s17763_s25 + $0x40] sm:$0xff] }
 0x175   : > { %15281 = vmatmul.msk.bf16.gmra.mxu3 %vm770_vm2, %v17349_v33 }
 0x176   : > { %15742 = vmatmul.msk.bf16.gmra.mxu0 %vm770_vm2, %v17413_v42  ;;  %v18205_v1 = vpop.f32.mrf.mxu2  ;;  %v17150_v42 = vld [vmem:[%s17763_s25 + $0x30] sm:$0xff]  ;;  %v2713_v33 = vsel %vm2653_vm3, %v2708_v45, %v2712_v9  ;;  %v2714_v45 = vshrl.u32 %v17283_v17, 16 }
 0x177   : > { %22416 = vst [vmem:[#allocation84_spill] sm:$0xff] %v18205_v1  ;;  %v17351_v17 = vld [vmem:[%s17763_s25 + $0x4b0] sm:$0xff] }
 0x178   : > { %v18207_v24 = vpop.f32.mrf.mxu1  ;;  %v18209_v60 = vpop.f32.mrf.mxu3 }
 0x179   : > { %22417 = vst [vmem:[#allocation85_spill] sm:$0xff] %v18207_v24 }
 0x17a   : > { %22418 = vst [vmem:[#allocation86_spill] sm:$0xff] %v18209_v60 }
 0x17b   : > { %v18211_v3 = vpop.f32.mrf.mxu0 }
 0x17e   : > { %v18213_v28 = vpop.f32.mrf.mxu2 }
 0x17f   : > { %22419 = vst [vmem:[#allocation87_spill] sm:$0xff] %v18213_v28 }
 0x180   : > { %v18216_v62 = vpop.f32.mrf.mxu1  ;;  %v18220_v1 = vpop.f32.mrf.mxu3 }
 0x181   : > { %22420 = vst [vmem:[#allocation88_spill] sm:$0xff] %v18216_v62 }
 0x182   : > { %22421 = vst [vmem:[#allocation89_spill] sm:$0xff] %v18220_v1  ;;  %v2718_v1 = vshll.u32 %v17284_v4, 16 }
 0x183   : > { %v18222_v24 = vpop.f32.mrf.mxu0  ;;  %14486 = vmatmul.msk.bf16.gmra.mxu1 %vm770_vm2, %v17150_v42  ;;  %14817 = vmatmul.msk.bf16.gmra.mxu2 %vm770_vm2, %v2713_v33  ;;  %v2716_v42 = vor.u32 %v2714_v45, %v2712_v9 }
 0x184   : > { %v2720_v62 = vrot.slane %v2718_v1, 1  ;;  %v17285_v1 = vld [vmem:[%s17763_s25 + $0x48] sm:$0xff] }
 0x185   : > { %15282 = vmatmul.msk.bf16.gmra.mxu3 %vm770_vm2, %v17350_v30 }
 0x186   : > { %15743 = vmatmul.msk.bf16.gmra.mxu0 %vm770_vm2, %v17414_v57  ;;  %v18230_v35 = vpop.f32.mrf.mxu2  ;;  %v2721_v30 = vsel %vm2653_vm3, %v2716_v42, %v2720_v62  ;;  %v2722_v42 = vshrl.u32 %v17284_v4, 16  ;;  %v17286_v4 = vld [vmem:[%s17763_s25 + $0x50] sm:$0xff] }
 0x187   : > { %22422 = vst [vmem:[#allocation90_spill] sm:$0xff] %v18230_v35 }
 0x188   : > { %v18232_v63 = vpop.f32.mrf.mxu1  ;;  %v4533_v60 = vpop.f32.mrf.mxu3 }
 0x189   : > { %22423 = vst [vmem:[#allocation91_spill] sm:$0xff] %v18232_v63 }
 0x18b   : > { %v18234_v28 = vpop.f32.mrf.mxu0 }
 0x18e   : > { %v18236_v33 = vpop.f32.mrf.mxu2 }
 0x18f   : > { %22424 = vst [vmem:[#allocation92_spill] sm:$0xff] %v18236_v33  ;;  %v2726_v33 = vshll.u32 %v17285_v1, 16 }
 0x190   : > { %v18239_v57 = vpop.f32.mrf.mxu1  ;;  %v4535_v38 = vpop.f32.mrf.mxu3 }
 0x191   : > { %22425 = vst [vmem:[#allocation93_spill] sm:$0xff] %v18239_v57  ;;  %v2728_v20 = vrot.slane %v2726_v33, 1 }
 0x193   : > { %v18243_v35 = vpop.f32.mrf.mxu0  ;;  %14487 = vmatmul.msk.bf16.gmra.mxu1 %vm770_vm2, %v17151_v48  ;;  %14818 = vmatmul.msk.bf16.gmra.mxu2 %vm770_vm2, %v2721_v30  ;;  %v2724_v48 = vor.u32 %v2722_v42, %v2720_v62 }
 0x195   : > { %15283 = vmatmul.msk.bf16.gmra.mxu3 %vm770_vm2, %v17351_v17  ;;  %v2729_v29 = vsel %vm2653_vm3, %v2724_v48, %v2728_v20  ;;  %v17416_v17 = vld [vmem:[%s17763_s25 + $0x6dc] sm:$0xff] }
 0x196   : > { %15744 = vmatmul.msk.bf16.gmra.mxu0 %vm770_vm2, %v17415_v14  ;;  %v18251_v9 = vpop.f32.mrf.mxu2 }
 0x197   : > { %22426 = vst [vmem:[#allocation94_spill] sm:$0xff] %v18251_v9  ;;  %v17352_v9 = vld [vmem:[%s17763_s25 + $0x4b8] sm:$0xff] }
 0x198   : > { %v18253_v45 = vpop.f32.mrf.mxu1  ;;  %v4538_v57 = vpop.f32.mrf.mxu3 }
 0x199   : > { %22427 = vst [vmem:[#allocation95_spill] sm:$0xff] %v18253_v45  ;;  %v2734_v45 = vshll.u32 %v17286_v4, 16 }
 0x19b   : > { %v18255_v63 = vpop.f32.mrf.mxu0 }
 0x19e   : > { %v18257_v30 = vpop.f32.mrf.mxu2 }
 0x19f   : > { %22428 = vst [vmem:[#allocation96_spill] sm:$0xff] %v18257_v30  ;;  %v2730_v30 = vshrl.u32 %v17285_v1, 16 }
 0x1a0   : > { %v1855_v14 = vpop.f32.mrf.mxu1  ;;  %v4540_v8 = vpop.f32.mrf.mxu3 }
 0x1a1   : > { %v1856_v62 = vadd.f32 %v1855_v14, %v17838_v49 }
 0x1a3   : > { %v5670_v56 = vpop.f32.mrf.mxu0  ;;  %14488 = vmatmul.msk.bf16.gmra.mxu1 %vm770_vm2, %v17152_v44  ;;  %14819 = vmatmul.msk.bf16.gmra.mxu2 %vm770_vm2, %v2729_v29  ;;  %v2732_v29 = vor.u32 %v2730_v30, %v2728_v20 }
 0x1a5   : > { %15284 = vmatmul.msk.bf16.gmra.mxu3 %vm770_vm2, %v17352_v9  ;;  %v17153_v9 = vld [vmem:[%s17763_s25 + $0x48] sm:$0xff] }
 0x1a6   : > { %15745 = vmatmul.msk.bf16.gmra.mxu0 %vm770_vm2, %v17416_v17  ;;  %v3396_v33 = vpop.f32.mrf.mxu2  ;;  %v2736_v17 = vrot.slane %v2734_v45, 1 }
 0x1a7   : > { %v3726_v42 = vadd.f32 %v3396_v33, %v1856_v62  ;;  %v17417_v33 = vld [vmem:[%s17763_s25 + $0x6e4] sm:$0xff] }
 0x1a8   : > { %v1857_v48 = vpop.f32.mrf.mxu1  ;;  %v4543_v43 = vpop.f32.mrf.mxu3  ;;  %v2737_v62 = vsel %vm2653_vm3, %v2732_v29, %v2736_v17 }
 0x1a9   : > { %v4863_v37 = vadd.f32 %v4533_v60, %v3726_v42  ;;  %v1858_v49 = vadd.f32 %v1857_v48, %v17851_v54  ;;  %v17287_v54 = vld [vmem:[%s17763_s25 + $0x58] sm:$0xff] }
 0x1aa   : > { %v2742_v45 = vshll.u32 %v17287_v54, 16 }
 0x1ab   : > { %v5672_v44 = vpop.f32.mrf.mxu0  ;;  %v18269_v31 = vadd.f32 %v5670_v56, %v4863_v37 }
 0x1ac   : > { %v2744_v29 = vrot.slane %v2742_v45, 1 }
 0x1ae   : > { %v3398_v14 = vpop.f32.mrf.mxu2 }
 0x1af   : > { %v3727_v25 = vadd.f32 %v3398_v14, %v1858_v49 }
 0x1b0   : > { %v1860_v19 = vpop.f32.mrf.mxu1  ;;  %v4545_v1 = vpop.f32.mrf.mxu3 }
 0x1b1   : > { %v4864_v13 = vadd.f32 %v4535_v38, %v3727_v25  ;;  %v1861_v37 = vadd.f32 %v1860_v19, %v17862_v61  ;;  %v2738_v38 = vshrl.u32 %v17286_v4, 16 }
 0x1b3   : > { %v5675_v7 = vpop.f32.mrf.mxu0  ;;  %14489 = vmatmul.msk.bf16.gmra.mxu1 %vm770_vm2, %v17153_v9  ;;  %14820 = vmatmul.msk.bf16.gmra.mxu2 %vm770_vm2, %v2737_v62  ;;  %v18278_v60 = vadd.f32 %v5672_v44, %v4864_v13  ;;  %v2740_v44 = vor.u32 %v2738_v38, %v2736_v17  ;;  %v17418_v62 = vld [vmem:[%s17763_s25 + $0x6ec] sm:$0xff] }
 0x1b5   : > { %15285 = vmatmul.msk.bf16.gmra.mxu3 %vm770_vm2, %v17353_v0  ;;  %v17154_v0 = vld [vmem:[%s17763_s25 + $0x50] sm:$0xff]  ;;  %v2745_v9 = vsel %vm2653_vm3, %v2740_v44, %v2744_v29 }
 0x1b6   : > { %15746 = vmatmul.msk.bf16.gmra.mxu0 %vm770_vm2, %v17417_v33  ;;  %v3401_v56 = vpop.f32.mrf.mxu2 }
 0x1b7   : > { %v3728_v20 = vadd.f32 %v3401_v56, %v1861_v37  ;;  %v17354_v56 = vld [vmem:[%s17763_s25 + $0x4c8] sm:$0xff] }
 0x1b8   : > { %v1862_v25 = vpop.f32.mrf.mxu1  ;;  %v4548_v30 = vpop.f32.mrf.mxu3 }
 0x1b9   : > { %v4865_v42 = vadd.f32 %v4538_v57, %v3728_v20  ;;  %v1863_v61 = vadd.f32 %v1862_v25, %v17875_v2  ;;  %v17288_v2 = vld [vmem:[%s17763_s25 + $0x60] sm:$0xff]  ;;  %v2746_v25 = vshrl.u32 %v17287_v54, 16 }
 0x1ba   : > { %v2750_v38 = vshll.u32 %v17288_v2, 16 }
 0x1bb   : > { %v5677_v48 = vpop.f32.mrf.mxu0  ;;  %v18284_v13 = vadd.f32 %v5675_v7, %v4865_v42 }
 0x1be   : > { %v3403_v19 = vpop.f32.mrf.mxu2 }
 0x1bf   : > { %v3729_v49 = vadd.f32 %v3403_v19, %v1863_v61  ;;  %v2748_v61 = vor.u32 %v2746_v25, %v2744_v29  ;;  %v2752_v19 = vrot.slane %v2750_v38, 1 }
 0x1c0   : > { %v1865_v14 = vpop.f32.mrf.mxu1  ;;  %v4550_v4 = vpop.f32.mrf.mxu3 }
 0x1c1   : > { %v4866_v33 = vadd.f32 %v4540_v8, %v3729_v49  ;;  %v1866_v57 = vadd.f32 %v1865_v14, %v17886_v10  ;;  %v17155_v14 = vld [vmem:[%s17763_s25 + $0x58] sm:$0xff] }
 0x1c3   : > { %v5680_v37 = vpop.f32.mrf.mxu0  ;;  %14490 = vmatmul.msk.bf16.gmra.mxu1 %vm770_vm2, %v17154_v0  ;;  %14821 = vmatmul.msk.bf16.gmra.mxu2 %vm770_vm2, %v2745_v9  ;;  %v18293_v7 = vadd.f32 %v5677_v48, %v4866_v33  ;;  %v17419_v33 = vld [vmem:[%s17763_s25 + $0x6f4] sm:$0xff] }
 0x1c5   : > { %15286 = vmatmul.msk.bf16.gmra.mxu3 %vm770_vm2, %v17354_v56 }
 0x1c6   : > { %15747 = vmatmul.msk.bf16.gmra.mxu0 %vm770_vm2, %v17418_v62  ;;  %v3406_v17 = vpop.f32.mrf.mxu2  ;;  %v2753_v62 = vsel %vm2653_vm3, %v2748_v61, %v2752_v19 }
 0x1c7   : > { %v3730_v20 = vadd.f32 %v3406_v17, %v1866_v57  ;;  %v17355_v17 = vld [vmem:[%s17763_s25 + $0x4d0] sm:$0xff] }
 0x1c8   : > { %v1867_v8 = vpop.f32.mrf.mxu1  ;;  %v4553_v45 = vpop.f32.mrf.mxu3 }
 0x1c9   : > { %v4867_v42 = vadd.f32 %v4543_v43, %v3730_v20  ;;  %v1868_v10 = vadd.f32 %v1867_v8, %v17899_v15  ;;  %v17289_v15 = vld [vmem:[%s17763_s25 + $0x68] sm:$0xff]  ;;  %v2754_v8 = vshrl.u32 %v17288_v2, 16 }
 0x1ca   : > { %v2758_v25 = vshll.u32 %v17289_v15, 16 }
 0x1cb   : > { %v5682_v44 = vpop.f32.mrf.mxu0  ;;  %v18299_v48 = vadd.f32 %v5680_v37, %v4867_v42 }
 0x1ce   : > { %v3408_v49 = vpop.f32.mrf.mxu2 }
 0x1cf   : > { %v3731_v0 = vadd.f32 %v3408_v49, %v1868_v10  ;;  %v2756_v10 = vor.u32 %v2754_v8, %v2752_v19  ;;  %v2760_v49 = vrot.slane %v2758_v25, 1 }
 0x1d0   : > { %v1870_v9 = vpop.f32.mrf.mxu1  ;;  %v4555_v54 = vpop.f32.mrf.mxu3 }
 0x1d1   : > { %v4868_v56 = vadd.f32 %v4545_v1, %v3731_v0  ;;  %v1871_v29 = vadd.f32 %v1870_v9, %v17910_v22  ;;  %v17156_v9 = vld [vmem:[%s17763_s25 + $0x60] sm:$0xff] }
 0x1d3   : > { %v5685_v57 = vpop.f32.mrf.mxu0  ;;  %14491 = vmatmul.msk.bf16.gmra.mxu1 %vm770_vm2, %v17155_v14  ;;  %14822 = vmatmul.msk.bf16.gmra.mxu2 %vm770_vm2, %v2753_v62  ;;  %v18308_v43 = vadd.f32 %v5682_v44, %v4868_v56  ;;  %v17420_v56 = vld [vmem:[%s17763_s25 + $0x6fc] sm:$0xff] }
 0x1d5   : > { %15287 = vmatmul.msk.bf16.gmra.mxu3 %vm770_vm2, %v17355_v17 }
 0x1d6   : > { %15748 = vmatmul.msk.bf16.gmra.mxu0 %vm770_vm2, %v17419_v33  ;;  %v3411_v37 = vpop.f32.mrf.mxu2  ;;  %v2761_v33 = vsel %vm2653_vm3, %v2756_v10, %v2760_v49 }
 0x1d7   : > { %v3732_v20 = vadd.f32 %v3411_v37, %v1871_v29  ;;  %v17356_v37 = vld [vmem:[%s17763_s25 + $0x4d8] sm:$0xff] }
 0x1d8   : > { %v1872_v1 = vpop.f32.mrf.mxu1  ;;  %v4558_v38 = vpop.f32.mrf.mxu3 }
 0x1d9   : > { %v4869_v42 = vadd.f32 %v4548_v30, %v3732_v20  ;;  %v1873_v22 = vadd.f32 %v1872_v1, %v17923_v27  ;;  %v17290_v27 = vld [vmem:[%s17763_s25 + $0x70] sm:$0xff]  ;;  %v2762_v1 = vshrl.u32 %v17289_v15, 16 }
 0x1da   : > { %v2766_v8 = vshll.u32 %v17290_v27, 16 }
 0x1db   : > { %v5687_v61 = vpop.f32.mrf.mxu0  ;;  %v18314_v44 = vadd.f32 %v5685_v57, %v4869_v42 }
 0x1de   : > { %v3413_v0 = vpop.f32.mrf.mxu2 }
 0x1df   : > { %v3733_v14 = vadd.f32 %v3413_v0, %v1873_v22  ;;  %v2764_v22 = vor.u32 %v2762_v1, %v2760_v49  ;;  %v2768_v0 = vrot.slane %v2766_v8, 1 }
 0x1e0   : > { %v1875_v62 = vpop.f32.mrf.mxu1  ;;  %v4560_v2 = vpop.f32.mrf.mxu3 }
 0x1e1   : > { %v4870_v17 = vadd.f32 %v4550_v4, %v3733_v14  ;;  %v1876_v19 = vadd.f32 %v1875_v62, %v17934_v34  ;;  %v17157_v62 = vld [vmem:[%s17763_s25 + $0x68] sm:$0xff] }
 0x1e3   : > { %v5690_v29 = vpop.f32.mrf.mxu0  ;;  %14492 = vmatmul.msk.bf16.gmra.mxu1 %vm770_vm2, %v17156_v9  ;;  %14823 = vmatmul.msk.bf16.gmra.mxu2 %vm770_vm2, %v2761_v33  ;;  %v18323_v30 = vadd.f32 %v5687_v61, %v4870_v17  ;;  %v17421_v17 = vld [vmem:[%s17763_s25 + $0x704] sm:$0xff] }
 0x1e5   : > { %15288 = vmatmul.msk.bf16.gmra.mxu3 %vm770_vm2, %v17356_v37 }
 0x1e6   : > { %15749 = vmatmul.msk.bf16.gmra.mxu0 %vm770_vm2, %v17420_v56  ;;  %v3416_v57 = vpop.f32.mrf.mxu2  ;;  %v2769_v56 = vsel %vm2653_vm3, %v2764_v22, %v2768_v0 }
 0x1e7   : > { %v3734_v20 = vadd.f32 %v3416_v57, %v1876_v19  ;;  %v17357_v57 = vld [vmem:[%s17763_s25 + $0x4e0] sm:$0xff] }
 0x1e8   : > { %v1877_v4 = vpop.f32.mrf.mxu1  ;;  %v4563_v25 = vpop.f32.mrf.mxu3 }
 0x1e9   : > { %v4871_v42 = vadd.f32 %v4553_v45, %v3734_v20  ;;  %v1878_v34 = vadd.f32 %v1877_v4, %v17947_v39  ;;  %v17291_v39 = vld [vmem:[%s17763_s25 + $0x78] sm:$0xff]  ;;  %v2770_v4 = vshrl.u32 %v17290_v27, 16 }
 0x1ea   : > { %v2774_v1 = vshll.u32 %v17291_v39, 16 }
 0x1eb   : > { %v5692_v10 = vpop.f32.mrf.mxu0  ;;  %v18329_v61 = vadd.f32 %v5690_v29, %v4871_v42 }
 0x1ee   : > { %v3418_v14 = vpop.f32.mrf.mxu2 }
 0x1ef   : > { %v3735_v9 = vadd.f32 %v3418_v14, %v1878_v34  ;;  %v2772_v34 = vor.u32 %v2770_v4, %v2768_v0  ;;  %v2776_v14 = vrot.slane %v2774_v1, 1 }
 0x1f0   : > { %v1880_v33 = vpop.f32.mrf.mxu1  ;;  %v4565_v15 = vpop.f32.mrf.mxu3 }
 0x1f1   : > { %v4872_v37 = vadd.f32 %v4555_v54, %v3735_v9  ;;  %v1881_v49 = vadd.f32 %v1880_v33, %v17958_v46  ;;  %v17158_v33 = vld [vmem:[%s17763_s25 + $0x70] sm:$0xff] }
 0x1f3   : > { %v5695_v19 = vpop.f32.mrf.mxu0  ;;  %14493 = vmatmul.msk.bf16.gmra.mxu1 %vm770_vm2, %v17157_v62  ;;  %14824 = vmatmul.msk.bf16.gmra.mxu2 %vm770_vm2, %v2769_v56  ;;  %v18338_v45 = vadd.f32 %v5692_v10, %v4872_v37  ;;  %v17422_v37 = vld [vmem:[%s17763_s25 + $0x70c] sm:$0xff] }
 0x1f5   : > { %15289 = vmatmul.msk.bf16.gmra.mxu3 %vm770_vm2, %v17357_v57 }
 0x1f6   : > { %15750 = vmatmul.msk.bf16.gmra.mxu0 %vm770_vm2, %v17421_v17  ;;  %v3421_v29 = vpop.f32.mrf.mxu2  ;;  %v2777_v17 = vsel %vm2653_vm3, %v2772_v34, %v2776_v14 }
 0x1f7   : > { %v3736_v20 = vadd.f32 %v3421_v29, %v1881_v49  ;;  %v17358_v29 = vld [vmem:[%s17763_s25 + $0x4e8] sm:$0xff] }
 0x1f8   : > { %v1882_v54 = vpop.f32.mrf.mxu1  ;;  %v4568_v8 = vpop.f32.mrf.mxu3 }
 0x1f9   : > { %v4873_v42 = vadd.f32 %v4558_v38, %v3736_v20  ;;  %v1883_v46 = vadd.f32 %v1882_v54, %v17971_v59  ;;  %v17292_v59 = vld [vmem:[%s17763_s25 + $0x80] sm:$0xff]  ;;  %v2778_v54 = vshrl.u32 %v17291_v39, 16 }
 0x1fa   : > { %v2782_v4 = vshll.u32 %v17292_v59, 16 }
 0x1fb   : > { %v5697_v22 = vpop.f32.mrf.mxu0  ;;  %v18344_v10 = vadd.f32 %v5695_v19, %v4873_v42 }
 0x1fe   : > { %v3423_v9 = vpop.f32.mrf.mxu2 }
 0x1ff   : > { %v3737_v62 = vadd.f32 %v3423_v9, %v1883_v46  ;;  %v2780_v46 = vor.u32 %v2778_v54, %v2776_v14  ;;  %v2784_v9 = vrot.slane %v2782_v4, 1 }
 0x200   : > { %v1885_v56 = vpop.f32.mrf.mxu1  ;;  %v4570_v27 = vpop.f32.mrf.mxu3 }
 0x201   : > { %v4874_v57 = vadd.f32 %v4560_v2, %v3737_v62  ;;  %v1886_v0 = vadd.f32 %v1885_v56, %v17982_v18  ;;  %v17159_v56 = vld [vmem:[%s17763_s25 + $0x78] sm:$0xff] }
 0x203   : > { %v5700_v49 = vpop.f32.mrf.mxu0  ;;  %14494 = vmatmul.msk.bf16.gmra.mxu1 %vm770_vm2, %v17158_v33  ;;  %14825 = vmatmul.msk.bf16.gmra.mxu2 %vm770_vm2, %v2777_v17  ;;  %v18353_v38 = vadd.f32 %v5697_v22, %v4874_v57  ;;  %v17423_v57 = vld [vmem:[%s17763_s25 + $0x714] sm:$0xff] }
 0x205   : > { %15290 = vmatmul.msk.bf16.gmra.mxu3 %vm770_vm2, %v17358_v29 }
 0x206   : > { %15751 = vmatmul.msk.bf16.gmra.mxu0 %vm770_vm2, %v17422_v37  ;;  %v3426_v19 = vpop.f32.mrf.mxu2  ;;  %v2785_v37 = vsel %vm2653_vm3, %v2780_v46, %v2784_v9 }
 0x207   : > { %v3738_v20 = vadd.f32 %v3426_v19, %v1886_v0  ;;  %v17359_v19 = vld [vmem:[%s17763_s25 + $0x4f0] sm:$0xff] }
 0x208   : > { %v1887_v2 = vpop.f32.mrf.mxu1  ;;  %v4573_v1 = vpop.f32.mrf.mxu3 }
 0x209   : > { %v4875_v42 = vadd.f32 %v4563_v25, %v3738_v20  ;;  %v1888_v18 = vadd.f32 %v1887_v2, %v17995_v32  ;;  %v17293_v32 = vld [vmem:[%s17763_s25 + $0x88] sm:$0xff]  ;;  %v2786_v2 = vshrl.u32 %v17292_v59, 16 }
 0x20a   : > { %v2790_v54 = vshll.u32 %v17293_v32, 16 }
 0x20b   : > { %v5702_v34 = vpop.f32.mrf.mxu0  ;;  %v18359_v22 = vadd.f32 %v5700_v49, %v4875_v42 }
 0x20e   : > { %v3428_v62 = vpop.f32.mrf.mxu2 }
 0x20f   : > { %v3739_v33 = vadd.f32 %v3428_v62, %v1888_v18  ;;  %v2788_v18 = vor.u32 %v2786_v2, %v2784_v9  ;;  %v2792_v62 = vrot.slane %v2790_v54, 1 }
 0x210   : > { %v1890_v17 = vpop.f32.mrf.mxu1  ;;  %v4575_v39 = vpop.f32.mrf.mxu3 }
 0x211   : > { %v4876_v29 = vadd.f32 %v4565_v15, %v3739_v33  ;;  %v1891_v14 = vadd.f32 %v1890_v17, %v18006_v6  ;;  %v17160_v17 = vld [vmem:[%s17763_s25 + $0x80] sm:$0xff] }
 0x213   : > { %v5705_v0 = vpop.f32.mrf.mxu0  ;;  %14495 = vmatmul.msk.bf16.gmra.mxu1 %vm770_vm2, %v17159_v56  ;;  %14826 = vmatmul.msk.bf16.gmra.mxu2 %vm770_vm2, %v2785_v37  ;;  %v18368_v25 = vadd.f32 %v5702_v34, %v4876_v29  ;;  %v17424_v29 = vld [vmem:[%s17763_s25 + $0x71c] sm:$0xff] }
 0x215   : > { %15291 = vmatmul.msk.bf16.gmra.mxu3 %vm770_vm2, %v17359_v19 }
 0x216   : > { %15752 = vmatmul.msk.bf16.gmra.mxu0 %vm770_vm2, %v17423_v57  ;;  %v3431_v49 = vpop.f32.mrf.mxu2  ;;  %v2793_v57 = vsel %vm2653_vm3, %v2788_v18, %v2792_v62 }
 0x217   : > { %v3740_v20 = vadd.f32 %v3431_v49, %v1891_v14  ;;  %v17360_v49 = vld [vmem:[%s17763_s25 + $0x4f8] sm:$0xff] }
 0x218   : > { %v1892_v15 = vpop.f32.mrf.mxu1  ;;  %v4578_v4 = vpop.f32.mrf.mxu3 }
 0x219   : > { %v4877_v42 = vadd.f32 %v4568_v8, %v3740_v20  ;;  %v1893_v6 = vadd.f32 %v1892_v15, %v18031_v11  ;;  %v17294_v11 = vld [vmem:[%s17763_s25 + $0x90] sm:$0xff]  ;;  %v2794_v15 = vshrl.u32 %v17293_v32, 16 }
 0x21a   : > { %v2798_v2 = vshll.u32 %v17294_v11, 16 }
 0x21b   : > { %v5707_v46 = vpop.f32.mrf.mxu0  ;;  %v18374_v34 = vadd.f32 %v5705_v0, %v4877_v42 }
 0x21e   : > { %v3433_v33 = vpop.f32.mrf.mxu2 }
 0x21f   : > { %v3741_v56 = vadd.f32 %v3433_v33, %v1893_v6  ;;  %v2796_v6 = vor.u32 %v2794_v15, %v2792_v62  ;;  %v2800_v33 = vrot.slane %v2798_v2, 1 }
 0x220   : > { %v1895_v37 = vpop.f32.mrf.mxu1  ;;  %v4580_v59 = vpop.f32.mrf.mxu3 }
 0x221   : > { %v4878_v19 = vadd.f32 %v4570_v27, %v3741_v56  ;;  %v1896_v9 = vadd.f32 %v1895_v37, %v18047_v21  ;;  %v17161_v37 = vld [vmem:[%s17763_s25 + $0x88] sm:$0xff] }
 0x223   : > { %v5710_v14 = vpop.f32.mrf.mxu0  ;;  %14496 = vmatmul.msk.bf16.gmra.mxu1 %vm770_vm2, %v17160_v17  ;;  %14827 = vmatmul.msk.bf16.gmra.mxu2 %vm770_vm2, %v2793_v57  ;;  %v18383_v8 = vadd.f32 %v5707_v46, %v4878_v19  ;;  %v17425_v19 = vld [vmem:[%s17763_s25 + $0x724] sm:$0xff] }
 0x225   : > { %15292 = vmatmul.msk.bf16.gmra.mxu3 %vm770_vm2, %v17360_v49 }
 0x226   : > { %15753 = vmatmul.msk.bf16.gmra.mxu0 %vm770_vm2, %v17424_v29  ;;  %v3436_v0 = vpop.f32.mrf.mxu2  ;;  %v2801_v29 = vsel %vm2653_vm3, %v2796_v6, %v2800_v33 }
 0x227   : > { %v3742_v20 = vadd.f32 %v3436_v0, %v1896_v9  ;;  %v17361_v0 = vld [vmem:[%s17763_s25 + $0x500] sm:$0xff] }
 0x228   : > { %v1897_v27 = vpop.f32.mrf.mxu1  ;;  %v4583_v54 = vpop.f32.mrf.mxu3 }
 0x229   : > { %v4879_v42 = vadd.f32 %v4573_v1, %v3742_v20  ;;  %v1898_v21 = vadd.f32 %v1897_v27, %v18061_v41  ;;  %v17295_v41 = vld [vmem:[%s17763_s25 + $0x98] sm:$0xff]  ;;  %v2802_v27 = vshrl.u32 %v17294_v11, 16 }
 0x22a   : > { %v2806_v15 = vshll.u32 %v17295_v41, 16 }
 0x22b   : > { %v5712_v18 = vpop.f32.mrf.mxu0  ;;  %v18389_v46 = vadd.f32 %v5710_v14, %v4879_v42 }
 0x22e   : > { %v3438_v56 = vpop.f32.mrf.mxu2 }
 0x22f   : > { %v3743_v17 = vadd.f32 %v3438_v56, %v1898_v21  ;;  %v2804_v21 = vor.u32 %v2802_v27, %v2800_v33  ;;  %v2808_v56 = vrot.slane %v2806_v15, 1 }
 0x230   : > { %v1900_v57 = vpop.f32.mrf.mxu1  ;;  %v4585_v32 = vpop.f32.mrf.mxu3 }
 0x231   : > { %v4880_v49 = vadd.f32 %v4575_v39, %v3743_v17  ;;  %v1901_v62 = vadd.f32 %v1900_v57, %v18072_v26  ;;  %v17162_v57 = vld [vmem:[%s17763_s25 + $0x90] sm:$0xff] }
 0x233   : > { %v5715_v9 = vpop.f32.mrf.mxu0  ;;  %14497 = vmatmul.msk.bf16.gmra.mxu1 %vm770_vm2, %v17161_v37  ;;  %14828 = vmatmul.msk.bf16.gmra.mxu2 %vm770_vm2, %v2801_v29  ;;  %v18398_v1 = vadd.f32 %v5712_v18, %v4880_v49  ;;  %v17426_v49 = vld [vmem:[%s17763_s25 + $0x72c] sm:$0xff] }
 0x235   : > { %15293 = vmatmul.msk.bf16.gmra.mxu3 %vm770_vm2, %v17361_v0 }
 0x236   : > { %15754 = vmatmul.msk.bf16.gmra.mxu0 %vm770_vm2, %v17425_v19  ;;  %v3441_v14 = vpop.f32.mrf.mxu2  ;;  %v2809_v19 = vsel %vm2653_vm3, %v2804_v21, %v2808_v56 }
 0x237   : > { %v3744_v20 = vadd.f32 %v3441_v14, %v1901_v62  ;;  %v17362_v14 = vld [vmem:[%s17763_s25 + $0x508] sm:$0xff] }
 0x238   : > { %v1902_v39 = vpop.f32.mrf.mxu1  ;;  %v4588_v2 = vpop.f32.mrf.mxu3 }
 0x239   : > { %v4881_v42 = vadd.f32 %v4578_v4, %v3744_v20  ;;  %v1903_v26 = vadd.f32 %v1902_v39, %v18086_v53  ;;  %v17296_v53 = vld [vmem:[%s17763_s25 + $0xa0] sm:$0xff]  ;;  %v2810_v39 = vshrl.u32 %v17295_v41, 16 }
 0x23a   : > { %v2814_v27 = vshll.u32 %v17296_v53, 16 }
 0x23b   : > { %v5717_v6 = vpop.f32.mrf.mxu0  ;;  %v18404_v18 = vadd.f32 %v5715_v9, %v4881_v42 }
 0x23e   : > { %v3443_v17 = vpop.f32.mrf.mxu2 }
 0x23f   : > { %v3745_v37 = vadd.f32 %v3443_v17, %v1903_v26  ;;  %v2812_v26 = vor.u32 %v2810_v39, %v2808_v56  ;;  %v2816_v17 = vrot.slane %v2814_v27, 1 }
 0x240   : > { %v1905_v29 = vpop.f32.mrf.mxu1  ;;  %v4590_v11 = vpop.f32.mrf.mxu3 }
 0x241   : > { %v4882_v0 = vadd.f32 %v4580_v59, %v3745_v37  ;;  %v1906_v33 = vadd.f32 %v1905_v29, %v18097_v40  ;;  %v17163_v29 = vld [vmem:[%s17763_s25 + $0x98] sm:$0xff] }
 0x243   : > { %v5720_v62 = vpop.f32.mrf.mxu0  ;;  %14498 = vmatmul.msk.bf16.gmra.mxu1 %vm770_vm2, %v17162_v57  ;;  %14829 = vmatmul.msk.bf16.gmra.mxu2 %vm770_vm2, %v2809_v19  ;;  %v18413_v4 = vadd.f32 %v5717_v6, %v4882_v0  ;;  %v17427_v0 = vld [vmem:[%s17763_s25 + $0x734] sm:$0xff] }
 0x245   : > { %15294 = vmatmul.msk.bf16.gmra.mxu3 %vm770_vm2, %v17362_v14 }
 0x246   : > { %15755 = vmatmul.msk.bf16.gmra.mxu0 %vm770_vm2, %v17426_v49  ;;  %v3446_v9 = vpop.f32.mrf.mxu2  ;;  %v2817_v49 = vsel %vm2653_vm3, %v2812_v26, %v2816_v17 }
 0x247   : > { %v3746_v20 = vadd.f32 %v3446_v9, %v1906_v33  ;;  %v17363_v9 = vld [vmem:[%s17763_s25 + $0x510] sm:$0xff] }
 0x248   : > { %v1907_v59 = vpop.f32.mrf.mxu1  ;;  %v4593_v15 = vpop.f32.mrf.mxu3 }
 0x249   : > { %v4883_v42 = vadd.f32 %v4583_v54, %v3746_v20  ;;  %v1908_v40 = vadd.f32 %v1907_v59, %v18111_v23  ;;  %v17297_v23 = vld [vmem:[%s17763_s25 + $0xa8] sm:$0xff]  ;;  %v2818_v59 = vshrl.u32 %v17296_v53, 16 }
 0x24a   : > { %v2822_v39 = vshll.u32 %v17297_v23, 16 }
 0x24b   : > { %v5722_v21 = vpop.f32.mrf.mxu0  ;;  %v18419_v6 = vadd.f32 %v5720_v62, %v4883_v42 }
 0x24e   : > { %v3448_v37 = vpop.f32.mrf.mxu2 }
 0x24f   : > { %v3747_v57 = vadd.f32 %v3448_v37, %v1908_v40  ;;  %v2820_v40 = vor.u32 %v2818_v59, %v2816_v17  ;;  %v2824_v37 = vrot.slane %v2822_v39, 1 }
 0x250   : > { %v1910_v19 = vpop.f32.mrf.mxu1  ;;  %v4595_v41 = vpop.f32.mrf.mxu3 }
 0x251   : > { %v4884_v14 = vadd.f32 %v4585_v32, %v3747_v57  ;;  %v1911_v56 = vadd.f32 %v1910_v19, %v18122_v16  ;;  %v17164_v19 = vld [vmem:[%s17763_s25 + $0xa0] sm:$0xff] }
 0x253   : > { %v5725_v33 = vpop.f32.mrf.mxu0  ;;  %14499 = vmatmul.msk.bf16.gmra.mxu1 %vm770_vm2, %v17163_v29  ;;  %14830 = vmatmul.msk.bf16.gmra.mxu2 %vm770_vm2, %v2817_v49  ;;  %v18428_v54 = vadd.f32 %v5722_v21, %v4884_v14  ;;  %v17428_v14 = vld [vmem:[%s17763_s25 + $0x73c] sm:$0xff] }
 0x255   : > { %15295 = vmatmul.msk.bf16.gmra.mxu3 %vm770_vm2, %v17363_v9 }
 0x256   : > { %15756 = vmatmul.msk.bf16.gmra.mxu0 %vm770_vm2, %v17427_v0  ;;  %v3451_v62 = vpop.f32.mrf.mxu2  ;;  %v2825_v0 = vsel %vm2653_vm3, %v2820_v40, %v2824_v37 }
 0x257   : > { %v3748_v20 = vadd.f32 %v3451_v62, %v1911_v56  ;;  %v17364_v62 = vld [vmem:[%s17763_s25 + $0x518] sm:$0xff] }
 0x258   : > { %v1912_v32 = vpop.f32.mrf.mxu1  ;;  %v4598_v27 = vpop.f32.mrf.mxu3 }
 0x259   : > { %v4885_v42 = vadd.f32 %v4588_v2, %v3748_v20  ;;  %v1913_v16 = vadd.f32 %v1912_v32, %v18136_v36  ;;  %v17298_v36 = vld [vmem:[%s17763_s25 + $0xb0] sm:$0xff]  ;;  %v2826_v32 = vshrl.u32 %v17297_v23, 16 }
 0x25a   : > { %v2830_v59 = vshll.u32 %v17298_v36, 16 }
 0x25b   : > { %v5727_v26 = vpop.f32.mrf.mxu0  ;;  %v18434_v21 = vadd.f32 %v5725_v33, %v4885_v42 }
 0x25e   : > { %v3453_v57 = vpop.f32.mrf.mxu2 }
 0x25f   : > { %v3749_v29 = vadd.f32 %v3453_v57, %v1913_v16  ;;  %v2828_v16 = vor.u32 %v2826_v32, %v2824_v37  ;;  %v2832_v57 = vrot.slane %v2830_v59, 1 }
 0x260   : > { %v1915_v49 = vpop.f32.mrf.mxu1  ;;  %v4600_v53 = vpop.f32.mrf.mxu3 }
 0x261   : > { %v4886_v9 = vadd.f32 %v4590_v11, %v3749_v29  ;;  %v1916_v17 = vadd.f32 %v1915_v49, %v18147_v55  ;;  %v17165_v49 = vld [vmem:[%s17763_s25 + $0xa8] sm:$0xff] }
 0x263   : > { %v5730_v56 = vpop.f32.mrf.mxu0  ;;  %14500 = vmatmul.msk.bf16.gmra.mxu1 %vm770_vm2, %v17164_v19  ;;  %14831 = vmatmul.msk.bf16.gmra.mxu2 %vm770_vm2, %v2825_v0  ;;  %v18443_v2 = vadd.f32 %v5727_v26, %v4886_v9  ;;  %v17429_v9 = vld [vmem:[%s17763_s25 + $0x744] sm:$0xff] }
 0x265   : > { %15296 = vmatmul.msk.bf16.gmra.mxu3 %vm770_vm2, %v17364_v62 }
 0x266   : > { %15757 = vmatmul.msk.bf16.gmra.mxu0 %vm770_vm2, %v17428_v14  ;;  %v3456_v33 = vpop.f32.mrf.mxu2  ;;  %v2833_v14 = vsel %vm2653_vm3, %v2828_v16, %v2832_v57 }
 0x267   : > { %v3750_v20 = vadd.f32 %v3456_v33, %v1916_v17  ;;  %v17365_v33 = vld [vmem:[%s17763_s25 + $0x520] sm:$0xff] }
 0x268   : > { %v1917_v11 = vpop.f32.mrf.mxu1  ;;  %v4603_v39 = vpop.f32.mrf.mxu3 }
 0x269   : > { %v4887_v42 = vadd.f32 %v4593_v15, %v3750_v20  ;;  %v1918_v55 = vadd.f32 %v1917_v11, %v18161_v12  ;;  %v17299_v12 = vld [vmem:[%s17763_s25 + $0xb8] sm:$0xff]  ;;  %v2834_v11 = vshrl.u32 %v17298_v36, 16 }
 0x26a   : > { %v2838_v32 = vshll.u32 %v17299_v12, 16 }
 0x26b   : > { %v5732_v40 = vpop.f32.mrf.mxu0  ;;  %v18449_v26 = vadd.f32 %v5730_v56, %v4887_v42 }
 0x26e   : > { %v3458_v29 = vpop.f32.mrf.mxu2 }
 0x26f   : > { %v3751_v19 = vadd.f32 %v3458_v29, %v1918_v55  ;;  %v2836_v55 = vor.u32 %v2834_v11, %v2832_v57  ;;  %v2840_v29 = vrot.slane %v2838_v32, 1 }
 0x270   : > { %v1920_v0 = vpop.f32.mrf.mxu1  ;;  %v4605_v23 = vpop.f32.mrf.mxu3 }
 0x271   : > { %v4888_v62 = vadd.f32 %v4595_v41, %v3751_v19  ;;  %v1921_v37 = vadd.f32 %v1920_v0, %v18172_v5  ;;  %v17166_v0 = vld [vmem:[%s17763_s25 + $0xb0] sm:$0xff] }
 0x273   : > { %v5735_v17 = vpop.f32.mrf.mxu0  ;;  %14501 = vmatmul.msk.bf16.gmra.mxu1 %vm770_vm2, %v17165_v49  ;;  %14832 = vmatmul.msk.bf16.gmra.mxu2 %vm770_vm2, %v2833_v14  ;;  %v18458_v15 = vadd.f32 %v5732_v40, %v4888_v62  ;;  %v17430_v62 = vld [vmem:[%s17763_s25 + $0x74c] sm:$0xff] }
 0x275   : > { %15297 = vmatmul.msk.bf16.gmra.mxu3 %vm770_vm2, %v17365_v33 }
 0x276   : > { %15758 = vmatmul.msk.bf16.gmra.mxu0 %vm770_vm2, %v17429_v9  ;;  %v3461_v56 = vpop.f32.mrf.mxu2  ;;  %v2841_v9 = vsel %vm2653_vm3, %v2836_v55, %v2840_v29 }
 0x277   : > { %v3752_v20 = vadd.f32 %v3461_v56, %v1921_v37  ;;  %v17366_v56 = vld [vmem:[%s17763_s25 + $0x528] sm:$0xff] }
 0x278   : > { %v1922_v41 = vpop.f32.mrf.mxu1  ;;  %v4608_v59 = vpop.f32.mrf.mxu3 }
 0x279   : > { %v4889_v42 = vadd.f32 %v4598_v27, %v3752_v20  ;;  %v1923_v5 = vadd.f32 %v1922_v41, %v18186_v51  ;;  %v17300_v51 = vld [vmem:[%s17763_s25 + $0xc0] sm:$0xff]  ;;  %v2842_v41 = vshrl.u32 %v17299_v12, 16 }
 0x27a   : > { %v2846_v11 = vshll.u32 %v17300_v51, 16 }
 0x27b   : > { %v5737_v16 = vpop.f32.mrf.mxu0  ;;  %v18464_v40 = vadd.f32 %v5735_v17, %v4889_v42 }
 0x27e   : > { %v3463_v19 = vpop.f32.mrf.mxu2 }
 0x27f   : > { %v3753_v49 = vadd.f32 %v3463_v19, %v1923_v5  ;;  %v2844_v5 = vor.u32 %v2842_v41, %v2840_v29  ;;  %v2848_v19 = vrot.slane %v2846_v11, 1 }
 0x280   : > { %v1925_v14 = vpop.f32.mrf.mxu1  ;;  %v4610_v36 = vpop.f32.mrf.mxu3 }
 0x281   : > { %v4890_v33 = vadd.f32 %v4600_v53, %v3753_v49  ;;  %v1926_v57 = vadd.f32 %v1925_v14, %v18197_v50  ;;  %v17167_v14 = vld [vmem:[%s17763_s25 + $0xb8] sm:$0xff] }
 0x283   : > { %v5740_v37 = vpop.f32.mrf.mxu0  ;;  %14502 = vmatmul.msk.bf16.gmra.mxu1 %vm770_vm2, %v17166_v0  ;;  %14833 = vmatmul.msk.bf16.gmra.mxu2 %vm770_vm2, %v2841_v9  ;;  %v18473_v27 = vadd.f32 %v5737_v16, %v4890_v33  ;;  %v17431_v33 = vld [vmem:[%s17763_s25 + $0x754] sm:$0xff] }
 0x285   : > { %15298 = vmatmul.msk.bf16.gmra.mxu3 %vm770_vm2, %v17366_v56 }
 0x286   : > { %15759 = vmatmul.msk.bf16.gmra.mxu0 %vm770_vm2, %v17430_v62  ;;  %v3466_v17 = vpop.f32.mrf.mxu2  ;;  %v2849_v62 = vsel %vm2653_vm3, %v2844_v5, %v2848_v19 }
 0x287   : > { %v3754_v20 = vadd.f32 %v3466_v17, %v1926_v57  ;;  %v17367_v17 = vld [vmem:[%s17763_s25 + $0x530] sm:$0xff] }
 0x288   : > { %v1927_v53 = vpop.f32.mrf.mxu1  ;;  %v4613_v32 = vpop.f32.mrf.mxu3 }
 0x289   : > { %v4891_v42 = vadd.f32 %v4603_v39, %v3754_v20  ;;  %v1928_v50 = vadd.f32 %v1927_v53, %v18211_v3  ;;  %v17301_v3 = vld [vmem:[%s17763_s25 + $0xc8] sm:$0xff]  ;;  %v2850_v53 = vshrl.u32 %v17300_v51, 16 }
 0x28a   : > { %v2854_v41 = vshll.u32 %v17301_v3, 16 }
 0x28b   : > { %v5742_v55 = vpop.f32.mrf.mxu0  ;;  %v18479_v16 = vadd.f32 %v5740_v37, %v4891_v42 }
 0x28d   : > { %22429 = vst [vmem:[#allocation97_spill] sm:$0xff] %v18479_v16 }
 0x28e   : > { %v3468_v49 = vpop.f32.mrf.mxu2 }
 0x28f   : > { %v3755_v0 = vadd.f32 %v3468_v49, %v1928_v50  ;;  %v2852_v50 = vor.u32 %v2850_v53, %v2848_v19  ;;  %v2856_v49 = vrot.slane %v2854_v41, 1 }
 0x290   : > { %v1930_v9 = vpop.f32.mrf.mxu1  ;;  %v4615_v12 = vpop.f32.mrf.mxu3 }
 0x291   : > { %v4892_v56 = vadd.f32 %v4605_v23, %v3755_v0  ;;  %v1931_v29 = vadd.f32 %v1930_v9, %v18222_v24  ;;  %v17168_v9 = vld [vmem:[%s17763_s25 + $0xc0] sm:$0xff] }
 0x293   : > { %v5745_v57 = vpop.f32.mrf.mxu0  ;;  %14503 = vmatmul.msk.bf16.gmra.mxu1 %vm770_vm2, %v17167_v14  ;;  %14834 = vmatmul.msk.bf16.gmra.mxu2 %vm770_vm2, %v2849_v62  ;;  %v18488_v39 = vadd.f32 %v5742_v55, %v4892_v56  ;;  %v17432_v56 = vld [vmem:[%s17763_s25 + $0x75c] sm:$0xff] }
 0x295   : > { %22430 = vst [vmem:[#allocation98_spill] sm:$0xff] %v18488_v39  ;;  %15299 = vmatmul.msk.bf16.gmra.mxu3 %vm770_vm2, %v17367_v17 }
 0x296   : > { %15760 = vmatmul.msk.bf16.gmra.mxu0 %vm770_vm2, %v17431_v33  ;;  %v3471_v37 = vpop.f32.mrf.mxu2  ;;  %v2857_v33 = vsel %vm2653_vm3, %v2852_v50, %v2856_v49 }
 0x297   : > { %v3756_v20 = vadd.f32 %v3471_v37, %v1931_v29  ;;  %v17368_v37 = vld [vmem:[%s17763_s25 + $0x538] sm:$0xff] }
 0x298   : > { %v1932_v23 = vpop.f32.mrf.mxu1  ;;  %v4618_v11 = vpop.f32.mrf.mxu3 }
 0x299   : > { %v4893_v42 = vadd.f32 %v4608_v59, %v3756_v20  ;;  %v1933_v24 = vadd.f32 %v1932_v23, %v18234_v28  ;;  %v17302_v28 = vld [vmem:[%s17763_s25 + $0xd0] sm:$0xff]  ;;  %v2858_v23 = vshrl.u32 %v17301_v3, 16 }
 0x29a   : > { %v2862_v53 = vshll.u32 %v17302_v28, 16 }
 0x29b   : > { %v5747_v5 = vpop.f32.mrf.mxu0  ;;  %v18494_v55 = vadd.f32 %v5745_v57, %v4893_v42 }
 0x29d   : > { %22431 = vst [vmem:[#allocation99_spill] sm:$0xff] %v18494_v55 }
 0x29e   : > { %v3473_v0 = vpop.f32.mrf.mxu2 }
 0x29f   : > { %v3757_v14 = vadd.f32 %v3473_v0, %v1933_v24  ;;  %v2860_v24 = vor.u32 %v2858_v23, %v2856_v49  ;;  %v2864_v0 = vrot.slane %v2862_v53, 1 }
 0x2a0   : > { %v1935_v62 = vpop.f32.mrf.mxu1  ;;  %v4620_v51 = vpop.f32.mrf.mxu3 }
 0x2a1   : > { %v4894_v17 = vadd.f32 %v4610_v36, %v3757_v14  ;;  %v1936_v19 = vadd.f32 %v1935_v62, %v18243_v35  ;;  %v17169_v62 = vld [vmem:[%s17763_s25 + $0xc8] sm:$0xff] }
 0x2a3   : > { %v5750_v29 = vpop.f32.mrf.mxu0  ;;  %14504 = vmatmul.msk.bf16.gmra.mxu1 %vm770_vm2, %v17168_v9  ;;  %14835 = vmatmul.msk.bf16.gmra.mxu2 %vm770_vm2, %v2857_v33  ;;  %v18503_v59 = vadd.f32 %v5747_v5, %v4894_v17  ;;  %v17433_v17 = vld [vmem:[%s17763_s25 + $0x764] sm:$0xff] }
 0x2a5   : > { %22432 = vst [vmem:[#allocation100_spill] sm:$0xff] %v18503_v59  ;;  %15300 = vmatmul.msk.bf16.gmra.mxu3 %vm770_vm2, %v17368_v37 }
 0x2a6   : > { %15761 = vmatmul.msk.bf16.gmra.mxu0 %vm770_vm2, %v17432_v56  ;;  %v3476_v57 = vpop.f32.mrf.mxu2  ;;  %v2865_v56 = vsel %vm2653_vm3, %v2860_v24, %v2864_v0 }
 0x2a7   : > { %v3758_v20 = vadd.f32 %v3476_v57, %v1936_v19  ;;  %v17369_v57 = vld [vmem:[%s17763_s25 + $0x540] sm:$0xff] }
 0x2a8   : > { %v1937_v36 = vpop.f32.mrf.mxu1  ;;  %v4623_v41 = vpop.f32.mrf.mxu3 }
 0x2a9   : > { %v4895_v42 = vadd.f32 %v4613_v32, %v3758_v20  ;;  %v1938_v35 = vadd.f32 %v1937_v36, %v18255_v63  ;;  %v17303_v63 = vld [vmem:[%s17763_s25 + $0xd8] sm:$0xff]  ;;  %v2866_v36 = vshrl.u32 %v17302_v28, 16 }
 0x2aa   : > { %v2870_v23 = vshll.u32 %v17303_v63, 16 }
 0x2ab   : > { %v5752_v50 = vpop.f32.mrf.mxu0  ;;  %v18509_v5 = vadd.f32 %v5750_v29, %v4895_v42 }
 0x2ad   : > { %22433 = vst [vmem:[#allocation101_spill] sm:$0xff] %v18509_v5 }
 0x2ae   : > { %v3478_v14 = vpop.f32.mrf.mxu2 }
 0x2af   : > { %v3759_v9 = vadd.f32 %v3478_v14, %v1938_v35  ;;  %v2868_v35 = vor.u32 %v2866_v36, %v2864_v0  ;;  %v2872_v14 = vrot.slane %v2870_v23, 1 }
 0x2b0   : > { %v1940_v33 = vpop.f32.mrf.mxu1  ;;  %v4625_v3 = vpop.f32.mrf.mxu3 }
 0x2b1   : > { %v4896_v37 = vadd.f32 %v4615_v12, %v3759_v9  ;;  %v1941_v49 = vadd.f32 %v1940_v33, %v17835_v47  ;;  %v17170_v33 = vld [vmem:[%s17763_s25 + $0xd0] sm:$0xff] }
 0x2b3   : > { %v5755_v19 = vpop.f32.mrf.mxu0  ;;  %14505 = vmatmul.msk.bf16.gmra.mxu1 %vm770_vm2, %v17169_v62  ;;  %14836 = vmatmul.msk.bf16.gmra.mxu2 %vm770_vm2, %v2865_v56  ;;  %v18518_v32 = vadd.f32 %v5752_v50, %v4896_v37  ;;  %v17434_v37 = vld [vmem:[%s17763_s25 + $0x76c] sm:$0xff] }
 0x2b5   : > { %22434 = vst [vmem:[#allocation102_spill] sm:$0xff] %v18518_v32  ;;  %15301 = vmatmul.msk.bf16.gmra.mxu3 %vm770_vm2, %v17369_v57  ;;  %v17208_v32 = vld [vmem:[%s17763_s25 + $0x200] sm:$0xff] }
 0x2b6   : > { %15762 = vmatmul.msk.bf16.gmra.mxu0 %vm770_vm2, %v17433_v17  ;;  %v3481_v29 = vpop.f32.mrf.mxu2  ;;  %v2873_v17 = vsel %vm2653_vm3, %v2868_v35, %v2872_v14 }
 0x2b7   : > { %v3760_v20 = vadd.f32 %v3481_v29, %v1941_v49  ;;  %v17370_v29 = vld [vmem:[%s17763_s25 + $0x548] sm:$0xff] }
 0x2b8   : > { %v1942_v12 = vpop.f32.mrf.mxu1  ;;  %v4628_v53 = vpop.f32.mrf.mxu3 }
 0x2b9   : > { %v4897_v42 = vadd.f32 %v4618_v11, %v3760_v20  ;;  %v1943_v47 = vadd.f32 %v1942_v12, %v17847_v52  ;;  %v17304_v52 = vld [vmem:[%s17763_s25 + $0xe0] sm:$0xff]  ;;  %v2874_v12 = vshrl.u32 %v17303_v63, 16 }
 0x2ba   : > { %v2878_v36 = vshll.u32 %v17304_v52, 16 }
 0x2bb   : > { %v5757_v24 = vpop.f32.mrf.mxu0  ;;  %v18524_v50 = vadd.f32 %v5755_v19, %v4897_v42 }
 0x2bd   : > { %22435 = vst [vmem:[#allocation103_spill] sm:$0xff] %v18524_v50 }
 0x2be   : > { %v3483_v9 = vpop.f32.mrf.mxu2 }
 0x2bf   : > { %v3761_v62 = vadd.f32 %v3483_v9, %v1943_v47  ;;  %v2876_v47 = vor.u32 %v2874_v12, %v2872_v14  ;;  %v2880_v9 = vrot.slane %v2878_v36, 1  ;;  %v17305_v14 = vld [vmem:[%s17763_s25 + $0xe8] sm:$0xff]  ;;  %v2882_v36 = vshrl.u32 %v17304_v52, 16 }
 0x2c0   : > { %v1945_v56 = vpop.f32.mrf.mxu1  ;;  %v4630_v28 = vpop.f32.mrf.mxu3 }
 0x2c1   : > { %v4898_v57 = vadd.f32 %v4620_v51, %v3761_v62  ;;  %v1946_v0 = vadd.f32 %v1945_v56, %v17857_v58  ;;  %v22438_v62 = vld [vmem:[#allocation7_spill] sm:$0xff] }
 0x2c3   : > { %v5760_v49 = vpop.f32.mrf.mxu0  ;;  %14506 = vmatmul.msk.bf16.gmra.mxu1 %vm770_vm2, %v17170_v33  ;;  %14837 = vmatmul.msk.bf16.gmra.mxu2 %vm770_vm2, %v2873_v17  ;;  %v18533_v11 = vadd.f32 %v5757_v24, %v4898_v57  ;;  %v17171_v17 = vld [vmem:[%s17763_s25 + $0xd8] sm:$0xff]  ;;  %v2881_v57 = vsel %vm2653_vm3, %v2876_v47, %v2880_v9 }
 0x2c5   : > { %22436 = vst [vmem:[#allocation104_spill] sm:$0xff] %v18533_v11  ;;  %15302 = vmatmul.msk.bf16.gmra.mxu3 %vm770_vm2, %v17370_v29  ;;  %v17435_v29 = vld [vmem:[%s17763_s25 + $0x774] sm:$0xff] }
 0x2c6   : > { %15763 = vmatmul.msk.bf16.gmra.mxu0 %vm770_vm2, %v17434_v37  ;;  %v3486_v19 = vpop.f32.mrf.mxu2  ;;  %v17371_v11 = vld [vmem:[%s17763_s25 + $0x550] sm:$0xff] }
 0x2c7   : > { %v3762_v20 = vadd.f32 %v3486_v19, %v1946_v0 }
 0x2c8   : > { %v1947_v51 = vpop.f32.mrf.mxu1  ;;  %v4633_v23 = vpop.f32.mrf.mxu3 }
 0x2c9   : > { %v4899_v42 = vadd.f32 %v4623_v41, %v3762_v20  ;;  %v1948_v58 = vadd.f32 %v1947_v51, %v22438_v62 }
 0x2cb   : > { %v5762_v35 = vpop.f32.mrf.mxu0  ;;  %v18539_v24 = vadd.f32 %v5760_v49, %v4899_v42  ;;  %v22440_v49 = vld [vmem:[#allocation10_spill] sm:$0xff]  ;;  %v2886_v42 = vshll.u32 %v17305_v14, 16 }
 0x2cd   : > { %22437 = vst [vmem:[#allocation105_spill] sm:$0xff] %v18539_v24  ;;  %v17372_v24 = vld [vmem:[%s17763_s25 + $0x558] sm:$0xff] }
 0x2ce   : > { %v3488_v33 = vpop.f32.mrf.mxu2 }
 0x2cf   : > { %v3763_v56 = vadd.f32 %v3488_v33, %v1948_v58  ;;  %v2884_v33 = vor.u32 %v2882_v36, %v2880_v9  ;;  %v17306_v9 = vld [vmem:[%s17763_s25 + $0xf0] sm:$0xff] }
 0x2d0   : > { %v1950_v37 = vpop.f32.mrf.mxu1  ;;  %v4635_v63 = vpop.f32.mrf.mxu3 }
 0x2d1   : > { %v4900_v0 = vadd.f32 %v4625_v3, %v3763_v56  ;;  %v1951_v20 = vadd.f32 %v1950_v37, %v22440_v49  ;;  %v2888_v56 = vrot.slane %v2886_v42, 1  ;;  %v2890_v42 = vshrl.u32 %v17305_v14, 16 }
 0x2d3   : > { %v5765_v19 = vpop.f32.mrf.mxu0  ;;  %14507 = vmatmul.msk.bf16.gmra.mxu1 %vm770_vm2, %v17171_v17  ;;  %14838 = vmatmul.msk.bf16.gmra.mxu2 %vm770_vm2, %v2881_v57  ;;  %v18548_v41 = vadd.f32 %v5762_v35, %v4900_v0  ;;  %v22442_v17 = vld [vmem:[#allocation13_spill] sm:$0xff]  ;;  %v2889_v49 = vsel %vm2653_vm3, %v2884_v33, %v2888_v56 }
 0x2d5   : > { %22439 = vst [vmem:[#allocation7_spill] sm:$0xff] %v18548_v41  ;;  %15303 = vmatmul.msk.bf16.gmra.mxu3 %vm770_vm2, %v17371_v11  ;;  %v17172_v11 = vld [vmem:[%s17763_s25 + $0xe0] sm:$0xff] }
 0x2d6   : > { %15764 = vmatmul.msk.bf16.gmra.mxu0 %vm770_vm2, %v17435_v29  ;;  %v3491_v51 = vpop.f32.mrf.mxu2 }
 0x2d7   : > { %v3764_v12 = vadd.f32 %v3491_v51, %v1951_v20  ;;  %v17436_v20 = vld [vmem:[%s17763_s25 + $0x77c] sm:$0xff] }
 0x2d8   : > { %v1952_v3 = vpop.f32.mrf.mxu1  ;;  %v4638_v47 = vpop.f32.mrf.mxu3 }
 0x2d9   : > { %v4901_v62 = vadd.f32 %v4628_v53, %v3764_v12  ;;  %v1953_v37 = vadd.f32 %v1952_v3, %v22442_v17 }
 0x2db   : > { %v5767_v58 = vpop.f32.mrf.mxu0  ;;  %v18554_v35 = vadd.f32 %v5765_v19, %v4901_v62  ;;  %v22444_v19 = vld [vmem:[#allocation16_spill] sm:$0xff]  ;;  %v2894_v62 = vshll.u32 %v17306_v9, 16 }
 0x2dd   : > { %22441 = vst [vmem:[#allocation10_spill] sm:$0xff] %v18554_v35  ;;  %v17373_v35 = vld [vmem:[%s17763_s25 + $0x560] sm:$0xff] }
 0x2de   : > { %v3493_v57 = vpop.f32.mrf.mxu2 }
 0x2df   : > { %v3765_v29 = vadd.f32 %v3493_v57, %v1953_v37  ;;  %v2892_v57 = vor.u32 %v2890_v42, %v2888_v56  ;;  %v22448_v56 = vld [vmem:[#allocation22_spill] sm:$0xff] }
 0x2e0   : > { %v1955_v0 = vpop.f32.mrf.mxu1  ;;  %v4640_v52 = vpop.f32.mrf.mxu3 }
 0x2e1   : > { %v4902_v51 = vadd.f32 %v4630_v28, %v3765_v29  ;;  %v1956_v12 = vadd.f32 %v1955_v0, %v22444_v19  ;;  %v2896_v29 = vrot.slane %v2894_v62, 1  ;;  %v2898_v62 = vshrl.u32 %v17306_v9, 16 }
 0x2e3   : > { %v5770_v41 = vpop.f32.mrf.mxu0  ;;  %14508 = vmatmul.msk.bf16.gmra.mxu1 %vm770_vm2, %v17172_v11  ;;  %14839 = vmatmul.msk.bf16.gmra.mxu2 %vm770_vm2, %v2889_v49  ;;  %v18563_v53 = vadd.f32 %v5767_v58, %v4902_v51  ;;  %v22446_v11 = vld [vmem:[#allocation19_spill] sm:$0xff]  ;;  %v2897_v19 = vsel %vm2653_vm3, %v2892_v57, %v2896_v29 }
 0x2e5   : > { %22443 = vst [vmem:[#allocation13_spill] sm:$0xff] %v18563_v53  ;;  %15304 = vmatmul.msk.bf16.gmra.mxu3 %vm770_vm2, %v17372_v24  ;;  %v17173_v24 = vld [vmem:[%s17763_s25 + $0xe8] sm:$0xff] }
 0x2e6   : > { %15765 = vmatmul.msk.bf16.gmra.mxu0 %vm770_vm2, %v17436_v20  ;;  %v3496_v3 = vpop.f32.mrf.mxu2 }
 0x2e7   : > { %v3766_v36 = vadd.f32 %v3496_v3, %v1956_v12  ;;  %v17437_v12 = vld [vmem:[%s17763_s25 + $0x784] sm:$0xff] }
 0x2e8   : > { %v1957_v28 = vpop.f32.mrf.mxu1  ;;  %v4643_v33 = vpop.f32.mrf.mxu3 }
 0x2e9   : > { %v4903_v17 = vadd.f32 %v4633_v23, %v3766_v36  ;;  %v1958_v0 = vadd.f32 %v1957_v28, %v22446_v11 }
 0x2eb   : > { %v5772_v37 = vpop.f32.mrf.mxu0  ;;  %v18569_v58 = vadd.f32 %v5770_v41, %v4903_v17  ;;  %v17307_v41 = vld [vmem:[%s17763_s25 + $0xf8] sm:$0xff] }
 0x2ec   : > { %v2902_v17 = vshll.u32 %v17307_v41, 16 }
 0x2ed   : > { %22445 = vst [vmem:[#allocation16_spill] sm:$0xff] %v18569_v58  ;;  %v17374_v58 = vld [vmem:[%s17763_s25 + $0x568] sm:$0xff] }
 0x2ee   : > { %v3498_v49 = vpop.f32.mrf.mxu2 }
 0x2ef   : > { %v3767_v20 = vadd.f32 %v3498_v49, %v1958_v0  ;;  %v2900_v49 = vor.u32 %v2898_v62, %v2896_v29  ;;  %v22452_v29 = vld [vmem:[#allocation28_spill] sm:$0xff] }
 0x2f0   : > { %v1960_v51 = vpop.f32.mrf.mxu1  ;;  %v4645_v14 = vpop.f32.mrf.mxu3 }
 0x2f1   : > { %v4904_v3 = vadd.f32 %v4635_v63, %v3767_v20  ;;  %v1961_v36 = vadd.f32 %v1960_v51, %v22448_v56  ;;  %v2904_v20 = vrot.slane %v2902_v17, 1  ;;  %v2906_v17 = vshrl.u32 %v17307_v41, 16 }
 0x2f3   : > { %v5775_v53 = vpop.f32.mrf.mxu0  ;;  %14509 = vmatmul.msk.bf16.gmra.mxu1 %vm770_vm2, %v17173_v24  ;;  %14840 = vmatmul.msk.bf16.gmra.mxu2 %vm770_vm2, %v2897_v19  ;;  %v18578_v23 = vadd.f32 %v5772_v37, %v4904_v3  ;;  %v22450_v24 = vld [vmem:[#allocation25_spill] sm:$0xff]  ;;  %v2905_v56 = vsel %vm2653_vm3, %v2900_v49, %v2904_v20 }
 0x2f5   : > { %22447 = vst [vmem:[#allocation19_spill] sm:$0xff] %v18578_v23  ;;  %15305 = vmatmul.msk.bf16.gmra.mxu3 %vm770_vm2, %v17373_v35  ;;  %v17174_v35 = vld [vmem:[%s17763_s25 + $0xf0] sm:$0xff] }
 0x2f6   : > { %15766 = vmatmul.msk.bf16.gmra.mxu0 %vm770_vm2, %v17437_v12  ;;  %v3501_v28 = vpop.f32.mrf.mxu2 }
 0x2f7   : > { %v3768_v42 = vadd.f32 %v3501_v28, %v1961_v36  ;;  %v17438_v36 = vld [vmem:[%s17763_s25 + $0x78c] sm:$0xff] }
 0x2f8   : > { %v1962_v63 = vpop.f32.mrf.mxu1  ;;  %v4648_v57 = vpop.f32.mrf.mxu3 }
 0x2f9   : > { %v4905_v11 = vadd.f32 %v4638_v47, %v3768_v42  ;;  %v1963_v51 = vadd.f32 %v1962_v63, %v22450_v24 }
 0x2fb   : > { %v5777_v0 = vpop.f32.mrf.mxu0  ;;  %v18584_v37 = vadd.f32 %v5775_v53, %v4905_v11  ;;  %v17308_v53 = vld [vmem:[%s17763_s25 + $0x100] sm:$0xff] }
 0x2fc   : > { %v2910_v11 = vshll.u32 %v17308_v53, 16 }
 0x2fd   : > { %22449 = vst [vmem:[#allocation22_spill] sm:$0xff] %v18584_v37  ;;  %v17375_v37 = vld [vmem:[%s17763_s25 + $0x570] sm:$0xff] }
 0x2fe   : > { %v3503_v19 = vpop.f32.mrf.mxu2 }
 0x2ff   : > { %v3769_v12 = vadd.f32 %v3503_v19, %v1963_v51  ;;  %v2908_v19 = vor.u32 %v2906_v17, %v2904_v20  ;;  %v22456_v20 = vld [vmem:[#allocation34_spill] sm:$0xff] }
 0x300   : > { %v1965_v3 = vpop.f32.mrf.mxu1  ;;  %v4650_v9 = vpop.f32.mrf.mxu3 }
 0x301   : > { %v4906_v28 = vadd.f32 %v4640_v52, %v3769_v12  ;;  %v1966_v42 = vadd.f32 %v1965_v3, %v22452_v29  ;;  %v2912_v12 = vrot.slane %v2910_v11, 1  ;;  %v2914_v11 = vshrl.u32 %v17308_v53, 16 }
 0x303   : > { %v5780_v23 = vpop.f32.mrf.mxu0  ;;  %14510 = vmatmul.msk.bf16.gmra.mxu1 %vm770_vm2, %v17174_v35  ;;  %14841 = vmatmul.msk.bf16.gmra.mxu2 %vm770_vm2, %v2905_v56  ;;  %v18593_v47 = vadd.f32 %v5777_v0, %v4906_v28  ;;  %v22454_v35 = vld [vmem:[#allocation31_spill] sm:$0xff]  ;;  %v2913_v29 = vsel %vm2653_vm3, %v2908_v19, %v2912_v12 }
 0x305   : > { %22451 = vst [vmem:[#allocation25_spill] sm:$0xff] %v18593_v47  ;;  %15306 = vmatmul.msk.bf16.gmra.mxu3 %vm770_vm2, %v17374_v58  ;;  %v17175_v58 = vld [vmem:[%s17763_s25 + $0xf8] sm:$0xff] }
 0x306   : > { %15767 = vmatmul.msk.bf16.gmra.mxu0 %vm770_vm2, %v17438_v36  ;;  %v3506_v63 = vpop.f32.mrf.mxu2 }
 0x307   : > { %v3770_v62 = vadd.f32 %v3506_v63, %v1966_v42  ;;  %v17439_v42 = vld [vmem:[%s17763_s25 + $0x794] sm:$0xff] }
 0x308   : > { %v1967_v52 = vpop.f32.mrf.mxu1  ;;  %v4653_v49 = vpop.f32.mrf.mxu3 }
 0x309   : > { %v4907_v24 = vadd.f32 %v4643_v33, %v3770_v62  ;;  %v1968_v3 = vadd.f32 %v1967_v52, %v22454_v35 }
 0x30b   : > { %v5782_v51 = vpop.f32.mrf.mxu0  ;;  %v18599_v0 = vadd.f32 %v5780_v23, %v4907_v24  ;;  %v17309_v23 = vld [vmem:[%s17763_s25 + $0x108] sm:$0xff] }
 0x30c   : > { %v2918_v24 = vshll.u32 %v17309_v23, 16 }
 0x30d   : > { %22453 = vst [vmem:[#allocation28_spill] sm:$0xff] %v18599_v0  ;;  %v17376_v0 = vld [vmem:[%s17763_s25 + $0x578] sm:$0xff] }
 0x30e   : > { %v3508_v56 = vpop.f32.mrf.mxu2 }
 0x30f   : > { %v3771_v36 = vadd.f32 %v3508_v56, %v1968_v3  ;;  %v2916_v56 = vor.u32 %v2914_v11, %v2912_v12  ;;  %v22460_v12 = vld [vmem:[#allocation40_spill] sm:$0xff] }
 0x310   : > { %v1970_v28 = vpop.f32.mrf.mxu1  ;;  %v4655_v41 = vpop.f32.mrf.mxu3 }
 0x311   : > { %v4908_v63 = vadd.f32 %v4645_v14, %v3771_v36  ;;  %v1971_v62 = vadd.f32 %v1970_v28, %v22456_v20  ;;  %v2920_v36 = vrot.slane %v2918_v24, 1  ;;  %v2922_v24 = vshrl.u32 %v17309_v23, 16 }
 0x313   : > { %v5785_v47 = vpop.f32.mrf.mxu0  ;;  %14511 = vmatmul.msk.bf16.gmra.mxu1 %vm770_vm2, %v17175_v58  ;;  %14842 = vmatmul.msk.bf16.gmra.mxu2 %vm770_vm2, %v2913_v29  ;;  %v18608_v33 = vadd.f32 %v5782_v51, %v4908_v63  ;;  %v22458_v58 = vld [vmem:[#allocation37_spill] sm:$0xff]  ;;  %v2921_v20 = vsel %vm2653_vm3, %v2916_v56, %v2920_v36 }
 0x315   : > { %22455 = vst [vmem:[#allocation31_spill] sm:$0xff] %v18608_v33  ;;  %15307 = vmatmul.msk.bf16.gmra.mxu3 %vm770_vm2, %v17375_v37  ;;  %v17176_v37 = vld [vmem:[%s17763_s25 + $0x100] sm:$0xff] }
 0x316   : > { %15768 = vmatmul.msk.bf16.gmra.mxu0 %vm770_vm2, %v17439_v42  ;;  %v3511_v52 = vpop.f32.mrf.mxu2 }
 0x317   : > { %v3772_v17 = vadd.f32 %v3511_v52, %v1971_v62  ;;  %v17440_v62 = vld [vmem:[%s17763_s25 + $0x79c] sm:$0xff] }
 0x318   : > { %v1972_v14 = vpop.f32.mrf.mxu1  ;;  %v4658_v19 = vpop.f32.mrf.mxu3 }
 0x319   : > { %v4909_v35 = vadd.f32 %v4648_v57, %v3772_v17  ;;  %v1973_v28 = vadd.f32 %v1972_v14, %v22458_v58 }
 0x31b   : > { %v5787_v3 = vpop.f32.mrf.mxu0  ;;  %v18614_v51 = vadd.f32 %v5785_v47, %v4909_v35  ;;  %v17310_v47 = vld [vmem:[%s17763_s25 + $0x110] sm:$0xff] }
 0x31c   : > { %v2926_v35 = vshll.u32 %v17310_v47, 16 }
 0x31d   : > { %22457 = vst [vmem:[#allocation34_spill] sm:$0xff] %v18614_v51  ;;  %v17377_v51 = vld [vmem:[%s17763_s25 + $0x580] sm:$0xff] }
 0x31e   : > { %v3513_v29 = vpop.f32.mrf.mxu2 }
 0x31f   : > { %v3773_v42 = vadd.f32 %v3513_v29, %v1973_v28  ;;  %v2924_v29 = vor.u32 %v2922_v24, %v2920_v36  ;;  %v22464_v36 = vld [vmem:[#allocation46_spill] sm:$0xff] }
 0x320   : > { %v1975_v63 = vpop.f32.mrf.mxu1  ;;  %v4660_v53 = vpop.f32.mrf.mxu3 }
 0x321   : > { %v4910_v52 = vadd.f32 %v4650_v9, %v3773_v42  ;;  %v1976_v17 = vadd.f32 %v1975_v63, %v22460_v12  ;;  %v2928_v42 = vrot.slane %v2926_v35, 1  ;;  %v2930_v35 = vshrl.u32 %v17310_v47, 16 }
 0x323   : > { %v5790_v33 = vpop.f32.mrf.mxu0  ;;  %14512 = vmatmul.msk.bf16.gmra.mxu1 %vm770_vm2, %v17176_v37  ;;  %14843 = vmatmul.msk.bf16.gmra.mxu2 %vm770_vm2, %v2921_v20  ;;  %v18623_v57 = vadd.f32 %v5787_v3, %v4910_v52  ;;  %v22462_v37 = vld [vmem:[#allocation43_spill] sm:$0xff]  ;;  %v2929_v12 = vsel %vm2653_vm3, %v2924_v29, %v2928_v42 }
 0x325   : > { %22459 = vst [vmem:[#allocation37_spill] sm:$0xff] %v18623_v57  ;;  %15308 = vmatmul.msk.bf16.gmra.mxu3 %vm770_vm2, %v17376_v0  ;;  %v17177_v0 = vld [vmem:[%s17763_s25 + $0x108] sm:$0xff] }
 0x326   : > { %15769 = vmatmul.msk.bf16.gmra.mxu0 %vm770_vm2, %v17440_v62  ;;  %v3516_v14 = vpop.f32.mrf.mxu2 }
 0x327   : > { %v3774_v11 = vadd.f32 %v3516_v14, %v1976_v17  ;;  %v17441_v17 = vld [vmem:[%s17763_s25 + $0x7a4] sm:$0xff] }
 0x328   : > { %v1977_v9 = vpop.f32.mrf.mxu1  ;;  %v4663_v56 = vpop.f32.mrf.mxu3 }
 0x329   : > { %v4911_v58 = vadd.f32 %v4653_v49, %v3774_v11  ;;  %v1978_v63 = vadd.f32 %v1977_v9, %v22462_v37 }
 0x32b   : > { %v5792_v28 = vpop.f32.mrf.mxu0  ;;  %v18629_v3 = vadd.f32 %v5790_v33, %v4911_v58  ;;  %v17311_v33 = vld [vmem:[%s17763_s25 + $0x118] sm:$0xff] }
 0x32c   : > { %v2934_v58 = vshll.u32 %v17311_v33, 16 }
 0x32d   : > { %22461 = vst [vmem:[#allocation40_spill] sm:$0xff] %v18629_v3  ;;  %v17378_v3 = vld [vmem:[%s17763_s25 + $0x588] sm:$0xff] }
 0x32e   : > { %v3518_v20 = vpop.f32.mrf.mxu2 }
 0x32f   : > { %v3775_v62 = vadd.f32 %v3518_v20, %v1978_v63  ;;  %v2932_v20 = vor.u32 %v2930_v35, %v2928_v42  ;;  %v22468_v42 = vld [vmem:[#allocation52_spill] sm:$0xff] }
 0x330   : > { %v1980_v52 = vpop.f32.mrf.mxu1  ;;  %v4665_v23 = vpop.f32.mrf.mxu3 }
 0x331   : > { %v4912_v14 = vadd.f32 %v4655_v41, %v3775_v62  ;;  %v1981_v11 = vadd.f32 %v1980_v52, %v22464_v36  ;;  %v2936_v62 = vrot.slane %v2934_v58, 1  ;;  %v2938_v58 = vshrl.u32 %v17311_v33, 16 }
 0x333   : > { %v5795_v57 = vpop.f32.mrf.mxu0  ;;  %14513 = vmatmul.msk.bf16.gmra.mxu1 %vm770_vm2, %v17177_v0  ;;  %14844 = vmatmul.msk.bf16.gmra.mxu2 %vm770_vm2, %v2929_v12  ;;  %v18638_v49 = vadd.f32 %v5792_v28, %v4912_v14  ;;  %v22466_v0 = vld [vmem:[#allocation49_spill] sm:$0xff]  ;;  %v2937_v36 = vsel %vm2653_vm3, %v2932_v20, %v2936_v62 }
 0x335   : > { %22463 = vst [vmem:[#allocation43_spill] sm:$0xff] %v18638_v49  ;;  %15309 = vmatmul.msk.bf16.gmra.mxu3 %vm770_vm2, %v17377_v51  ;;  %v17178_v51 = vld [vmem:[%s17763_s25 + $0x110] sm:$0xff] }
 0x336   : > { %15770 = vmatmul.msk.bf16.gmra.mxu0 %vm770_vm2, %v17441_v17  ;;  %v3521_v9 = vpop.f32.mrf.mxu2 }
 0x337   : > { %v3776_v24 = vadd.f32 %v3521_v9, %v1981_v11  ;;  %v17442_v11 = vld [vmem:[%s17763_s25 + $0x7ac] sm:$0xff] }
 0x338   : > { %v1982_v41 = vpop.f32.mrf.mxu1  ;;  %v4668_v29 = vpop.f32.mrf.mxu3 }
 0x339   : > { %v4913_v37 = vadd.f32 %v4658_v19, %v3776_v24  ;;  %v1983_v52 = vadd.f32 %v1982_v41, %v22466_v0 }
 0x33b   : > { %v5797_v63 = vpop.f32.mrf.mxu0  ;;  %v18644_v28 = vadd.f32 %v5795_v57, %v4913_v37  ;;  %v17312_v57 = vld [vmem:[%s17763_s25 + $0x120] sm:$0xff] }
 0x33c   : > { %v2942_v37 = vshll.u32 %v17312_v57, 16 }
 0x33d   : > { %22465 = vst [vmem:[#allocation46_spill] sm:$0xff] %v18644_v28  ;;  %v17379_v28 = vld [vmem:[%s17763_s25 + $0x590] sm:$0xff] }
 0x33e   : > { %v3523_v12 = vpop.f32.mrf.mxu2 }
 0x33f   : > { %v3777_v17 = vadd.f32 %v3523_v12, %v1983_v52  ;;  %v2940_v12 = vor.u32 %v2938_v58, %v2936_v62  ;;  %v22472_v62 = vld [vmem:[#allocation58_spill] sm:$0xff] }
 0x340   : > { %v1985_v14 = vpop.f32.mrf.mxu1  ;;  %v4670_v47 = vpop.f32.mrf.mxu3 }
 0x341   : > { %v4914_v9 = vadd.f32 %v4660_v53, %v3777_v17  ;;  %v1986_v24 = vadd.f32 %v1985_v14, %v22468_v42  ;;  %v2944_v17 = vrot.slane %v2942_v37, 1  ;;  %v2946_v37 = vshrl.u32 %v17312_v57, 16 }
 0x343   : > { %v5800_v49 = vpop.f32.mrf.mxu0  ;;  %14514 = vmatmul.msk.bf16.gmra.mxu1 %vm770_vm2, %v17178_v51  ;;  %14845 = vmatmul.msk.bf16.gmra.mxu2 %vm770_vm2, %v2937_v36  ;;  %v18653_v19 = vadd.f32 %v5797_v63, %v4914_v9  ;;  %v22470_v51 = vld [vmem:[#allocation55_spill] sm:$0xff]  ;;  %v2945_v42 = vsel %vm2653_vm3, %v2940_v12, %v2944_v17 }
 0x345   : > { %22467 = vst [vmem:[#allocation49_spill] sm:$0xff] %v18653_v19  ;;  %15310 = vmatmul.msk.bf16.gmra.mxu3 %vm770_vm2, %v17378_v3  ;;  %v17179_v3 = vld [vmem:[%s17763_s25 + $0x118] sm:$0xff] }
 0x346   : > { %15771 = vmatmul.msk.bf16.gmra.mxu0 %vm770_vm2, %v17442_v11  ;;  %v3526_v41 = vpop.f32.mrf.mxu2 }
 0x347   : > { %v3778_v35 = vadd.f32 %v3526_v41, %v1986_v24  ;;  %v17443_v24 = vld [vmem:[%s17763_s25 + $0x7b4] sm:$0xff] }
 0x348   : > { %v1987_v53 = vpop.f32.mrf.mxu1  ;;  %v4673_v20 = vpop.f32.mrf.mxu3 }
 0x349   : > { %v4915_v0 = vadd.f32 %v4663_v56, %v3778_v35  ;;  %v1988_v14 = vadd.f32 %v1987_v53, %v22470_v51 }
 0x34b   : > { %v5802_v52 = vpop.f32.mrf.mxu0  ;;  %v18659_v63 = vadd.f32 %v5800_v49, %v4915_v0  ;;  %v17313_v49 = vld [vmem:[%s17763_s25 + $0x128] sm:$0xff] }
 0x34c   : > { %v2950_v0 = vshll.u32 %v17313_v49, 16 }
 0x34d   : > { %22469 = vst [vmem:[#allocation52_spill] sm:$0xff] %v18659_v63  ;;  %v17380_v63 = vld [vmem:[%s17763_s25 + $0x598] sm:$0xff] }
 0x34e   : > { %v3528_v36 = vpop.f32.mrf.mxu2 }
 0x34f   : > { %v3779_v11 = vadd.f32 %v3528_v36, %v1988_v14  ;;  %v2948_v36 = vor.u32 %v2946_v37, %v2944_v17  ;;  %v22476_v17 = vld [vmem:[#allocation64_spill] sm:$0xff] }
 0x350   : > { %v1990_v9 = vpop.f32.mrf.mxu1  ;;  %v4675_v33 = vpop.f32.mrf.mxu3 }
 0x351   : > { %v4916_v41 = vadd.f32 %v4665_v23, %v3779_v11  ;;  %v1991_v35 = vadd.f32 %v1990_v9, %v22472_v62  ;;  %v2952_v11 = vrot.slane %v2950_v0, 1  ;;  %v2954_v0 = vshrl.u32 %v17313_v49, 16 }
 0x353   : > { %v5805_v19 = vpop.f32.mrf.mxu0  ;;  %14515 = vmatmul.msk.bf16.gmra.mxu1 %vm770_vm2, %v17179_v3  ;;  %14846 = vmatmul.msk.bf16.gmra.mxu2 %vm770_vm2, %v2945_v42  ;;  %v18668_v56 = vadd.f32 %v5802_v52, %v4916_v41  ;;  %v22474_v3 = vld [vmem:[#allocation61_spill] sm:$0xff]  ;;  %v2953_v62 = vsel %vm2653_vm3, %v2948_v36, %v2952_v11 }
 0x355   : > { %22471 = vst [vmem:[#allocation55_spill] sm:$0xff] %v18668_v56  ;;  %15311 = vmatmul.msk.bf16.gmra.mxu3 %vm770_vm2, %v17379_v28  ;;  %v17180_v28 = vld [vmem:[%s17763_s25 + $0x120] sm:$0xff] }
 0x356   : > { %15772 = vmatmul.msk.bf16.gmra.mxu0 %vm770_vm2, %v17443_v24  ;;  %v3531_v53 = vpop.f32.mrf.mxu2 }
 0x357   : > { %v3780_v58 = vadd.f32 %v3531_v53, %v1991_v35  ;;  %v17444_v35 = vld [vmem:[%s17763_s25 + $0x7bc] sm:$0xff] }
 0x358   : > { %v1992_v23 = vpop.f32.mrf.mxu1  ;;  %v4678_v12 = vpop.f32.mrf.mxu3 }
 0x359   : > { %v4917_v51 = vadd.f32 %v4668_v29, %v3780_v58  ;;  %v1993_v9 = vadd.f32 %v1992_v23, %v22474_v3 }
 0x35b   : > { %v5807_v14 = vpop.f32.mrf.mxu0  ;;  %v18674_v52 = vadd.f32 %v5805_v19, %v4917_v51  ;;  %v17314_v19 = vld [vmem:[%s17763_s25 + $0x130] sm:$0xff] }
 0x35c   : > { %v2958_v51 = vshll.u32 %v17314_v19, 16 }
 0x35d   : > { %22473 = vst [vmem:[#allocation58_spill] sm:$0xff] %v18674_v52  ;;  %v17381_v52 = vld [vmem:[%s17763_s25 + $0x5a0] sm:$0xff] }
 0x35e   : > { %v3533_v42 = vpop.f32.mrf.mxu2 }
 0x35f   : > { %v3781_v24 = vadd.f32 %v3533_v42, %v1993_v9  ;;  %v2956_v42 = vor.u32 %v2954_v0, %v2952_v11  ;;  %v22480_v11 = vld [vmem:[#allocation70_spill] sm:$0xff] }
 0x360   : > { %v1995_v41 = vpop.f32.mrf.mxu1  ;;  %v4680_v57 = vpop.f32.mrf.mxu3 }
 0x361   : > { %v4918_v53 = vadd.f32 %v4670_v47, %v3781_v24  ;;  %v1996_v58 = vadd.f32 %v1995_v41, %v22476_v17  ;;  %v2960_v24 = vrot.slane %v2958_v51, 1  ;;  %v2962_v51 = vshrl.u32 %v17314_v19, 16 }
 0x363   : > { %v5810_v56 = vpop.f32.mrf.mxu0  ;;  %14516 = vmatmul.msk.bf16.gmra.mxu1 %vm770_vm2, %v17180_v28  ;;  %14847 = vmatmul.msk.bf16.gmra.mxu2 %vm770_vm2, %v2953_v62  ;;  %v18683_v29 = vadd.f32 %v5807_v14, %v4918_v53  ;;  %v22478_v28 = vld [vmem:[#allocation67_spill] sm:$0xff]  ;;  %v2961_v17 = vsel %vm2653_vm3, %v2956_v42, %v2960_v24 }
 0x365   : > { %22475 = vst [vmem:[#allocation61_spill] sm:$0xff] %v18683_v29  ;;  %15312 = vmatmul.msk.bf16.gmra.mxu3 %vm770_vm2, %v17380_v63  ;;  %v17181_v63 = vld [vmem:[%s17763_s25 + $0x128] sm:$0xff] }
 0x366   : > { %15773 = vmatmul.msk.bf16.gmra.mxu0 %vm770_vm2, %v17444_v35  ;;  %v3536_v23 = vpop.f32.mrf.mxu2 }
 0x367   : > { %v3782_v37 = vadd.f32 %v3536_v23, %v1996_v58  ;;  %v17445_v58 = vld [vmem:[%s17763_s25 + $0x7c4] sm:$0xff] }
 0x368   : > { %v1997_v47 = vpop.f32.mrf.mxu1  ;;  %v4683_v36 = vpop.f32.mrf.mxu3 }
 0x369   : > { %v4919_v3 = vadd.f32 %v4673_v20, %v3782_v37  ;;  %v1998_v41 = vadd.f32 %v1997_v47, %v22478_v28 }
 0x36b   : > { %v5812_v9 = vpop.f32.mrf.mxu0  ;;  %v18689_v14 = vadd.f32 %v5810_v56, %v4919_v3  ;;  %v17315_v56 = vld [vmem:[%s17763_s25 + $0x138] sm:$0xff] }
 0x36c   : > { %v2966_v3 = vshll.u32 %v17315_v56, 16 }
 0x36d   : > { %22477 = vst [vmem:[#allocation64_spill] sm:$0xff] %v18689_v14  ;;  %v17382_v14 = vld [vmem:[%s17763_s25 + $0x5a8] sm:$0xff] }
 0x36e   : > { %v3538_v62 = vpop.f32.mrf.mxu2 }
 0x36f   : > { %v3783_v35 = vadd.f32 %v3538_v62, %v1998_v41  ;;  %v2964_v62 = vor.u32 %v2962_v51, %v2960_v24  ;;  %v22484_v24 = vld [vmem:[#allocation76_spill] sm:$0xff] }
 0x370   : > { %v2000_v53 = vpop.f32.mrf.mxu1  ;;  %v4685_v49 = vpop.f32.mrf.mxu3 }
 0x371   : > { %v4920_v23 = vadd.f32 %v4675_v33, %v3783_v35  ;;  %v2001_v37 = vadd.f32 %v2000_v53, %v22480_v11  ;;  %v2968_v35 = vrot.slane %v2966_v3, 1  ;;  %v2970_v3 = vshrl.u32 %v17315_v56, 16 }
 0x373   : > { %v5815_v29 = vpop.f32.mrf.mxu0  ;;  %14517 = vmatmul.msk.bf16.gmra.mxu1 %vm770_vm2, %v17181_v63  ;;  %14848 = vmatmul.msk.bf16.gmra.mxu2 %vm770_vm2, %v2961_v17  ;;  %v18698_v20 = vadd.f32 %v5812_v9, %v4920_v23  ;;  %v22482_v63 = vld [vmem:[#allocation73_spill] sm:$0xff]  ;;  %v2969_v11 = vsel %vm2653_vm3, %v2964_v62, %v2968_v35 }
 0x375   : > { %22479 = vst [vmem:[#allocation67_spill] sm:$0xff] %v18698_v20  ;;  %15313 = vmatmul.msk.bf16.gmra.mxu3 %vm770_vm2, %v17381_v52  ;;  %v17182_v52 = vld [vmem:[%s17763_s25 + $0x130] sm:$0xff] }
 0x376   : > { %15774 = vmatmul.msk.bf16.gmra.mxu0 %vm770_vm2, %v17445_v58  ;;  %v3541_v47 = vpop.f32.mrf.mxu2 }
 0x377   : > { %v3784_v0 = vadd.f32 %v3541_v47, %v2001_v37  ;;  %v17446_v37 = vld [vmem:[%s17763_s25 + $0x7cc] sm:$0xff] }
 0x378   : > { %v2002_v33 = vpop.f32.mrf.mxu1  ;;  %v4688_v42 = vpop.f32.mrf.mxu3 }
 0x379   : > { %v4921_v28 = vadd.f32 %v4678_v12, %v3784_v0  ;;  %v2003_v53 = vadd.f32 %v2002_v33, %v22482_v63 }
 0x37b   : > { %v5817_v41 = vpop.f32.mrf.mxu0  ;;  %v18704_v9 = vadd.f32 %v5815_v29, %v4921_v28  ;;  %v17316_v29 = vld [vmem:[%s17763_s25 + $0x140] sm:$0xff] }
 0x37c   : > { %v2974_v28 = vshll.u32 %v17316_v29, 16 }
 0x37d   : > { %22481 = vst [vmem:[#allocation70_spill] sm:$0xff] %v18704_v9  ;;  %v17383_v9 = vld [vmem:[%s17763_s25 + $0x5b0] sm:$0xff] }
 0x37e   : > { %v3543_v17 = vpop.f32.mrf.mxu2 }
 0x37f   : > { %v3785_v58 = vadd.f32 %v3543_v17, %v2003_v53  ;;  %v2972_v17 = vor.u32 %v2970_v3, %v2968_v35  ;;  %v22488_v35 = vld [vmem:[#allocation82_spill] sm:$0xff] }
 0x380   : > { %v2005_v23 = vpop.f32.mrf.mxu1  ;;  %v4690_v19 = vpop.f32.mrf.mxu3 }
 0x381   : > { %v4922_v47 = vadd.f32 %v4680_v57, %v3785_v58  ;;  %v2006_v0 = vadd.f32 %v2005_v23, %v22484_v24  ;;  %v2976_v58 = vrot.slane %v2974_v28, 1  ;;  %v2978_v28 = vshrl.u32 %v17316_v29, 16 }
 0x383   : > { %v5820_v20 = vpop.f32.mrf.mxu0  ;;  %14518 = vmatmul.msk.bf16.gmra.mxu1 %vm770_vm2, %v17182_v52  ;;  %14849 = vmatmul.msk.bf16.gmra.mxu2 %vm770_vm2, %v2969_v11  ;;  %v18713_v12 = vadd.f32 %v5817_v41, %v4922_v47  ;;  %v22486_v52 = vld [vmem:[#allocation79_spill] sm:$0xff]  ;;  %v2977_v24 = vsel %vm2653_vm3, %v2972_v17, %v2976_v58 }
 0x385   : > { %22483 = vst [vmem:[#allocation73_spill] sm:$0xff] %v18713_v12  ;;  %15314 = vmatmul.msk.bf16.gmra.mxu3 %vm770_vm2, %v17382_v14  ;;  %v17183_v14 = vld [vmem:[%s17763_s25 + $0x138] sm:$0xff] }
 0x386   : > { %15775 = vmatmul.msk.bf16.gmra.mxu0 %vm770_vm2, %v17446_v37  ;;  %v3546_v33 = vpop.f32.mrf.mxu2 }
 0x387   : > { %v3786_v51 = vadd.f32 %v3546_v33, %v2006_v0  ;;  %v17447_v0 = vld [vmem:[%s17763_s25 + $0x7d4] sm:$0xff] }
 0x388   : > { %v2007_v57 = vpop.f32.mrf.mxu1  ;;  %v4693_v62 = vpop.f32.mrf.mxu3 }
 0x389   : > { %v4923_v63 = vadd.f32 %v4683_v36, %v3786_v51  ;;  %v2008_v23 = vadd.f32 %v2007_v57, %v22486_v52 }
 0x38b   : > { %v5822_v53 = vpop.f32.mrf.mxu0  ;;  %v18719_v41 = vadd.f32 %v5820_v20, %v4923_v63  ;;  %v17317_v20 = vld [vmem:[%s17763_s25 + $0x148] sm:$0xff] }
 0x38c   : > { %v2982_v63 = vshll.u32 %v17317_v20, 16 }
 0x38d   : > { %22485 = vst [vmem:[#allocation76_spill] sm:$0xff] %v18719_v41  ;;  %v17384_v41 = vld [vmem:[%s17763_s25 + $0x5b8] sm:$0xff] }
 0x38e   : > { %v3548_v11 = vpop.f32.mrf.mxu2 }
 0x38f   : > { %v3787_v37 = vadd.f32 %v3548_v11, %v2008_v23  ;;  %v2980_v11 = vor.u32 %v2978_v28, %v2976_v58  ;;  %v22492_v58 = vld [vmem:[#allocation88_spill] sm:$0xff] }
 0x390   : > { %v2010_v47 = vpop.f32.mrf.mxu1  ;;  %v4695_v56 = vpop.f32.mrf.mxu3 }
 0x391   : > { %v4924_v33 = vadd.f32 %v4685_v49, %v3787_v37  ;;  %v2011_v51 = vadd.f32 %v2010_v47, %v22488_v35  ;;  %v2984_v37 = vrot.slane %v2982_v63, 1  ;;  %v2986_v63 = vshrl.u32 %v17317_v20, 16 }
 0x393   : > { %v5825_v12 = vpop.f32.mrf.mxu0  ;;  %14519 = vmatmul.msk.bf16.gmra.mxu1 %vm770_vm2, %v17183_v14  ;;  %14850 = vmatmul.msk.bf16.gmra.mxu2 %vm770_vm2, %v2977_v24  ;;  %v18728_v36 = vadd.f32 %v5822_v53, %v4924_v33  ;;  %v22490_v14 = vld [vmem:[#allocation85_spill] sm:$0xff]  ;;  %v2985_v35 = vsel %vm2653_vm3, %v2980_v11, %v2984_v37 }
 0x395   : > { %22487 = vst [vmem:[#allocation79_spill] sm:$0xff] %v18728_v36  ;;  %15315 = vmatmul.msk.bf16.gmra.mxu3 %vm770_vm2, %v17383_v9  ;;  %v17184_v9 = vld [vmem:[%s17763_s25 + $0x140] sm:$0xff] }
 0x396   : > { %15776 = vmatmul.msk.bf16.gmra.mxu0 %vm770_vm2, %v17447_v0  ;;  %v3551_v57 = vpop.f32.mrf.mxu2 }
 0x397   : > { %v3788_v3 = vadd.f32 %v3551_v57, %v2011_v51  ;;  %v17448_v51 = vld [vmem:[%s17763_s25 + $0x7dc] sm:$0xff] }
 0x398   : > { %v2012_v49 = vpop.f32.mrf.mxu1  ;;  %v4698_v17 = vpop.f32.mrf.mxu3 }
 0x399   : > { %v4925_v52 = vadd.f32 %v4688_v42, %v3788_v3  ;;  %v2013_v47 = vadd.f32 %v2012_v49, %v22490_v14 }
 0x39b   : > { %v5827_v23 = vpop.f32.mrf.mxu0  ;;  %v18734_v53 = vadd.f32 %v5825_v12, %v4925_v52  ;;  %v17318_v12 = vld [vmem:[%s17763_s25 + $0x150] sm:$0xff] }
 0x39c   : > { %v2990_v52 = vshll.u32 %v17318_v12, 16 }
 0x39d   : > { %22489 = vst [vmem:[#allocation82_spill] sm:$0xff] %v18734_v53  ;;  %v17385_v53 = vld [vmem:[%s17763_s25 + $0x5c0] sm:$0xff] }
 0x39e   : > { %v3553_v24 = vpop.f32.mrf.mxu2 }
 0x39f   : > { %v3789_v0 = vadd.f32 %v3553_v24, %v2013_v47  ;;  %v2988_v24 = vor.u32 %v2986_v63, %v2984_v37  ;;  %v22496_v37 = vld [vmem:[#allocation93_spill] sm:$0xff] }
 0x3a0   : > { %v2015_v33 = vpop.f32.mrf.mxu1  ;;  %v4700_v29 = vpop.f32.mrf.mxu3 }
 0x3a1   : > { %v4926_v57 = vadd.f32 %v4690_v19, %v3789_v0  ;;  %v2016_v3 = vadd.f32 %v2015_v33, %v22492_v58  ;;  %v2992_v0 = vrot.slane %v2990_v52, 1  ;;  %v2994_v52 = vshrl.u32 %v17318_v12, 16 }
 0x3a3   : > { %v5830_v36 = vpop.f32.mrf.mxu0  ;;  %14520 = vmatmul.msk.bf16.gmra.mxu1 %vm770_vm2, %v17184_v9  ;;  %14851 = vmatmul.msk.bf16.gmra.mxu2 %vm770_vm2, %v2985_v35  ;;  %v18743_v42 = vadd.f32 %v5827_v23, %v4926_v57  ;;  %v22494_v9 = vld [vmem:[#allocation91_spill] sm:$0xff]  ;;  %v2993_v58 = vsel %vm2653_vm3, %v2988_v24, %v2992_v0 }
 0x3a5   : > { %22491 = vst [vmem:[#allocation85_spill] sm:$0xff] %v18743_v42  ;;  %15316 = vmatmul.msk.bf16.gmra.mxu3 %vm770_vm2, %v17384_v41  ;;  %v17185_v41 = vld [vmem:[%s17763_s25 + $0x148] sm:$0xff] }
 0x3a6   : > { %15777 = vmatmul.msk.bf16.gmra.mxu0 %vm770_vm2, %v17448_v51  ;;  %v3556_v49 = vpop.f32.mrf.mxu2 }
 0x3a7   : > { %v3790_v28 = vadd.f32 %v3556_v49, %v2016_v3  ;;  %v17449_v3 = vld [vmem:[%s17763_s25 + $0x7e4] sm:$0xff] }
 0x3a8   : > { %v2017_v19 = vpop.f32.mrf.mxu1  ;;  %v4703_v11 = vpop.f32.mrf.mxu3 }
 0x3a9   : > { %v4927_v14 = vadd.f32 %v4693_v62, %v3790_v28  ;;  %v2018_v33 = vadd.f32 %v2017_v19, %v22494_v9 }
 0x3ab   : > { %v5832_v47 = vpop.f32.mrf.mxu0  ;;  %v18749_v23 = vadd.f32 %v5830_v36, %v4927_v14  ;;  %v17319_v36 = vld [vmem:[%s17763_s25 + $0x158] sm:$0xff] }
 0x3ac   : > { %v2998_v14 = vshll.u32 %v17319_v36, 16 }
 0x3ad   : > { %22493 = vst [vmem:[#allocation88_spill] sm:$0xff] %v18749_v23  ;;  %v17386_v23 = vld [vmem:[%s17763_s25 + $0x5c8] sm:$0xff] }
 0x3ae   : > { %v3558_v35 = vpop.f32.mrf.mxu2 }
 0x3af   : > { %v3791_v51 = vadd.f32 %v3558_v35, %v2018_v33  ;;  %v2996_v35 = vor.u32 %v2994_v52, %v2992_v0  ;;  %v22500_v0 = vld [vmem:[#allocation2_spill] sm:$0xff] }
 0x3b0   : > { %v2020_v57 = vpop.f32.mrf.mxu1  ;;  %v4705_v20 = vpop.f32.mrf.mxu3 }
 0x3b1   : > { %v4928_v49 = vadd.f32 %v4695_v56, %v3791_v51  ;;  %v2021_v28 = vadd.f32 %v2020_v57, %v22496_v37  ;;  %v3000_v51 = vrot.slane %v2998_v14, 1  ;;  %v3002_v14 = vshrl.u32 %v17319_v36, 16 }
 0x3b3   : > { %v5835_v42 = vpop.f32.mrf.mxu0  ;;  %14521 = vmatmul.msk.bf16.gmra.mxu1 %vm770_vm2, %v17185_v41  ;;  %14852 = vmatmul.msk.bf16.gmra.mxu2 %vm770_vm2, %v2993_v58  ;;  %v18758_v62 = vadd.f32 %v5832_v47, %v4928_v49  ;;  %v22498_v41 = vld [vmem:[#allocation95_spill] sm:$0xff]  ;;  %v3001_v37 = vsel %vm2653_vm3, %v2996_v35, %v3000_v51 }
 0x3b5   : > { %22495 = vst [vmem:[#allocation91_spill] sm:$0xff] %v18758_v62  ;;  %15317 = vmatmul.msk.bf16.gmra.mxu3 %vm770_vm2, %v17385_v53  ;;  %v17186_v53 = vld [vmem:[%s17763_s25 + $0x150] sm:$0xff] }
 0x3b6   : > { %15778 = vmatmul.msk.bf16.gmra.mxu0 %vm770_vm2, %v17449_v3  ;;  %v3561_v19 = vpop.f32.mrf.mxu2 }
 0x3b7   : > { %v3792_v63 = vadd.f32 %v3561_v19, %v2021_v28  ;;  %v17450_v28 = vld [vmem:[%s17763_s25 + $0x7ec] sm:$0xff] }
 0x3b8   : > { %v2022_v56 = vpop.f32.mrf.mxu1  ;;  %v4708_v24 = vpop.f32.mrf.mxu3 }
 0x3b9   : > { %v4929_v9 = vadd.f32 %v4698_v17, %v3792_v63  ;;  %v2023_v57 = vadd.f32 %v2022_v56, %v22498_v41 }
 0x3bb   : > { %v5837_v33 = vpop.f32.mrf.mxu0  ;;  %v18764_v47 = vadd.f32 %v5835_v42, %v4929_v9  ;;  %v17320_v42 = vld [vmem:[%s17763_s25 + $0x160] sm:$0xff] }
 0x3bc   : > { %v3006_v9 = vshll.u32 %v17320_v42, 16 }
 0x3bd   : > { %22497 = vst [vmem:[#allocation93_spill] sm:$0xff] %v18764_v47  ;;  %v17387_v47 = vld [vmem:[%s17763_s25 + $0x5d0] sm:$0xff] }
 0x3be   : > { %v3563_v58 = vpop.f32.mrf.mxu2 }
 0x3bf   : > { %v3793_v3 = vadd.f32 %v3563_v58, %v2023_v57  ;;  %v3004_v58 = vor.u32 %v3002_v14, %v3000_v51  ;;  %v22504_v51 = vld [vmem:[#allocation6_spill] sm:$0xff] }
 0x3c0   : > { %v2025_v49 = vpop.f32.mrf.mxu1  ;;  %v4710_v12 = vpop.f32.mrf.mxu3 }
 0x3c1   : > { %v4930_v19 = vadd.f32 %v4700_v29, %v3793_v3  ;;  %v2026_v63 = vadd.f32 %v2025_v49, %v22500_v0  ;;  %v3008_v3 = vrot.slane %v3006_v9, 1  ;;  %v3010_v9 = vshrl.u32 %v17320_v42, 16 }
 0x3c3   : > { %v5840_v62 = vpop.f32.mrf.mxu0  ;;  %14522 = vmatmul.msk.bf16.gmra.mxu1 %vm770_vm2, %v17186_v53  ;;  %14853 = vmatmul.msk.bf16.gmra.mxu2 %vm770_vm2, %v3001_v37  ;;  %v18773_v17 = vadd.f32 %v5837_v33, %v4930_v19  ;;  %v22502_v53 = vld [vmem:[#allocation4_spill] sm:$0xff]  ;;  %v3009_v0 = vsel %vm2653_vm3, %v3004_v58, %v3008_v3 }
 0x3c5   : > { %22499 = vst [vmem:[#allocation95_spill] sm:$0xff] %v18773_v17  ;;  %15318 = vmatmul.msk.bf16.gmra.mxu3 %vm770_vm2, %v17386_v23  ;;  %v17187_v23 = vld [vmem:[%s17763_s25 + $0x158] sm:$0xff] }
 0x3c6   : > { %15779 = vmatmul.msk.bf16.gmra.mxu0 %vm770_vm2, %v17450_v28  ;;  %v3566_v56 = vpop.f32.mrf.mxu2 }
 0x3c7   : > { %v3794_v52 = vadd.f32 %v3566_v56, %v2026_v63  ;;  %v17451_v63 = vld [vmem:[%s17763_s25 + $0x7f4] sm:$0xff] }
 0x3c8   : > { %v2027_v29 = vpop.f32.mrf.mxu1  ;;  %v4713_v35 = vpop.f32.mrf.mxu3 }
 0x3c9   : > { %v4931_v41 = vadd.f32 %v4703_v11, %v3794_v52  ;;  %v2028_v49 = vadd.f32 %v2027_v29, %v22502_v53 }
 0x3cb   : > { %v5842_v57 = vpop.f32.mrf.mxu0  ;;  %v18779_v33 = vadd.f32 %v5840_v62, %v4931_v41  ;;  %v17321_v62 = vld [vmem:[%s17763_s25 + $0x168] sm:$0xff] }
 0x3cc   : > { %v3014_v41 = vshll.u32 %v17321_v62, 16 }
 0x3cd   : > { %22501 = vst [vmem:[#allocation2_spill] sm:$0xff] %v18779_v33  ;;  %v17388_v33 = vld [vmem:[%s17763_s25 + $0x5d8] sm:$0xff] }
 0x3ce   : > { %v3568_v37 = vpop.f32.mrf.mxu2 }
 0x3cf   : > { %v3795_v28 = vadd.f32 %v3568_v37, %v2028_v49  ;;  %v3012_v37 = vor.u32 %v3010_v9, %v3008_v3  ;;  %v22508_v3 = vld [vmem:[#allocation12_spill] sm:$0xff] }
 0x3d0   : > { %v2030_v19 = vpop.f32.mrf.mxu1  ;;  %v4715_v36 = vpop.f32.mrf.mxu3 }
 0x3d1   : > { %v4932_v56 = vadd.f32 %v4705_v20, %v3795_v28  ;;  %v2031_v52 = vadd.f32 %v2030_v19, %v22504_v51  ;;  %v3016_v28 = vrot.slane %v3014_v41, 1  ;;  %v3018_v41 = vshrl.u32 %v17321_v62, 16 }
 0x3d3   : > { %v5845_v17 = vpop.f32.mrf.mxu0  ;;  %14523 = vmatmul.msk.bf16.gmra.mxu1 %vm770_vm2, %v17187_v23  ;;  %14854 = vmatmul.msk.bf16.gmra.mxu2 %vm770_vm2, %v3009_v0  ;;  %v18788_v11 = vadd.f32 %v5842_v57, %v4932_v56  ;;  %v22506_v23 = vld [vmem:[#allocation9_spill] sm:$0xff]  ;;  %v3017_v51 = vsel %vm2653_vm3, %v3012_v37, %v3016_v28 }
 0x3d5   : > { %22503 = vst [vmem:[#allocation4_spill] sm:$0xff] %v18788_v11  ;;  %15319 = vmatmul.msk.bf16.gmra.mxu3 %vm770_vm2, %v17387_v47  ;;  %v17188_v47 = vld [vmem:[%s17763_s25 + $0x160] sm:$0xff] }
 0x3d6   : > { %15780 = vmatmul.msk.bf16.gmra.mxu0 %vm770_vm2, %v17451_v63  ;;  %v3571_v29 = vpop.f32.mrf.mxu2 }
 0x3d7   : > { %v3796_v14 = vadd.f32 %v3571_v29, %v2031_v52  ;;  %v17452_v52 = vld [vmem:[%s17763_s25 + $0x7fc] sm:$0xff] }
 0x3d8   : > { %v2032_v20 = vpop.f32.mrf.mxu1  ;;  %v4718_v58 = vpop.f32.mrf.mxu3 }
 0x3d9   : > { %v4933_v53 = vadd.f32 %v4708_v24, %v3796_v14  ;;  %v2033_v19 = vadd.f32 %v2032_v20, %v22506_v23 }
 0x3db   : > { %v5847_v49 = vpop.f32.mrf.mxu0  ;;  %v18794_v57 = vadd.f32 %v5845_v17, %v4933_v53  ;;  %v17322_v17 = vld [vmem:[%s17763_s25 + $0x170] sm:$0xff] }
 0x3dc   : > { %v3022_v53 = vshll.u32 %v17322_v17, 16 }
 0x3dd   : > { %22505 = vst [vmem:[#allocation6_spill] sm:$0xff] %v18794_v57  ;;  %v17389_v57 = vld [vmem:[%s17763_s25 + $0x5e0] sm:$0xff] }
 0x3de   : > { %v3573_v0 = vpop.f32.mrf.mxu2 }
 0x3df   : > { %v3797_v63 = vadd.f32 %v3573_v0, %v2033_v19  ;;  %v3020_v0 = vor.u32 %v3018_v41, %v3016_v28  ;;  %v22512_v28 = vld [vmem:[#allocation18_spill] sm:$0xff] }
 0x3e0   : > { %v2035_v56 = vpop.f32.mrf.mxu1  ;;  %v4720_v42 = vpop.f32.mrf.mxu3 }
 0x3e1   : > { %v4934_v29 = vadd.f32 %v4710_v12, %v3797_v63  ;;  %v2036_v14 = vadd.f32 %v2035_v56, %v22508_v3  ;;  %v3024_v63 = vrot.slane %v3022_v53, 1  ;;  %v3026_v53 = vshrl.u32 %v17322_v17, 16 }
 0x3e3   : > { %v5850_v11 = vpop.f32.mrf.mxu0  ;;  %14524 = vmatmul.msk.bf16.gmra.mxu1 %vm770_vm2, %v17188_v47  ;;  %14855 = vmatmul.msk.bf16.gmra.mxu2 %vm770_vm2, %v3017_v51  ;;  %v18803_v24 = vadd.f32 %v5847_v49, %v4934_v29  ;;  %v22510_v47 = vld [vmem:[#allocation15_spill] sm:$0xff]  ;;  %v3025_v3 = vsel %vm2653_vm3, %v3020_v0, %v3024_v63 }
 0x3e5   : > { %22507 = vst [vmem:[#allocation9_spill] sm:$0xff] %v18803_v24  ;;  %15320 = vmatmul.msk.bf16.gmra.mxu3 %vm770_vm2, %v17388_v33  ;;  %v17189_v33 = vld [vmem:[%s17763_s25 + $0x168] sm:$0xff] }
 0x3e6   : > { %15781 = vmatmul.msk.bf16.gmra.mxu0 %vm770_vm2, %v17452_v52  ;;  %v3576_v20 = vpop.f32.mrf.mxu2 }
 0x3e7   : > { %v3798_v9 = vadd.f32 %v3576_v20, %v2036_v14  ;;  %v17453_v14 = vld [vmem:[%s17763_s25 + $0x804] sm:$0xff] }
 0x3e8   : > { %v2037_v12 = vpop.f32.mrf.mxu1  ;;  %v4723_v37 = vpop.f32.mrf.mxu3 }
 0x3e9   : > { %v4935_v23 = vadd.f32 %v4713_v35, %v3798_v9  ;;  %v2038_v56 = vadd.f32 %v2037_v12, %v22510_v47 }
 0x3eb   : > { %v5852_v19 = vpop.f32.mrf.mxu0  ;;  %v18809_v49 = vadd.f32 %v5850_v11, %v4935_v23  ;;  %v17323_v11 = vld [vmem:[%s17763_s25 + $0x178] sm:$0xff] }
 0x3ec   : > { %v3030_v23 = vshll.u32 %v17323_v11, 16 }
 0x3ed   : > { %22509 = vst [vmem:[#allocation12_spill] sm:$0xff] %v18809_v49  ;;  %v17390_v49 = vld [vmem:[%s17763_s25 + $0x5e8] sm:$0xff] }
 0x3ee   : > { %v3578_v51 = vpop.f32.mrf.mxu2 }
 0x3ef   : > { %v3799_v52 = vadd.f32 %v3578_v51, %v2038_v56  ;;  %v3028_v51 = vor.u32 %v3026_v53, %v3024_v63  ;;  %v22516_v63 = vld [vmem:[#allocation24_spill] sm:$0xff] }
 0x3f0   : > { %v2040_v29 = vpop.f32.mrf.mxu1  ;;  %v4725_v62 = vpop.f32.mrf.mxu3 }
 0x3f1   : > { %v4936_v20 = vadd.f32 %v4715_v36, %v3799_v52  ;;  %v2041_v9 = vadd.f32 %v2040_v29, %v22512_v28  ;;  %v3032_v52 = vrot.slane %v3030_v23, 1  ;;  %v3034_v23 = vshrl.u32 %v17323_v11, 16 }
 0x3f3   : > { %v5855_v24 = vpop.f32.mrf.mxu0  ;;  %14525 = vmatmul.msk.bf16.gmra.mxu1 %vm770_vm2, %v17189_v33  ;;  %14856 = vmatmul.msk.bf16.gmra.mxu2 %vm770_vm2, %v3025_v3  ;;  %v18818_v35 = vadd.f32 %v5852_v19, %v4936_v20  ;;  %v22514_v33 = vld [vmem:[#allocation21_spill] sm:$0xff]  ;;  %v3033_v28 = vsel %vm2653_vm3, %v3028_v51, %v3032_v52 }
 0x3f5   : > { %22511 = vst [vmem:[#allocation15_spill] sm:$0xff] %v18818_v35  ;;  %15321 = vmatmul.msk.bf16.gmra.mxu3 %vm770_vm2, %v17389_v57  ;;  %v17190_v57 = vld [vmem:[%s17763_s25 + $0x170] sm:$0xff] }
 0x3f6   : > { %15782 = vmatmul.msk.bf16.gmra.mxu0 %vm770_vm2, %v17453_v14  ;;  %v3581_v12 = vpop.f32.mrf.mxu2 }
 0x3f7   : > { %v3800_v41 = vadd.f32 %v3581_v12, %v2041_v9  ;;  %v17454_v9 = vld [vmem:[%s17763_s25 + $0x80c] sm:$0xff] }
 0x3f8   : > { %v2042_v36 = vpop.f32.mrf.mxu1  ;;  %v4728_v0 = vpop.f32.mrf.mxu3 }
 0x3f9   : > { %v4937_v47 = vadd.f32 %v4718_v58, %v3800_v41  ;;  %v2043_v29 = vadd.f32 %v2042_v36, %v22514_v33 }
 0x3fb   : > { %v5857_v56 = vpop.f32.mrf.mxu0  ;;  %v18824_v19 = vadd.f32 %v5855_v24, %v4937_v47  ;;  %v17324_v24 = vld [vmem:[%s17763_s25 + $0x180] sm:$0xff] }
 0x3fc   : > { %v3038_v47 = vshll.u32 %v17324_v24, 16 }
 0x3fd   : > { %22513 = vst [vmem:[#allocation18_spill] sm:$0xff] %v18824_v19  ;;  %v17391_v19 = vld [vmem:[%s17763_s25 + $0x5f0] sm:$0xff] }
 0x3fe   : > { %v3583_v3 = vpop.f32.mrf.mxu2 }
 0x3ff   : > { %v3801_v14 = vadd.f32 %v3583_v3, %v2043_v29  ;;  %v3036_v3 = vor.u32 %v3034_v23, %v3032_v52  ;;  %v22520_v52 = vld [vmem:[#allocation30_spill] sm:$0xff] }
 0x400   : > { %v2045_v20 = vpop.f32.mrf.mxu1  ;;  %v4730_v17 = vpop.f32.mrf.mxu3 }
 0x401   : > { %v4938_v12 = vadd.f32 %v4720_v42, %v3801_v14  ;;  %v2046_v41 = vadd.f32 %v2045_v20, %v22516_v63  ;;  %v3040_v14 = vrot.slane %v3038_v47, 1  ;;  %v3042_v47 = vshrl.u32 %v17324_v24, 16 }
 0x403   : > { %v5860_v35 = vpop.f32.mrf.mxu0  ;;  %14526 = vmatmul.msk.bf16.gmra.mxu1 %vm770_vm2, %v17190_v57  ;;  %14857 = vmatmul.msk.bf16.gmra.mxu2 %vm770_vm2, %v3033_v28  ;;  %v18833_v58 = vadd.f32 %v5857_v56, %v4938_v12  ;;  %v22518_v57 = vld [vmem:[#allocation27_spill] sm:$0xff]  ;;  %v3041_v63 = vsel %vm2653_vm3, %v3036_v3, %v3040_v14 }
 0x405   : > { %22515 = vst [vmem:[#allocation21_spill] sm:$0xff] %v18833_v58  ;;  %15322 = vmatmul.msk.bf16.gmra.mxu3 %vm770_vm2, %v17390_v49  ;;  %v17191_v49 = vld [vmem:[%s17763_s25 + $0x178] sm:$0xff] }
 0x406   : > { %15783 = vmatmul.msk.bf16.gmra.mxu0 %vm770_vm2, %v17454_v9  ;;  %v3586_v36 = vpop.f32.mrf.mxu2 }
 0x407   : > { %v3802_v53 = vadd.f32 %v3586_v36, %v2046_v41  ;;  %v17455_v41 = vld [vmem:[%s17763_s25 + $0x814] sm:$0xff] }
 0x408   : > { %v2047_v42 = vpop.f32.mrf.mxu1  ;;  %v4733_v51 = vpop.f32.mrf.mxu3 }
 0x409   : > { %v4939_v33 = vadd.f32 %v4723_v37, %v3802_v53  ;;  %v2048_v20 = vadd.f32 %v2047_v42, %v22518_v57 }
 0x40b   : > { %v5862_v29 = vpop.f32.mrf.mxu0  ;;  %v18839_v56 = vadd.f32 %v5860_v35, %v4939_v33  ;;  %v17325_v35 = vld [vmem:[%s17763_s25 + $0x188] sm:$0xff] }
 0x40c   : > { %v3046_v33 = vshll.u32 %v17325_v35, 16 }
 0x40d   : > { %22517 = vst [vmem:[#allocation24_spill] sm:$0xff] %v18839_v56  ;;  %v17392_v56 = vld [vmem:[%s17763_s25 + $0x5f8] sm:$0xff] }
 0x40e   : > { %v3588_v28 = vpop.f32.mrf.mxu2 }
 0x40f   : > { %v3803_v9 = vadd.f32 %v3588_v28, %v2048_v20  ;;  %v3044_v28 = vor.u32 %v3042_v47, %v3040_v14  ;;  %v22524_v14 = vld [vmem:[#allocation36_spill] sm:$0xff] }
 0x410   : > { %v2050_v12 = vpop.f32.mrf.mxu1  ;;  %v4735_v11 = vpop.f32.mrf.mxu3 }
 0x411   : > { %v4940_v36 = vadd.f32 %v4725_v62, %v3803_v9  ;;  %v2051_v53 = vadd.f32 %v2050_v12, %v22520_v52  ;;  %v3048_v9 = vrot.slane %v3046_v33, 1  ;;  %v3050_v33 = vshrl.u32 %v17325_v35, 16 }
 0x413   : > { %v5865_v58 = vpop.f32.mrf.mxu0  ;;  %14527 = vmatmul.msk.bf16.gmra.mxu1 %vm770_vm2, %v17191_v49  ;;  %14858 = vmatmul.msk.bf16.gmra.mxu2 %vm770_vm2, %v3041_v63  ;;  %v18848_v37 = vadd.f32 %v5862_v29, %v4940_v36  ;;  %v22522_v49 = vld [vmem:[#allocation33_spill] sm:$0xff]  ;;  %v3049_v52 = vsel %vm2653_vm3, %v3044_v28, %v3048_v9 }
 0x415   : > { %22519 = vst [vmem:[#allocation27_spill] sm:$0xff] %v18848_v37  ;;  %15323 = vmatmul.msk.bf16.gmra.mxu3 %vm770_vm2, %v17391_v19  ;;  %v17192_v19 = vld [vmem:[%s17763_s25 + $0x180] sm:$0xff] }
 0x416   : > { %15784 = vmatmul.msk.bf16.gmra.mxu0 %vm770_vm2, %v17455_v41  ;;  %v3591_v42 = vpop.f32.mrf.mxu2 }
 0x417   : > { %v3804_v23 = vadd.f32 %v3591_v42, %v2051_v53  ;;  %v17456_v53 = vld [vmem:[%s17763_s25 + $0x81c] sm:$0xff] }
 0x418   : > { %v2052_v62 = vpop.f32.mrf.mxu1  ;;  %v4738_v3 = vpop.f32.mrf.mxu3 }
 0x419   : > { %v4941_v57 = vadd.f32 %v4728_v0, %v3804_v23  ;;  %v2053_v12 = vadd.f32 %v2052_v62, %v22522_v49 }
 0x41b   : > { %v5867_v20 = vpop.f32.mrf.mxu0  ;;  %v18854_v29 = vadd.f32 %v5865_v58, %v4941_v57  ;;  %v17326_v58 = vld [vmem:[%s17763_s25 + $0x190] sm:$0xff] }
 0x41c   : > { %v3054_v57 = vshll.u32 %v17326_v58, 16 }
 0x41d   : > { %22521 = vst [vmem:[#allocation30_spill] sm:$0xff] %v18854_v29  ;;  %v17393_v29 = vld [vmem:[%s17763_s25 + $0x600] sm:$0xff] }
 0x41e   : > { %v3593_v63 = vpop.f32.mrf.mxu2 }
 0x41f   : > { %v3805_v41 = vadd.f32 %v3593_v63, %v2053_v12  ;;  %v3052_v63 = vor.u32 %v3050_v33, %v3048_v9  ;;  %v22528_v9 = vld [vmem:[#allocation42_spill] sm:$0xff] }
 0x420   : > { %v2055_v36 = vpop.f32.mrf.mxu1  ;;  %v4740_v24 = vpop.f32.mrf.mxu3 }
 0x421   : > { %v4942_v42 = vadd.f32 %v4730_v17, %v3805_v41  ;;  %v2056_v23 = vadd.f32 %v2055_v36, %v22524_v14  ;;  %v3056_v41 = vrot.slane %v3054_v57, 1  ;;  %v3058_v57 = vshrl.u32 %v17326_v58, 16 }
 0x423   : > { %v5870_v37 = vpop.f32.mrf.mxu0  ;;  %14528 = vmatmul.msk.bf16.gmra.mxu1 %vm770_vm2, %v17192_v19  ;;  %14859 = vmatmul.msk.bf16.gmra.mxu2 %vm770_vm2, %v3049_v52  ;;  %v18863_v0 = vadd.f32 %v5867_v20, %v4942_v42  ;;  %v22526_v19 = vld [vmem:[#allocation39_spill] sm:$0xff]  ;;  %v3057_v14 = vsel %vm2653_vm3, %v3052_v63, %v3056_v41 }
 0x425   : > { %22523 = vst [vmem:[#allocation33_spill] sm:$0xff] %v18863_v0  ;;  %15324 = vmatmul.msk.bf16.gmra.mxu3 %vm770_vm2, %v17392_v56  ;;  %v17193_v56 = vld [vmem:[%s17763_s25 + $0x188] sm:$0xff] }
 0x426   : > { %15785 = vmatmul.msk.bf16.gmra.mxu0 %vm770_vm2, %v17456_v53  ;;  %v3596_v62 = vpop.f32.mrf.mxu2 }
 0x427   : > { %v3806_v47 = vadd.f32 %v3596_v62, %v2056_v23  ;;  %v17457_v23 = vld [vmem:[%s17763_s25 + $0x824] sm:$0xff] }
 0x428   : > { %v2057_v17 = vpop.f32.mrf.mxu1  ;;  %v4743_v28 = vpop.f32.mrf.mxu3 }
 0x429   : > { %v4943_v49 = vadd.f32 %v4733_v51, %v3806_v47  ;;  %v2058_v36 = vadd.f32 %v2057_v17, %v22526_v19 }
 0x42b   : > { %v5872_v12 = vpop.f32.mrf.mxu0  ;;  %v18869_v20 = vadd.f32 %v5870_v37, %v4943_v49  ;;  %v17327_v37 = vld [vmem:[%s17763_s25 + $0x198] sm:$0xff] }
 0x42c   : > { %v3062_v49 = vshll.u32 %v17327_v37, 16 }
 0x42d   : > { %22525 = vst [vmem:[#allocation36_spill] sm:$0xff] %v18869_v20  ;;  %v17394_v20 = vld [vmem:[%s17763_s25 + $0x608] sm:$0xff] }
 0x42e   : > { %v3598_v52 = vpop.f32.mrf.mxu2 }
 0x42f   : > { %v3807_v53 = vadd.f32 %v3598_v52, %v2058_v36  ;;  %v3060_v52 = vor.u32 %v3058_v57, %v3056_v41  ;;  %v22532_v41 = vld [vmem:[#allocation48_spill] sm:$0xff] }
 0x430   : > { %v2060_v42 = vpop.f32.mrf.mxu1  ;;  %v4745_v35 = vpop.f32.mrf.mxu3 }
 0x431   : > { %v4944_v62 = vadd.f32 %v4735_v11, %v3807_v53  ;;  %v2061_v47 = vadd.f32 %v2060_v42, %v22528_v9  ;;  %v3064_v53 = vrot.slane %v3062_v49, 1  ;;  %v3066_v49 = vshrl.u32 %v17327_v37, 16 }
 0x433   : > { %v5875_v0 = vpop.f32.mrf.mxu0  ;;  %14529 = vmatmul.msk.bf16.gmra.mxu1 %vm770_vm2, %v17193_v56  ;;  %14860 = vmatmul.msk.bf16.gmra.mxu2 %vm770_vm2, %v3057_v14  ;;  %v18878_v51 = vadd.f32 %v5872_v12, %v4944_v62  ;;  %v22530_v56 = vld [vmem:[#allocation45_spill] sm:$0xff]  ;;  %v3065_v9 = vsel %vm2653_vm3, %v3060_v52, %v3064_v53 }
 0x435   : > { %22527 = vst [vmem:[#allocation39_spill] sm:$0xff] %v18878_v51  ;;  %15325 = vmatmul.msk.bf16.gmra.mxu3 %vm770_vm2, %v17393_v29  ;;  %v17194_v29 = vld [vmem:[%s17763_s25 + $0x190] sm:$0xff] }
 0x436   : > { %15786 = vmatmul.msk.bf16.gmra.mxu0 %vm770_vm2, %v17457_v23  ;;  %v3601_v17 = vpop.f32.mrf.mxu2 }
 0x437   : > { %v3808_v33 = vadd.f32 %v3601_v17, %v2061_v47  ;;  %v17458_v47 = vld [vmem:[%s17763_s25 + $0x82c] sm:$0xff] }
 0x438   : > { %v2062_v11 = vpop.f32.mrf.mxu1  ;;  %v4748_v63 = vpop.f32.mrf.mxu3 }
 0x439   : > { %v4945_v19 = vadd.f32 %v4738_v3, %v3808_v33  ;;  %v2063_v42 = vadd.f32 %v2062_v11, %v22530_v56 }
 0x43b   : > { %v5877_v36 = vpop.f32.mrf.mxu0  ;;  %v18884_v12 = vadd.f32 %v5875_v0, %v4945_v19  ;;  %v17328_v0 = vld [vmem:[%s17763_s25 + $0x1a0] sm:$0xff] }
 0x43c   : > { %v3070_v19 = vshll.u32 %v17328_v0, 16 }
 0x43d   : > { %22529 = vst [vmem:[#allocation42_spill] sm:$0xff] %v18884_v12  ;;  %v17395_v12 = vld [vmem:[%s17763_s25 + $0x610] sm:$0xff] }
 0x43e   : > { %v3603_v14 = vpop.f32.mrf.mxu2 }
 0x43f   : > { %v3809_v23 = vadd.f32 %v3603_v14, %v2063_v42  ;;  %v3068_v14 = vor.u32 %v3066_v49, %v3064_v53  ;;  %v22536_v53 = vld [vmem:[#allocation54_spill] sm:$0xff] }
 0x440   : > { %v2065_v62 = vpop.f32.mrf.mxu1  ;;  %v4750_v58 = vpop.f32.mrf.mxu3 }
 0x441   : > { %v4946_v17 = vadd.f32 %v4740_v24, %v3809_v23  ;;  %v2066_v33 = vadd.f32 %v2065_v62, %v22532_v41  ;;  %v3072_v23 = vrot.slane %v3070_v19, 1  ;;  %v3074_v19 = vshrl.u32 %v17328_v0, 16 }
 0x443   : > { %v5880_v51 = vpop.f32.mrf.mxu0  ;;  %14530 = vmatmul.msk.bf16.gmra.mxu1 %vm770_vm2, %v17194_v29  ;;  %14861 = vmatmul.msk.bf16.gmra.mxu2 %vm770_vm2, %v3065_v9  ;;  %v18893_v3 = vadd.f32 %v5877_v36, %v4946_v17  ;;  %v22534_v29 = vld [vmem:[#allocation51_spill] sm:$0xff]  ;;  %v3073_v41 = vsel %vm2653_vm3, %v3068_v14, %v3072_v23 }
 0x445   : > { %22531 = vst [vmem:[#allocation45_spill] sm:$0xff] %v18893_v3  ;;  %15326 = vmatmul.msk.bf16.gmra.mxu3 %vm770_vm2, %v17394_v20  ;;  %v17195_v20 = vld [vmem:[%s17763_s25 + $0x198] sm:$0xff] }
 0x446   : > { %15787 = vmatmul.msk.bf16.gmra.mxu0 %vm770_vm2, %v17458_v47  ;;  %v3606_v11 = vpop.f32.mrf.mxu2 }
 0x447   : > { %v3810_v57 = vadd.f32 %v3606_v11, %v2066_v33  ;;  %v17459_v33 = vld [vmem:[%s17763_s25 + $0x834] sm:$0xff] }
 0x448   : > { %v2067_v24 = vpop.f32.mrf.mxu1  ;;  %v4753_v52 = vpop.f32.mrf.mxu3 }
 0x449   : > { %v4947_v56 = vadd.f32 %v4743_v28, %v3810_v57  ;;  %v2068_v62 = vadd.f32 %v2067_v24, %v22534_v29 }
 0x44b   : > { %v5882_v42 = vpop.f32.mrf.mxu0  ;;  %v18899_v36 = vadd.f32 %v5880_v51, %v4947_v56  ;;  %v17329_v51 = vld [vmem:[%s17763_s25 + $0x1a8] sm:$0xff] }
 0x44c   : > { %v3078_v56 = vshll.u32 %v17329_v51, 16 }
 0x44d   : > { %22533 = vst [vmem:[#allocation48_spill] sm:$0xff] %v18899_v36  ;;  %v17396_v36 = vld [vmem:[%s17763_s25 + $0x618] sm:$0xff] }
 0x44e   : > { %v3608_v9 = vpop.f32.mrf.mxu2 }
 0x44f   : > { %v3811_v47 = vadd.f32 %v3608_v9, %v2068_v62  ;;  %v3076_v9 = vor.u32 %v3074_v19, %v3072_v23  ;;  %v22540_v23 = vld [vmem:[#allocation60_spill] sm:$0xff] }
 0x450   : > { %v2070_v17 = vpop.f32.mrf.mxu1  ;;  %v4755_v37 = vpop.f32.mrf.mxu3 }
 0x451   : > { %v4948_v11 = vadd.f32 %v4745_v35, %v3811_v47  ;;  %v2071_v57 = vadd.f32 %v2070_v17, %v22536_v53  ;;  %v3080_v47 = vrot.slane %v3078_v56, 1  ;;  %v3082_v56 = vshrl.u32 %v17329_v51, 16 }
 0x453   : > { %v5885_v3 = vpop.f32.mrf.mxu0  ;;  %14531 = vmatmul.msk.bf16.gmra.mxu1 %vm770_vm2, %v17195_v20  ;;  %14862 = vmatmul.msk.bf16.gmra.mxu2 %vm770_vm2, %v3073_v41  ;;  %v18908_v28 = vadd.f32 %v5882_v42, %v4948_v11  ;;  %v22538_v20 = vld [vmem:[#allocation57_spill] sm:$0xff]  ;;  %v3081_v53 = vsel %vm2653_vm3, %v3076_v9, %v3080_v47 }
 0x455   : > { %22535 = vst [vmem:[#allocation51_spill] sm:$0xff] %v18908_v28  ;;  %15327 = vmatmul.msk.bf16.gmra.mxu3 %vm770_vm2, %v17395_v12  ;;  %v17196_v12 = vld [vmem:[%s17763_s25 + $0x1a0] sm:$0xff] }
 0x456   : > { %15788 = vmatmul.msk.bf16.gmra.mxu0 %vm770_vm2, %v17459_v33  ;;  %v3611_v24 = vpop.f32.mrf.mxu2 }
 0x457   : > { %v3812_v49 = vadd.f32 %v3611_v24, %v2071_v57  ;;  %v17460_v57 = vld [vmem:[%s17763_s25 + $0x83c] sm:$0xff] }
 0x458   : > { %v2072_v35 = vpop.f32.mrf.mxu1  ;;  %v4758_v14 = vpop.f32.mrf.mxu3 }
 0x459   : > { %v4949_v29 = vadd.f32 %v4748_v63, %v3812_v49  ;;  %v2073_v17 = vadd.f32 %v2072_v35, %v22538_v20 }
 0x45b   : > { %v5887_v62 = vpop.f32.mrf.mxu0  ;;  %v18914_v42 = vadd.f32 %v5885_v3, %v4949_v29  ;;  %v17330_v3 = vld [vmem:[%s17763_s25 + $0x1b0] sm:$0xff] }
 0x45c   : > { %v3086_v29 = vshll.u32 %v17330_v3, 16 }
 0x45d   : > { %22537 = vst [vmem:[#allocation54_spill] sm:$0xff] %v18914_v42  ;;  %v17397_v42 = vld [vmem:[%s17763_s25 + $0x620] sm:$0xff] }
 0x45e   : > { %v3613_v41 = vpop.f32.mrf.mxu2 }
 0x45f   : > { %v3813_v33 = vadd.f32 %v3613_v41, %v2073_v17  ;;  %v3084_v41 = vor.u32 %v3082_v56, %v3080_v47  ;;  %v22544_v47 = vld [vmem:[#allocation66_spill] sm:$0xff] }
 0x460   : > { %v2075_v11 = vpop.f32.mrf.mxu1  ;;  %v4760_v0 = vpop.f32.mrf.mxu3 }
 0x461   : > { %v4950_v24 = vadd.f32 %v4750_v58, %v3813_v33  ;;  %v2076_v49 = vadd.f32 %v2075_v11, %v22540_v23  ;;  %v3088_v33 = vrot.slane %v3086_v29, 1  ;;  %v3090_v29 = vshrl.u32 %v17330_v3, 16 }
 0x463   : > { %v5890_v28 = vpop.f32.mrf.mxu0  ;;  %14532 = vmatmul.msk.bf16.gmra.mxu1 %vm770_vm2, %v17196_v12  ;;  %14863 = vmatmul.msk.bf16.gmra.mxu2 %vm770_vm2, %v3081_v53  ;;  %v18923_v63 = vadd.f32 %v5887_v62, %v4950_v24  ;;  %v22542_v12 = vld [vmem:[#allocation63_spill] sm:$0xff]  ;;  %v3089_v23 = vsel %vm2653_vm3, %v3084_v41, %v3088_v33 }
 0x465   : > { %22539 = vst [vmem:[#allocation57_spill] sm:$0xff] %v18923_v63  ;;  %15328 = vmatmul.msk.bf16.gmra.mxu3 %vm770_vm2, %v17396_v36  ;;  %v17197_v36 = vld [vmem:[%s17763_s25 + $0x1a8] sm:$0xff] }
 0x466   : > { %15789 = vmatmul.msk.bf16.gmra.mxu0 %vm770_vm2, %v17460_v57  ;;  %v3616_v35 = vpop.f32.mrf.mxu2 }
 0x467   : > { %v3814_v19 = vadd.f32 %v3616_v35, %v2076_v49  ;;  %v17461_v49 = vld [vmem:[%s17763_s25 + $0x844] sm:$0xff] }
 0x468   : > { %v2077_v58 = vpop.f32.mrf.mxu1  ;;  %v4763_v9 = vpop.f32.mrf.mxu3 }
 0x469   : > { %v4951_v20 = vadd.f32 %v4753_v52, %v3814_v19  ;;  %v2078_v11 = vadd.f32 %v2077_v58, %v22542_v12 }
 0x46b   : > { %v5892_v17 = vpop.f32.mrf.mxu0  ;;  %v18929_v62 = vadd.f32 %v5890_v28, %v4951_v20  ;;  %v17331_v28 = vld [vmem:[%s17763_s25 + $0x1b8] sm:$0xff] }
 0x46c   : > { %v3094_v20 = vshll.u32 %v17331_v28, 16 }
 0x46d   : > { %22541 = vst [vmem:[#allocation60_spill] sm:$0xff] %v18929_v62  ;;  %v17398_v62 = vld [vmem:[%s17763_s25 + $0x628] sm:$0xff] }
 0x46e   : > { %v3618_v53 = vpop.f32.mrf.mxu2 }
 0x46f   : > { %v3815_v57 = vadd.f32 %v3618_v53, %v2078_v11  ;;  %v3092_v53 = vor.u32 %v3090_v29, %v3088_v33  ;;  %v22548_v33 = vld [vmem:[#allocation72_spill] sm:$0xff] }
 0x470   : > { %v2080_v24 = vpop.f32.mrf.mxu1  ;;  %v4765_v51 = vpop.f32.mrf.mxu3 }
 0x471   : > { %v4952_v35 = vadd.f32 %v4755_v37, %v3815_v57  ;;  %v2081_v19 = vadd.f32 %v2080_v24, %v22544_v47  ;;  %v3096_v57 = vrot.slane %v3094_v20, 1  ;;  %v3098_v20 = vshrl.u32 %v17331_v28, 16 }
 0x473   : > { %v5895_v63 = vpop.f32.mrf.mxu0  ;;  %14533 = vmatmul.msk.bf16.gmra.mxu1 %vm770_vm2, %v17197_v36  ;;  %14864 = vmatmul.msk.bf16.gmra.mxu2 %vm770_vm2, %v3089_v23  ;;  %v18938_v52 = vadd.f32 %v5892_v17, %v4952_v35  ;;  %v22546_v36 = vld [vmem:[#allocation69_spill] sm:$0xff]  ;;  %v3097_v47 = vsel %vm2653_vm3, %v3092_v53, %v3096_v57 }
 0x475   : > { %22543 = vst [vmem:[#allocation63_spill] sm:$0xff] %v18938_v52  ;;  %15329 = vmatmul.msk.bf16.gmra.mxu3 %vm770_vm2, %v17397_v42  ;;  %v17198_v42 = vld [vmem:[%s17763_s25 + $0x1b0] sm:$0xff] }
 0x476   : > { %15790 = vmatmul.msk.bf16.gmra.mxu0 %vm770_vm2, %v17461_v49  ;;  %v3621_v58 = vpop.f32.mrf.mxu2 }
 0x477   : > { %v3816_v56 = vadd.f32 %v3621_v58, %v2081_v19  ;;  %v17462_v19 = vld [vmem:[%s17763_s25 + $0x84c] sm:$0xff] }
 0x478   : > { %v2082_v37 = vpop.f32.mrf.mxu1  ;;  %v4768_v41 = vpop.f32.mrf.mxu3 }
 0x479   : > { %v4953_v12 = vadd.f32 %v4758_v14, %v3816_v56  ;;  %v2083_v24 = vadd.f32 %v2082_v37, %v22546_v36 }
 0x47b   : > { %v5897_v11 = vpop.f32.mrf.mxu0  ;;  %v18944_v17 = vadd.f32 %v5895_v63, %v4953_v12  ;;  %v17332_v63 = vld [vmem:[%s17763_s25 + $0x1c0] sm:$0xff] }
 0x47c   : > { %v3102_v12 = vshll.u32 %v17332_v63, 16 }
 0x47d   : > { %22545 = vst [vmem:[#allocation66_spill] sm:$0xff] %v18944_v17  ;;  %v17399_v17 = vld [vmem:[%s17763_s25 + $0x630] sm:$0xff] }
 0x47e   : > { %v3623_v23 = vpop.f32.mrf.mxu2 }
 0x47f   : > { %v3817_v49 = vadd.f32 %v3623_v23, %v2083_v24  ;;  %v3100_v23 = vor.u32 %v3098_v20, %v3096_v57  ;;  %v22552_v57 = vld [vmem:[#allocation78_spill] sm:$0xff] }
 0x480   : > { %v2085_v35 = vpop.f32.mrf.mxu1  ;;  %v4770_v3 = vpop.f32.mrf.mxu3 }
 0x481   : > { %v4954_v58 = vadd.f32 %v4760_v0, %v3817_v49  ;;  %v2086_v56 = vadd.f32 %v2085_v35, %v22548_v33  ;;  %v3104_v49 = vrot.slane %v3102_v12, 1  ;;  %v3106_v12 = vshrl.u32 %v17332_v63, 16 }
 0x483   : > { %v5900_v52 = vpop.f32.mrf.mxu0  ;;  %14534 = vmatmul.msk.bf16.gmra.mxu1 %vm770_vm2, %v17198_v42  ;;  %14865 = vmatmul.msk.bf16.gmra.mxu2 %vm770_vm2, %v3097_v47  ;;  %v18953_v14 = vadd.f32 %v5897_v11, %v4954_v58  ;;  %v22550_v42 = vld [vmem:[#allocation75_spill] sm:$0xff]  ;;  %v3105_v33 = vsel %vm2653_vm3, %v3100_v23, %v3104_v49 }
 0x485   : > { %22547 = vst [vmem:[#allocation69_spill] sm:$0xff] %v18953_v14  ;;  %15330 = vmatmul.msk.bf16.gmra.mxu3 %vm770_vm2, %v17398_v62  ;;  %v17199_v62 = vld [vmem:[%s17763_s25 + $0x1b8] sm:$0xff] }
 0x486   : > { %15791 = vmatmul.msk.bf16.gmra.mxu0 %vm770_vm2, %v17462_v19  ;;  %v3626_v37 = vpop.f32.mrf.mxu2 }
 0x487   : > { %v3818_v29 = vadd.f32 %v3626_v37, %v2086_v56  ;;  %v17463_v56 = vld [vmem:[%s17763_s25 + $0x854] sm:$0xff] }
 0x488   : > { %v2087_v0 = vpop.f32.mrf.mxu1  ;;  %v4773_v53 = vpop.f32.mrf.mxu3 }
 0x489   : > { %v4955_v36 = vadd.f32 %v4763_v9, %v3818_v29  ;;  %v2088_v35 = vadd.f32 %v2087_v0, %v22550_v42 }
 0x48b   : > { %v5902_v24 = vpop.f32.mrf.mxu0  ;;  %v18959_v11 = vadd.f32 %v5900_v52, %v4955_v36  ;;  %v17333_v52 = vld [vmem:[%s17763_s25 + $0x1c8] sm:$0xff] }
 0x48c   : > { %v3110_v36 = vshll.u32 %v17333_v52, 16 }
 0x48d   : > { %22549 = vst [vmem:[#allocation72_spill] sm:$0xff] %v18959_v11  ;;  %v17400_v11 = vld [vmem:[%s17763_s25 + $0x638] sm:$0xff] }
 0x48e   : > { %v3628_v47 = vpop.f32.mrf.mxu2 }
 0x48f   : > { %v3819_v19 = vadd.f32 %v3628_v47, %v2088_v35  ;;  %v3108_v47 = vor.u32 %v3106_v12, %v3104_v49  ;;  %v22556_v49 = vld [vmem:[#allocation84_spill] sm:$0xff] }
 0x490   : > { %v2090_v58 = vpop.f32.mrf.mxu1  ;;  %v4775_v28 = vpop.f32.mrf.mxu3 }
 0x491   : > { %v4956_v37 = vadd.f32 %v4765_v51, %v3819_v19  ;;  %v2091_v29 = vadd.f32 %v2090_v58, %v22552_v57  ;;  %v3112_v19 = vrot.slane %v3110_v36, 1  ;;  %v3114_v36 = vshrl.u32 %v17333_v52, 16 }
 0x493   : > { %v5905_v14 = vpop.f32.mrf.mxu0  ;;  %14535 = vmatmul.msk.bf16.gmra.mxu1 %vm770_vm2, %v17199_v62  ;;  %14866 = vmatmul.msk.bf16.gmra.mxu2 %vm770_vm2, %v3105_v33  ;;  %v18968_v9 = vadd.f32 %v5902_v24, %v4956_v37  ;;  %v22554_v62 = vld [vmem:[#allocation81_spill] sm:$0xff]  ;;  %v3113_v57 = vsel %vm2653_vm3, %v3108_v47, %v3112_v19 }
 0x495   : > { %22551 = vst [vmem:[#allocation75_spill] sm:$0xff] %v18968_v9  ;;  %15331 = vmatmul.msk.bf16.gmra.mxu3 %vm770_vm2, %v17399_v17  ;;  %v17200_v17 = vld [vmem:[%s17763_s25 + $0x1c0] sm:$0xff] }
 0x496   : > { %15792 = vmatmul.msk.bf16.gmra.mxu0 %vm770_vm2, %v17463_v56  ;;  %v3631_v0 = vpop.f32.mrf.mxu2 }
 0x497   : > { %v3820_v20 = vadd.f32 %v3631_v0, %v2091_v29  ;;  %v17464_v29 = vld [vmem:[%s17763_s25 + $0x85c] sm:$0xff] }
 0x498   : > { %v2092_v51 = vpop.f32.mrf.mxu1  ;;  %v4778_v23 = vpop.f32.mrf.mxu3 }
 0x499   : > { %v4957_v42 = vadd.f32 %v4768_v41, %v3820_v20  ;;  %v2093_v58 = vadd.f32 %v2092_v51, %v22554_v62 }
 0x49b   : > { %v5907_v35 = vpop.f32.mrf.mxu0  ;;  %v18974_v24 = vadd.f32 %v5905_v14, %v4957_v42  ;;  %v17334_v14 = vld [vmem:[%s17763_s25 + $0x1d0] sm:$0xff] }
 0x49c   : > { %v3118_v42 = vshll.u32 %v17334_v14, 16 }
 0x49d   : > { %22553 = vst [vmem:[#allocation78_spill] sm:$0xff] %v18974_v24  ;;  %v17401_v24 = vld [vmem:[%s17763_s25 + $0x640] sm:$0xff] }
 0x49e   : > { %v3633_v33 = vpop.f32.mrf.mxu2 }
 0x49f   : > { %v3821_v56 = vadd.f32 %v3633_v33, %v2093_v58  ;;  %v3116_v33 = vor.u32 %v3114_v36, %v3112_v19  ;;  %v22560_v19 = vld [vmem:[#allocation90_spill] sm:$0xff] }
 0x4a0   : > { %v2095_v37 = vpop.f32.mrf.mxu1  ;;  %v4780_v63 = vpop.f32.mrf.mxu3 }
 0x4a1   : > { %v4958_v0 = vadd.f32 %v4770_v3, %v3821_v56  ;;  %v2096_v20 = vadd.f32 %v2095_v37, %v22556_v49  ;;  %v3120_v56 = vrot.slane %v3118_v42, 1  ;;  %v3122_v42 = vshrl.u32 %v17334_v14, 16 }
 0x4a3   : > { %v5910_v9 = vpop.f32.mrf.mxu0  ;;  %14536 = vmatmul.msk.bf16.gmra.mxu1 %vm770_vm2, %v17200_v17  ;;  %14867 = vmatmul.msk.bf16.gmra.mxu2 %vm770_vm2, %v3113_v57  ;;  %v18983_v41 = vadd.f32 %v5907_v35, %v4958_v0  ;;  %v22558_v17 = vld [vmem:[#allocation87_spill] sm:$0xff]  ;;  %v3121_v49 = vsel %vm2653_vm3, %v3116_v33, %v3120_v56 }
 0x4a5   : > { %22555 = vst [vmem:[#allocation81_spill] sm:$0xff] %v18983_v41  ;;  %15332 = vmatmul.msk.bf16.gmra.mxu3 %vm770_vm2, %v17400_v11  ;;  %v17201_v11 = vld [vmem:[%s17763_s25 + $0x1c8] sm:$0xff] }
 0x4a6   : > { %15793 = vmatmul.msk.bf16.gmra.mxu0 %vm770_vm2, %v17464_v29  ;;  %v3636_v51 = vpop.f32.mrf.mxu2 }
 0x4a7   : > { %v3822_v12 = vadd.f32 %v3636_v51, %v2096_v20  ;;  %v17465_v20 = vld [vmem:[%s17763_s25 + $0x864] sm:$0xff] }
 0x4a8   : > { %v2097_v3 = vpop.f32.mrf.mxu1  ;;  %v4783_v47 = vpop.f32.mrf.mxu3 }
 0x4a9   : > { %v4959_v62 = vadd.f32 %v4773_v53, %v3822_v12  ;;  %v2098_v37 = vadd.f32 %v2097_v3, %v22558_v17 }
 0x4ab   : > { %v5912_v58 = vpop.f32.mrf.mxu0  ;;  %v18989_v35 = vadd.f32 %v5910_v9, %v4959_v62  ;;  %v17335_v9 = vld [vmem:[%s17763_s25 + $0x1d8] sm:$0xff] }
 0x4ac   : > { %v3126_v62 = vshll.u32 %v17335_v9, 16 }
 0x4ad   : > { %22557 = vst [vmem:[#allocation84_spill] sm:$0xff] %v18989_v35  ;;  %v17402_v35 = vld [vmem:[%s17763_s25 + $0x648] sm:$0xff] }
 0x4ae   : > { %v3638_v57 = vpop.f32.mrf.mxu2 }
 0x4af   : > { %v3823_v29 = vadd.f32 %v3638_v57, %v2098_v37  ;;  %v3124_v57 = vor.u32 %v3122_v42, %v3120_v56  ;;  %v22564_v56 = vld [vmem:[#allocation94_spill] sm:$0xff] }
 0x4b0   : > { %v2100_v0 = vpop.f32.mrf.mxu1  ;;  %v4785_v52 = vpop.f32.mrf.mxu3 }
 0x4b1   : > { %v4960_v51 = vadd.f32 %v4775_v28, %v3823_v29  ;;  %v2101_v12 = vadd.f32 %v2100_v0, %v22560_v19  ;;  %v3128_v29 = vrot.slane %v3126_v62, 1  ;;  %v3130_v62 = vshrl.u32 %v17335_v9, 16 }
 0x4b3   : > { %v5915_v41 = vpop.f32.mrf.mxu0  ;;  %14537 = vmatmul.msk.bf16.gmra.mxu1 %vm770_vm2, %v17201_v11  ;;  %14868 = vmatmul.msk.bf16.gmra.mxu2 %vm770_vm2, %v3121_v49  ;;  %v18998_v53 = vadd.f32 %v5912_v58, %v4960_v51  ;;  %v22562_v11 = vld [vmem:[#allocation92_spill] sm:$0xff]  ;;  %v3129_v19 = vsel %vm2653_vm3, %v3124_v57, %v3128_v29 }
 0x4b5   : > { %22559 = vst [vmem:[#allocation87_spill] sm:$0xff] %v18998_v53  ;;  %15333 = vmatmul.msk.bf16.gmra.mxu3 %vm770_vm2, %v17401_v24  ;;  %v17202_v24 = vld [vmem:[%s17763_s25 + $0x1d0] sm:$0xff] }
 0x4b6   : > { %15794 = vmatmul.msk.bf16.gmra.mxu0 %vm770_vm2, %v17465_v20  ;;  %v3641_v3 = vpop.f32.mrf.mxu2 }
 0x4b7   : > { %v3824_v36 = vadd.f32 %v3641_v3, %v2101_v12  ;;  %v17466_v12 = vld [vmem:[%s17763_s25 + $0x86c] sm:$0xff] }
 0x4b8   : > { %v2102_v28 = vpop.f32.mrf.mxu1  ;;  %v4788_v33 = vpop.f32.mrf.mxu3 }
 0x4b9   : > { %v4961_v17 = vadd.f32 %v4778_v23, %v3824_v36  ;;  %v2103_v0 = vadd.f32 %v2102_v28, %v22562_v11 }
 0x4bb   : > { %v5917_v37 = vpop.f32.mrf.mxu0  ;;  %v19004_v58 = vadd.f32 %v5915_v41, %v4961_v17  ;;  %v17336_v41 = vld [vmem:[%s17763_s25 + $0x1e0] sm:$0xff] }
 0x4bc   : > { %v3134_v17 = vshll.u32 %v17336_v41, 16 }
 0x4bd   : > { %22561 = vst [vmem:[#allocation90_spill] sm:$0xff] %v19004_v58  ;;  %v17403_v58 = vld [vmem:[%s17763_s25 + $0x650] sm:$0xff] }
 0x4be   : > { %v3643_v49 = vpop.f32.mrf.mxu2 }
 0x4bf   : > { %v3825_v20 = vadd.f32 %v3643_v49, %v2103_v0  ;;  %v3132_v49 = vor.u32 %v3130_v62, %v3128_v29  ;;  %v22568_v29 = vld [vmem:[#allocation3_spill] sm:$0xff] }
 0x4c0   : > { %v2105_v51 = vpop.f32.mrf.mxu1  ;;  %v4790_v14 = vpop.f32.mrf.mxu3 }
 0x4c1   : > { %v4962_v3 = vadd.f32 %v4780_v63, %v3825_v20  ;;  %v2106_v36 = vadd.f32 %v2105_v51, %v22564_v56  ;;  %v3136_v20 = vrot.slane %v3134_v17, 1  ;;  %v3138_v17 = vshrl.u32 %v17336_v41, 16 }
 0x4c3   : > { %v5920_v53 = vpop.f32.mrf.mxu0  ;;  %14538 = vmatmul.msk.bf16.gmra.mxu1 %vm770_vm2, %v17202_v24  ;;  %14869 = vmatmul.msk.bf16.gmra.mxu2 %vm770_vm2, %v3129_v19  ;;  %v19013_v23 = vadd.f32 %v5917_v37, %v4962_v3  ;;  %v22566_v24 = vld [vmem:[#allocation96_spill] sm:$0xff]  ;;  %v3137_v56 = vsel %vm2653_vm3, %v3132_v49, %v3136_v20 }
 0x4c5   : > { %22563 = vst [vmem:[#allocation92_spill] sm:$0xff] %v19013_v23  ;;  %15334 = vmatmul.msk.bf16.gmra.mxu3 %vm770_vm2, %v17402_v35  ;;  %v17203_v35 = vld [vmem:[%s17763_s25 + $0x1d8] sm:$0xff] }
 0x4c6   : > { %15795 = vmatmul.msk.bf16.gmra.mxu0 %vm770_vm2, %v17466_v12  ;;  %v3646_v28 = vpop.f32.mrf.mxu2 }
 0x4c7   : > { %v3826_v42 = vadd.f32 %v3646_v28, %v2106_v36  ;;  %v17467_v36 = vld [vmem:[%s17763_s25 + $0x874] sm:$0xff] }
 0x4c8   : > { %v2107_v63 = vpop.f32.mrf.mxu1  ;;  %v4793_v57 = vpop.f32.mrf.mxu3 }
 0x4c9   : > { %v4963_v11 = vadd.f32 %v4783_v47, %v3826_v42  ;;  %v2108_v51 = vadd.f32 %v2107_v63, %v22566_v24 }
 0x4cb   : > { %v5922_v0 = vpop.f32.mrf.mxu0  ;;  %v19019_v37 = vadd.f32 %v5920_v53, %v4963_v11  ;;  %v17337_v53 = vld [vmem:[%s17763_s25 + $0x1e8] sm:$0xff] }
 0x4cc   : > { %v3142_v11 = vshll.u32 %v17337_v53, 16 }
 0x4cd   : > { %22565 = vst [vmem:[#allocation94_spill] sm:$0xff] %v19019_v37  ;;  %v17404_v37 = vld [vmem:[%s17763_s25 + $0x658] sm:$0xff] }
 0x4ce   : > { %v3648_v19 = vpop.f32.mrf.mxu2 }
 0x4cf   : > { %v3827_v12 = vadd.f32 %v3648_v19, %v2108_v51  ;;  %v3140_v19 = vor.u32 %v3138_v17, %v3136_v20  ;;  %v22572_v20 = vld [vmem:[#allocation8_spill] sm:$0xff] }
 0x4d0   : > { %v2110_v3 = vpop.f32.mrf.mxu1  ;;  %v4795_v9 = vpop.f32.mrf.mxu3 }
 0x4d1   : > { %v4964_v28 = vadd.f32 %v4785_v52, %v3827_v12  ;;  %v2111_v42 = vadd.f32 %v2110_v3, %v22568_v29  ;;  %v3144_v12 = vrot.slane %v3142_v11, 1  ;;  %v3146_v11 = vshrl.u32 %v17337_v53, 16 }
 0x4d3   : > { %v5925_v23 = vpop.f32.mrf.mxu0  ;;  %14539 = vmatmul.msk.bf16.gmra.mxu1 %vm770_vm2, %v17203_v35  ;;  %14870 = vmatmul.msk.bf16.gmra.mxu2 %vm770_vm2, %v3137_v56  ;;  %v19028_v47 = vadd.f32 %v5922_v0, %v4964_v28  ;;  %v22570_v35 = vld [vmem:[#allocation5_spill] sm:$0xff]  ;;  %v3145_v29 = vsel %vm2653_vm3, %v3140_v19, %v3144_v12 }
 0x4d5   : > { %22567 = vst [vmem:[#allocation96_spill] sm:$0xff] %v19028_v47  ;;  %15335 = vmatmul.msk.bf16.gmra.mxu3 %vm770_vm2, %v17403_v58  ;;  %v17204_v58 = vld [vmem:[%s17763_s25 + $0x1e0] sm:$0xff] }
 0x4d6   : > { %15796 = vmatmul.msk.bf16.gmra.mxu0 %vm770_vm2, %v17467_v36  ;;  %v3651_v63 = vpop.f32.mrf.mxu2 }
 0x4d7   : > { %v3828_v62 = vadd.f32 %v3651_v63, %v2111_v42  ;;  %v17468_v42 = vld [vmem:[%s17763_s25 + $0x87c] sm:$0xff] }
 0x4d8   : > { %v2112_v52 = vpop.f32.mrf.mxu1  ;;  %v4798_v49 = vpop.f32.mrf.mxu3 }
 0x4d9   : > { %v4965_v24 = vadd.f32 %v4788_v33, %v3828_v62  ;;  %v2113_v3 = vadd.f32 %v2112_v52, %v22570_v35 }
 0x4db   : > { %v5927_v51 = vpop.f32.mrf.mxu0  ;;  %v19034_v0 = vadd.f32 %v5925_v23, %v4965_v24  ;;  %v17338_v23 = vld [vmem:[%s17763_s25 + $0x1f0] sm:$0xff] }
 0x4dc   : > { %v3150_v24 = vshll.u32 %v17338_v23, 16 }
 0x4dd   : > { %22569 = vst [vmem:[#allocation3_spill] sm:$0xff] %v19034_v0  ;;  %v17405_v0 = vld [vmem:[%s17763_s25 + $0x660] sm:$0xff] }
 0x4de   : > { %v3653_v56 = vpop.f32.mrf.mxu2 }
 0x4df   : > { %v3829_v36 = vadd.f32 %v3653_v56, %v2113_v3  ;;  %v3148_v56 = vor.u32 %v3146_v11, %v3144_v12  ;;  %v22576_v12 = vld [vmem:[#allocation14_spill] sm:$0xff] }
 0x4e0   : > { %v2115_v28 = vpop.f32.mrf.mxu1  ;;  %v4800_v41 = vpop.f32.mrf.mxu3 }
 0x4e1   : > { %v4966_v63 = vadd.f32 %v4790_v14, %v3829_v36  ;;  %v2116_v62 = vadd.f32 %v2115_v28, %v22572_v20  ;;  %v3152_v36 = vrot.slane %v3150_v24, 1  ;;  %v3154_v24 = vshrl.u32 %v17338_v23, 16 }
 0x4e3   : > { %v5930_v47 = vpop.f32.mrf.mxu0  ;;  %14540 = vmatmul.msk.bf16.gmra.mxu1 %vm770_vm2, %v17204_v58  ;;  %14871 = vmatmul.msk.bf16.gmra.mxu2 %vm770_vm2, %v3145_v29  ;;  %v19043_v33 = vadd.f32 %v5927_v51, %v4966_v63  ;;  %v22574_v58 = vld [vmem:[#allocation11_spill] sm:$0xff]  ;;  %v3153_v20 = vsel %vm2653_vm3, %v3148_v56, %v3152_v36 }
 0x4e5   : > { %22571 = vst [vmem:[#allocation5_spill] sm:$0xff] %v19043_v33  ;;  %15336 = vmatmul.msk.bf16.gmra.mxu3 %vm770_vm2, %v17404_v37  ;;  %v17205_v37 = vld [vmem:[%s17763_s25 + $0x1e8] sm:$0xff] }
 0x4e6   : > { %15797 = vmatmul.msk.bf16.gmra.mxu0 %vm770_vm2, %v17468_v42  ;;  %v3656_v52 = vpop.f32.mrf.mxu2 }
 0x4e7   : > { %v3830_v17 = vadd.f32 %v3656_v52, %v2116_v62  ;;  %v17469_v62 = vld [vmem:[%s17763_s25 + $0x884] sm:$0xff] }
 0x4e8   : > { %v2117_v14 = vpop.f32.mrf.mxu1  ;;  %v4803_v19 = vpop.f32.mrf.mxu3 }
 0x4e9   : > { %v4967_v35 = vadd.f32 %v4793_v57, %v3830_v17  ;;  %v2118_v28 = vadd.f32 %v2117_v14, %v22574_v58 }
 0x4eb   : > { %v5932_v3 = vpop.f32.mrf.mxu0  ;;  %v19049_v51 = vadd.f32 %v5930_v47, %v4967_v35  ;;  %v17339_v47 = vld [vmem:[%s17763_s25 + $0x1f8] sm:$0xff] }
 0x4ec   : > { %v3158_v35 = vshll.u32 %v17339_v47, 16 }
 0x4ed   : > { %22573 = vst [vmem:[#allocation8_spill] sm:$0xff] %v19049_v51  ;;  %v2317_v51 = vld [vmem:[%s17763_s25 + $0x210] sm:$0x1] }
 0x4ee   : > { %v3658_v29 = vpop.f32.mrf.mxu2 }
 0x4ef   : > { %v3831_v42 = vadd.f32 %v3658_v29, %v2118_v28  ;;  %v3156_v29 = vor.u32 %v3154_v24, %v3152_v36  ;;  %v17340_v36 = vld [vmem:[%s17763_s25 + $0x200] sm:$0xff] }
 0x4f0   : > { %v2120_v63 = vpop.f32.mrf.mxu1  ;;  %v4805_v53 = vpop.f32.mrf.mxu3 }
 0x4f1   : > { %v4968_v52 = vadd.f32 %v4795_v9, %v3831_v42  ;;  %v2121_v17 = vadd.f32 %v2120_v63, %v22576_v12  ;;  %v3160_v42 = vrot.slane %v3158_v35, 1 }
 0x4f3   : > { %v5935_v33 = vpop.f32.mrf.mxu0  ;;  %14541 = vmatmul.msk.bf16.gmra.mxu1 %vm770_vm2, %v17205_v37  ;;  %14872 = vmatmul.msk.bf16.gmra.mxu2 %vm770_vm2, %v3153_v20  ;;  %v19058_v57 = vadd.f32 %v5932_v3, %v4968_v52  ;;  %v22578_v37 = vld [vmem:[#allocation17_spill] sm:$0xff]  ;;  %v3161_v12 = vsel %vm2653_vm3, %v3156_v29, %v3160_v42  ;;  %v3166_v29 = vshll.u32 %v17340_v36, 16 }
 0x4f5   : > { %22575 = vst [vmem:[#allocation11_spill] sm:$0xff] %v19058_v57  ;;  %15337 = vmatmul.msk.bf16.gmra.mxu3 %vm770_vm2, %v17405_v0  ;;  %v17206_v0 = vld [vmem:[%s17763_s25 + $0x1f0] sm:$0xff] }
 0x4f6   : > { %15798 = vmatmul.msk.bf16.gmra.mxu0 %vm770_vm2, %v17469_v62  ;;  %v3661_v14 = vpop.f32.mrf.mxu2 }
 0x4f7   : > { %v3832_v11 = vadd.f32 %v3661_v14, %v2121_v17  ;;  %v17470_v17 = vld [vmem:[%s17763_s25 + $0x88c] sm:$0xff] }
 0x4f8   : > { %v2122_v9 = vpop.f32.mrf.mxu1  ;;  %v4808_v56 = vpop.f32.mrf.mxu3 }
 0x4f9   : > { %v4969_v58 = vadd.f32 %v4798_v49, %v3832_v11  ;;  %v2123_v63 = vadd.f32 %v2122_v9, %v22578_v37  ;;  %v17406_v49 = vld [vmem:[%s17763_s25 + $0x668] sm:$0xff]  ;;  %v22580_v11 = vld [vmem:[#allocation20_spill] sm:$0xff] }
 0x4fb   : > { %v5937_v28 = vpop.f32.mrf.mxu0  ;;  %v19064_v3 = vadd.f32 %v5935_v33, %v4969_v58  ;;  %v3162_v58 = vshrl.u32 %v17339_v47, 16 }
 0x4fd   : > { %22577 = vst [vmem:[#allocation14_spill] sm:$0xff] %v19064_v3 }
 0x4fe   : > { %v3663_v20 = vpop.f32.mrf.mxu2 }
 0x4ff   : > { %v3833_v62 = vadd.f32 %v3663_v20, %v2123_v63 }
 0x500   : > { %v2125_v52 = vpop.f32.mrf.mxu1  ;;  %v19070_v23 = vpop.f32.mrf.mxu3 }
 0x501   : > { %v4970_v14 = vadd.f32 %v4800_v41, %v3833_v62  ;;  %v2126_v9 = vadd.f32 %v2125_v52, %v22580_v11  ;;  %v3164_v62 = vor.u32 %v3162_v58, %v3160_v42  ;;  %v17605_v58 = vld [vmem:[%s17763_s25 + $0x244] sm:$0xff] }
 0x503   : > { %v5940_v57 = vpop.f32.mrf.mxu0  ;;  %14542 = vmatmul.msk.bf16.gmra.mxu1 %vm770_vm2, %v17206_v0  ;;  %14873 = vmatmul.msk.bf16.gmra.mxu2 %vm770_vm2, %v3161_v12  ;;  %v19075_v33 = vadd.f32 %v5937_v28, %v4970_v14  ;;  %v3168_v0 = vrot.slane %v3166_v29, 1  ;;  %v22582_v12 = vld [vmem:[#allocation23_spill] sm:$0xff]  ;;  %v22584_v29 = vld [vmem:[#allocation26_spill] sm:$0xff] }
 0x505   : > { %22579 = vst [vmem:[#allocation17_spill] sm:$0xff] %v19075_v33  ;;  %15338 = vmatmul.msk.bf16.gmra.mxu3 %vm770_vm2, %v17406_v49  ;;  %v17207_v49 = vld [vmem:[%s17763_s25 + $0x1f8] sm:$0xff]  ;;  %v3169_v47 = vsel %vm2653_vm3, %v3164_v62, %v3168_v0 }
 0x506   : > { %15799 = vmatmul.msk.bf16.gmra.mxu0 %vm770_vm2, %v17470_v17  ;;  %v3666_v24 = vpop.f32.mrf.mxu2  ;;  %v22586_v33 = vld [vmem:[#allocation29_spill] sm:$0xff] }
 0x507   : > { %v3834_v35 = vadd.f32 %v3666_v24, %v2126_v9  ;;  %v17471_v9 = vld [vmem:[%s17763_s25 + $0x894] sm:$0xff] }
 0x508   : > { %v2127_v41 = vpop.f32.mrf.mxu1  ;;  %v19081_v37 = vpop.f32.mrf.mxu3 }
 0x509   : > { %v4971_v63 = vadd.f32 %v4803_v19, %v3834_v35  ;;  %v2128_v52 = vadd.f32 %v2127_v41, %v22582_v12  ;;  %v17341_v41 = vld [vmem:[%s17763_s25 + $0x208] sm:$0xff] }
 0x50a   : > { %v17606_v12 = vld [vmem:[%s17763_s25 + $0x24c] sm:$0xff] }
 0x50b   : > { %v5942_v28 = vpop.f32.mrf.mxu0  ;;  %v19083_v20 = vadd.f32 %v5940_v57, %v4971_v63  ;;  %v17407_v57 = vld [vmem:[%s17763_s25 + $0x670] sm:$0xff] }
 0x50d   : > { %22581 = vst [vmem:[#allocation20_spill] sm:$0xff] %v19083_v20  ;;  %v9952_v20 = vshll.u32 %v17606_v12, 16 }
 0x50e   : > { %v3668_v17 = vpop.f32.mrf.mxu2 }
 0x50f   : > { %v3835_v14 = vadd.f32 %v3668_v17, %v2128_v52 }
 0x510   : > { %v2130_v11 = vpop.f32.mrf.mxu1  ;;  %v19089_v24 = vpop.f32.mrf.mxu3 }
 0x511   : > { %v4972_v19 = vadd.f32 %v4805_v53, %v3835_v14  ;;  %v2131_v63 = vadd.f32 %v2130_v11, %v22584_v29  ;;  %v9947_v53 = vshll.u32 %v17605_v58, 16  ;;  %v3170_v14 = vshrl.u32 %v17340_v36, 16 }
 0x512   : > { %v9954_v36 = vrot.slane %v9952_v20, 1  ;;  %v22588_v20 = vld [vmem:[#allocation32_spill] sm:$0xff] }
 0x513   : > { %v5945_v35 = vpop.f32.mrf.mxu0  ;;  %14543 = vmatmul.msk.bf16.gmra.mxu1 %vm770_vm2, %v17207_v49  ;;  %14874 = vmatmul.msk.bf16.gmra.mxu2 %vm770_vm2, %v3169_v47  ;;  %v19094_v42 = vadd.f32 %v5942_v28, %v4972_v19  ;;  %v3174_v49 = vshll.u32 %v17341_v41, 16 }
 0x515   : > { %22583 = vst [vmem:[#allocation23_spill] sm:$0xff] %v19094_v42  ;;  %15339 = vmatmul.msk.bf16.gmra.mxu3 %vm770_vm2, %v17407_v57  ;;  %v9949_v42 = vrot.slane %v9947_v53, 1  ;;  %v3172_v57 = vor.u32 %v3170_v14, %v3168_v0  ;;  %v3176_v29 = vrot.slane %v3174_v49, 1  ;;  %v3178_v49 = vshrl.u32 %v17341_v41, 16 }
 0x516   : > { %15800 = vmatmul.msk.bf16.gmra.mxu0 %vm770_vm2, %v17471_v9  ;;  %v3671_v62 = vpop.f32.mrf.mxu2  ;;  %v9945_v9 = vshrl.u32 %v17605_v58, 16  ;;  %v2585_v58 = vunpack.c.l.b16 %v2317_v51 }
 0x517   : > { %v3836_v52 = vadd.f32 %v3671_v62, %v2131_v63 }
 0x518   : > { %v2132_v17 = vpop.f32.mrf.mxu1  ;;  %v19102_v47 = vpop.f32.mrf.mxu3  ;;  %v9950_v62 = vor.u32 %v9949_v42, %v9945_v9 }
 0x519   : > { %v4973_v28 = vadd.f32 %v4808_v56, %v3836_v52  ;;  %v2133_v3 = vadd.f32 %v2132_v17, %v22586_v33  ;;  %v3177_v56 = vsel %vm2653_vm3, %v3172_v57, %v3176_v29  ;;  %v17472_v52 = vld [vmem:[%s17763_s25 + $0x89c] sm:$0xff]  ;;  %v19123_v17 = vld [vmem:[%s17763_s25 + $0x254] sm:$0xff]  ;;  %v9956_v57 = vshrl.u32 %v17606_v12, 16 }
 0x51a   : > { %v9955_v14 = vsel %vm2653_vm3, %v9950_v62, %v9954_v36  ;;  %v3180_v62 = vor.u32 %v3178_v49, %v3176_v29 }
 0x51b   : > { %v5947_v19 = vpop.f32.mrf.mxu0  ;;  %v19104_v11 = vadd.f32 %v5945_v35, %v4973_v28  ;;  %v9958_v41 = vor.u32 %v9956_v57, %v9954_v36  ;;  %v19150_v57 = vld [vmem:[%s17763_s25 + $0x18] sm:$0xff] }
 0x51c   : > { %v11156_v39 = vrot.slane %v19150_v57, 1 }
 0x51d   : > { %22585 = vst [vmem:[#allocation26_spill] sm:$0xff] %v19104_v11 }
 0x51e   : > { %v3673_v63 = vpop.f32.mrf.mxu2 }
 0x51f   : > { %v3837_v50 = vadd.f32 %v3673_v63, %v2133_v3  ;;  %v2652_v3 = vpack.c.b16 %v2585_v58, %v2585_v58 }
 0x520   : > { %v2135_v5 = vpop.f32.mrf.mxu1  ;;  %v19111_v53 = vpop.f32.mrf.mxu3 }
 0x521   : > { %v4974_v35 = vadd.f32 %v19070_v23, %v3837_v50  ;;  %v2136_v42 = vadd.f32 %v2135_v5, %v22588_v20  ;;  %v9960_v5 = vshll.u32 %v19123_v17, 16  ;;  %v17209_v20 = vld [vmem:[%s17763_s25 + $0x208] sm:$0xff] }
 0x523   : > { %v5950_v0 = vpop.f32.mrf.mxu0  ;;  %14544 = vmatmul.msk.bf16.gmra.mxu1 %vm770_vm2, %v17208_v32  ;;  %14875 = vmatmul.msk.bf16.gmra.mxu2 %vm770_vm2, %v3177_v56  ;;  %v19117_v33 = vadd.f32 %v5947_v19, %v4974_v35  ;;  %v3182_v32 = vshll.u32 %v2652_v3, 16 }
 0x525   : > { %22587 = vst [vmem:[#allocation29_spill] sm:$0xff] %v19117_v33  ;;  %16992 = vmatmul.msk.bf16.vlgmr.msra.gmra.mxu3 %vm770_vm2, %v9955_v14  ;;  %v3184_v56 = vrot.slane %v3182_v32, 1  ;;  %v9962_v14 = vrot.slane %v9960_v5, 1  ;;  %v22592_v5 = vld [vmem:[#allocation38_spill] sm:$0xff]  ;;  %v9964_v33 = vshrl.u32 %v19123_v17, 16 }
 0x526   : > { %15801 = vmatmul.msk.bf16.gmra.mxu0 %vm770_vm2, %v17472_v52  ;;  %v3676_v51 = vpop.f32.mrf.mxu2  ;;  %v22590_v52 = vld [vmem:[#allocation35_spill] sm:$0xff] }
 0x527   : > { %v3838_v50 = vadd.f32 %v3676_v51, %v2136_v42  ;;  %v3185_v12 = vsel %vm2653_vm3, %v3180_v62, %v3184_v56  ;;  %v17473_v51 = vld [vmem:[%s17763_s25 + $0x8a4] sm:$0xff]  ;;  %v9963_v36 = vsel %vm2653_vm3, %v9958_v41, %v9962_v14 }
 0x528   : > { %v2137_v23 = vpop.f32.mrf.mxu1  ;;  %v19125_v28 = vpop.f32.mrf.mxu3 }
 0x529   : > { %v4975_v19 = vadd.f32 %v19081_v37, %v3838_v50  ;;  %v2138_v58 = vadd.f32 %v2137_v23, %v22590_v52  ;;  %v17474_v37 = vld [vmem:[%s17763_s25 + $0x468] sm:$0xff]  ;;  %v17675_v23 = vld [vmem:[%s17763_s25 + $0x10] sm:$0xff]  }
 0x52a   : > { %v6603_v49 = vshll.u32 %v17474_v37, 16  ;;  %v17676_v52 = vld [vmem:[%s17763_s25 + $0x10] sm:$0xf0] }
 0x52b   : > { %v5952_v9 = vpop.f32.mrf.mxu0  ;;  %v19129_v63 = vadd.f32 %v5950_v0, %v4975_v19  ;;  %v19147_v19 = vld [vmem:[%s17763_s25 + $0x470] sm:$0xff] }
 0x52d   : > { %22589 = vst [vmem:[#allocation32_spill] sm:$0xff] %v19129_v63 }
 0x52e   : > { %v3678_v35 = vpop.f32.mrf.mxu2 }
 0x52f   : > { %v3839_v3 = vadd.f32 %v3678_v35, %v2138_v58  ;;  %v17677_v58 = vld [vmem:[%s17763_s25 + $0x10] sm:$0xe]  ;;  %v19157_v35 = vld [vmem:[%s17763_s25 + $0x25c] sm:$0xff] }
 0x530   : > { %v2140_v42 = vpop.f32.mrf.mxu1  ;;  %v19136_v50 = vpop.f32.mrf.mxu3  ;;  %v9968_v11 = vshll.u32 %v19157_v35, 16 }
 0x531   : > { %v4976_v29 = vadd.f32 %v19089_v24, %v3839_v3  ;;  %v8275_v24 = vshll.u32 %v17675_v23, 16  ;;  %v2141_v62 = vadd.f32 %v2140_v42, %v22592_v5  ;;  %v6601_v3 = vshrl.u32 %v17474_v37, 16 }
 0x532   : > { %v17678_v5 = vor.u32 %v17677_v58, %v17676_v52  ;;  %v9970_v52 = vrot.slane %v9968_v11, 1  ;;  %v17476_v11 = vld [vmem:[%s17763_s25 + $0x478] sm:$0xff] }
 0x533   : > { %v5955_v0 = vpop.f32.mrf.mxu0  ;;  %14545 = vmatmul.msk.bf16.gmra.mxu1 %vm770_vm2, %v17209_v20  ;;  %14876 = vmatmul.msk.bf16.gmra.mxu2 %vm770_vm2, %v3185_v12  ;;  %v19143_v32 = vadd.f32 %v5952_v9, %v4976_v29  ;;  %v6605_v9 = vrot.slane %v6603_v49, 1  ;;  %v6608_v12 = vshll.u32 %v19147_v19, 16  ;;  %v8277_v29 = vrot.slane %v8275_v24, 1 }
 0x534   : > { %v11155_v55 = vrot.slane %v17678_v5, 1  ;;  %v6612_v5 = vshrl.u32 %v19147_v19, 16  ;;  %v22598_v19 = vld [vmem:[#allocation47_spill] sm:$0xff] }
 0x535   : > { %22591 = vst [vmem:[#allocation35_spill] sm:$0xff] %v19143_v32  ;;  %16993 = vmatmul.msk.bf16.gmra.mxu3 %vm770_vm2, %v9963_v36  ;;  %v8280_v32 = vshll.u32 %v19150_v57, 16  ;;  %v6606_v37 = vor.u32 %v6605_v9, %v6601_v3  ;;  %v6610_v49 = vrot.slane %v6608_v12, 1 }
 0x536   : > { %15802 = vmatmul.msk.bf16.gmra.mxu0 %vm770_vm2, %v17473_v51  ;;  %v3681_v56 = vpop.f32.mrf.mxu2  ;;  %v8273_v51 = vshrl.u32 %v17675_v23, 16  ;;  %v22594_v23 = vld [vmem:[#allocation41_spill] sm:$0xff] }
 0x537   : > { %v3840_v41 = vadd.f32 %v3681_v56, %v2141_v62  ;;  %v8282_v59 = vrot.slane %v8280_v32, 1 }
 0x538   : > { %v2142_v20 = vpop.f32.mrf.mxu1  ;;  %v19161_v63 = vpop.f32.mrf.mxu3  ;;  %v8278_v56 = vor.u32 %v8277_v29, %v8273_v51  ;;  %v17609_v29 = vld [vmem:[%s17763_s25 + $0x264] sm:$0xff] }
 0x539   : > { %v4977_v42 = vadd.f32 %v19102_v47, %v3840_v41  ;;  %v2143_v24 = vadd.f32 %v2142_v20, %v22594_v23  ;;  %v9966_v47 = vor.u32 %v9964_v33, %v9962_v14  ;;  %v11157_v20 = vsel %vm11154_vm4, %v11155_v55, %v11156_v39  ;;  %v19184_v33 = vld [vmem:[%s17763_s25 + $0x20] sm:$0xff]  ;;  %v22596_v14 = vld [vmem:[#allocation44_spill] sm:$0xff] }
 0x53a   : > { %v8283_v41 = vsel %vm2653_vm3, %v8278_v56, %v8282_v59  ;;  %v8284_v56 = vshrl.u32 %v19150_v57, 16  ;;  %v11158_v57 = vrot.slane %v19184_v33, 1 }
 0x53b   : > { %v5957_v36 = vpop.f32.mrf.mxu0  ;;  %v19166_v62 = vadd.f32 %v5955_v0, %v4977_v42  ;;  %v6611_v0 = vsel %vm2653_vm3, %v6606_v37, %v6610_v49  ;;  %v9971_v12 = vsel %vm2653_vm3, %v9966_v47, %v9970_v52  ;;  %v6616_v37 = vshll.u32 %v17476_v11, 16 }
 0x53d   : > { %22593 = vst [vmem:[#allocation38_spill] sm:$0xff] %v19166_v62 }
 0x53e   : > { %v3683_v16 = vpop.f32.mrf.mxu2 }
 0x53f   : > { %v3841_v17 = vadd.f32 %v3683_v16, %v2143_v24 }
 0x540   : > { %v2145_v58 = vpop.f32.mrf.mxu1  ;;  %v19172_v3 = vpop.f32.mrf.mxu3 }
 0x541   : > { %v4978_v32 = vadd.f32 %v19111_v53, %v3841_v17  ;;  %v2146_v51 = vadd.f32 %v2145_v58, %v22596_v14  ;;  %v9972_v17 = vshrl.u32 %v19157_v35, 16  ;;  %v9976_v58 = vshll.u32 %v17609_v29, 16 }
 0x543   : > { %v5960_v9 = vpop.f32.mrf.mxu0  ;;  %16201 = vmatmul.msk.bf16.vlgmr.msra.gmra.mxu1 %vm770_vm2, %v6611_v0  ;;  %16528 = vmatmul.msk.bf16.vlgmr.msra.gmra.mxu2 %vm770_vm2, %v8283_v41  ;;  %v19179_v16 = vadd.f32 %v5957_v36, %v4978_v32  ;;  %v8288_v36 = vshll.u32 %v19184_v33, 16  ;;  %v6614_v41 = vor.u32 %v6612_v5, %v6610_v49  ;;  %v6618_v32 = vrot.slane %v6616_v37, 1 }
 0x545   : > { %22595 = vst [vmem:[#allocation41_spill] sm:$0xff] %v19179_v16  ;;  %16994 = vmatmul.msk.bf16.gmra.mxu3 %vm770_vm2, %v9971_v12  ;;  %v8290_v12 = vrot.slane %v8288_v36, 1  ;;  %v9978_v16 = vrot.slane %v9976_v58, 1  ;;  %v6619_v35 = vsel %vm2653_vm3, %v6614_v41, %v6618_v32  ;;  %v19214_v36 = vld [vmem:[%s17763_s25 + $0x28] sm:$0xff] }
 0x546   : > { %17059 = vmatmul.msk.bf16.vlgmr.msra.gmra.mxu0 %vm770_vm2, %v11157_v20  ;;  %v3686_v53 = vpop.f32.mrf.mxu2  ;;  %v8286_v20 = vor.u32 %v8284_v56, %v8282_v59  ;;  %v17477_v56 = vld [vmem:[%s17763_s25 + $0x480] sm:$0xff]  ;;  %v17610_v58 = vld [vmem:[%s17763_s25 + $0x26c] sm:$0xff] }
 0x547   : > { %v3842_v55 = vadd.f32 %v3686_v53, %v2146_v51  ;;  %v9974_v53 = vor.u32 %v9972_v17, %v9970_v52 }
 0x548   : > { %v2147_v42 = vpop.f32.mrf.mxu1  ;;  %v19192_v23 = vpop.f32.mrf.mxu3 }
 0x549   : > { %v4979_v24 = vadd.f32 %v19125_v28, %v3842_v55  ;;  %v2148_v14 = vadd.f32 %v2147_v42, %v22598_v19  ;;  %v11159_v42 = vsel %vm11154_vm4, %v11156_v39, %v11158_v57  ;;  %v9979_v37 = vsel %vm2653_vm3, %v9974_v53, %v9978_v16 }
 0x54a   : > { %v6624_v19 = vshll.u32 %v17477_v56, 16 }
 0x54b   : > { %v5962_v47 = vpop.f32.mrf.mxu0  ;;  %v19196_v0 = vadd.f32 %v5960_v9, %v4979_v24  ;;  %v8291_v9 = vsel %vm2653_vm3, %v8286_v20, %v8290_v12  ;;  %v22600_v24 = vld [vmem:[#allocation50_spill] sm:$0xff]  ;;  %v6620_v20 = vshrl.u32 %v17476_v11, 16 }
 0x54d   : > { %22597 = vst [vmem:[#allocation44_spill] sm:$0xff] %v19196_v0 }
 0x54e   : > { %v3688_v51 = vpop.f32.mrf.mxu2 }
 0x54f   : > { %v3843_v28 = vadd.f32 %v3688_v51, %v2148_v14  ;;  %v8292_v14 = vshrl.u32 %v19184_v33, 16 }
 0x550   : > { %v2150_v55 = vpop.f32.mrf.mxu1  ;;  %v19202_v49 = vpop.f32.mrf.mxu3 }
 0x551   : > { %v4980_v59 = vadd.f32 %v19136_v50, %v3843_v28  ;;  %v2151_v17 = vadd.f32 %v2150_v55, %v22600_v24 }
 0x553   : > { %v5965_v5 = vpop.f32.mrf.mxu0  ;;  %16202 = vmatmul.msk.bf16.gmra.mxu1 %vm770_vm2, %v6619_v35  ;;  %16529 = vmatmul.msk.bf16.gmra.mxu2 %vm770_vm2, %v8291_v9  ;;  %v19209_v52 = vadd.f32 %v5962_v47, %v4980_v59  ;;  %v8296_v47 = vshll.u32 %v19214_v36, 16  ;;  %v9980_v35 = vshrl.u32 %v17609_v29, 16  ;;  %v9984_v9 = vshll.u32 %v17610_v58, 16 }
 0x554   : > { %v6622_v59 = vor.u32 %v6620_v20, %v6618_v32 }
 0x555   : > { %22599 = vst [vmem:[#allocation47_spill] sm:$0xff] %v19209_v52  ;;  %16995 = vmatmul.msk.bf16.gmra.mxu3 %vm770_vm2, %v9979_v37  ;;  %v8294_v37 = vor.u32 %v8292_v14, %v8290_v12  ;;  %v8298_v24 = vrot.slane %v8296_v47, 1  ;;  %v9982_v52 = vor.u32 %v9980_v35, %v9978_v16  ;;  %v9986_v0 = vrot.slane %v9984_v9, 1  ;;  %v19242_v14 = vld [vmem:[%s17763_s25 + $0x30] sm:$0xff] }
 0x556   : > { %17060 = vmatmul.msk.bf16.gmra.mxu0 %vm770_vm2, %v11159_v42  ;;  %v3691_v50 = vpop.f32.mrf.mxu2  ;;  %v6626_v42 = vrot.slane %v6624_v19, 1  ;;  %v17478_v19 = vld [vmem:[%s17763_s25 + $0x488] sm:$0xff]  ;;  %v22604_v47 = vld [vmem:[#allocation56_spill] sm:$0xff] }
 0x557   : > { %v3844_v39 = vadd.f32 %v3691_v50, %v2151_v17  ;;  %v22602_v17 = vld [vmem:[#allocation53_spill] sm:$0xff]  ;;  %v11160_v50 = vrot.slane %v19214_v36, 1  ;;  %v9987_v20 = vsel %vm2653_vm3, %v9982_v52, %v9986_v0  ;;  %v6628_v52 = vshrl.u32 %v17477_v56, 16 }
 0x558   : > { %v2152_v41 = vpop.f32.mrf.mxu1  ;;  %v19221_v51 = vpop.f32.mrf.mxu3  ;;  %v6627_v29 = vsel %vm2653_vm3, %v6622_v59, %v6626_v42  ;;  %v6632_v9 = vshll.u32 %v17478_v19, 16  ;;  %v8300_v59 = vshrl.u32 %v19214_v36, 16 }
 0x559   : > { %v4981_v53 = vadd.f32 %v19161_v63, %v3844_v39  ;;  %v2153_v11 = vadd.f32 %v2152_v41, %v22602_v17  ;;  %v11161_v41 = vsel %vm11154_vm4, %v11158_v57, %v11160_v50 }
 0x55b   : > { %v5967_v28 = vpop.f32.mrf.mxu0  ;;  %v19224_v55 = vadd.f32 %v5965_v5, %v4981_v53  ;;  %v8299_v5 = vsel %vm2653_vm3, %v8294_v37, %v8298_v24 }
 0x55d   : > { %22601 = vst [vmem:[#allocation50_spill] sm:$0xff] %v19224_v55 }
 0x55e   : > { %v3693_v33 = vpop.f32.mrf.mxu2 }
 0x55f   : > { %v3845_v62 = vadd.f32 %v3693_v33, %v2153_v11  ;;  %v9988_v33 = vshrl.u32 %v17610_v58, 16 }
 0x560   : > { %v2155_v63 = vpop.f32.mrf.mxu1  ;;  %v19230_v32 = vpop.f32.mrf.mxu3 }
 0x561   : > { %v4982_v12 = vadd.f32 %v19172_v3, %v3845_v62  ;;  %v2156_v53 = vadd.f32 %v2155_v63, %v22604_v47  ;;  %v17611_v3 = vld [vmem:[%s17763_s25 + $0x274] sm:$0xff]  ;;  %v22606_v47 = vld [vmem:[#allocation59_spill] sm:$0xff] }
 0x563   : > { %v5970_v39 = vpop.f32.mrf.mxu0  ;;  %16203 = vmatmul.msk.bf16.gmra.mxu1 %vm770_vm2, %v6627_v29  ;;  %16530 = vmatmul.msk.bf16.gmra.mxu2 %vm770_vm2, %v8299_v5  ;;  %v19237_v16 = vadd.f32 %v5967_v28, %v4982_v12  ;;  %v8304_v28 = vshll.u32 %v19242_v14, 16  ;;  %v9992_v29 = vshll.u32 %v17611_v3, 16  ;;  %v6630_v5 = vor.u32 %v6628_v52, %v6626_v42 }
 0x564   : > { %v6634_v12 = vrot.slane %v6632_v9, 1  ;;  %v17479_v9 = vld [vmem:[%s17763_s25 + $0x490] sm:$0xff] }
 0x565   : > { %22603 = vst [vmem:[#allocation53_spill] sm:$0xff] %v19237_v16  ;;  %16996 = vmatmul.msk.bf16.gmra.mxu3 %vm770_vm2, %v9987_v20  ;;  %v8306_v20 = vrot.slane %v8304_v28, 1  ;;  %v9994_v16 = vrot.slane %v9992_v29, 1  ;;  %v22608_v28 = vld [vmem:[#allocation62_spill] sm:$0xff]  ;;  %v6636_v29 = vshrl.u32 %v17478_v19, 16 }
 0x566   : > { %17061 = vmatmul.msk.bf16.gmra.mxu0 %vm770_vm2, %v11161_v41  ;;  %v3696_v62 = vpop.f32.mrf.mxu2  ;;  %v8302_v41 = vor.u32 %v8300_v59, %v8298_v24  ;;  %v6635_v58 = vsel %vm2653_vm3, %v6630_v5, %v6634_v12  ;;  %v19270_v59 = vld [vmem:[%s17763_s25 + $0x38] sm:$0xff]  ;;  %v6640_v5 = vshll.u32 %v17479_v9, 16 }
 0x567   : > { %v3846_v57 = vadd.f32 %v3696_v62, %v2156_v53  ;;  %v11162_v53 = vrot.slane %v19242_v14, 1  ;;  %v9990_v62 = vor.u32 %v9988_v33, %v9986_v0 }
 0x568   : > { %v2157_v35 = vpop.f32.mrf.mxu1  ;;  %v19249_v37 = vpop.f32.mrf.mxu3 }
 0x569   : > { %v4983_v17 = vadd.f32 %v19192_v23, %v3846_v57  ;;  %v2158_v56 = vadd.f32 %v2157_v35, %v22606_v47  ;;  %v11163_v35 = vsel %vm11154_vm4, %v11160_v50, %v11162_v53  ;;  %v9995_v52 = vsel %vm2653_vm3, %v9990_v62, %v9994_v16 }
 0x56a   : > { %v9996_v62 = vshrl.u32 %v17611_v3, 16 }
 0x56b   : > { %v5972_v11 = vpop.f32.mrf.mxu0  ;;  %v19252_v63 = vadd.f32 %v5970_v39, %v4983_v17  ;;  %v8307_v39 = vsel %vm2653_vm3, %v8302_v41, %v8306_v20  ;;  %v8308_v41 = vshrl.u32 %v19242_v14, 16 }
 0x56d   : > { %22605 = vst [vmem:[#allocation56_spill] sm:$0xff] %v19252_v63 }
 0x56e   : > { %v3698_v36 = vpop.f32.mrf.mxu2 }
 0x56f   : > { %v3847_v55 = vadd.f32 %v3698_v36, %v2158_v56 }
 0x570   : > { %v2160_v23 = vpop.f32.mrf.mxu1  ;;  %v19258_v42 = vpop.f32.mrf.mxu3 }
 0x571   : > { %v4984_v24 = vadd.f32 %v19202_v49, %v3847_v55  ;;  %v2161_v17 = vadd.f32 %v2160_v23, %v22608_v28  ;;  %v17612_v55 = vld [vmem:[%s17763_s25 + $0x27c] sm:$0xff] }
 0x572   : > { %v22610_v28 = vld [vmem:[#allocation65_spill] sm:$0xff] }
 0x573   : > { %v5975_v57 = vpop.f32.mrf.mxu0  ;;  %16204 = vmatmul.msk.bf16.gmra.mxu1 %vm770_vm2, %v6635_v58  ;;  %16531 = vmatmul.msk.bf16.gmra.mxu2 %vm770_vm2, %v8307_v39  ;;  %v19265_v0 = vadd.f32 %v5972_v11, %v4984_v24  ;;  %v8312_v11 = vshll.u32 %v19270_v59, 16  ;;  %v10000_v58 = vshll.u32 %v17612_v55, 16  ;;  %v6638_v39 = vor.u32 %v6636_v29, %v6634_v12 }
 0x574   : > { %v6642_v24 = vrot.slane %v6640_v5, 1  ;;  %v17480_v5 = vld [vmem:[%s17763_s25 + $0x498] sm:$0xff] }
 0x575   : > { %22607 = vst [vmem:[#allocation59_spill] sm:$0xff] %v19265_v0  ;;  %16997 = vmatmul.msk.bf16.gmra.mxu3 %vm770_vm2, %v9995_v52  ;;  %v8314_v52 = vrot.slane %v8312_v11, 1  ;;  %v10002_v0 = vrot.slane %v10000_v58, 1  ;;  %v22612_v11 = vld [vmem:[#allocation68_spill] sm:$0xff]  ;;  %v6644_v58 = vshrl.u32 %v17479_v9, 16 }
 0x576   : > { %17062 = vmatmul.msk.bf16.gmra.mxu0 %vm770_vm2, %v11163_v35  ;;  %v3701_v49 = vpop.f32.mrf.mxu2  ;;  %v8310_v35 = vor.u32 %v8308_v41, %v8306_v20  ;;  %v6643_v3 = vsel %vm2653_vm3, %v6638_v39, %v6642_v24  ;;  %v19298_v41 = vld [vmem:[%s17763_s25 + $0x40] sm:$0xff]  ;;  %v6648_v39 = vshll.u32 %v17480_v5, 16 }
 0x577   : > { %v3848_v50 = vadd.f32 %v3701_v49, %v2161_v17  ;;  %v11164_v17 = vrot.slane %v19270_v59, 1  ;;  %v9998_v49 = vor.u32 %v9996_v62, %v9994_v16 }
 0x578   : > { %v2162_v33 = vpop.f32.mrf.mxu1  ;;  %v19277_v47 = vpop.f32.mrf.mxu3 }
 0x579   : > { %v4985_v56 = vadd.f32 %v19221_v51, %v3848_v50  ;;  %v2163_v19 = vadd.f32 %v2162_v33, %v22610_v28  ;;  %v11165_v33 = vsel %vm11154_vm4, %v11162_v53, %v11164_v17  ;;  %v10003_v29 = vsel %vm2653_vm3, %v9998_v49, %v10002_v0 }
 0x57a   : > { %v10004_v49 = vshrl.u32 %v17612_v55, 16 }
 0x57b   : > { %v5977_v36 = vpop.f32.mrf.mxu0  ;;  %v19280_v23 = vadd.f32 %v5975_v57, %v4985_v56  ;;  %v8315_v57 = vsel %vm2653_vm3, %v8310_v35, %v8314_v52  ;;  %v8316_v35 = vshrl.u32 %v19270_v59, 16 }
 0x57d   : > { %22609 = vst [vmem:[#allocation62_spill] sm:$0xff] %v19280_v23 }
 0x57e   : > { %v3703_v14 = vpop.f32.mrf.mxu2 }
 0x57f   : > { %v3849_v63 = vadd.f32 %v3703_v14, %v2163_v19 }
 0x580   : > { %v2165_v51 = vpop.f32.mrf.mxu1  ;;  %v19286_v12 = vpop.f32.mrf.mxu3 }
 0x581   : > { %v4986_v20 = vadd.f32 %v19230_v32, %v3849_v63  ;;  %v2166_v56 = vadd.f32 %v2165_v51, %v22612_v11  ;;  %v17613_v63 = vld [vmem:[%s17763_s25 + $0x284] sm:$0xff] }
 0x582   : > { %v22614_v11 = vld [vmem:[#allocation71_spill] sm:$0xff] }
 0x583   : > { %v5980_v50 = vpop.f32.mrf.mxu0  ;;  %16205 = vmatmul.msk.bf16.gmra.mxu1 %vm770_vm2, %v6643_v3  ;;  %16532 = vmatmul.msk.bf16.gmra.mxu2 %vm770_vm2, %v8315_v57  ;;  %v19293_v16 = vadd.f32 %v5977_v36, %v4986_v20  ;;  %v8320_v36 = vshll.u32 %v19298_v41, 16  ;;  %v10008_v3 = vshll.u32 %v17613_v63, 16  ;;  %v6646_v57 = vor.u32 %v6644_v58, %v6642_v24 }
 0x584   : > { %v6650_v20 = vrot.slane %v6648_v39, 1  ;;  %v17481_v39 = vld [vmem:[%s17763_s25 + $0x4a0] sm:$0xff] }
 0x585   : > { %22611 = vst [vmem:[#allocation65_spill] sm:$0xff] %v19293_v16  ;;  %16998 = vmatmul.msk.bf16.gmra.mxu3 %vm770_vm2, %v10003_v29  ;;  %v8322_v29 = vrot.slane %v8320_v36, 1  ;;  %v10010_v16 = vrot.slane %v10008_v3, 1  ;;  %v22616_v36 = vld [vmem:[#allocation74_spill] sm:$0xff]  ;;  %v6652_v3 = vshrl.u32 %v17480_v5, 16 }
 0x586   : > { %17063 = vmatmul.msk.bf16.gmra.mxu0 %vm770_vm2, %v11165_v33  ;;  %v3706_v32 = vpop.f32.mrf.mxu2  ;;  %v8318_v33 = vor.u32 %v8316_v35, %v8314_v52  ;;  %v6651_v55 = vsel %vm2653_vm3, %v6646_v57, %v6650_v20  ;;  %v19326_v35 = vld [vmem:[%s17763_s25 + $0x48] sm:$0xff]  ;;  %v6656_v57 = vshll.u32 %v17481_v39, 16 }
 0x587   : > { %v3850_v53 = vadd.f32 %v3706_v32, %v2166_v56  ;;  %v11166_v56 = vrot.slane %v19298_v41, 1  ;;  %v10006_v32 = vor.u32 %v10004_v49, %v10002_v0 }
 0x588   : > { %v2167_v62 = vpop.f32.mrf.mxu1  ;;  %v19305_v28 = vpop.f32.mrf.mxu3 }
 0x589   : > { %v4987_v19 = vadd.f32 %v19249_v37, %v3850_v53  ;;  %v2168_v9 = vadd.f32 %v2167_v62, %v22614_v11  ;;  %v11167_v62 = vsel %vm11154_vm4, %v11164_v17, %v11166_v56  ;;  %v10011_v58 = vsel %vm2653_vm3, %v10006_v32, %v10010_v16 }
 0x58a   : > { %v10012_v32 = vshrl.u32 %v17613_v63, 16 }
 0x58b   : > { %v5982_v14 = vpop.f32.mrf.mxu0  ;;  %v19308_v51 = vadd.f32 %v5980_v50, %v4987_v19  ;;  %v8323_v50 = vsel %vm2653_vm3, %v8318_v33, %v8322_v29  ;;  %v8324_v33 = vshrl.u32 %v19298_v41, 16 }
 0x58d   : > { %22613 = vst [vmem:[#allocation68_spill] sm:$0xff] %v19308_v51 }
 0x58e   : > { %v3708_v59 = vpop.f32.mrf.mxu2 }
 0x58f   : > { %v3851_v23 = vadd.f32 %v3708_v59, %v2168_v9 }
 0x590   : > { %v2170_v37 = vpop.f32.mrf.mxu1  ;;  %v19314_v24 = vpop.f32.mrf.mxu3 }
 0x591   : > { %v4988_v52 = vadd.f32 %v19258_v42, %v3851_v23  ;;  %v2171_v19 = vadd.f32 %v2170_v37, %v22616_v36  ;;  %v17614_v23 = vld [vmem:[%s17763_s25 + $0x28c] sm:$0xff]  ;;  %v22618_v36 = vld [vmem:[#allocation77_spill] sm:$0xff] }
 0x593   : > { %v5985_v53 = vpop.f32.mrf.mxu0  ;;  %16206 = vmatmul.msk.bf16.gmra.mxu1 %vm770_vm2, %v6651_v55  ;;  %16533 = vmatmul.msk.bf16.gmra.mxu2 %vm770_vm2, %v8323_v50  ;;  %v19321_v0 = vadd.f32 %v5982_v14, %v4988_v52  ;;  %v8328_v14 = vshll.u32 %v19326_v35, 16  ;;  %v10016_v55 = vshll.u32 %v17614_v23, 16  ;;  %v6654_v50 = vor.u32 %v6652_v3, %v6650_v20 }
 0x594   : > { %v6658_v52 = vrot.slane %v6656_v57, 1  ;;  %v17482_v57 = vld [vmem:[%s17763_s25 + $0x4a8] sm:$0xff] }
 0x595   : > { %22615 = vst [vmem:[#allocation71_spill] sm:$0xff] %v19321_v0  ;;  %16999 = vmatmul.msk.bf16.gmra.mxu3 %vm770_vm2, %v10011_v58  ;;  %v8330_v58 = vrot.slane %v8328_v14, 1  ;;  %v10018_v0 = vrot.slane %v10016_v55, 1  ;;  %v22620_v14 = vld [vmem:[#allocation80_spill] sm:$0xff]  ;;  %v6660_v55 = vshrl.u32 %v17481_v39, 16 }
 0x596   : > { %17064 = vmatmul.msk.bf16.gmra.mxu0 %vm770_vm2, %v11167_v62  ;;  %v3711_v42 = vpop.f32.mrf.mxu2  ;;  %v8326_v62 = vor.u32 %v8324_v33, %v8322_v29  ;;  %v6659_v63 = vsel %vm2653_vm3, %v6654_v50, %v6658_v52  ;;  %v19354_v33 = vld [vmem:[%s17763_s25 + $0x50] sm:$0xff]  ;;  %v6664_v50 = vshll.u32 %v17482_v57, 16 }
 0x597   : > { %v3852_v17 = vadd.f32 %v3711_v42, %v2171_v19  ;;  %v11168_v19 = vrot.slane %v19326_v35, 1  ;;  %v10014_v42 = vor.u32 %v10012_v32, %v10010_v16 }
 0x598   : > { %v2172_v49 = vpop.f32.mrf.mxu1  ;;  %v19333_v11 = vpop.f32.mrf.mxu3 }
 0x599   : > { %v4989_v9 = vadd.f32 %v19277_v47, %v3852_v17  ;;  %v2173_v5 = vadd.f32 %v2172_v49, %v22618_v36  ;;  %v11169_v49 = vsel %vm11154_vm4, %v11166_v56, %v11168_v19  ;;  %v10019_v3 = vsel %vm2653_vm3, %v10014_v42, %v10018_v0 }
 0x59a   : > { %v10020_v42 = vshrl.u32 %v17614_v23, 16 }
 0x59b   : > { %v5987_v59 = vpop.f32.mrf.mxu0  ;;  %v19336_v37 = vadd.f32 %v5985_v53, %v4989_v9  ;;  %v8331_v53 = vsel %vm2653_vm3, %v8326_v62, %v8330_v58  ;;  %v8332_v62 = vshrl.u32 %v19326_v35, 16 }
 0x59d   : > { %22617 = vst [vmem:[#allocation74_spill] sm:$0xff] %v19336_v37 }
 0x59e   : > { %v3713_v41 = vpop.f32.mrf.mxu2 }
 0x59f   : > { %v3853_v51 = vadd.f32 %v3713_v41, %v2173_v5 }
 0x5a0   : > { %v2175_v47 = vpop.f32.mrf.mxu1  ;;  %v19342_v20 = vpop.f32.mrf.mxu3 }
 0x5a1   : > { %v4990_v29 = vadd.f32 %v19286_v12, %v3853_v51  ;;  %v2176_v9 = vadd.f32 %v2175_v47, %v22620_v14  ;;  %v17615_v51 = vld [vmem:[%s17763_s25 + $0x294] sm:$0xff]  ;;  %v22621_v14 = vld [vmem:[#allocation83_spill] sm:$0xff] }
 0x5a3   : > { %v5990_v17 = vpop.f32.mrf.mxu0  ;;  %16207 = vmatmul.msk.bf16.gmra.mxu1 %vm770_vm2, %v6659_v63  ;;  %16534 = vmatmul.msk.bf16.gmra.mxu2 %vm770_vm2, %v8331_v53  ;;  %v19349_v16 = vadd.f32 %v5987_v59, %v4990_v29  ;;  %v8336_v59 = vshll.u32 %v19354_v33, 16  ;;  %v10024_v63 = vshll.u32 %v17615_v51, 16  ;;  %v6662_v53 = vor.u32 %v6660_v55, %v6658_v52 }
 0x5a4   : > { %v6666_v29 = vrot.slane %v6664_v50, 1  ;;  %v17483_v50 = vld [vmem:[%s17763_s25 + $0x4b0] sm:$0xff] }
 0x5a5   : > { %22619 = vst [vmem:[#allocation77_spill] sm:$0xff] %v19349_v16  ;;  %17000 = vmatmul.msk.bf16.gmra.mxu3 %vm770_vm2, %v10019_v3  ;;  %v8338_v3 = vrot.slane %v8336_v59, 1  ;;  %v10026_v16 = vrot.slane %v10024_v63, 1  ;;  %v22623_v59 = vld [vmem:[#allocation86_spill] sm:$0xff]  ;;  %v6668_v63 = vshrl.u32 %v17482_v57, 16  ;;  %v22625_v57 = vld [vmem:[#allocation89_spill] sm:$0xff] }
 0x5a6   : > { %17065 = vmatmul.msk.bf16.gmra.mxu0 %vm770_vm2, %v11169_v49  ;;  %v3716_v12 = vpop.f32.mrf.mxu2  ;;  %v8334_v49 = vor.u32 %v8332_v62, %v8330_v58  ;;  %v6667_v23 = vsel %vm2653_vm3, %v6662_v53, %v6666_v29  ;;  %v19382_v62 = vld [vmem:[%s17763_s25 + $0x58] sm:$0xff]  ;;  %v6672_v53 = vshll.u32 %v17483_v50, 16 }
 0x5a7   : > { %v3854_v56 = vadd.f32 %v3716_v12, %v2176_v9  ;;  %v11170_v9 = vrot.slane %v19354_v33, 1  ;;  %v10022_v12 = vor.u32 %v10020_v42, %v10018_v0 }
 0x5a8   : > { %v2177_v32 = vpop.f32.mrf.mxu1  ;;  %v19361_v36 = vpop.f32.mrf.mxu3 }
 0x5a9   : > { %v4991_v5 = vadd.f32 %v19305_v28, %v3854_v56  ;;  %v2178_v39 = vadd.f32 %v2177_v32, %v22621_v14  ;;  %v11171_v32 = vsel %vm11154_vm4, %v11168_v19, %v11170_v9  ;;  %v10027_v55 = vsel %vm2653_vm3, %v10022_v12, %v10026_v16 }
 0x5aa   : > { %v10028_v12 = vshrl.u32 %v17615_v51, 16 }
 0x5ab   : > { %v5992_v41 = vpop.f32.mrf.mxu0  ;;  %v19364_v47 = vadd.f32 %v5990_v17, %v4991_v5  ;;  %v8339_v17 = vsel %vm2653_vm3, %v8334_v49, %v8338_v3  ;;  %v8340_v49 = vshrl.u32 %v19354_v33, 16  ;;  %v11172_v33 = vrot.slane %v19382_v62, 1 }
 0x5ae   : > { %v3718_v35 = vpop.f32.mrf.mxu2 }
 0x5af   : > { %v3855_v37 = vadd.f32 %v3718_v35, %v2178_v39 }
 0x5b0   : > { %v2180_v28 = vpop.f32.mrf.mxu1  ;;  %v19370_v52 = vpop.f32.mrf.mxu3 }
 0x5b1   : > { %v4992_v58 = vadd.f32 %v19314_v24, %v3855_v37  ;;  %v2181_v5 = vadd.f32 %v2180_v28, %v22623_v59  ;;  %v19387_v37 = vld [vmem:[%s17763_s25 + $0x29c] sm:$0xff] }
 0x5b2   : > { %v10032_v28 = vshll.u32 %v19387_v37, 16 }
 0x5b3   : > { %v5995_v56 = vpop.f32.mrf.mxu0  ;;  %16208 = vmatmul.msk.bf16.gmra.mxu1 %vm770_vm2, %v6667_v23  ;;  %16535 = vmatmul.msk.bf16.gmra.mxu2 %vm770_vm2, %v8339_v17  ;;  %v19377_v0 = vadd.f32 %v5992_v41, %v4992_v58  ;;  %v8344_v41 = vshll.u32 %v19382_v62, 16  ;;  %v6670_v17 = vor.u32 %v6668_v63, %v6666_v29  ;;  %v6674_v58 = vrot.slane %v6672_v53, 1 }
 0x5b5   : > { %22622 = vst [vmem:[#allocation80_spill] sm:$0xff] %v19377_v0  ;;  %17001 = vmatmul.msk.bf16.gmra.mxu3 %vm770_vm2, %v10027_v55  ;;  %v8346_v55 = vrot.slane %v8344_v41, 1  ;;  %v10034_v0 = vrot.slane %v10032_v28, 1  ;;  %v6675_v51 = vsel %vm2653_vm3, %v6670_v17, %v6674_v58  ;;  %v19415_v41 = vld [vmem:[%s17763_s25 + $0x60] sm:$0xff]  ;;  %v6676_v17 = vshrl.u32 %v17483_v50, 16 }
 0x5b6   : > { %17066 = vmatmul.msk.bf16.gmra.mxu0 %vm770_vm2, %v11171_v32  ;;  %v3721_v24 = vpop.f32.mrf.mxu2  ;;  %v8342_v32 = vor.u32 %v8340_v49, %v8338_v3  ;;  %v19412_v49 = vld [vmem:[%s17763_s25 + $0x4b8] sm:$0xff] }
 0x5b7   : > { %v3856_v19 = vadd.f32 %v3721_v24, %v2181_v5  ;;  %v10030_v24 = vor.u32 %v10028_v12, %v10026_v16 }
 0x5b8   : > { %v2182_v42 = vpop.f32.mrf.mxu1  ;;  %v19391_v14 = vpop.f32.mrf.mxu3 }
 0x5b9   : > { %v4993_v39 = vadd.f32 %v19333_v11, %v3856_v19  ;;  %v2183_v59 = vadd.f32 %v2182_v42, %v22625_v57  ;;  %v11173_v42 = vsel %vm11154_vm4, %v11170_v9, %v11172_v33  ;;  %v10035_v53 = vsel %vm2653_vm3, %v10030_v24, %v10034_v0  ;;  %v19420_v9 = vld [vmem:[%s17763_s25 + $0x2a4] sm:$0xff] }
 0x5ba   : > { %v8352_v57 = vshll.u32 %v19415_v41, 16  ;;  %v10040_v50 = vshll.u32 %v19420_v9, 16 }
 0x5bb   : > { %v5997_v35 = vpop.f32.mrf.mxu0  ;;  %v19395_v23 = vadd.f32 %v5995_v56, %v4993_v39  ;;  %v8347_v56 = vsel %vm2653_vm3, %v8342_v32, %v8346_v55  ;;  %v6680_v32 = vshll.u32 %v19412_v49, 16 }
 0x5bd   : > { %22624 = vst [vmem:[#allocation83_spill] sm:$0xff] %v19395_v23 }
 0x5be   : > { %v3723_v5 = vpop.f32.mrf.mxu2 }
 0x5bf   : > { %v3857_v11 = vadd.f32 %v3723_v5, %v2183_v59 }
 0x5c0   : > { %v7342_v19 = vpop.f32.mrf.mxu1  ;;  %v19401_v29 = vpop.f32.mrf.mxu3 }
 0x5c1   : > { %v4994_v3 = vadd.f32 %v19342_v20, %v3857_v11  ;;  %v7672_v39 = vadd.f32 %v7342_v19, %v18269_v31  ;;  %v19431_v31 = vld [vmem:[%s22332_s2] ss:$0 sm:$0xff]  ;;  %v10036_v11 = vshrl.u32 %v19387_v37, 16 }
 0x5c3   : > { %v11498_v63 = vpop.f32.mrf.mxu0  ;;  %16209 = vmatmul.msk.bf16.gmra.mxu1 %vm770_vm2, %v6675_v51  ;;  %16536 = vmatmul.msk.bf16.gmra.mxu2 %vm770_vm2, %v8347_v56  ;;  %v19408_v16 = vadd.f32 %v5997_v35, %v4994_v3  ;;  %v8348_v35 = vshrl.u32 %v19382_v62, 16  ;;  %v6678_v51 = vor.u32 %v6676_v17, %v6674_v58  ;;  %v6682_v62 = vrot.slane %v6680_v32, 1 }
 0x5c4   : > { %v8354_v3 = vrot.slane %v8352_v57, 1 }
 0x5c5   : > { %22626 = vst [vmem:[#allocation86_spill] sm:$0xff] %v19408_v16  ;;  %17002 = vmatmul.msk.bf16.gmra.mxu3 %vm770_vm2, %v10035_v53  ;;  %v8350_v56 = vor.u32 %v8348_v35, %v8346_v55  ;;  %v11174_v53 = vrot.slane %v19415_v41, 1 }
 0x5c6   : > { %17067 = vmatmul.msk.bf16.gmra.mxu0 %vm770_vm2, %v11173_v42  ;;  %v9014_v20 = vpop.f32.mrf.mxu2 }
 0x5c7   : > { %v9344_v12 = vadd.f32 %v9014_v20, %v7672_v39  ;;  %v10038_v20 = vor.u32 %v10036_v11, %v10034_v0  ;;  %v8355_v58 = vsel %vm2653_vm3, %v8350_v56, %v8354_v3  ;;  %v11175_v0 = vsel %vm11154_vm4, %v11172_v33, %v11174_v53 }
 0x5c8   : > { %v7344_v28 = vpop.f32.mrf.mxu1  ;;  %v19425_v59 = vpop.f32.mrf.mxu3 }
 0x5c9   : > { %v11016_v5 = vadd.f32 %v19361_v36, %v9344_v12  ;;  %v7673_v36 = vadd.f32 %v7344_v28, %v18278_v60  ;;  %v10042_v12 = vrot.slane %v10040_v50, 1 }
 0x5cb   : > { %v11500_v24 = vpop.f32.mrf.mxu0  ;;  %v11828_v19 = vadd.f32 %v11498_v63, %v11016_v5  ;;  %v6683_v63 = vsel %vm2653_vm3, %v6678_v51, %v6682_v62  ;;  %v10043_v32 = vsel %vm2653_vm3, %v10038_v20, %v10042_v12  ;;  %v6684_v51 = vshrl.u32 %v19412_v49, 16 }
 0x5cd   : > { %v11964_v42 = vadd.f32 %v19431_v31, %v11828_v19  ;;  %v6686_v49 = vor.u32 %v6684_v51, %v6682_v62 }
 0x5ce   : > { %v9016_v39 = vpop.f32.mrf.mxu2 }
 0x5cf   : > { %v12096_v16 = vmax.f32 %v11964_v42, 0.0  ;;  %v9345_v23 = vadd.f32 %v9016_v39, %v7673_v36  ;;  %v8356_v42 = vshrl.u32 %v19415_v41, 16 }
 0x5d0   : > { %v7347_v37 = vpop.f32.mrf.mxu1  ;;  %v19441_v55 = vpop.f32.mrf.mxu3 }
 0x5d1   : > { %v12228_v17 = vmin.f32 %v12096_v16, 6.0  ;;  %v11017_v60 = vadd.f32 %v19370_v52, %v9345_v23  ;;  %v19457_v52 = vld [vmem:[%s17763_s25 + $0x4c0] sm:$0xff]  ;;  %v19460_v23 = vld [vmem:[%s17763_s25 + $0x68] sm:$0xff]  ;;  %v7674_v16 = vadd.f32 %v7347_v37, %v18284_v13 }
 0x5d2   : > { %v6688_v56 = vshll.u32 %v19457_v52, 16  ;;  %v8360_v36 = vshll.u32 %v19460_v23, 16 }
 0x5d3   : > { %v11503_v28 = vpop.f32.mrf.mxu0  ;;  %v12360_v35 = vpack.c.bf16 %v12228_v17, %v12228_v17  ;;  %v11829_v57 = vadd.f32 %v11500_v24, %v11017_v60  ;;  %16210 = vmatmul.msk.bf16.gmra.mxu1 %vm770_vm2, %v6683_v63  ;;  %16537 = vmatmul.msk.bf16.gmra.mxu2 %vm770_vm2, %v8355_v58  ;;  %v19468_v24 = vld [vmem:[%s17763_s25 + $0x2ac] sm:$0xff]  ;;  %v10044_v63 = vshrl.u32 %v19420_v9, 16 }
 0x5d4   : > { %v10048_v58 = vshll.u32 %v19468_v24, 16 }
 0x5d5   : > { %12365 = vst.msk [vmem:[%s19450_s15] sm:$0xf] %vm12364_vm5, %v12360_v35  ;;  %v11965_v33 = vadd.f32 %v19431_v31, %v11829_v57  ;;  %17003 = vmatmul.msk.bf16.gmra.mxu3 %vm770_vm2, %v10043_v32  ;;  %v8358_v32 = vor.u32 %v8356_v42, %v8354_v3  ;;  %v8362_v35 = vrot.slane %v8360_v36, 1 }
 0x5d6   : > { %17068 = vmatmul.msk.bf16.gmra.mxu0 %vm770_vm2, %v11175_v0  ;;  %v9019_v5 = vpop.f32.mrf.mxu2  ;;  %v6690_v0 = vrot.slane %v6688_v56, 1 }
 0x5d7   : > { %v12097_v11 = vmax.f32 %v11965_v33, 0.0  ;;  %v9346_v50 = vadd.f32 %v9019_v5, %v7674_v16  ;;  %v11176_v16 = vrot.slane %v19460_v23, 1  ;;  %v10046_v5 = vor.u32 %v10044_v63, %v10042_v12 }
 0x5d8   : > { %v7349_v19 = vpop.f32.mrf.mxu1  ;;  %v19474_v39 = vpop.f32.mrf.mxu3  ;;  %v6691_v62 = vsel %vm2653_vm3, %v6686_v49, %v6690_v0  ;;  %v8363_v3 = vsel %vm2653_vm3, %v8358_v32, %v8362_v35  ;;  %v6692_v49 = vshrl.u32 %v19457_v52, 16 }
 0x5d9   : > { %v12229_v13 = vmin.f32 %v12097_v11, 6.0  ;;  %v11018_v20 = vadd.f32 %v19391_v14, %v9346_v50  ;;  %v7675_v33 = vadd.f32 %v7349_v19, %v18293_v7  ;;  %v10050_v11 = vrot.slane %v10048_v58, 1 }
 0x5da   : > { %v11177_v12 = vsel %vm11154_vm4, %v11174_v53, %v11176_v16  ;;  %v6694_v52 = vor.u32 %v6692_v49, %v6690_v0 }
 0x5db   : > { %v11505_v37 = vpop.f32.mrf.mxu0  ;;  %v12361_v17 = vpack.c.bf16 %v12229_v13, %v12229_v13  ;;  %v11830_v60 = vadd.f32 %v11503_v28, %v11018_v20  ;;  %v10051_v42 = vsel %vm2653_vm3, %v10046_v5, %v10050_v11  ;;  %v19499_v20 = vld [vmem:[%s17763_s25 + $0x4c8] sm:$0xff] }
 0x5dc   : > { %v6696_v32 = vshll.u32 %v19499_v20, 16 }
 0x5dd   : > { %12366 = vst.msk [vmem:[%s19450_s15 + $0x4] sm:$0xf] %vm12364_vm5, %v12361_v17  ;;  %v11966_v57 = vadd.f32 %v19431_v31, %v11830_v60  ;;  %v19510_v17 = vld [vmem:[%s17763_s25 + $0x2b4] sm:$0xff] }
 0x5de   : > { %v9021_v14 = vpop.f32.mrf.mxu2 }
 0x5df   : > { %v12098_v9 = vmax.f32 %v11966_v57, 0.0  ;;  %v9347_v50 = vadd.f32 %v9021_v14, %v7675_v33  ;;  %v8364_v57 = vshrl.u32 %v19460_v23, 16 }
 0x5e0   : > { %v7352_v28 = vpop.f32.mrf.mxu1  ;;  %v19486_v51 = vpop.f32.mrf.mxu3 }
 0x5e1   : > { %v12230_v56 = vmin.f32 %v12098_v9, 6.0  ;;  %v11019_v7 = vadd.f32 %v19401_v29, %v9347_v50  ;;  %v19502_v29 = vld [vmem:[%s17763_s25 + $0x70] sm:$0xff]  ;;  %v7676_v53 = vadd.f32 %v7352_v28, %v18299_v48  ;;  %v10052_v50 = vshrl.u32 %v19468_v24, 16 }
 0x5e2   : > { %v8368_v33 = vshll.u32 %v19502_v29, 16  ;;  %v10056_v28 = vshll.u32 %v19510_v17, 16 }
 0x5e3   : > { %v11508_v19 = vpop.f32.mrf.mxu0  ;;  %v12362_v36 = vpack.c.bf16 %v12230_v56, %v12230_v56  ;;  %v11831_v13 = vadd.f32 %v11505_v37, %v11019_v7  ;;  %16211 = vmatmul.msk.bf16.gmra.mxu1 %vm770_vm2, %v6691_v62  ;;  %16538 = vmatmul.msk.bf16.gmra.mxu2 %vm770_vm2, %v8363_v3  ;;  %v6698_v56 = vrot.slane %v6696_v32, 1  ;;  %v8366_v7 = vor.u32 %v8364_v57, %v8362_v35 }
 0x5e5   : > { %12367 = vst.msk [vmem:[%s19450_s15 + $0x8] sm:$0xf] %vm12364_vm5, %v12362_v36  ;;  %v11967_v41 = vadd.f32 %v19431_v31, %v11831_v13  ;;  %17004 = vmatmul.msk.bf16.gmra.mxu3 %vm770_vm2, %v10051_v42  ;;  %v11178_v13 = vrot.slane %v19502_v29, 1  ;;  %v6699_v0 = vsel %vm2653_vm3, %v6694_v52, %v6698_v56 }
 0x5e6   : > { %17069 = vmatmul.msk.bf16.gmra.mxu0 %vm770_vm2, %v11177_v12  ;;  %v9024_v63 = vpop.f32.mrf.mxu2  ;;  %v8370_v12 = vrot.slane %v8368_v33, 1  ;;  %v19541_v33 = vld [vmem:[%s17763_s25 + $0x4d0] sm:$0xff] }
 0x5e7   : > { %v12099_v37 = vmax.f32 %v11967_v41, 0.0  ;;  %v9348_v58 = vadd.f32 %v9024_v63, %v7676_v53  ;;  %v10054_v41 = vor.u32 %v10052_v50, %v10050_v11  ;;  %v10058_v53 = vrot.slane %v10056_v28, 1 }
 0x5e8   : > { %v7354_v60 = vpop.f32.mrf.mxu1  ;;  %v19516_v14 = vpop.f32.mrf.mxu3  ;;  %v8371_v35 = vsel %vm2653_vm3, %v8366_v7, %v8370_v12  ;;  %v11179_v11 = vsel %vm11154_vm4, %v11176_v16, %v11178_v13  ;;  %v6700_v50 = vshrl.u32 %v19499_v20, 16  ;;  %v19551_v7 = vld [vmem:[%s17763_s25 + $0x2bc] sm:$0xff] }
 0x5e9   : > { %v12231_v48 = vmin.f32 %v12099_v37, 6.0  ;;  %v11020_v5 = vadd.f32 %v19425_v59, %v9348_v58  ;;  %v7677_v36 = vadd.f32 %v7354_v60, %v18308_v43  ;;  %v10059_v60 = vsel %vm2653_vm3, %v10054_v41, %v10058_v53 }
 0x5eb   : > { %v11510_v9 = vpop.f32.mrf.mxu0  ;;  %v12363_v62 = vpack.c.bf16 %v12231_v48, %v12231_v48  ;;  %v11832_v3 = vadd.f32 %v11508_v19, %v11020_v5 }
 0x5ed   : > { %12368 = vst.msk [vmem:[%s19450_s15 + $0xc] sm:$0xf] %vm12364_vm5, %v12363_v62  ;;  %v11968_v42 = vadd.f32 %v19431_v31, %v11832_v3 }
 0x5ee   : > { %v9026_v59 = vpop.f32.mrf.mxu2 }
 0x5ef   : > { %v12100_v24 = vmax.f32 %v11968_v42, 0.0  ;;  %v9349_v63 = vadd.f32 %v9026_v59, %v7677_v36  ;;  %v6704_v36 = vshll.u32 %v19541_v33, 16  ;;  %v8372_v59 = vshrl.u32 %v19502_v29, 16  ;;  %v19600_v29 = vld [vmem:[%s17763_s25 + $0x80] sm:$0xff] }
 0x5f0   : > { %v7357_v19 = vpop.f32.mrf.mxu1  ;;  %v19528_v37 = vpop.f32.mrf.mxu3 }
 0x5f1   : > { %v12232_v58 = vmin.f32 %v12100_v24, 6.0  ;;  %v11021_v49 = vadd.f32 %v19441_v55, %v9349_v63  ;;  %v19544_v55 = vld [vmem:[%s17763_s25 + $0x78] sm:$0xff]  ;;  %v7678_v16 = vadd.f32 %v7357_v19, %v18314_v44 }
 0x5f2   : > { %v8376_v41 = vshll.u32 %v19544_v55, 16 }
 0x5f3   : > { %v11513_v43 = vpop.f32.mrf.mxu0  ;;  %v12369_v32 = vpack.c.bf16 %v12232_v58, %v12232_v58  ;;  %v11833_v57 = vadd.f32 %v11510_v9, %v11021_v49  ;;  %16212 = vmatmul.msk.bf16.gmra.mxu1 %vm770_vm2, %v6699_v0  ;;  %16539 = vmatmul.msk.bf16.gmra.mxu2 %vm770_vm2, %v8371_v35  ;;  %v10060_v0 = vshrl.u32 %v19510_v17, 16  ;;  %v10064_v35 = vshll.u32 %v19551_v7, 16 }
 0x5f5   : > { %v12378_v48 = vshrl.u32 %v12369_v32, 16  ;;  %v12381_v5 = vshll.u32 %v12369_v32, 16  ;;  %v11969_v23 = vadd.f32 %v19431_v31, %v11833_v57  ;;  %17005 = vmatmul.msk.bf16.gmra.mxu3 %vm770_vm2, %v10059_v60  ;;  %v19561_v60 = vrot.slane %v6704_v36, 1 }
 0x5f6   : > { %17070 = vmatmul.msk.bf16.gmra.mxu0 %vm770_vm2, %v11179_v11  ;;  %v9029_v9 = vpop.f32.mrf.mxu2  ;;  %v6702_v11 = vor.u32 %v6700_v50, %v6698_v56  ;;  %v8374_v32 = vor.u32 %v8372_v59, %v8370_v12  ;;  %v19563_v57 = vrot.slane %v8376_v41, 1  ;;  %v19573_v12 = vrot.slane %v10064_v35, 1 }
 0x5f7   : > { %v12380_v28 = vrot.slane %v12378_v48, 4  ;;  %v12383_v62 = vrot.slane %v12381_v5, 5  ;;  %v12101_v3 = vmax.f32 %v11969_v23, 0.0  ;;  %v9350_v52 = vadd.f32 %v9029_v9, %v7678_v16  ;;  %v22132_v9 = vld [vmem:[%s17763_s25 + $0x670] sm:$0xff] }
 0x5f8   : > { %v7359_v42 = vpop.f32.mrf.mxu1  ;;  %v19556_v24 = vpop.f32.mrf.mxu3  ;;  %v11180_v48 = vrot.slane %v19544_v55, 1  ;;  %v6707_v36 = vsel %vm2653_vm3, %v6702_v11, %v19561_v60 }
 0x5f9   : > { %v12233_v44 = vmin.f32 %v12101_v3, 6.0  ;;  %v11022_v63 = vadd.f32 %v19474_v39, %v9350_v52  ;;  %v12384_v20 = vor.u32 %v12383_v62, %v12380_v28  ;;  %v7679_v16 = vadd.f32 %v7359_v42, %v18323_v30 }
 0x5fa   : > { %v8379_v30 = vsel %vm2653_vm3, %v8374_v32, %v19563_v57 }
 0x5fb   : > { %v11515_v19 = vpop.f32.mrf.mxu0  ;;  %v12370_v58 = vpack.c.bf16 %v12233_v44, %v12233_v44  ;;  %v11834_v49 = vadd.f32 %v11513_v43, %v11022_v63  ;;  %v12385_v17 = vrot.slane %v12384_v20, 4  ;;  %v10062_v43 = vor.u32 %v10060_v0, %v10058_v53 }
 0x5fc   : > { %v11181_v63 = vsel %vm11154_vm4, %v11178_v13, %v11180_v48 }
 0x5fd   : > { %v12387_v5 = vshll.u32 %v12370_v58, 16  ;;  %v12391_v39 = vshrl.u32 %v12370_v58, 16  ;;  %v11970_v23 = vadd.f32 %v19431_v31, %v11834_v49  ;;  %v10067_v0 = vsel %vm2653_vm3, %v10062_v43, %v19573_v12  ;;  %v19607_v43 = vld [vmem:[%s17763_s25 + $0x2c4] sm:$0xff] }
 0x5fe   : > { %v9031_v56 = vpop.f32.mrf.mxu2 }
 0x5ff   : > { %v12389_v50 = vrot.slane %v12387_v5, 5  ;;  %v12393_v28 = vrot.slane %v12391_v39, 4  ;;  %v12102_v62 = vmax.f32 %v11970_v23, 0.0  ;;  %v9351_v3 = vadd.f32 %v9031_v56, %v7679_v16 }
 0x600   : > { %v7362_v52 = vpop.f32.mrf.mxu1  ;;  %v19579_v42 = vpop.f32.mrf.mxu3  ;;  %v6708_v39 = vshrl.u32 %v19541_v33, 16 }
 0x601   : > { %v12390_v53 = vsel %vm19569_vm8, %v12385_v17, %v12389_v50  ;;  %v12234_v59 = vmin.f32 %v12102_v62, 6.0  ;;  %v11023_v41 = vadd.f32 %v19486_v51, %v9351_v3  ;;  %v12394_v20 = vor.u32 %v12393_v28, %v12389_v50  ;;  %v19597_v51 = vld [vmem:[%s17763_s25 + $0x4d8] sm:$0xff] }
 0x602   : > { %12425 = vst.msk [vmem:[%s19450_s15 + $0x10] sm:$0xf] %vm12364_vm5, %v12390_v53  ;;  %v7680_v32 = vadd.f32 %v7362_v52, %v18329_v61  ;;  %v6712_v28 = vshll.u32 %v19597_v51, 16  ;;  %v8380_v62 = vshrl.u32 %v19544_v55, 16  ;;  %v8384_v61 = vshll.u32 %v19600_v29, 16 }
 0x603   : > { %v11518_v44 = vpop.f32.mrf.mxu0  ;;  %v12371_v35 = vpack.c.bf16 %v12234_v59, %v12234_v59  ;;  %v11835_v58 = vadd.f32 %v11515_v19, %v11023_v41  ;;  %16213 = vmatmul.msk.bf16.gmra.mxu1 %vm770_vm2, %v6707_v36  ;;  %16540 = vmatmul.msk.bf16.gmra.mxu2 %vm770_vm2, %v8379_v30  ;;  %v12395_v19 = vrot.slane %v12394_v20, 4  ;;  %v10068_v59 = vshrl.u32 %v19551_v7, 16 }
 0x604   : > { %v10072_v41 = vshll.u32 %v19607_v43, 16 }
 0x605   : > { %v12397_v13 = vshll.u32 %v12371_v35, 16  ;;  %v12401_v49 = vshrl.u32 %v12371_v35, 16  ;;  %v11971_v11 = vadd.f32 %v19431_v31, %v11835_v58  ;;  %17006 = vmatmul.msk.bf16.gmra.mxu3 %vm770_vm2, %v10067_v0  ;;  %v6710_v0 = vor.u32 %v6708_v39, %v19561_v60 }
 0x606   : > { %17071 = vmatmul.msk.bf16.gmra.mxu0 %vm770_vm2, %v11181_v63  ;;  %v9034_v5 = vpop.f32.mrf.mxu2  ;;  %v6714_v35 = vrot.slane %v6712_v28, 1  ;;  %v8382_v58 = vor.u32 %v8380_v62, %v19563_v57 }
 0x607   : > { %v12399_v23 = vrot.slane %v12397_v13, 5  ;;  %v12403_v16 = vrot.slane %v12401_v49, 4  ;;  %v12103_v17 = vmax.f32 %v11971_v11, 0.0  ;;  %v9352_v56 = vadd.f32 %v9034_v5, %v7680_v32 }
 0x608   : > { %v7364_v50 = vpop.f32.mrf.mxu1  ;;  %v19612_v3 = vpop.f32.mrf.mxu3  ;;  %v19623_v13 = vrot.slane %v8384_v61, 1  ;;  %v11182_v49 = vrot.slane %v19600_v29, 1 }
 0x609   : > { %v12400_v52 = vsel %vm19569_vm8, %v12395_v19, %v12399_v23  ;;  %v12235_v33 = vmin.f32 %v12103_v17, 6.0  ;;  %v11024_v36 = vadd.f32 %v19516_v14, %v9352_v56  ;;  %v12404_v53 = vor.u32 %v12403_v16, %v12399_v23 }
 0x60a   : > { %12426 = vst.msk [vmem:[%s19450_s15 + $0x14] sm:$0xf] %vm12364_vm5, %v12400_v52  ;;  %v7681_v19 = vadd.f32 %v7364_v50, %v18338_v45  ;;  %v10074_v23 = vrot.slane %v10072_v41, 1  ;;  %v6715_v56 = vsel %vm2653_vm3, %v6710_v0, %v6714_v35  ;;  %v8387_v28 = vsel %vm2653_vm3, %v8382_v58, %v19623_v13  ;;  %v19652_v41 = vld [vmem:[%s17763_s25 + $0x88] sm:$0xff] }
 0x60b   : > { %v11520_v30 = vpop.f32.mrf.mxu0  ;;  %v12372_v63 = vpack.c.bf16 %v12235_v33, %v12235_v33  ;;  %v11836_v20 = vadd.f32 %v11518_v44, %v11024_v36  ;;  %v12405_v7 = vrot.slane %v12404_v53, 4  ;;  %v10070_v44 = vor.u32 %v10068_v59, %v19573_v12 }
 0x60c   : > { %v11183_v52 = vsel %vm11154_vm4, %v11180_v48, %v11182_v49 }
 0x60d   : > { %v12407_v14 = vshll.u32 %v12372_v63, 16  ;;  %v12411_v11 = vshrl.u32 %v12372_v63, 16  ;;  %v11972_v32 = vadd.f32 %v19431_v31, %v11836_v20  ;;  %v10075_v33 = vsel %vm2653_vm3, %v10070_v44, %v10074_v23 }
 0x60e   : > { %v9036_v5 = vpop.f32.mrf.mxu2 }
 0x60f   : > { %v12409_v60 = vrot.slane %v12407_v14, 5  ;;  %v12413_v39 = vrot.slane %v12411_v11, 4  ;;  %v12104_v16 = vmax.f32 %v11972_v32, 0.0  ;;  %v9353_v57 = vadd.f32 %v9036_v5, %v7681_v19  ;;  %v19659_v32 = vld [vmem:[%s17763_s25 + $0x2cc] sm:$0xff] }
 0x610   : > { %v7367_v17 = vpop.f32.mrf.mxu1  ;;  %v19632_v62 = vpop.f32.mrf.mxu3  ;;  %v8388_v5 = vshrl.u32 %v19600_v29, 16 }
 0x611   : > { %v12410_v45 = vsel %vm19569_vm8, %v12405_v7, %v12409_v60  ;;  %v12236_v50 = vmin.f32 %v12104_v16, 6.0  ;;  %v11025_v12 = vadd.f32 %v19528_v37, %v9353_v57  ;;  %v12414_v36 = vor.u32 %v12413_v39, %v12409_v60  ;;  %v19649_v37 = vld [vmem:[%s17763_s25 + $0x4e0] sm:$0xff] }
 0x612   : > { %12427 = vst.msk [vmem:[%s19450_s15 + $0x18] sm:$0xf] %vm12364_vm5, %v12410_v45  ;;  %v7682_v63 = vadd.f32 %v7367_v17, %v18344_v10  ;;  %v6720_v7 = vshll.u32 %v19649_v37, 16  ;;  %v8392_v10 = vshll.u32 %v19652_v41, 16  ;;  %v10076_v57 = vshrl.u32 %v19607_v43, 16 }
 0x613   : > { %v11523_v61 = vpop.f32.mrf.mxu0  ;;  %v12373_v53 = vpack.c.bf16 %v12236_v50, %v12236_v50  ;;  %v11837_v59 = vadd.f32 %v11520_v30, %v11025_v12  ;;  %16214 = vmatmul.msk.bf16.gmra.mxu1 %vm770_vm2, %v6715_v56  ;;  %16541 = vmatmul.msk.bf16.gmra.mxu2 %vm770_vm2, %v8387_v28  ;;  %v6716_v30 = vshrl.u32 %v19597_v51, 16  ;;  %v12415_v0 = vrot.slane %v12414_v36, 4 }
 0x614   : > { %v10080_v17 = vshll.u32 %v19659_v32, 16  ;;  %v6722_v12 = vrot.slane %v6720_v7, 1 }
 0x615   : > { %v12417_v55 = vshll.u32 %v12373_v53, 16  ;;  %v11973_v48 = vadd.f32 %v19431_v31, %v11837_v59  ;;  %17007 = vmatmul.msk.bf16.gmra.mxu3 %vm770_vm2, %v10075_v33  ;;  %v6718_v45 = vor.u32 %v6716_v30, %v6714_v35  ;;  %v11184_v33 = vrot.slane %v19652_v41, 1 }
 0x616   : > { %17072 = vmatmul.msk.bf16.gmra.mxu0 %vm770_vm2, %v11183_v52  ;;  %v9039_v20 = vpop.f32.mrf.mxu2  ;;  %v8390_v52 = vor.u32 %v8388_v5, %v19623_v13  ;;  %v17125_v36 = vrot.slane %v12373_v53, 9  ;;  %v10078_v35 = vor.u32 %v10076_v57, %v10074_v23 }
 0x617   : > { %v12419_v58 = vrot.slane %v12417_v55, 5  ;;  %v12105_v14 = vmax.f32 %v11973_v48, 0.0  ;;  %v9354_v11 = vadd.f32 %v9039_v20, %v7682_v63  ;;  %v10082_v48 = vrot.slane %v10080_v17, 1 }
 0x618   : > { %v7369_v19 = vpop.f32.mrf.mxu1  ;;  %v19664_v44 = vpop.f32.mrf.mxu3  ;;  %v6723_v53 = vsel %vm2653_vm3, %v6718_v45, %v6722_v12 }
 0x619   : > { %v12420_v51 = vsel %vm19569_vm8, %v12415_v0, %v12419_v58  ;;  %v12237_v60 = vmin.f32 %v12105_v14, 6.0  ;;  %v11026_v39 = vadd.f32 %v19556_v24, %v9354_v11  ;;  %v8394_v24 = vrot.slane %v8392_v10, 1  ;;  %v19704_v10 = vld [vmem:[%s17763_s25 + $0x90] sm:$0xff] }
 0x61a   : > { %12428 = vst.msk [vmem:[%s19450_s15 + $0x1c] sm:$0xf] %vm12364_vm5, %v12420_v51  ;;  %v7683_v55 = vadd.f32 %v7369_v19, %v18353_v38  ;;  %v11185_v11 = vsel %vm11154_vm4, %v11182_v49, %v11184_v33  ;;  %v10083_v19 = vsel %vm2653_vm3, %v10078_v35, %v10082_v48  ;;  %v10084_v35 = vshrl.u32 %v19659_v32, 16 }
 0x61b   : > { %v11525_v16 = vpop.f32.mrf.mxu0  ;;  %v12429_v56 = vpack.c.bf16 %v12237_v60, %v12237_v60  ;;  %v11838_v28 = vadd.f32 %v11523_v61, %v11026_v39  ;;  %v8395_v0 = vsel %vm2653_vm3, %v8390_v52, %v8394_v24 }
 0x61d   : > { %v12443_v59 = vrot.slane %v12429_v56, 5  ;;  %v11974_v43 = vadd.f32 %v19431_v31, %v11838_v28  ;;  %v6724_v56 = vshrl.u32 %v19649_v37, 16  ;;  %v19713_v28 = vld [vmem:[%s17763_s25 + $0x2d4] sm:$0xff] }
 0x61e   : > { %v9041_v61 = vpop.f32.mrf.mxu2  ;;  %v10088_v37 = vshll.u32 %v19713_v28, 16 }
 0x61f   : > { %v12444_v63 = vsel %vm19674_vm11, %v17125_v36, %v12443_v59  ;;  %v12106_v20 = vmax.f32 %v11974_v43, 0.0  ;;  %v9355_v30 = vadd.f32 %v9041_v61, %v7683_v55  ;;  %v12445_v51 = vrot.slane %v12443_v59, 4 }
 0x620   : > { %12458 = vst.msk [vmem:[%s19450_s15 + $0x20] sm:$0xf] %vm12364_vm5, %v12444_v63  ;;  %v7372_v13 = vpop.f32.mrf.mxu1  ;;  %v19688_v58 = vpop.f32.mrf.mxu3  ;;  %v8396_v36 = vshrl.u32 %v19652_v41, 16  ;;  %v10090_v32 = vrot.slane %v10088_v37, 1 }
 0x621   : > { %v12238_v38 = vmin.f32 %v12106_v20, 6.0  ;;  %v11027_v23 = vadd.f32 %v19579_v42, %v9355_v30  ;;  %v19701_v42 = vld [vmem:[%s17763_s25 + $0x4e8] sm:$0xff]  ;;  %v7684_v60 = vadd.f32 %v7372_v13, %v18359_v22  ;;  %v8400_v22 = vshll.u32 %v19704_v10, 16 }
 0x622   : > { %v6728_v52 = vshll.u32 %v19701_v42, 16  ;;  %v6726_v30 = vor.u32 %v6724_v56, %v6722_v12  ;;  %v6732_v37 = vshrl.u32 %v19701_v42, 16 }
 0x623   : > { %v11528_v14 = vpop.f32.mrf.mxu0  ;;  %v12430_v7 = vpack.c.bf16 %v12238_v38, %v12238_v38  ;;  %v11839_v5 = vadd.f32 %v11525_v16, %v11027_v23  ;;  %16215 = vmatmul.msk.bf16.gmra.mxu1 %vm770_vm2, %v6723_v53  ;;  %16542 = vmatmul.msk.bf16.gmra.mxu2 %vm770_vm2, %v8395_v0  ;;  %v8398_v53 = vor.u32 %v8396_v36, %v8394_v24  ;;  %v8402_v0 = vrot.slane %v8400_v22, 1 }
 0x624   : > { %v6730_v13 = vrot.slane %v6728_v52, 1  ;;  %v11186_v38 = vrot.slane %v19704_v10, 1  ;;  %v19750_v52 = vld [vmem:[%s17763_s25 + $0x98] sm:$0xff] }
 0x625   : > { %v12446_v29 = vrot.slane %v12430_v7, 5  ;;  %v11975_v49 = vadd.f32 %v19431_v31, %v11839_v5  ;;  %17008 = vmatmul.msk.bf16.gmra.mxu3 %vm770_vm2, %v10083_v19  ;;  %v10086_v5 = vor.u32 %v10084_v35, %v10082_v48 }
 0x626   : > { %17073 = vmatmul.msk.bf16.gmra.mxu0 %vm770_vm2, %v11185_v11  ;;  %v9044_v39 = vpop.f32.mrf.mxu2 }
 0x627   : > { %v12447_v16 = vsel %vm19674_vm11, %v12445_v51, %v12446_v29  ;;  %v12107_v57 = vmax.f32 %v11975_v49, 0.0  ;;  %v9356_v17 = vadd.f32 %v9044_v39, %v7684_v60  ;;  %v12448_v23 = vrot.slane %v12446_v29, 4 }
 0x628   : > { %12459 = vst.msk [vmem:[%s19450_s15 + $0x24] sm:$0xf] %vm12364_vm5, %v12447_v16  ;;  %v7374_v45 = vpop.f32.mrf.mxu1  ;;  %v19720_v59 = vpop.f32.mrf.mxu3  ;;  %v6731_v29 = vsel %vm2653_vm3, %v6726_v30, %v6730_v13  ;;  %v8403_v49 = vsel %vm2653_vm3, %v8398_v53, %v8402_v0  ;;  %v11187_v16 = vsel %vm11154_vm4, %v11184_v33, %v11186_v38 }
 0x629   : > { %v12239_v43 = vmin.f32 %v12107_v57, 6.0  ;;  %v11028_v55 = vadd.f32 %v19612_v3, %v9356_v17  ;;  %v7685_v3 = vadd.f32 %v7374_v45, %v18368_v25  ;;  %v10091_v57 = vsel %vm2653_vm3, %v10086_v5, %v10090_v32  ;;  %v19746_v45 = vld [vmem:[%s17763_s25 + $0x4f0] sm:$0xff] }
 0x62b   : > { %v11530_v61 = vpop.f32.mrf.mxu0  ;;  %v12431_v63 = vpack.c.bf16 %v12239_v43, %v12239_v43  ;;  %v11840_v20 = vadd.f32 %v11528_v14, %v11028_v55 }
 0x62d   : > { %v12449_v11 = vrot.slane %v12431_v63, 5  ;;  %v11976_v19 = vadd.f32 %v19431_v31, %v11840_v20  ;;  %v6736_v63 = vshll.u32 %v19746_v45, 16  ;;  %v19760_v20 = vld [vmem:[%s17763_s25 + $0x2dc] sm:$0xff] }
 0x62e   : > { %v9046_v7 = vpop.f32.mrf.mxu2 }
 0x62f   : > { %v12450_v51 = vsel %vm19674_vm11, %v12448_v23, %v12449_v11  ;;  %v12108_v14 = vmax.f32 %v11976_v19, 0.0  ;;  %v9357_v12 = vadd.f32 %v9046_v7, %v7685_v3  ;;  %v8404_v23 = vshrl.u32 %v19704_v10, 16 }
 0x630   : > { %12460 = vst.msk [vmem:[%s19450_s15 + $0x28] sm:$0xf] %vm12364_vm5, %v12450_v51  ;;  %v7377_v24 = vpop.f32.mrf.mxu1  ;;  %v19734_v60 = vpop.f32.mrf.mxu3  ;;  %v10092_v51 = vshrl.u32 %v19713_v28, 16 }
 0x631   : > { %v12240_v25 = vmin.f32 %v12108_v14, 6.0  ;;  %v11029_v48 = vadd.f32 %v19632_v62, %v9357_v12  ;;  %v12451_v62 = vrot.slane %v12449_v11, 4  ;;  %v7686_v43 = vadd.f32 %v7377_v24, %v18374_v34 }
 0x632   : > { %v8408_v11 = vshll.u32 %v19750_v52, 16  ;;  %v10096_v14 = vshll.u32 %v19760_v20, 16  ;;  %v6734_v24 = vor.u32 %v6732_v37, %v6730_v13 }
 0x633   : > { %v11533_v39 = vpop.f32.mrf.mxu0  ;;  %v12432_v17 = vpack.c.bf16 %v12240_v25, %v12240_v25  ;;  %v11841_v56 = vadd.f32 %v11530_v61, %v11029_v48  ;;  %16216 = vmatmul.msk.bf16.gmra.mxu1 %vm770_vm2, %v6731_v29  ;;  %16543 = vmatmul.msk.bf16.gmra.mxu2 %vm770_vm2, %v8403_v49  ;;  %v19771_v29 = vrot.slane %v6736_v63, 1  ;;  %v8406_v25 = vor.u32 %v8404_v23, %v8402_v0 }
 0x634   : > { %v19773_v48 = vrot.slane %v8408_v11, 1 }
 0x635   : > { %v12452_v41 = vrot.slane %v12432_v17, 5  ;;  %v12470_v36 = vshrl.u32 %v12432_v17, 16  ;;  %v12473_v33 = vshll.u32 %v12432_v17, 16  ;;  %v11977_v22 = vadd.f32 %v19431_v31, %v11841_v56  ;;  %17009 = vmatmul.msk.bf16.gmra.mxu3 %vm770_vm2, %v10091_v57 }
 0x636   : > { %17074 = vmatmul.msk.bf16.gmra.mxu0 %vm770_vm2, %v11187_v16  ;;  %v9049_v55 = vpop.f32.mrf.mxu2  ;;  %v11188_v16 = vrot.slane %v19750_v52, 1 }
 0x637   : > { %v12453_v61 = vsel %vm19674_vm11, %v12451_v62, %v12452_v41  ;;  %v12109_v35 = vmax.f32 %v11977_v22, 0.0  ;;  %v9358_v30 = vadd.f32 %v9049_v55, %v7686_v43  ;;  %v12472_v19 = vrot.slane %v12470_v36, 5 }
 0x638   : > { %12461 = vst.msk [vmem:[%s19450_s15 + $0x2c] sm:$0xf] %vm12364_vm5, %v12453_v61  ;;  %v7379_v53 = vpop.f32.mrf.mxu1  ;;  %v19766_v34 = vpop.f32.mrf.mxu3  ;;  %v12475_v3 = vrot.slane %v12473_v33, 6  ;;  %v10094_v41 = vor.u32 %v10092_v51, %v10090_v32  ;;  %v19778_v36 = vrot.slane %v10096_v14, 1  ;;  %v8411_v32 = vsel %vm2653_vm3, %v8406_v25, %v19773_v48  ;;  %v19819_v25 = vld [vmem:[%s17763_s25 + $0x2e4] sm:$0xff] }
 0x639   : > { %v12241_v7 = vmin.f32 %v12109_v35, 6.0  ;;  %v11030_v42 = vadd.f32 %v19664_v44, %v9358_v30  ;;  %v7687_v44 = vadd.f32 %v7379_v53, %v18383_v8  ;;  %v6739_v8 = vsel %vm2653_vm3, %v6734_v24, %v19771_v29 }
 0x63a   : > { %v12476_v57 = vor.u32 %v12475_v3, %v12472_v19  ;;  %v11189_v30 = vsel %vm11154_vm4, %v11186_v38, %v11188_v16  ;;  %v10099_v23 = vsel %vm2653_vm3, %v10094_v41, %v19778_v36  ;;  %v19811_v38 = vld [vmem:[%s17763_s25 + $0xa0] sm:$0xff]  ;;  %v6740_v24 = vshrl.u32 %v19746_v45, 16 }
 0x63b   : > { %v11535_v5 = vpop.f32.mrf.mxu0  ;;  %v12462_v12 = vpack.c.bf16 %v12241_v7, %v12241_v7  ;;  %v11842_v49 = vadd.f32 %v11533_v39, %v11030_v42 }
 0x63c   : > { %v12477_v61 = vrot.slane %v12476_v57, 4 }
 0x63d   : > { %v12479_v17 = vshrl.u32 %v12462_v12, 16  ;;  %v12482_v56 = vshll.u32 %v12462_v12, 16  ;;  %v11978_v28 = vadd.f32 %v19431_v31, %v11842_v49 }
 0x63e   : > { %v9051_v62 = vpop.f32.mrf.mxu2 }
 0x63f   : > { %v12481_v13 = vrot.slane %v12479_v17, 5  ;;  %v12484_v33 = vrot.slane %v12482_v56, 6  ;;  %v9359_v22 = vadd.f32 %v9051_v62, %v7687_v44  ;;  %v12110_v39 = vmax.f32 %v11978_v28, 0.0 }
 0x640   : > { %v7382_v43 = vpop.f32.mrf.mxu1  ;;  %v19790_v55 = vpop.f32.mrf.mxu3  ;;  %v8412_v44 = vshrl.u32 %v19750_v52, 16 }
 0x641   : > { %v12485_v35 = vor.u32 %v12484_v33, %v12481_v13  ;;  %v11031_v37 = vadd.f32 %v19688_v58, %v9359_v22  ;;  %v12242_v53 = vmin.f32 %v12110_v39, 6.0  ;;  %v19805_v58 = vld [vmem:[%s17763_s25 + $0x4f8] sm:$0xff]  ;;  %v7688_v7 = vadd.f32 %v7382_v43, %v18389_v46 }
 0x642   : > { %v6744_v49 = vshll.u32 %v19805_v58, 16  ;;  %v8416_v46 = vshll.u32 %v19811_v38, 16  ;;  %v10100_v22 = vshrl.u32 %v19760_v20, 16  ;;  %v10104_v39 = vshll.u32 %v19819_v25, 16 }
 0x643   : > { %v11538_v63 = vpop.f32.mrf.mxu0  ;;  %v12486_v11 = vsel %vm19782_vm14, %v12477_v61, %v12485_v35  ;;  %v11843_v19 = vadd.f32 %v11535_v5, %v11031_v37  ;;  %16217 = vmatmul.msk.bf16.gmra.mxu1 %vm770_vm2, %v6739_v8  ;;  %16544 = vmatmul.msk.bf16.gmra.mxu2 %vm770_vm2, %v8411_v32  ;;  %v12463_v10 = vpack.c.bf16 %v12242_v53, %v12242_v53  ;;  %v12487_v33 = vrot.slane %v12485_v35, 4 }
 0x644   : > { %12521 = vst.msk [vmem:[%s19450_s15 + $0x30] sm:$0xf] %vm12364_vm5, %v12486_v11  ;;  %v6742_v32 = vor.u32 %v6740_v24, %v19771_v29  ;;  %v19829_v61 = vrot.slane %v6744_v49, 1  ;;  %v19834_v53 = vrot.slane %v8416_v46, 1  ;;  %v10102_v11 = vor.u32 %v10100_v22, %v19778_v36 }
 0x645   : > { %v11979_v3 = vadd.f32 %v19431_v31, %v11843_v19  ;;  %17010 = vmatmul.msk.bf16.gmra.mxu3 %vm770_vm2, %v10099_v23  ;;  %v12489_v5 = vshrl.u32 %v12463_v10, 16  ;;  %v12492_v42 = vshll.u32 %v12463_v10, 16  ;;  %v19842_v19 = vrot.slane %v10104_v39, 1 }
 0x646   : > { %17075 = vmatmul.msk.bf16.gmra.mxu0 %vm770_vm2, %v11189_v30  ;;  %v9054_v51 = vpop.f32.mrf.mxu2  ;;  %v8414_v30 = vor.u32 %v8412_v44, %v19773_v48 }
 0x647   : > { %v12111_v14 = vmax.f32 %v11979_v3, 0.0  ;;  %v9360_v12 = vadd.f32 %v9054_v51, %v7688_v7  ;;  %v12491_v57 = vrot.slane %v12489_v5, 5  ;;  %v12494_v17 = vrot.slane %v12492_v42, 6 }
 0x648   : > { %v7384_v56 = vpop.f32.mrf.mxu1  ;;  %v19823_v28 = vpop.f32.mrf.mxu3  ;;  %v6747_v42 = vsel %vm2653_vm3, %v6742_v32, %v19829_v61  ;;  %v8419_v51 = vsel %vm2653_vm3, %v8414_v30, %v19834_v53  ;;  %v19881_v32 = vld [vmem:[%s17763_s25 + $0x2ec] sm:$0xff] }
 0x649   : > { %v12243_v62 = vmin.f32 %v12111_v14, 6.0  ;;  %v11032_v41 = vadd.f32 %v19720_v59, %v9360_v12  ;;  %v12495_v45 = vor.u32 %v12494_v17, %v12491_v57  ;;  %v11190_v59 = vrot.slane %v19811_v38, 1 }
 0x64a   : > { %v10107_v57 = vsel %vm2653_vm3, %v10102_v11, %v19842_v19 }
 0x64b   : > { %v11540_v13 = vpop.f32.mrf.mxu0  ;;  %v12464_v43 = vpack.c.bf16 %v12243_v62, %v12243_v62  ;;  %v11844_v8 = vadd.f32 %v11538_v63, %v11032_v41  ;;  %v12496_v37 = vsel %vm19782_vm14, %v12487_v33, %v12495_v45  ;;  %v7689_v63 = vadd.f32 %v7384_v56, %v18398_v1  ;;  %v19874_v62 = vld [vmem:[%s22332_s2] ss:$0 sm:$0xff] }
 0x64c   : > { %12522 = vst.msk [vmem:[%s19450_s15 + $0x34] sm:$0xf] %vm12364_vm5, %v12496_v37  ;;  %v11191_v1 = vsel %vm11154_vm4, %v11188_v16, %v11190_v59  ;;  %v12497_v36 = vrot.slane %v12495_v45, 4  ;;  %v19866_v16 = vld [vmem:[%s17763_s25 + $0x500] sm:$0xff]  ;;  %v6748_v45 = vshrl.u32 %v19805_v58, 16 }
 0x64d   : > { %v12499_v20 = vshrl.u32 %v12464_v43, 16  ;;  %v12502_v35 = vshll.u32 %v12464_v43, 16  ;;  %v11980_v23 = vadd.f32 %v19431_v31, %v11844_v8  ;;  %v6752_v30 = vshll.u32 %v19866_v16, 16 }
 0x64e   : > { %v9056_v29 = vpop.f32.mrf.mxu2 }
 0x64f   : > { %v12501_v10 = vrot.slane %v12499_v20, 5  ;;  %v12504_v3 = vrot.slane %v12502_v35, 6  ;;  %v12112_v48 = vmax.f32 %v11980_v23, 0.0  ;;  %v9361_v7 = vadd.f32 %v9056_v29, %v7689_v63 }
 0x650   : > { %v7387_v5 = vpop.f32.mrf.mxu1  ;;  %v19853_v31 = vpop.f32.mrf.mxu3  ;;  %v8420_v20 = vshrl.u32 %v19811_v38, 16 }
 0x651   : > { %v12505_v14 = vor.u32 %v12504_v3, %v12501_v10  ;;  %v12244_v12 = vmin.f32 %v12112_v48, 6.0  ;;  %v11033_v24 = vadd.f32 %v19734_v60, %v9361_v7  ;;  %v19869_v60 = vld [vmem:[%s17763_s25 + $0xa8] sm:$0xff]  ;;  %v10108_v10 = vshrl.u32 %v19819_v25, 16 }
 0x652   : > { %v10112_v3 = vshll.u32 %v19881_v32, 16  ;;  %v8422_v25 = vor.u32 %v8420_v20, %v19834_v53 }
 0x653   : > { %v11543_v49 = vpop.f32.mrf.mxu0  ;;  %v12506_v17 = vsel %vm19782_vm14, %v12497_v36, %v12505_v14  ;;  %v12465_v56 = vpack.c.bf16 %v12244_v12, %v12244_v12  ;;  %v11845_v52 = vadd.f32 %v11540_v13, %v11033_v24  ;;  %16218 = vmatmul.msk.bf16.gmra.mxu1 %vm770_vm2, %v6747_v42  ;;  %16545 = vmatmul.msk.bf16.gmra.mxu2 %vm770_vm2, %v8419_v51  ;;  %v12507_v23 = vrot.slane %v12505_v14, 4 }
 0x654   : > { %12523 = vst.msk [vmem:[%s19450_s15 + $0x38] sm:$0xf] %vm12364_vm5, %v12506_v17  ;;  %v7690_v13 = vadd.f32 %v7387_v5, %v18404_v18  ;;  %v8424_v18 = vshll.u32 %v19869_v60, 16  ;;  %v6750_v42 = vor.u32 %v6748_v45, %v19829_v61  ;;  %v11192_v36 = vrot.slane %v19869_v60, 1 }
 0x655   : > { %v12509_v44 = vshrl.u32 %v12465_v56, 16  ;;  %v12512_v46 = vshll.u32 %v12465_v56, 16  ;;  %v11981_v41 = vadd.f32 %v19874_v62, %v11845_v52  ;;  %17011 = vmatmul.msk.bf16.gmra.mxu3 %vm770_vm2, %v10107_v57  ;;  %v17126_v14 = vrot.slane %v12465_v56, 10 }
 0x656   : > { %17076 = vmatmul.msk.bf16.gmra.mxu0 %vm770_vm2, %v11191_v1  ;;  %v9059_v33 = vpop.f32.mrf.mxu2  ;;  %v8426_v1 = vrot.slane %v8424_v18, 1  ;;  %v10110_v57 = vor.u32 %v10108_v10, %v19842_v19  ;;  %v10114_v17 = vrot.slane %v10112_v3, 1  ;;  %v11193_v45 = vsel %vm11154_vm4, %v11190_v59, %v11192_v36 }
 0x657   : > { %v12511_v22 = vrot.slane %v12509_v44, 5  ;;  %v12514_v39 = vrot.slane %v12512_v46, 6  ;;  %v12113_v43 = vmax.f32 %v11981_v41, 0.0  ;;  %v9362_v8 = vadd.f32 %v9059_v33, %v7690_v13 }
 0x658   : > { %v7389_v37 = vpop.f32.mrf.mxu1  ;;  %v19886_v35 = vpop.f32.mrf.mxu3  ;;  %v8427_v41 = vsel %vm2653_vm3, %v8422_v25, %v8426_v1  ;;  %v8428_v3 = vshrl.u32 %v19869_v60, 16  ;;  %v10116_v25 = vshrl.u32 %v19881_v32, 16 }
 0x659   : > { %v12515_v63 = vor.u32 %v12514_v39, %v12511_v22  ;;  %v12245_v58 = vmin.f32 %v12113_v43, 6.0  ;;  %v11034_v29 = vadd.f32 %v19766_v34, %v9362_v8  ;;  %v6754_v34 = vrot.slane %v6752_v30, 1  ;;  %v19929_v8 = vld [vmem:[%s17763_s25 + $0xb0] sm:$0xff] }
 0x65a   : > { %v7691_v61 = vadd.f32 %v7389_v37, %v18413_v4  ;;  %v10115_v22 = vsel %vm2653_vm3, %v10110_v57, %v10114_v17 }
 0x65b   : > { %v11545_v11 = vpop.f32.mrf.mxu0  ;;  %v12516_v48 = vsel %vm19782_vm14, %v12507_v23, %v12515_v63  ;;  %v12525_v7 = vpack.c.bf16 %v12245_v58, %v12245_v58  ;;  %v11846_v5 = vadd.f32 %v11543_v49, %v11034_v29  ;;  %v6755_v56 = vsel %vm2653_vm3, %v6750_v42, %v6754_v34  ;;  %v19938_v29 = vld [vmem:[%s17763_s25 + $0x2f4] sm:$0xff] }
 0x65c   : > { %12524 = vst.msk [vmem:[%s19450_s15 + $0x3c] sm:$0xf] %vm12364_vm5, %v12516_v48  ;;  %v6756_v58 = vshrl.u32 %v19866_v16, 16  ;;  %v10120_v16 = vshll.u32 %v19938_v29, 16 }
 0x65d   : > { %v12539_v12 = vrot.slane %v12525_v7, 6  ;;  %v11982_v24 = vadd.f32 %v19874_v62, %v11846_v5 }
 0x65e   : > { %v9061_v49 = vpop.f32.mrf.mxu2  ;;  %v10122_v32 = vrot.slane %v10120_v16, 1 }
 0x65f   : > { %v12540_v52 = vsel %vm19896_vm6, %v17126_v14, %v12539_v12  ;;  %v12114_v44 = vmax.f32 %v11982_v24, 0.0  ;;  %v9363_v46 = vadd.f32 %v9061_v49, %v7691_v61  ;;  %v12541_v37 = vrot.slane %v12539_v12, 4 }
 0x660   : > { %12554 = vst.msk [vmem:[%s19450_s15 + $0x40] sm:$0xf] %vm12364_vm5, %v12540_v52  ;;  %v7392_v53 = vpop.f32.mrf.mxu1  ;;  %v19913_v13 = vpop.f32.mrf.mxu3  ;;  %v6758_v24 = vor.u32 %v6756_v58, %v6754_v34  ;;  %v8430_v49 = vor.u32 %v8428_v3, %v8426_v1  ;;  %v11194_v52 = vrot.slane %v19929_v8, 1 }
 0x661   : > { %v12246_v4 = vmin.f32 %v12114_v44, 6.0  ;;  %v11035_v19 = vadd.f32 %v19790_v55, %v9363_v46  ;;  %v19926_v55 = vld [vmem:[%s17763_s25 + $0x508] sm:$0xff]  ;;  %v7692_v30 = vadd.f32 %v7392_v53, %v18419_v6  ;;  %v8432_v6 = vshll.u32 %v19929_v8, 16 }
 0x662   : > { %v6760_v10 = vshll.u32 %v19926_v55, 16  ;;  %v6764_v3 = vshrl.u32 %v19926_v55, 16 }
 0x663   : > { %v11548_v33 = vpop.f32.mrf.mxu0  ;;  %v12526_v39 = vpack.c.bf16 %v12246_v4, %v12246_v4  ;;  %v11847_v43 = vadd.f32 %v11545_v11, %v11035_v19  ;;  %16219 = vmatmul.msk.bf16.gmra.mxu1 %vm770_vm2, %v6755_v56  ;;  %16546 = vmatmul.msk.bf16.gmra.mxu2 %vm770_vm2, %v8427_v41  ;;  %v8434_v57 = vrot.slane %v8432_v6, 1  ;;  %v10118_v41 = vor.u32 %v10116_v25, %v10114_v17 }
 0x664   : > { %v6762_v61 = vrot.slane %v6760_v10, 1  ;;  %v8436_v25 = vshrl.u32 %v19929_v8, 16 }
 0x665   : > { %v12542_v38 = vrot.slane %v12526_v39, 6  ;;  %v11983_v59 = vadd.f32 %v19874_v62, %v11847_v43  ;;  %17012 = vmatmul.msk.bf16.gmra.mxu3 %vm770_vm2, %v10115_v22  ;;  %v11195_v43 = vsel %vm11154_vm4, %v11192_v36, %v11194_v52 }
 0x666   : > { %17077 = vmatmul.msk.bf16.gmra.mxu0 %vm770_vm2, %v11193_v45  ;;  %v9064_v20 = vpop.f32.mrf.mxu2  ;;  %v8435_v45 = vsel %vm2653_vm3, %v8430_v49, %v8434_v57 }
 0x667   : > { %v12543_v18 = vsel %vm19896_vm6, %v12541_v37, %v12542_v38  ;;  %v12115_v23 = vmax.f32 %v11983_v59, 0.0  ;;  %v9364_v63 = vadd.f32 %v9064_v20, %v7692_v30  ;;  %v12544_v44 = vrot.slane %v12542_v38, 4  ;;  %v19971_v30 = vld [vmem:[%s17763_s25 + $0x510] sm:$0xff]  ;;  %v19975_v20 = vld [vmem:[%s17763_s25 + $0xb8] sm:$0xff] }
 0x668   : > { %12555 = vst.msk [vmem:[%s19450_s15 + $0x44] sm:$0xf] %vm12364_vm5, %v12543_v18  ;;  %v7394_v11 = vpop.f32.mrf.mxu1  ;;  %v19945_v48 = vpop.f32.mrf.mxu3  ;;  %v10123_v37 = vsel %vm2653_vm3, %v10118_v41, %v10122_v32  ;;  %v6768_v6 = vshll.u32 %v19971_v30, 16  ;;  %v8440_v16 = vshll.u32 %v19975_v20, 16 }
 0x669   : > { %v12247_v7 = vmin.f32 %v12115_v23, 6.0  ;;  %v11036_v5 = vadd.f32 %v19823_v28, %v9364_v63  ;;  %v7693_v28 = vadd.f32 %v7394_v11, %v18428_v54 }
 0x66b   : > { %v11550_v42 = vpop.f32.mrf.mxu0  ;;  %v12527_v14 = vpack.c.bf16 %v12247_v7, %v12247_v7  ;;  %v11848_v12 = vadd.f32 %v11548_v33, %v11036_v5  ;;  %v6763_v33 = vsel %vm2653_vm3, %v6758_v24, %v6762_v61  ;;  %v19985_v7 = vld [vmem:[%s17763_s25 + $0x2fc] sm:$0xff] }
 0x66d   : > { %v12545_v46 = vrot.slane %v12527_v14, 6  ;;  %v11984_v53 = vadd.f32 %v19874_v62, %v11848_v12 }
 0x66e   : > { %v9066_v56 = vpop.f32.mrf.mxu2 }
 0x66f   : > { %v12546_v4 = vsel %vm19896_vm6, %v12544_v44, %v12545_v46  ;;  %v12116_v19 = vmax.f32 %v11984_v53, 0.0  ;;  %v9365_v34 = vadd.f32 %v9066_v56, %v7693_v28  ;;  %v10124_v44 = vshrl.u32 %v19938_v29, 16 }
 0x670   : > { %12556 = vst.msk [vmem:[%s19450_s15 + $0x48] sm:$0xf] %vm12364_vm5, %v12546_v4  ;;  %v7397_v1 = vpop.f32.mrf.mxu1  ;;  %v19959_v22 = vpop.f32.mrf.mxu3  ;;  %v6766_v28 = vor.u32 %v6764_v3, %v6762_v61  ;;  %v19996_v56 = vrot.slane %v6768_v6, 1  ;;  %v8438_v4 = vor.u32 %v8436_v25, %v8434_v57 }
 0x671   : > { %v12248_v54 = vmin.f32 %v12116_v19, 6.0  ;;  %v11037_v17 = vadd.f32 %v19853_v31, %v9365_v34  ;;  %v12547_v31 = vrot.slane %v12545_v46, 4  ;;  %v7694_v63 = vadd.f32 %v7397_v1, %v18434_v21 }
 0x672   : > { %v10128_v46 = vshll.u32 %v19985_v7, 16  ;;  %v19998_v19 = vrot.slane %v8440_v16, 1  ;;  %v11196_v34 = vrot.slane %v19975_v20, 1 }
 0x673   : > { %v11553_v39 = vpop.f32.mrf.mxu0  ;;  %v12528_v38 = vpack.c.bf16 %v12248_v54, %v12248_v54  ;;  %v11849_v59 = vadd.f32 %v11550_v42, %v11037_v17  ;;  %16220 = vmatmul.msk.bf16.gmra.mxu1 %vm770_vm2, %v6763_v33  ;;  %16547 = vmatmul.msk.bf16.gmra.mxu2 %vm770_vm2, %v8435_v45  ;;  %v10126_v17 = vor.u32 %v10124_v44, %v10122_v32 }
 0x674   : > { %v8443_v32 = vsel %vm2653_vm3, %v8438_v4, %v19998_v19 }
 0x675   : > { %v12548_v60 = vrot.slane %v12528_v38, 6  ;;  %v12566_v18 = vshrl.u32 %v12528_v38, 16  ;;  %v12569_v36 = vshll.u32 %v12528_v38, 16  ;;  %v11985_v23 = vadd.f32 %v19874_v62, %v11849_v59  ;;  %17013 = vmatmul.msk.bf16.gmra.mxu3 %vm770_vm2, %v10123_v37 }
 0x676   : > { %17078 = vmatmul.msk.bf16.gmra.mxu0 %vm770_vm2, %v11195_v43  ;;  %v9069_v58 = vpop.f32.mrf.mxu2  ;;  %v20003_v43 = vrot.slane %v10128_v46, 1 }
 0x677   : > { %v12549_v11 = vsel %vm19896_vm6, %v12547_v31, %v12548_v60  ;;  %v12117_v10 = vmax.f32 %v11985_v23, 0.0  ;;  %v9366_v5 = vadd.f32 %v9069_v58, %v7694_v63  ;;  %v12568_v14 = vrot.slane %v12566_v18, 6 }
 0x678   : > { %12557 = vst.msk [vmem:[%s19450_s15 + $0x4c] sm:$0xf] %vm12364_vm5, %v12549_v11  ;;  %v7399_v42 = vpop.f32.mrf.mxu1  ;;  %v19991_v21 = vpop.f32.mrf.mxu3  ;;  %v12571_v12 = vrot.slane %v12569_v36, 7  ;;  %v11197_v63 = vsel %vm11154_vm4, %v11194_v52, %v11196_v34  ;;  %v10131_v11 = vsel %vm2653_vm3, %v10126_v17, %v20003_v43  ;;  %v20036_v52 = vld [vmem:[%s17763_s25 + $0xc0] sm:$0xff] }
 0x679   : > { %v12249_v24 = vmin.f32 %v12117_v10, 6.0  ;;  %v11038_v55 = vadd.f32 %v19886_v35, %v9366_v5  ;;  %v7695_v35 = vadd.f32 %v7399_v42, %v18443_v2  ;;  %v6771_v2 = vsel %vm2653_vm3, %v6766_v28, %v19996_v56 }
 0x67a   : > { %v12572_v1 = vor.u32 %v12571_v12, %v12568_v14  ;;  %v8444_v28 = vshrl.u32 %v19975_v20, 16 }
 0x67b   : > { %v11555_v49 = vpop.f32.mrf.mxu0  ;;  %v12558_v53 = vpack.c.bf16 %v12249_v24, %v12249_v24  ;;  %v11850_v41 = vadd.f32 %v11553_v39, %v11038_v55  ;;  %v6772_v24 = vshrl.u32 %v19971_v30, 16  ;;  %v20044_v55 = vld [vmem:[%s17763_s25 + $0x304] sm:$0xff] }
 0x67c   : > { %v12573_v60 = vrot.slane %v12572_v1, 4 }
 0x67d   : > { %v12575_v33 = vshrl.u32 %v12558_v53, 16  ;;  %v12578_v45 = vshll.u32 %v12558_v53, 16  ;;  %v11986_v29 = vadd.f32 %v19874_v62, %v11850_v41 }
 0x67e   : > { %v9071_v54 = vpop.f32.mrf.mxu2 }
 0x67f   : > { %v12577_v61 = vrot.slane %v12575_v33, 6  ;;  %v12580_v37 = vrot.slane %v12578_v45, 7  ;;  %v9367_v38 = vadd.f32 %v9071_v54, %v7695_v35  ;;  %v12118_v39 = vmax.f32 %v11986_v29, 0.0 }
 0x680   : > { %v7402_v59 = vpop.f32.mrf.mxu1  ;;  %v20015_v31 = vpop.f32.mrf.mxu3  ;;  %v10132_v35 = vshrl.u32 %v19985_v7, 16  ;;  %v10136_v29 = vshll.u32 %v20044_v55, 16 }
 0x681   : > { %v12581_v18 = vor.u32 %v12580_v37, %v12577_v61  ;;  %v11039_v36 = vadd.f32 %v19913_v13, %v9367_v38  ;;  %v12250_v58 = vmin.f32 %v12118_v39, 6.0  ;;  %v20030_v13 = vld [vmem:[%s17763_s25 + $0x518] sm:$0xff]  ;;  %v7696_v5 = vadd.f32 %v7402_v59, %v18449_v26 }
 0x682   : > { %v8448_v26 = vshll.u32 %v20036_v52, 16  ;;  %v6774_v61 = vor.u32 %v6772_v24, %v19996_v56  ;;  %v8446_v39 = vor.u32 %v8444_v28, %v19998_v19  ;;  %v6780_v28 = vshrl.u32 %v20030_v13, 16 }
 0x683   : > { %v11558_v23 = vpop.f32.mrf.mxu0  ;;  %v12582_v10 = vsel %vm20007_vm9, %v12573_v60, %v12581_v18  ;;  %v11851_v3 = vadd.f32 %v11555_v49, %v11039_v36  ;;  %16221 = vmatmul.msk.bf16.gmra.mxu1 %vm770_vm2, %v6771_v2  ;;  %16548 = vmatmul.msk.bf16.gmra.mxu2 %vm770_vm2, %v8443_v32  ;;  %v12559_v8 = vpack.c.bf16 %v12250_v58, %v12250_v58  ;;  %v6776_v49 = vshll.u32 %v20030_v13, 16 }
 0x684   : > { %12617 = vst.msk [vmem:[%s19450_s15 + $0x50] sm:$0xf] %vm12364_vm5, %v12582_v10  ;;  %v12583_v45 = vrot.slane %v12581_v18, 4  ;;  %v20059_v59 = vrot.slane %v8448_v26, 1  ;;  %v10134_v18 = vor.u32 %v10132_v35, %v20003_v43  ;;  %v20067_v36 = vrot.slane %v10136_v29, 1 }
 0x685   : > { %v11987_v6 = vadd.f32 %v19874_v62, %v11851_v3  ;;  %17014 = vmatmul.msk.bf16.gmra.mxu3 %vm770_vm2, %v10131_v11  ;;  %v12585_v42 = vshrl.u32 %v12559_v8, 16  ;;  %v12588_v25 = vshll.u32 %v12559_v8, 16  ;;  %v20054_v37 = vrot.slane %v6776_v49, 1 }
 0x686   : > { %17079 = vmatmul.msk.bf16.gmra.mxu0 %vm770_vm2, %v11197_v63  ;;  %v9074_v16 = vpop.f32.mrf.mxu2  ;;  %v8451_v3 = vsel %vm2653_vm3, %v8446_v39, %v20059_v59  ;;  %v8452_v29 = vshrl.u32 %v20036_v52, 16 }
 0x687   : > { %v12119_v14 = vmax.f32 %v11987_v6, 0.0  ;;  %v9368_v12 = vadd.f32 %v9074_v16, %v7696_v5  ;;  %v12587_v44 = vrot.slane %v12585_v42, 6  ;;  %v12590_v46 = vrot.slane %v12588_v25, 7 }
 0x688   : > { %v7404_v53 = vpop.f32.mrf.mxu1  ;;  %v20048_v41 = vpop.f32.mrf.mxu3  ;;  %v6779_v10 = vsel %vm2653_vm3, %v6774_v61, %v20054_v37  ;;  %v10139_v16 = vsel %vm2653_vm3, %v10134_v18, %v20067_v36  ;;  %v6782_v18 = vor.u32 %v6780_v28, %v20054_v37  ;;  %v22639_v28 = vld [vmem:[#allocation97_spill] sm:$0xff] }
 0x689   : > { %v12251_v4 = vmin.f32 %v12119_v14, 6.0  ;;  %v11040_v1 = vadd.f32 %v19945_v48, %v9368_v12  ;;  %v12591_v30 = vor.u32 %v12590_v46, %v12587_v44  ;;  %v11198_v48 = vrot.slane %v20036_v52, 1 }
 0x68a   : > { %v7697_v60 = vadd.f32 %v7404_v53, %v18458_v15 }
 0x68b   : > { %v11560_v33 = vpop.f32.mrf.mxu0  ;;  %v12560_v54 = vpack.c.bf16 %v12251_v4, %v12251_v4  ;;  %v11852_v17 = vadd.f32 %v11558_v23, %v11040_v1  ;;  %v12592_v38 = vsel %vm20007_vm9, %v12583_v45, %v12591_v30  ;;  %v11199_v15 = vsel %vm11154_vm4, %v11196_v34, %v11198_v48  ;;  %v20091_v34 = vld [vmem:[%s17763_s25 + $0x520] sm:$0xff]  ;;  %v20101_v45 = vld [vmem:[%s17763_s25 + $0x30c] sm:$0xff] }
 0x68c   : > { %12618 = vst.msk [vmem:[%s19450_s15 + $0x54] sm:$0xf] %vm12364_vm5, %v12592_v38  ;;  %v12593_v8 = vrot.slane %v12591_v30, 4  ;;  %v6784_v35 = vshll.u32 %v20091_v34, 16 }
 0x68d   : > { %v12595_v7 = vshrl.u32 %v12560_v54, 16  ;;  %v12598_v2 = vshll.u32 %v12560_v54, 16  ;;  %v11988_v32 = vadd.f32 %v19874_v62, %v11852_v17 }
 0x68e   : > { %v9076_v56 = vpop.f32.mrf.mxu2 }
 0x68f   : > { %v12597_v23 = vrot.slane %v12595_v7, 6  ;;  %v12600_v63 = vrot.slane %v12598_v2, 7  ;;  %v12120_v19 = vmax.f32 %v11988_v32, 0.0  ;;  %v9369_v58 = vadd.f32 %v9076_v56, %v7697_v60 }
 0x690   : > { %v7407_v11 = vpop.f32.mrf.mxu1  ;;  %v20078_v43 = vpop.f32.mrf.mxu3  ;;  %v10140_v7 = vshrl.u32 %v20044_v55, 16  ;;  %v10144_v2 = vshll.u32 %v20101_v45, 16  ;;  %v8454_v55 = vor.u32 %v8452_v29, %v20059_v59  ;;  %v20158_v29 = vld [vmem:[%s17763_s25 + $0x314] sm:$0xff] }
 0x691   : > { %v12601_v6 = vor.u32 %v12600_v63, %v12597_v23  ;;  %v12252_v5 = vmin.f32 %v12120_v19, 6.0  ;;  %v11041_v42 = vadd.f32 %v19959_v22, %v9369_v58  ;;  %v20094_v22 = vld [vmem:[%s17763_s25 + $0xc8] sm:$0xff]  ;;  %v7698_v46 = vadd.f32 %v7407_v11, %v18464_v40 }
 0x692   : > { %v8456_v40 = vshll.u32 %v20094_v22, 16  ;;  %v11200_v19 = vrot.slane %v20094_v22, 1 }
 0x693   : > { %v11563_v25 = vpop.f32.mrf.mxu0  ;;  %v12602_v14 = vsel %vm20007_vm9, %v12593_v8, %v12601_v6  ;;  %v12561_v12 = vpack.c.bf16 %v12252_v5, %v12252_v5  ;;  %v11853_v20 = vadd.f32 %v11560_v33, %v11041_v42  ;;  %16222 = vmatmul.msk.bf16.gmra.mxu1 %vm770_vm2, %v6779_v10  ;;  %16549 = vmatmul.msk.bf16.gmra.mxu2 %vm770_vm2, %v8451_v3  ;;  %v12603_v17 = vrot.slane %v12601_v6, 4 }
 0x694   : > { %12619 = vst.msk [vmem:[%s19450_s15 + $0x58] sm:$0xf] %vm12364_vm5, %v12602_v14  ;;  %v8458_v63 = vrot.slane %v8456_v40, 1  ;;  %v10146_v8 = vrot.slane %v10144_v2, 1 }
 0x695   : > { %v12605_v24 = vshrl.u32 %v12561_v12, 16  ;;  %v12608_v49 = vshll.u32 %v12561_v12, 16  ;;  %v11989_v44 = vadd.f32 %v19874_v62, %v11853_v20  ;;  %17015 = vmatmul.msk.bf16.gmra.mxu3 %vm770_vm2, %v10139_v16  ;;  %v17127_v58 = vrot.slane %v12561_v12, 11 }
 0x696   : > { %17080 = vmatmul.msk.bf16.gmra.mxu0 %vm770_vm2, %v11199_v15  ;;  %v9079_v53 = vpop.f32.mrf.mxu2  ;;  %v10142_v15 = vor.u32 %v10140_v7, %v20067_v36  ;;  %v8459_v16 = vsel %vm2653_vm3, %v8454_v55, %v8458_v63  ;;  %v11201_v20 = vsel %vm11154_vm4, %v11198_v48, %v11200_v19 }
 0x697   : > { %v12607_v26 = vrot.slane %v12605_v24, 6  ;;  %v12610_v4 = vrot.slane %v12608_v49, 7  ;;  %v12121_v1 = vmax.f32 %v11989_v44, 0.0  ;;  %v9370_v33 = vadd.f32 %v9079_v53, %v7698_v46  ;;  %v20149_v46 = vld [vmem:[%s17763_s25 + $0xd0] sm:$0xff] }
 0x698   : > { %v7409_v30 = vpop.f32.mrf.mxu1  ;;  %v20106_v54 = vpop.f32.mrf.mxu3  ;;  %v10147_v24 = vsel %vm2653_vm3, %v10142_v15, %v10146_v8 }
 0x699   : > { %v12611_v61 = vor.u32 %v12610_v4, %v12607_v26  ;;  %v12253_v13 = vmin.f32 %v12121_v1, 6.0  ;;  %v11042_v38 = vadd.f32 %v19991_v21, %v9370_v33  ;;  %v6786_v21 = vrot.slane %v6784_v35, 1 }
 0x69a   : > { %v7699_v37 = vadd.f32 %v7409_v30, %v18473_v27  ;;  %v6788_v35 = vshrl.u32 %v20091_v34, 16  ;;  %v10152_v34 = vshll.u32 %v20158_v29, 16 }
 0x69b   : > { %v11565_v39 = vpop.f32.mrf.mxu0  ;;  %v12612_v32 = vsel %vm20007_vm9, %v12603_v17, %v12611_v61  ;;  %v12621_v60 = vpack.c.bf16 %v12253_v13, %v12253_v13  ;;  %v11854_v56 = vadd.f32 %v11563_v25, %v11042_v38  ;;  %v6787_v25 = vsel %vm2653_vm3, %v6782_v18, %v6786_v21 }
 0x69c   : > { %12620 = vst.msk [vmem:[%s19450_s15 + $0x5c] sm:$0xf] %vm12364_vm5, %v12612_v32  ;;  %v8460_v61 = vshrl.u32 %v20094_v22, 16  ;;  %v8464_v13 = vshll.u32 %v20149_v46, 16  ;;  %v10148_v32 = vshrl.u32 %v20101_v45, 16  ;;  %v6790_v18 = vor.u32 %v6788_v35, %v6786_v21 }
 0x69d   : > { %v12635_v11 = vrot.slane %v12621_v60, 7  ;;  %v11990_v10 = vadd.f32 %v19874_v62, %v11854_v56  ;;  %v10154_v45 = vrot.slane %v10152_v34, 1 }
 0x69e   : > { %v9081_v3 = vpop.f32.mrf.mxu2 }
 0x69f   : > { %v12636_v6 = vsel %vm20116_vm12, %v17127_v58, %v12635_v11  ;;  %v12122_v5 = vmax.f32 %v11990_v10, 0.0  ;;  %v9371_v42 = vadd.f32 %v9081_v3, %v7699_v37  ;;  %v12637_v53 = vrot.slane %v12635_v11, 4 }
 0x6a0   : > { %12650 = vst.msk [vmem:[%s19450_s15 + $0x60] sm:$0xf] %vm12364_vm5, %v12636_v6  ;;  %v7412_v59 = vpop.f32.mrf.mxu1  ;;  %v20133_v14 = vpop.f32.mrf.mxu3  ;;  %v8462_v58 = vor.u32 %v8460_v61, %v8458_v63  ;;  %v8466_v11 = vrot.slane %v8464_v13, 1  ;;  %v11202_v10 = vrot.slane %v20149_v46, 1  ;;  %v22640_v6 = vld [vmem:[#allocation98_spill] sm:$0xff]  ;;  %v8468_v13 = vshrl.u32 %v20149_v46, 16 }
 0x6a1   : > { %v12254_v27 = vmin.f32 %v12122_v5, 6.0  ;;  %v11043_v36 = vadd.f32 %v20015_v31, %v9371_v42  ;;  %v20146_v31 = vld [vmem:[%s17763_s25 + $0x528] sm:$0xff]  ;;  %v7700_v26 = vadd.f32 %v7412_v59, %v22639_v28  ;;  %v10150_v42 = vor.u32 %v10148_v32, %v10146_v8  ;;  %v20247_v46 = vld [vmem:[%s17763_s25 + $0x538] sm:$0xff] }
 0x6a2   : > { %v6792_v17 = vshll.u32 %v20146_v31, 16  ;;  %v22641_v28 = vld [vmem:[#allocation99_spill] sm:$0xff]  ;;  %v6796_v35 = vshrl.u32 %v20146_v31, 16  ;;  %v10156_v31 = vshrl.u32 %v20158_v29, 16 }
 0x6a3   : > { %v11568_v12 = vpop.f32.mrf.mxu0  ;;  %v12622_v49 = vpack.c.bf16 %v12254_v27, %v12254_v27  ;;  %v11855_v44 = vadd.f32 %v11565_v39, %v11043_v36  ;;  %16223 = vmatmul.msk.bf16.gmra.mxu1 %vm770_vm2, %v6787_v25  ;;  %16550 = vmatmul.msk.bf16.gmra.mxu2 %vm770_vm2, %v8459_v16  ;;  %v8467_v27 = vsel %vm2653_vm3, %v8462_v58, %v8466_v11 }
 0x6a4   : > { %v6794_v55 = vrot.slane %v6792_v17, 1  ;;  %v10158_v29 = vor.u32 %v10156_v31, %v10154_v45  ;;  %v6808_v31 = vshll.u32 %v20247_v46, 16 }
 0x6a5   : > { %v12638_v52 = vrot.slane %v12622_v49, 7  ;;  %v11991_v48 = vadd.f32 %v19874_v62, %v11855_v44  ;;  %17016 = vmatmul.msk.bf16.gmra.mxu3 %vm770_vm2, %v10147_v24  ;;  %v11203_v24 = vsel %vm11154_vm4, %v11200_v19, %v11202_v10  ;;  %v10155_v49 = vsel %vm2653_vm3, %v10150_v42, %v10154_v45  ;;  %v22642_v42 = vld [vmem:[#allocation100_spill] sm:$0xff] }
 0x6a6   : > { %17081 = vmatmul.msk.bf16.gmra.mxu0 %vm770_vm2, %v11201_v20  ;;  %v9084_v4 = vpop.f32.mrf.mxu2  ;;  %v6795_v63 = vsel %vm2653_vm3, %v6790_v18, %v6794_v55  ;;  %v6798_v58 = vor.u32 %v6796_v35, %v6794_v55 }
 0x6a7   : > { %v12639_v1 = vsel %vm20116_vm12, %v12637_v53, %v12638_v52  ;;  %v12123_v33 = vmax.f32 %v11991_v48, 0.0  ;;  %v9372_v30 = vadd.f32 %v9084_v4, %v7700_v26  ;;  %v12640_v37 = vrot.slane %v12638_v52, 4  ;;  %v20195_v52 = vld [vmem:[%s17763_s25 + $0xd8] sm:$0xff] }
 0x6a8   : > { %12651 = vst.msk [vmem:[%s19450_s15 + $0x64] sm:$0xf] %vm12364_vm5, %v12639_v1  ;;  %v7414_v40 = vpop.f32.mrf.mxu1  ;;  %v20165_v38 = vpop.f32.mrf.mxu3 }
 0x6a9   : > { %v12255_v39 = vmin.f32 %v12123_v33, 6.0  ;;  %v11044_v7 = vadd.f32 %v20048_v41, %v9372_v30  ;;  %v7701_v41 = vadd.f32 %v7414_v40, %v22640_v6  ;;  %v20204_v40 = vld [vmem:[%s17763_s25 + $0x31c] sm:$0xff]  ;;  %v11204_v6 = vrot.slane %v20195_v52, 1 }
 0x6ab   : > { %v11570_v2 = vpop.f32.mrf.mxu0  ;;  %v12623_v60 = vpack.c.bf16 %v12255_v39, %v12255_v39  ;;  %v11856_v56 = vadd.f32 %v11568_v12, %v11044_v7  ;;  %v8472_v39 = vshll.u32 %v20195_v52, 16  ;;  %v11205_v45 = vsel %vm11154_vm4, %v11202_v10, %v11204_v6 }
 0x6ad   : > { %v12641_v3 = vrot.slane %v12623_v60, 7  ;;  %v11992_v15 = vadd.f32 %v19874_v62, %v11856_v56  ;;  %v10160_v60 = vshll.u32 %v20204_v40, 16 }
 0x6ae   : > { %v9086_v5 = vpop.f32.mrf.mxu2 }
 0x6af   : > { %v12642_v59 = vsel %vm20116_vm12, %v12640_v37, %v12641_v3  ;;  %v12124_v25 = vmax.f32 %v11992_v15, 0.0  ;;  %v9373_v16 = vadd.f32 %v9086_v5, %v7701_v41  ;;  %v12643_v48 = vrot.slane %v12641_v3, 4 }
 0x6b0   : > { %12652 = vst.msk [vmem:[%s19450_s15 + $0x68] sm:$0xf] %vm12364_vm5, %v12642_v59  ;;  %v7417_v21 = vpop.f32.mrf.mxu1  ;;  %v20179_v36 = vpop.f32.mrf.mxu3  ;;  %v8470_v3 = vor.u32 %v8468_v13, %v8466_v11  ;;  %v20216_v15 = vrot.slane %v8472_v39, 1 }
 0x6b1   : > { %v12256_v12 = vmin.f32 %v12124_v25, 6.0  ;;  %v11045_v8 = vadd.f32 %v20078_v43, %v9373_v16  ;;  %v20192_v43 = vld [vmem:[%s17763_s25 + $0x530] sm:$0xff]  ;;  %v7702_v26 = vadd.f32 %v7417_v21, %v22641_v28  ;;  %v10162_v16 = vrot.slane %v10160_v60, 1 }
 0x6b2   : > { %v6800_v61 = vshll.u32 %v20192_v43, 16  ;;  %v8476_v60 = vshrl.u32 %v20195_v52, 16  ;;  %v20294_v52 = vld [vmem:[%s17763_s25 + $0x540] sm:$0xff] }
 0x6b3   : > { %v11573_v20 = vpop.f32.mrf.mxu0  ;;  %v12624_v44 = vpack.c.bf16 %v12256_v12, %v12256_v12  ;;  %v11857_v53 = vadd.f32 %v11570_v2, %v11045_v8  ;;  %16224 = vmatmul.msk.bf16.gmra.mxu1 %vm770_vm2, %v6795_v63  ;;  %16551 = vmatmul.msk.bf16.gmra.mxu2 %vm770_vm2, %v8467_v27 }
 0x6b4   : > { %v6802_v37 = vrot.slane %v6800_v61, 1 }
 0x6b5   : > { %v12644_v22 = vrot.slane %v12624_v44, 7  ;;  %v11993_v19 = vadd.f32 %v19874_v62, %v11857_v53  ;;  %17017 = vmatmul.msk.bf16.gmra.mxu3 %vm770_vm2, %v10155_v49  ;;  %v12662_v41 = vshrl.u32 %v12624_v44, 16 }
 0x6b6   : > { %17082 = vmatmul.msk.bf16.gmra.mxu0 %vm770_vm2, %v11203_v24  ;;  %v9089_v4 = vpop.f32.mrf.mxu2  ;;  %v6803_v8 = vsel %vm2653_vm3, %v6798_v58, %v6802_v37 }
 0x6b7   : > { %v12645_v1 = vsel %vm20116_vm12, %v12643_v48, %v12644_v22  ;;  %v12125_v33 = vmax.f32 %v11993_v19, 0.0  ;;  %v9374_v30 = vadd.f32 %v9089_v4, %v7702_v26  ;;  %v17128_v49 = vrot.slane %v12662_v41, 11 }
 0x6b8   : > { %12653 = vst.msk [vmem:[%s19450_s15 + $0x6c] sm:$0xf] %vm12364_vm5, %v12645_v1  ;;  %v7419_v17 = vpop.f32.mrf.mxu1  ;;  %v20211_v7 = vpop.f32.mrf.mxu3  ;;  %v10163_v19 = vsel %vm2653_vm3, %v10158_v29, %v10162_v16 }
 0x6b9   : > { %v12257_v2 = vmin.f32 %v12125_v33, 6.0  ;;  %v11046_v32 = vadd.f32 %v20106_v54, %v9374_v30  ;;  %v7703_v59 = vadd.f32 %v7419_v17, %v22642_v42  ;;  %v22645_v33 = vld [vmem:[#allocation101_spill] sm:$0xff]  ;;  %v6804_v17 = vshrl.u32 %v20192_v43, 16 }
 0x6bb   : > { %v11575_v34 = vpop.f32.mrf.mxu0  ;;  %v12654_v56 = vpack.c.bf16 %v12257_v2, %v12257_v2  ;;  %v11858_v18 = vadd.f32 %v11573_v20, %v11046_v32  ;;  %v8475_v20 = vsel %vm2653_vm3, %v8470_v3, %v20216_v15  ;;  %v20257_v32 = vld [vmem:[%s17763_s25 + $0x324] sm:$0xff] }
 0x6bc   : > { %v10168_v42 = vshll.u32 %v20257_v32, 16 }
 0x6bd   : > { %v12667_v5 = vshrl.u32 %v12654_v56, 16  ;;  %v11994_v54 = vadd.f32 %v19874_v62, %v11858_v18  ;;  %v12670_v63 = vshll.u32 %v12654_v56, 16 }
 0x6be   : > { %v9091_v25 = vpop.f32.mrf.mxu2 }
 0x6bf   : > { %v12669_v21 = vrot.slane %v12667_v5, 7  ;;  %v12126_v27 = vmax.f32 %v11994_v54, 0.0  ;;  %v9375_v12 = vadd.f32 %v9091_v25, %v7703_v59  ;;  %v10164_v54 = vshrl.u32 %v20204_v40, 16  ;;  %v22646_v40 = vld [vmem:[#allocation102_spill] sm:$0xff] }
 0x6c0   : > { %v7422_v11 = vpop.f32.mrf.mxu1  ;;  %v20235_v24 = vpop.f32.mrf.mxu3 }
 0x6c1   : > { %v12672_v44 = vor.u32 %v12670_v63, %v12669_v21  ;;  %v12258_v53 = vmin.f32 %v12126_v27, 6.0  ;;  %v11047_v48 = vadd.f32 %v20133_v14, %v9375_v12  ;;  %v20250_v14 = vld [vmem:[%s17763_s25 + $0xe0] sm:$0xff]  ;;  %v7704_v30 = vadd.f32 %v7422_v11, %v22645_v33 }
 0x6c2   : > { %v8480_v56 = vshll.u32 %v20250_v14, 16  ;;  %v12674_v58 = vrot.slane %v12669_v21, 4  ;;  %v6806_v63 = vor.u32 %v6804_v17, %v6802_v37  ;;  %v6810_v27 = vrot.slane %v6808_v31, 1 }
 0x6c3   : > { %v11578_v22 = vpop.f32.mrf.mxu0  ;;  %v12673_v28 = vsel %vm20223_vm15, %v17128_v49, %v12672_v44  ;;  %v12655_v26 = vpack.c.bf16 %v12258_v53, %v12258_v53  ;;  %v11859_v4 = vadd.f32 %v11575_v34, %v11047_v48  ;;  %16225 = vmatmul.msk.bf16.gmra.mxu1 %vm770_vm2, %v6803_v8  ;;  %16552 = vmatmul.msk.bf16.gmra.mxu2 %vm770_vm2, %v8475_v20  ;;  %v11206_v11 = vrot.slane %v20250_v14, 1 }
 0x6c4   : > { %12705 = vst.msk [vmem:[%s19450_s15 + $0x70] sm:$0xf] %vm12364_vm5, %v12673_v28  ;;  %v8478_v21 = vor.u32 %v8476_v60, %v20216_v15  ;;  %v8482_v12 = vrot.slane %v8480_v56, 1  ;;  %v10166_v49 = vor.u32 %v10164_v54, %v10162_v16  ;;  %v10170_v44 = vrot.slane %v10168_v42, 1 }
 0x6c5   : > { %v12676_v10 = vshrl.u32 %v12655_v26, 16  ;;  %v11995_v1 = vadd.f32 %v19874_v62, %v11859_v4  ;;  %17018 = vmatmul.msk.bf16.gmra.mxu3 %vm770_vm2, %v10163_v19  ;;  %v12679_v13 = vshll.u32 %v12655_v26, 16  ;;  %v6811_v28 = vsel %vm2653_vm3, %v6806_v63, %v6810_v27 }
 0x6c6   : > { %17083 = vmatmul.msk.bf16.gmra.mxu0 %vm770_vm2, %v11205_v45  ;;  %v9094_v35 = vpop.f32.mrf.mxu2  ;;  %v8483_v15 = vsel %vm2653_vm3, %v8478_v21, %v8482_v12  ;;  %v11207_v26 = vsel %vm11154_vm4, %v11204_v6, %v11206_v11  ;;  %v6816_v54 = vshll.u32 %v20294_v52, 16  ;;  %v8484_v42 = vshrl.u32 %v20250_v14, 16 }
 0x6c7   : > { %v12678_v61 = vrot.slane %v12676_v10, 7  ;;  %v12127_v39 = vmax.f32 %v11995_v1, 0.0  ;;  %v9376_v2 = vadd.f32 %v9094_v35, %v7704_v30  ;;  %v10171_v35 = vsel %vm2653_vm3, %v10166_v49, %v10170_v44 }
 0x6c8   : > { %v7424_v34 = vpop.f32.mrf.mxu1  ;;  %v20262_v18 = vpop.f32.mrf.mxu3 }
 0x6c9   : > { %v12681_v3 = vor.u32 %v12679_v13, %v12678_v61  ;;  %v12259_v41 = vmin.f32 %v12127_v39, 6.0  ;;  %v11048_v43 = vadd.f32 %v20165_v38, %v9376_v2  ;;  %v7705_v20 = vadd.f32 %v7424_v34, %v22646_v40  ;;  %v22647_v2 = vld [vmem:[#allocation103_spill] sm:$0xff] }
 0x6ca   : > { %v12683_v4 = vrot.slane %v12678_v61, 4 }
 0x6cb   : > { %v11580_v5 = vpop.f32.mrf.mxu0  ;;  %v12682_v59 = vsel %vm20223_vm15, %v12674_v58, %v12681_v3  ;;  %v12656_v25 = vpack.c.bf16 %v12259_v41, %v12259_v41  ;;  %v11860_v29 = vadd.f32 %v11578_v22, %v11048_v43  ;;  %v20303_v41 = vld [vmem:[%s17763_s25 + $0x32c] sm:$0xff] }
 0x6cc   : > { %12706 = vst.msk [vmem:[%s19450_s15 + $0x74] sm:$0xf] %vm12364_vm5, %v12682_v59  ;;  %v10176_v40 = vshll.u32 %v20303_v41, 16 }
 0x6cd   : > { %v12685_v38 = vshrl.u32 %v12656_v25, 16  ;;  %v11996_v8 = vadd.f32 %v19874_v62, %v11860_v29  ;;  %v12688_v48 = vshll.u32 %v12656_v25, 16 }
 0x6ce   : > { %v9096_v45 = vpop.f32.mrf.mxu2 }
 0x6cf   : > { %v12687_v53 = vrot.slane %v12685_v38, 7  ;;  %v12128_v22 = vmax.f32 %v11996_v8, 0.0  ;;  %v9377_v37 = vadd.f32 %v9096_v45, %v7705_v20  ;;  %v10172_v8 = vshrl.u32 %v20257_v32, 16 }
 0x6d0   : > { %v7427_v19 = vpop.f32.mrf.mxu1  ;;  %v20282_v16 = vpop.f32.mrf.mxu3 }
 0x6d1   : > { %v12690_v10 = vor.u32 %v12688_v48, %v12687_v53  ;;  %v12260_v1 = vmin.f32 %v12128_v22, 6.0  ;;  %v11049_v33 = vadd.f32 %v20179_v36, %v9377_v37  ;;  %v20297_v36 = vld [vmem:[%s17763_s25 + $0xe8] sm:$0xff]  ;;  %v7706_v34 = vadd.f32 %v7427_v19, %v22647_v2  ;;  %v22648_v37 = vld [vmem:[#allocation104_spill] sm:$0xff] }
 0x6d2   : > { %v12692_v25 = vrot.slane %v12687_v53, 4  ;;  %v6818_v48 = vrot.slane %v6816_v54, 1  ;;  %v8486_v22 = vor.u32 %v8484_v42, %v8482_v12  ;;  %v20343_v2 = vld [vmem:[%s17763_s25 + $0x548] sm:$0xff]  ;;  %v8492_v54 = vshrl.u32 %v20297_v36, 16 }
 0x6d3   : > { %v11583_v30 = vpop.f32.mrf.mxu0  ;;  %v12691_v17 = vsel %vm20223_vm15, %v12683_v4, %v12690_v10  ;;  %v12657_v13 = vpack.c.bf16 %v12260_v1, %v12260_v1  ;;  %v11861_v39 = vadd.f32 %v11580_v5, %v11049_v33  ;;  %16226 = vmatmul.msk.bf16.gmra.mxu1 %vm770_vm2, %v6811_v28  ;;  %16553 = vmatmul.msk.bf16.gmra.mxu2 %vm770_vm2, %v8483_v15  ;;  %v6812_v5 = vshrl.u32 %v20247_v46, 16 }
 0x6d4   : > { %12707 = vst.msk [vmem:[%s19450_s15 + $0x78] sm:$0xf] %vm12364_vm5, %v12691_v17  ;;  %v11208_v28 = vrot.slane %v20297_v36, 1  ;;  %v10178_v4 = vrot.slane %v10176_v40, 1 }
 0x6d5   : > { %v12694_v6 = vshrl.u32 %v12657_v13, 16  ;;  %v11997_v61 = vadd.f32 %v19874_v62, %v11861_v39  ;;  %17019 = vmatmul.msk.bf16.gmra.mxu3 %vm770_vm2, %v10171_v35  ;;  %v12697_v56 = vshll.u32 %v12657_v13, 16  ;;  %v8488_v62 = vshll.u32 %v20297_v36, 16 }
 0x6d6   : > { %17084 = vmatmul.msk.bf16.gmra.mxu0 %vm770_vm2, %v11207_v26  ;;  %v9099_v31 = vpop.f32.mrf.mxu2  ;;  %v6814_v49 = vor.u32 %v6812_v5, %v6810_v27  ;;  %v10174_v26 = vor.u32 %v10172_v8, %v10170_v44  ;;  %v11209_v44 = vsel %vm11154_vm4, %v11206_v11, %v11208_v28  ;;  %v22649_v11 = vld [vmem:[#allocation105_spill] sm:$0xff]  ;;  %v6824_v5 = vshll.u32 %v20343_v2, 16 }
 0x6d7   : > { %v12696_v60 = vrot.slane %v12694_v6, 7  ;;  %v12129_v58 = vmax.f32 %v11997_v61, 0.0  ;;  %v9378_v3 = vadd.f32 %v9099_v31, %v7706_v34  ;;  %v8490_v53 = vrot.slane %v8488_v62, 1 }
 0x6d8   : > { %v7429_v43 = vpop.f32.mrf.mxu1  ;;  %v20309_v59 = vpop.f32.mrf.mxu3  ;;  %v6819_v1 = vsel %vm2653_vm3, %v6814_v49, %v6818_v48  ;;  %v10179_v39 = vsel %vm2653_vm3, %v10174_v26, %v10178_v4 }
 0x6d9   : > { %v12699_v29 = vor.u32 %v12697_v56, %v12696_v60  ;;  %v12261_v63 = vmin.f32 %v12129_v58, 6.0  ;;  %v11050_v21 = vadd.f32 %v20211_v7, %v9378_v3  ;;  %v20323_v7 = vld [vmem:[%s22332_s2] ss:$0 sm:$0xff]  ;;  %v7707_v19 = vadd.f32 %v7429_v43, %v22648_v37  ;;  %v20354_v58 = vld [vmem:[%s17763_s25 + $0x334] sm:$0xff] }
 0x6da   : > { %v8491_v33 = vsel %vm2653_vm3, %v8486_v22, %v8490_v53  ;;  %v6820_v43 = vshrl.u32 %v20294_v52, 16  ;;  %v22650_v22 = vld [vmem:[#allocation7_spill] sm:$0xff] }
 0x6db   : > { %v11585_v38 = vpop.f32.mrf.mxu0  ;;  %v12700_v46 = vsel %vm20223_vm15, %v12692_v25, %v12699_v29  ;;  %v12709_v20 = vpack.c.bf16 %v12261_v63, %v12261_v63  ;;  %v11862_v45 = vadd.f32 %v11583_v30, %v11050_v21  ;;  %v10180_v21 = vshrl.u32 %v20303_v41, 16 }
 0x6dc   : > { %12708 = vst.msk [vmem:[%s19450_s15 + $0x7c] sm:$0xf] %vm12364_vm5, %v12700_v46  ;;  %v6822_v52 = vor.u32 %v6820_v43, %v6818_v48  ;;  %v6826_v46 = vrot.slane %v6824_v5, 1 }
 0x6dd   : > { %12713 = vst.msk [vmem:[%s19450_s15 + $0x80] sm:$0xf] %vm12364_vm5, %v12709_v20  ;;  %v11998_v32 = vadd.f32 %v20323_v7, %v11862_v45  ;;  %v8494_v20 = vor.u32 %v8492_v54, %v8490_v53 }
 0x6de   : > { %v9101_v15 = vpop.f32.mrf.mxu2  ;;  %v6827_v48 = vsel %vm2653_vm3, %v6822_v52, %v6826_v46 }
 0x6df   : > { %v12130_v27 = vmax.f32 %v11998_v32, 0.0  ;;  %v9379_v12 = vadd.f32 %v9101_v15, %v7707_v19  ;;  %v10182_v19 = vor.u32 %v10180_v21, %v10178_v4 }
 0x6e0   : > { %v7432_v10 = vpop.f32.mrf.mxu1  ;;  %v20330_v30 = vpop.f32.mrf.mxu3 }
 0x6e1   : > { %v12262_v35 = vmin.f32 %v12130_v27, 6.0  ;;  %v11051_v17 = vadd.f32 %v20235_v24, %v9379_v12  ;;  %v20346_v24 = vld [vmem:[%s17763_s25 + $0xf0] sm:$0xff]  ;;  %v7708_v34 = vadd.f32 %v7432_v10, %v22649_v11  ;;  %v6828_v11 = vshrl.u32 %v20343_v2, 16 }
 0x6e2   : > { %v8496_v42 = vshll.u32 %v20346_v24, 16  ;;  %v11210_v37 = vrot.slane %v20346_v24, 1 }
 0x6e3   : > { %v11588_v13 = vpop.f32.mrf.mxu0  ;;  %v12710_v6 = vpack.c.bf16 %v12262_v35, %v12262_v35  ;;  %v11863_v61 = vadd.f32 %v11585_v38, %v11051_v17  ;;  %16227 = vmatmul.msk.bf16.gmra.mxu1 %vm770_vm2, %v6819_v1  ;;  %16554 = vmatmul.msk.bf16.gmra.mxu2 %vm770_vm2, %v8491_v33  ;;  %v10184_v38 = vshll.u32 %v20354_v58, 16  ;;  %v6830_v21 = vor.u32 %v6828_v11, %v6826_v46 }
 0x6e4   : > { %v8498_v45 = vrot.slane %v8496_v42, 1  ;;  %v11211_v4 = vsel %vm11154_vm4, %v11208_v28, %v11210_v37  ;;  %v22651_v28 = vld [vmem:[#allocation10_spill] sm:$0xff] }
 0x6e5   : > { %12714 = vst.msk [vmem:[%s19450_s15 + $0x84] sm:$0xf] %vm12364_vm5, %v12710_v6  ;;  %v11999_v14 = vadd.f32 %v20323_v7, %v11863_v61  ;;  %17020 = vmatmul.msk.bf16.gmra.mxu3 %vm770_vm2, %v10179_v39  ;;  %v10186_v15 = vrot.slane %v10184_v38, 1 }
 0x6e6   : > { %17085 = vmatmul.msk.bf16.gmra.mxu0 %vm770_vm2, %v11209_v44  ;;  %v9104_v31 = vpop.f32.mrf.mxu2  ;;  %v8499_v53 = vsel %vm2653_vm3, %v8494_v20, %v8498_v45  ;;  %v20385_v44 = vld [vmem:[%s17763_s25 + $0x550] sm:$0xff] }
 0x6e7   : > { %v12131_v60 = vmax.f32 %v11999_v14, 0.0  ;;  %v9380_v56 = vadd.f32 %v9104_v31, %v7708_v34  ;;  %v10187_v35 = vsel %vm2653_vm3, %v10182_v19, %v10186_v15  ;;  %v20397_v34 = vld [vmem:[%s17763_s25 + $0x33c] sm:$0xff] }
 0x6e8   : > { %v7434_v3 = vpop.f32.mrf.mxu1  ;;  %v20360_v62 = vpop.f32.mrf.mxu3 }
 0x6e9   : > { %v12263_v25 = vmin.f32 %v12131_v60, 6.0  ;;  %v11052_v29 = vadd.f32 %v20262_v18, %v9380_v56  ;;  %v7709_v32 = vadd.f32 %v7434_v3, %v22650_v22  ;;  %v6832_v60 = vshll.u32 %v20385_v44, 16 }
 0x6ea   : > { %v8500_v56 = vshrl.u32 %v20346_v24, 16 }
 0x6eb   : > { %v11590_v63 = vpop.f32.mrf.mxu0  ;;  %v12711_v8 = vpack.c.bf16 %v12263_v25, %v12263_v25  ;;  %v11864_v40 = vadd.f32 %v11588_v13, %v11052_v29  ;;  %v10188_v25 = vshrl.u32 %v20354_v58, 16  ;;  %v10192_v29 = vshll.u32 %v20397_v34, 16 }
 0x6ec   : > { %v6834_v38 = vrot.slane %v6832_v60, 1 }
 0x6ed   : > { %12715 = vst.msk [vmem:[%s19450_s15 + $0x88] sm:$0xf] %vm12364_vm5, %v12711_v8  ;;  %v12000_v49 = vadd.f32 %v20323_v7, %v11864_v40  ;;  %v8502_v8 = vor.u32 %v8500_v56, %v8498_v45  ;;  %v10190_v19 = vor.u32 %v10188_v25, %v10186_v15 }
 0x6ee   : > { %v9106_v18 = vpop.f32.mrf.mxu2  ;;  %v6835_v45 = vsel %vm2653_vm3, %v6830_v21, %v6834_v38 }
 0x6ef   : > { %v12132_v41 = vmax.f32 %v12000_v49, 0.0  ;;  %v9381_v26 = vadd.f32 %v9106_v18, %v7709_v32  ;;  %v22652_v32 = vld [vmem:[#allocation13_spill] sm:$0xff] }
 0x6f0   : > { %v7437_v27 = vpop.f32.mrf.mxu1  ;;  %v20372_v12 = vpop.f32.mrf.mxu3 }
 0x6f1   : > { %v12264_v10 = vmin.f32 %v12132_v41, 6.0  ;;  %v11053_v1 = vadd.f32 %v20282_v16, %v9381_v26  ;;  %v20388_v16 = vld [vmem:[%s17763_s25 + $0xf8] sm:$0xff]  ;;  %v7710_v39 = vadd.f32 %v7437_v27, %v22651_v28  ;;  %v10194_v41 = vrot.slane %v10192_v29, 1  ;;  %v20428_v28 = vld [vmem:[%s17763_s25 + $0x100] sm:$0xff] }
 0x6f2   : > { %v8504_v3 = vshll.u32 %v20388_v16, 16  ;;  %v11212_v52 = vrot.slane %v20388_v16, 1  ;;  %v8508_v29 = vshrl.u32 %v20388_v16, 16 }
 0x6f3   : > { %v11593_v33 = vpop.f32.mrf.mxu0  ;;  %v12712_v17 = vpack.c.bf16 %v12264_v10, %v12264_v10  ;;  %v11865_v13 = vadd.f32 %v11590_v63, %v11053_v1  ;;  %16228 = vmatmul.msk.bf16.gmra.mxu1 %vm770_vm2, %v6827_v48  ;;  %16555 = vmatmul.msk.bf16.gmra.mxu2 %vm770_vm2, %v8499_v53 }
 0x6f4   : > { %v8506_v40 = vrot.slane %v8504_v3, 1  ;;  %v11213_v15 = vsel %vm11154_vm4, %v11210_v37, %v11212_v52 }
 0x6f5   : > { %12716 = vst.msk [vmem:[%s19450_s15 + $0x8c] sm:$0xf] %vm12364_vm5, %v12712_v17  ;;  %v12001_v36 = vadd.f32 %v20323_v7, %v11865_v13  ;;  %17021 = vmatmul.msk.bf16.gmra.mxu3 %vm770_vm2, %v10187_v35  ;;  %v10195_v17 = vsel %vm2653_vm3, %v10190_v19, %v10194_v41 }
 0x6f6   : > { %17086 = vmatmul.msk.bf16.gmra.mxu0 %vm770_vm2, %v11211_v4  ;;  %v9109_v6 = vpop.f32.mrf.mxu2  ;;  %v8507_v53 = vsel %vm2653_vm3, %v8502_v8, %v8506_v40 }
 0x6f7   : > { %v12133_v61 = vmax.f32 %v12001_v36, 0.0  ;;  %v9382_v14 = vadd.f32 %v9109_v6, %v7710_v39  ;;  %v22653_v6 = vld [vmem:[#allocation16_spill] sm:$0xff] }
 0x6f8   : > { %v7439_v31 = vpop.f32.mrf.mxu1  ;;  %v20402_v43 = vpop.f32.mrf.mxu3 }
 0x6f9   : > { %v12265_v5 = vmin.f32 %v12133_v61, 6.0  ;;  %v11054_v54 = vadd.f32 %v20309_v59, %v9382_v14  ;;  %v7711_v18 = vadd.f32 %v7439_v31, %v22652_v32  ;;  %v6836_v31 = vshrl.u32 %v20385_v44, 16 }
 0x6fb   : > { %v11595_v42 = vpop.f32.mrf.mxu0  ;;  %v12717_v2 = vpack.c.bf16 %v12265_v5, %v12265_v5  ;;  %v11866_v63 = vadd.f32 %v11593_v33, %v11054_v54  ;;  %v20435_v54 = vld [vmem:[%s17763_s25 + $0x344] sm:$0xff]  ;;  %v6838_v19 = vor.u32 %v6836_v31, %v6834_v38 }
 0x6fc   : > { %v10200_v32 = vshll.u32 %v20435_v54, 16 }
 0x6fd   : > { %v12723_v20 = vshrl.u32 %v12717_v2, 16  ;;  %v12726_v49 = vshll.u32 %v12717_v2, 16  ;;  %v12002_v22 = vadd.f32 %v20323_v7, %v11866_v63  ;;  %v8512_v2 = vshll.u32 %v20428_v28, 16 }
 0x6fe   : > { %v9111_v59 = vpop.f32.mrf.mxu2 }
 0x6ff   : > { %v12725_v58 = vrot.slane %v12723_v20, 4  ;;  %v12728_v26 = vrot.slane %v12726_v49, 5  ;;  %v12134_v27 = vmax.f32 %v12002_v22, 0.0  ;;  %v9383_v48 = vadd.f32 %v9111_v59, %v7711_v18 }
 0x700   : > { %v7442_v46 = vpop.f32.mrf.mxu1  ;;  %v20412_v10 = vpop.f32.mrf.mxu3  ;;  %v10196_v22 = vshrl.u32 %v20397_v34, 16 }
 0x701   : > { %v12266_v1 = vmin.f32 %v12134_v27, 6.0  ;;  %v11055_v33 = vadd.f32 %v20330_v30, %v9383_v48  ;;  %v12729_v35 = vor.u32 %v12728_v26, %v12725_v58  ;;  %v20425_v30 = vld [vmem:[%s17763_s25 + $0x558] sm:$0xff]  ;;  %v7712_v61 = vadd.f32 %v7442_v46, %v22653_v6 }
 0x702   : > { %v6840_v25 = vshll.u32 %v20425_v30, 16  ;;  %v8510_v26 = vor.u32 %v8508_v29, %v8506_v40  ;;  %v20451_v27 = vrot.slane %v8512_v2, 1  ;;  %v11214_v48 = vrot.slane %v20428_v28, 1 }
 0x703   : > { %v11598_v4 = vpop.f32.mrf.mxu0  ;;  %v12718_v13 = vpack.c.bf16 %v12266_v1, %v12266_v1  ;;  %v11867_v36 = vadd.f32 %v11595_v42, %v11055_v33  ;;  %16229 = vmatmul.msk.bf16.gmra.mxu1 %vm770_vm2, %v6835_v45  ;;  %16556 = vmatmul.msk.bf16.gmra.mxu2 %vm770_vm2, %v8507_v53  ;;  %v12730_v14 = vrot.slane %v12729_v35, 4  ;;  %v22654_v53 = vld [vmem:[#allocation19_spill] sm:$0xff]  ;;  %v10202_v35 = vrot.slane %v10200_v32, 1 }
 0x704   : > { %v20449_v58 = vrot.slane %v6840_v25, 1  ;;  %v6844_v32 = vshrl.u32 %v20425_v30, 16 }
 0x705   : > { %v12732_v39 = vshll.u32 %v12718_v13, 16  ;;  %v12736_v24 = vshrl.u32 %v12718_v13, 16  ;;  %v12003_v37 = vadd.f32 %v20323_v7, %v11867_v36  ;;  %17022 = vmatmul.msk.bf16.gmra.mxu3 %vm770_vm2, %v10195_v17 }
 0x706   : > { %17087 = vmatmul.msk.bf16.gmra.mxu0 %vm770_vm2, %v11213_v15  ;;  %v9114_v11 = vpop.f32.mrf.mxu2  ;;  %v10198_v15 = vor.u32 %v10196_v22, %v10194_v41  ;;  %v6843_v36 = vsel %vm2653_vm3, %v6838_v19, %v20449_v58 }
 0x707   : > { %v12734_v60 = vrot.slane %v12732_v39, 5  ;;  %v12738_v56 = vrot.slane %v12736_v24, 4  ;;  %v12135_v3 = vmax.f32 %v12003_v37, 0.0  ;;  %v9384_v5 = vadd.f32 %v9114_v11, %v7712_v61 }
 0x708   : > { %v7444_v42 = vpop.f32.mrf.mxu1  ;;  %v20440_v63 = vpop.f32.mrf.mxu3  ;;  %v8515_v39 = vsel %vm2653_vm3, %v8510_v26, %v20451_v27  ;;  %v10203_v31 = vsel %vm2653_vm3, %v10198_v15, %v10202_v35 }
 0x709   : > { %v12735_v21 = vsel %vm19569_vm8, %v12730_v14, %v12734_v60  ;;  %v12267_v44 = vmin.f32 %v12135_v3, 6.0  ;;  %v11056_v8 = vadd.f32 %v20360_v62, %v9384_v5  ;;  %v12739_v49 = vor.u32 %v12738_v56, %v12734_v60  ;;  %v20480_v3 = vld [vmem:[%s17763_s25 + $0x108] sm:$0xff] }
 0x70a   : > { %12770 = vst.msk [vmem:[%s19450_s15 + $0x90] sm:$0xf] %vm12364_vm5, %v12735_v21  ;;  %v7713_v1 = vadd.f32 %v7444_v42, %v22654_v53  ;;  %v11215_v14 = vsel %vm11154_vm4, %v11212_v52, %v11214_v48  ;;  %v22655_v42 = vld [vmem:[#allocation22_spill] sm:$0xff]  ;;  %v8520_v19 = vshll.u32 %v20480_v3, 16 }
 0x70b   : > { %v11600_v20 = vpop.f32.mrf.mxu0  ;;  %v12719_v18 = vpack.c.bf16 %v12267_v44, %v12267_v44  ;;  %v11868_v59 = vadd.f32 %v11598_v4, %v11056_v8  ;;  %v12740_v33 = vrot.slane %v12739_v49, 4  ;;  %v20486_v49 = vld [vmem:[%s17763_s25 + $0x34c] sm:$0xff] }
 0x70c   : > { %v10208_v30 = vshll.u32 %v20486_v49, 16 }
 0x70d   : > { %v12742_v46 = vshll.u32 %v12719_v18, 16  ;;  %v12746_v62 = vshrl.u32 %v12719_v18, 16  ;;  %v12004_v45 = vadd.f32 %v20323_v7, %v11868_v59  ;;  %v8516_v59 = vshrl.u32 %v20428_v28, 16 }
 0x70e   : > { %v9116_v34 = vpop.f32.mrf.mxu2 }
 0x70f   : > { %v12744_v4 = vrot.slane %v12742_v46, 5  ;;  %v12748_v38 = vrot.slane %v12746_v62, 4  ;;  %v12136_v17 = vmax.f32 %v12004_v45, 0.0  ;;  %v9385_v13 = vadd.f32 %v9116_v34, %v7713_v1 }
 0x710   : > { %v7447_v40 = vpop.f32.mrf.mxu1  ;;  %v20460_v24 = vpop.f32.mrf.mxu3  ;;  %v10204_v1 = vshrl.u32 %v20435_v54, 16 }
 0x711   : > { %v12745_v41 = vsel %vm19569_vm8, %v12740_v33, %v12744_v4  ;;  %v12268_v37 = vmin.f32 %v12136_v17, 6.0  ;;  %v11057_v6 = vadd.f32 %v20372_v12, %v9385_v13  ;;  %v12749_v11 = vor.u32 %v12748_v38, %v12744_v4  ;;  %v20477_v12 = vld [vmem:[%s17763_s25 + $0x560] sm:$0xff] }
 0x712   : > { %12771 = vst.msk [vmem:[%s19450_s15 + $0x94] sm:$0xf] %vm12364_vm5, %v12745_v41  ;;  %v7714_v25 = vadd.f32 %v7447_v40, %v22655_v42  ;;  %v6848_v18 = vshll.u32 %v20477_v12, 16  ;;  %v6846_v4 = vor.u32 %v6844_v32, %v20449_v58  ;;  %v8518_v17 = vor.u32 %v8516_v59, %v20451_v27 }
 0x713   : > { %v11603_v61 = vpop.f32.mrf.mxu0  ;;  %v12720_v60 = vpack.c.bf16 %v12268_v37, %v12268_v37  ;;  %v11869_v56 = vadd.f32 %v11600_v20, %v11057_v6  ;;  %16230 = vmatmul.msk.bf16.gmra.mxu1 %vm770_vm2, %v6843_v36  ;;  %16557 = vmatmul.msk.bf16.gmra.mxu2 %vm770_vm2, %v8515_v39  ;;  %v12750_v29 = vrot.slane %v12749_v11, 4  ;;  %v8522_v13 = vrot.slane %v8520_v19, 1 }
 0x714   : > { %v6850_v38 = vrot.slane %v6848_v18, 1  ;;  %v11216_v41 = vrot.slane %v20480_v3, 1  ;;  %v10206_v54 = vor.u32 %v10204_v1, %v10202_v35  ;;  %v10210_v6 = vrot.slane %v10208_v30, 1 }
 0x715   : > { %v12752_v16 = vshll.u32 %v12720_v60, 16  ;;  %v12756_v52 = vshrl.u32 %v12720_v60, 16  ;;  %v12005_v5 = vadd.f32 %v20323_v7, %v11869_v56  ;;  %17023 = vmatmul.msk.bf16.gmra.mxu3 %vm770_vm2, %v10203_v31  ;;  %v8523_v60 = vsel %vm2653_vm3, %v8518_v17, %v8522_v13 }
 0x716   : > { %17088 = vmatmul.msk.bf16.gmra.mxu0 %vm770_vm2, %v11215_v14  ;;  %v9119_v2 = vpop.f32.mrf.mxu2  ;;  %v6851_v27 = vsel %vm2653_vm3, %v6846_v4, %v6850_v38  ;;  %v11217_v42 = vsel %vm11154_vm4, %v11214_v48, %v11216_v41  ;;  %v6852_v19 = vshrl.u32 %v20477_v12, 16  ;;  %v10212_v4 = vshrl.u32 %v20486_v49, 16 }
 0x717   : > { %v12754_v21 = vrot.slane %v12752_v16, 5  ;;  %v12758_v44 = vrot.slane %v12756_v52, 4  ;;  %v12137_v8 = vmax.f32 %v12005_v5, 0.0  ;;  %v9386_v20 = vadd.f32 %v9119_v2, %v7714_v25 }
 0x718   : > { %v7449_v22 = vpop.f32.mrf.mxu1  ;;  %v20492_v26 = vpop.f32.mrf.mxu3  ;;  %v10211_v25 = vsel %vm2653_vm3, %v10206_v54, %v10210_v6 }
 0x719   : > { %v12755_v46 = vsel %vm19569_vm8, %v12750_v29, %v12754_v21  ;;  %v12269_v62 = vmin.f32 %v12137_v8, 6.0  ;;  %v11058_v45 = vadd.f32 %v20402_v43, %v9386_v20  ;;  %v12759_v33 = vor.u32 %v12758_v44, %v12754_v21  ;;  %v22656_v43 = vld [vmem:[#allocation25_spill] sm:$0xff]  ;;  %v20528_v21 = vld [vmem:[%s17763_s25 + $0x110] sm:$0xff] }
 0x71a   : > { %12772 = vst.msk [vmem:[%s19450_s15 + $0x98] sm:$0xf] %vm12364_vm5, %v12755_v46  ;;  %v7715_v39 = vadd.f32 %v7449_v22, %v22656_v43  ;;  %v22657_v8 = vld [vmem:[#allocation28_spill] sm:$0xff]  ;;  %v8528_v1 = vshll.u32 %v20528_v21, 16  ;;  %v11218_v54 = vrot.slane %v20528_v21, 1 }
 0x71b   : > { %v11605_v53 = vpop.f32.mrf.mxu0  ;;  %v12721_v34 = vpack.c.bf16 %v12269_v62, %v12269_v62  ;;  %v11870_v15 = vadd.f32 %v11603_v61, %v11058_v45  ;;  %v12760_v14 = vrot.slane %v12759_v33, 4  ;;  %v20537_v46 = vld [vmem:[%s17763_s25 + $0x354] sm:$0xff] }
 0x71c   : > { %v10216_v12 = vshll.u32 %v20537_v46, 16 }
 0x71d   : > { %v12762_v40 = vshll.u32 %v12721_v34, 16  ;;  %v12006_v36 = vadd.f32 %v20323_v7, %v11870_v15  ;;  %v17129_v28 = vrot.slane %v12721_v34, 9 }
 0x71e   : > { %v9121_v37 = vpop.f32.mrf.mxu2  ;;  %v10218_v49 = vrot.slane %v10216_v12, 1 }
 0x71f   : > { %v12764_v11 = vrot.slane %v12762_v40, 5  ;;  %v12138_v61 = vmax.f32 %v12006_v36, 0.0  ;;  %v9387_v31 = vadd.f32 %v9121_v37, %v7715_v39  ;;  %v6854_v36 = vor.u32 %v6852_v19, %v6850_v38 }
 0x720   : > { %v7452_v58 = vpop.f32.mrf.mxu1  ;;  %v20508_v56 = vpop.f32.mrf.mxu3  ;;  %v8530_v37 = vrot.slane %v8528_v1, 1 }
 0x721   : > { %v12765_v16 = vsel %vm19569_vm8, %v12760_v14, %v12764_v11  ;;  %v12270_v52 = vmin.f32 %v12138_v61, 6.0  ;;  %v11059_v35 = vadd.f32 %v20412_v10, %v9387_v31  ;;  %v20525_v10 = vld [vmem:[%s17763_s25 + $0x568] sm:$0xff]  ;;  %v7716_v20 = vadd.f32 %v7452_v58, %v22657_v8 }
 0x722   : > { %12773 = vst.msk [vmem:[%s19450_s15 + $0x9c] sm:$0xf] %vm12364_vm5, %v12765_v16  ;;  %v6856_v45 = vshll.u32 %v20525_v10, 16  ;;  %v22658_v31 = vld [vmem:[#allocation31_spill] sm:$0xff] }
 0x723   : > { %v11608_v5 = vpop.f32.mrf.mxu0  ;;  %v12774_v29 = vpack.c.bf16 %v12270_v52, %v12270_v52  ;;  %v11871_v2 = vadd.f32 %v11605_v53, %v11059_v35  ;;  %16231 = vmatmul.msk.bf16.gmra.mxu1 %vm770_vm2, %v6851_v27  ;;  %16558 = vmatmul.msk.bf16.gmra.mxu2 %vm770_vm2, %v8523_v60  ;;  %v8524_v53 = vshrl.u32 %v20480_v3, 16  ;;  %v10214_v27 = vor.u32 %v10212_v4, %v10210_v6 }
 0x724   : > { %v6858_v43 = vrot.slane %v6856_v45, 1 }
 0x725   : > { %v12785_v48 = vrot.slane %v12774_v29, 5  ;;  %v12007_v44 = vadd.f32 %v20323_v7, %v11871_v2  ;;  %17024 = vmatmul.msk.bf16.gmra.mxu3 %vm770_vm2, %v10211_v25  ;;  %v8526_v39 = vor.u32 %v8524_v53, %v8522_v13  ;;  %v11219_v29 = vsel %vm11154_vm4, %v11216_v41, %v11218_v54  ;;  %v20584_v53 = vld [vmem:[%s17763_s25 + $0x35c] sm:$0xff] }
 0x726   : > { %17089 = vmatmul.msk.bf16.gmra.mxu0 %vm770_vm2, %v11217_v42  ;;  %v9124_v22 = vpop.f32.mrf.mxu2  ;;  %v6859_v52 = vsel %vm2653_vm3, %v6854_v36, %v6858_v43  ;;  %v10219_v2 = vsel %vm2653_vm3, %v10214_v27, %v10218_v49 }
 0x727   : > { %v12786_v32 = vsel %vm19674_vm11, %v17129_v28, %v12785_v48  ;;  %v12139_v18 = vmax.f32 %v12007_v44, 0.0  ;;  %v9388_v59 = vadd.f32 %v9124_v22, %v7716_v20  ;;  %v12787_v14 = vrot.slane %v12785_v48, 4  ;;  %v20570_v44 = vld [vmem:[%s17763_s25 + $0x570] sm:$0xff]  ;;  %v22659_v20 = vld [vmem:[#allocation34_spill] sm:$0xff] }
 0x728   : > { %12800 = vst.msk [vmem:[%s19450_s15 + $0xa0] sm:$0xf] %vm12364_vm5, %v12786_v32  ;;  %v7454_v62 = vpop.f32.mrf.mxu1  ;;  %v20544_v30 = vpop.f32.mrf.mxu3  ;;  %v8531_v35 = vsel %vm2653_vm3, %v8526_v39, %v8530_v37  ;;  %v6864_v45 = vshll.u32 %v20570_v44, 16 }
 0x729   : > { %v12271_v33 = vmin.f32 %v12139_v18, 6.0  ;;  %v11060_v34 = vadd.f32 %v20440_v63, %v9388_v59  ;;  %v7717_v63 = vadd.f32 %v7454_v62, %v22658_v31  ;;  %v6860_v18 = vshrl.u32 %v20525_v10, 16 }
 0x72b   : > { %v11610_v15 = vpop.f32.mrf.mxu0  ;;  %v12775_v17 = vpack.c.bf16 %v12271_v33, %v12271_v33  ;;  %v11872_v40 = vadd.f32 %v11608_v5, %v11060_v34  ;;  %v8532_v33 = vshrl.u32 %v20528_v21, 16 }
 0x72d   : > { %v12788_v11 = vrot.slane %v12775_v17, 5  ;;  %v12008_v61 = vadd.f32 %v20323_v7, %v11872_v40  ;;  %v10220_v17 = vshrl.u32 %v20537_v46, 16  ;;  %v10224_v40 = vshll.u32 %v20584_v53, 16 }
 0x72e   : > { %v9126_v58 = vpop.f32.mrf.mxu2  ;;  %v8534_v31 = vor.u32 %v8532_v33, %v8530_v37 }
 0x72f   : > { %v12789_v60 = vsel %vm19674_vm11, %v12787_v14, %v12788_v11  ;;  %v12140_v16 = vmax.f32 %v12008_v61, 0.0  ;;  %v9389_v38 = vadd.f32 %v9126_v58, %v7717_v63  ;;  %v12790_v8 = vrot.slane %v12788_v11, 4 }
 0x730   : > { %12801 = vst.msk [vmem:[%s19450_s15 + $0xa4] sm:$0xf] %vm12364_vm5, %v12789_v60  ;;  %v7457_v13 = vpop.f32.mrf.mxu1  ;;  %v20558_v5 = vpop.f32.mrf.mxu3  ;;  %v6862_v14 = vor.u32 %v6860_v18, %v6858_v43  ;;  %v6866_v11 = vrot.slane %v6864_v45, 1  ;;  %v20620_v18 = vld [vmem:[%s17763_s25 + $0x578] sm:$0xff] }
 0x731   : > { %v12272_v42 = vmin.f32 %v12140_v16, 6.0  ;;  %v11061_v6 = vadd.f32 %v20460_v24, %v9389_v38  ;;  %v20574_v24 = vld [vmem:[%s17763_s25 + $0x118] sm:$0xff]  ;;  %v7718_v22 = vadd.f32 %v7457_v13, %v22659_v20 }
 0x732   : > { %v8536_v34 = vshll.u32 %v20574_v24, 16  ;;  %v11220_v58 = vrot.slane %v20574_v24, 1  ;;  %v22660_v38 = vld [vmem:[#allocation37_spill] sm:$0xff] }
 0x733   : > { %v11613_v25 = vpop.f32.mrf.mxu0  ;;  %v12776_v28 = vpack.c.bf16 %v12272_v42, %v12272_v42  ;;  %v11873_v48 = vadd.f32 %v11610_v15, %v11061_v6  ;;  %16232 = vmatmul.msk.bf16.gmra.mxu1 %vm770_vm2, %v6859_v52  ;;  %16559 = vmatmul.msk.bf16.gmra.mxu2 %vm770_vm2, %v8531_v35  ;;  %v10222_v52 = vor.u32 %v10220_v17, %v10218_v49  ;;  %v10226_v35 = vrot.slane %v10224_v40, 1 }
 0x734   : > { %v20595_v63 = vrot.slane %v8536_v34, 1 }
 0x735   : > { %v12791_v3 = vrot.slane %v12776_v28, 5  ;;  %v12009_v41 = vadd.f32 %v20323_v7, %v11873_v48  ;;  %17025 = vmatmul.msk.bf16.gmra.mxu3 %vm770_vm2, %v10219_v2  ;;  %v10227_v20 = vsel %vm2653_vm3, %v10222_v52, %v10226_v35 }
 0x736   : > { %17090 = vmatmul.msk.bf16.gmra.mxu0 %vm770_vm2, %v11219_v29  ;;  %v9129_v32 = vpop.f32.mrf.mxu2  ;;  %v8539_v29 = vsel %vm2653_vm3, %v8534_v31, %v20595_v63 }
 0x737   : > { %v12792_v59 = vsel %vm19674_vm11, %v12790_v8, %v12791_v3  ;;  %v12141_v19 = vmax.f32 %v12009_v41, 0.0  ;;  %v9390_v62 = vadd.f32 %v9129_v32, %v7718_v22  ;;  %v12793_v61 = vrot.slane %v12791_v3, 4 }
 0x738   : > { %12802 = vst.msk [vmem:[%s19450_s15 + $0xa8] sm:$0xf] %vm12364_vm5, %v12792_v59  ;;  %v7459_v1 = vpop.f32.mrf.mxu1  ;;  %v20590_v15 = vpop.f32.mrf.mxu3  ;;  %v11221_v3 = vsel %vm11154_vm4, %v11218_v54, %v11220_v58  ;;  %v20623_v59 = vld [vmem:[%s17763_s25 + $0x120] sm:$0xff] }
 0x739   : > { %v12273_v4 = vmin.f32 %v12141_v19, 6.0  ;;  %v11062_v10 = vadd.f32 %v20492_v26, %v9390_v62  ;;  %v7719_v46 = vadd.f32 %v7459_v1, %v22660_v38  ;;  %v22661_v62 = vld [vmem:[#allocation40_spill] sm:$0xff] }
 0x73b   : > { %v11615_v12 = vpop.f32.mrf.mxu0  ;;  %v12777_v36 = vpack.c.bf16 %v12273_v4, %v12273_v4  ;;  %v11874_v39 = vadd.f32 %v11613_v25, %v11062_v10  ;;  %v6867_v25 = vsel %vm2653_vm3, %v6862_v14, %v6866_v11  ;;  %v6868_v10 = vshrl.u32 %v20570_v44, 16 }
 0x73c   : > { %v8544_v14 = vshll.u32 %v20623_v59, 16  ;;  %v10228_v44 = vshrl.u32 %v20584_v53, 16  ;;  %v11222_v53 = vrot.slane %v20623_v59, 1 }
 0x73d   : > { %v12794_v27 = vrot.slane %v12777_v36, 5  ;;  %v12809_v60 = vshrl.u32 %v12777_v36, 16  ;;  %v12812_v16 = vshll.u32 %v12777_v36, 16  ;;  %v12010_v26 = vadd.f32 %v20323_v7, %v11874_v39 }
 0x73e   : > { %v9131_v13 = vpop.f32.mrf.mxu2  ;;  %v6872_v36 = vshll.u32 %v20620_v18, 16  ;;  %v8540_v39 = vshrl.u32 %v20574_v24, 16  ;;  %v6870_v52 = vor.u32 %v6868_v10, %v6866_v11  ;;  %v20671_v24 = vld [vmem:[%s17763_s25 + $0x580] sm:$0xff] }
 0x73f   : > { %v12795_v43 = vsel %vm19674_vm11, %v12793_v61, %v12794_v27  ;;  %v12142_v42 = vmax.f32 %v12010_v26, 0.0  ;;  %v9391_v37 = vadd.f32 %v9131_v13, %v7719_v46  ;;  %v12811_v28 = vrot.slane %v12809_v60, 5 }
 0x740   : > { %12803 = vst.msk [vmem:[%s19450_s15 + $0xac] sm:$0xf] %vm12364_vm5, %v12795_v43  ;;  %v7462_v6 = vpop.f32.mrf.mxu1  ;;  %v20607_v2 = vpop.f32.mrf.mxu3  ;;  %v12814_v49 = vrot.slane %v12812_v16, 6 }
 0x741   : > { %v12274_v48 = vmin.f32 %v12142_v42, 6.0  ;;  %v11063_v41 = vadd.f32 %v20508_v56, %v9391_v37  ;;  %v7720_v56 = vadd.f32 %v7462_v6, %v22661_v62  ;;  %v6874_v42 = vrot.slane %v6872_v36, 1  ;;  %v22663_v36 = vld [vmem:[#allocation46_spill] sm:$0xff] }
 0x742   : > { %v12815_v21 = vor.u32 %v12814_v49, %v12811_v28  ;;  %v8542_v37 = vor.u32 %v8540_v39, %v20595_v63  ;;  %v20645_v6 = vrot.slane %v8544_v14, 1 }
 0x743   : > { %v11618_v8 = vpop.f32.mrf.mxu0  ;;  %v12804_v22 = vpack.c.bf16 %v12274_v48, %v12274_v48  ;;  %16233 = vmatmul.msk.bf16.gmra.mxu1 %vm770_vm2, %v6867_v25  ;;  %16560 = vmatmul.msk.bf16.gmra.mxu2 %vm770_vm2, %v8539_v29  ;;  %v11875_v32 = vadd.f32 %v11615_v12, %v11063_v41  ;;  %v20630_v12 = vld [vmem:[%s17763_s25 + $0x364] sm:$0xff]  ;;  %v6875_v63 = vsel %vm2653_vm3, %v6870_v52, %v6874_v42 }
 0x744   : > { %v12816_v31 = vrot.slane %v12815_v21, 4  ;;  %v10232_v38 = vshll.u32 %v20630_v12, 16  ;;  %v22662_v25 = vld [vmem:[#allocation43_spill] sm:$0xff]  ;;  %v8547_v21 = vsel %vm2653_vm3, %v8542_v37, %v20645_v6 }
 0x745   : > { %v12818_v19 = vshrl.u32 %v12804_v22, 16  ;;  %v12821_v54 = vshll.u32 %v12804_v22, 16  ;;  %17026 = vmatmul.msk.bf16.gmra.mxu3 %vm770_vm2, %v10227_v20  ;;  %v12011_v45 = vadd.f32 %v20323_v7, %v11875_v32 }
 0x746   : > { %17091 = vmatmul.msk.bf16.gmra.mxu0 %vm770_vm2, %v11221_v3  ;;  %v9134_v1 = vpop.f32.mrf.mxu2  ;;  %v10230_v3 = vor.u32 %v10228_v44, %v10226_v35  ;;  %v20683_v44 = vld [vmem:[%s17763_s25 + $0x36c] sm:$0xff] }
 0x747   : > { %v12820_v33 = vrot.slane %v12818_v19, 5  ;;  %v12823_v34 = vrot.slane %v12821_v54, 6  ;;  %v9392_v4 = vadd.f32 %v9134_v1, %v7720_v56  ;;  %v12143_v17 = vmax.f32 %v12011_v45, 0.0 }
 0x748   : > { %v7464_v40 = vpop.f32.mrf.mxu1  ;;  %v20635_v61 = vpop.f32.mrf.mxu3  ;;  %v11223_v56 = vsel %vm11154_vm4, %v11220_v58, %v11222_v53  ;;  %v20674_v58 = vld [vmem:[%s17763_s25 + $0x128] sm:$0xff] }
 0x749   : > { %v12824_v27 = vor.u32 %v12823_v34, %v12820_v33  ;;  %v11064_v60 = vadd.f32 %v20544_v30, %v9392_v4  ;;  %v12275_v26 = vmin.f32 %v12143_v17, 6.0  ;;  %v7721_v29 = vadd.f32 %v7464_v40, %v22662_v25 }
 0x74a   : > { %v8552_v52 = vshll.u32 %v20674_v58, 16 }
 0x74b   : > { %v11620_v16 = vpop.f32.mrf.mxu0  ;;  %v12825_v46 = vsel %vm19782_vm14, %v12816_v31, %v12824_v27  ;;  %v11876_v13 = vadd.f32 %v11618_v8, %v11064_v60  ;;  %v12805_v43 = vpack.c.bf16 %v12275_v26, %v12275_v26  ;;  %v20650_v8 = vrot.slane %v10232_v38, 1 }
 0x74c   : > { %12860 = vst.msk [vmem:[%s19450_s15 + $0xb0] sm:$0xf] %vm12364_vm5, %v12825_v46  ;;  %v12826_v45 = vrot.slane %v12824_v27, 4  ;;  %v6876_v31 = vshrl.u32 %v20620_v18, 16  ;;  %v6880_v46 = vshll.u32 %v20671_v24, 16 }
 0x74d   : > { %v12012_v30 = vadd.f32 %v20323_v7, %v11876_v13  ;;  %v12828_v28 = vshrl.u32 %v12805_v43, 16  ;;  %v12831_v49 = vshll.u32 %v12805_v43, 16  ;;  %v10235_v33 = vsel %vm2653_vm3, %v10230_v3, %v20650_v8 }
 0x74e   : > { %v9136_v48 = vpop.f32.mrf.mxu2  ;;  %v8548_v13 = vshrl.u32 %v20623_v59, 16  ;;  %v20721_v59 = vld [vmem:[%s17763_s25 + $0x588] sm:$0xff] }
 0x74f   : > { %v12144_v11 = vmax.f32 %v12012_v30, 0.0  ;;  %v9393_v41 = vadd.f32 %v9136_v48, %v7721_v29  ;;  %v12830_v20 = vrot.slane %v12828_v28, 5  ;;  %v12833_v22 = vrot.slane %v12831_v49, 6 }
 0x750   : > { %v7467_v32 = vpop.f32.mrf.mxu1  ;;  %v20655_v19 = vpop.f32.mrf.mxu3  ;;  %v10236_v28 = vshrl.u32 %v20630_v12, 16  ;;  %v10240_v49 = vshll.u32 %v20683_v44, 16 }
 0x751   : > { %v12276_v54 = vmin.f32 %v12144_v11, 6.0  ;;  %v11065_v35 = vadd.f32 %v20558_v5, %v9393_v41  ;;  %v12834_v1 = vor.u32 %v12833_v22, %v12830_v20  ;;  %v7722_v39 = vadd.f32 %v7467_v32, %v22663_v36 }
 0x752   : > { %v6878_v41 = vor.u32 %v6876_v31, %v6874_v42  ;;  %v6882_v20 = vrot.slane %v6880_v46, 1  ;;  %v8550_v22 = vor.u32 %v8548_v13, %v20645_v6  ;;  %v8554_v32 = vrot.slane %v8552_v52, 1  ;;  %v22665_v46 = vld [vmem:[#allocation52_spill] sm:$0xff] }
 0x753   : > { %v11623_v62 = vpop.f32.mrf.mxu0  ;;  %v12806_v34 = vpack.c.bf16 %v12276_v54, %v12276_v54  ;;  %v11877_v4 = vadd.f32 %v11620_v16, %v11065_v35  ;;  %16234 = vmatmul.msk.bf16.gmra.mxu1 %vm770_vm2, %v6875_v63  ;;  %16561 = vmatmul.msk.bf16.gmra.mxu2 %vm770_vm2, %v8547_v21  ;;  %v12835_v5 = vsel %vm19782_vm14, %v12826_v45, %v12834_v1  ;;  %v12836_v37 = vrot.slane %v12834_v1, 4  ;;  %v22664_v54 = vld [vmem:[#allocation49_spill] sm:$0xff] }
 0x754   : > { %12861 = vst.msk [vmem:[%s19450_s15 + $0xb4] sm:$0xf] %vm12364_vm5, %v12835_v5  ;;  %v11224_v63 = vrot.slane %v20674_v58, 1  ;;  %v10238_v45 = vor.u32 %v10236_v28, %v20650_v8  ;;  %v10242_v1 = vrot.slane %v10240_v49, 1  ;;  %v6883_v6 = vsel %vm2653_vm3, %v6878_v41, %v6882_v20 }
 0x755   : > { %v12838_v10 = vshrl.u32 %v12806_v34, 16  ;;  %v12841_v17 = vshll.u32 %v12806_v34, 16  ;;  %v12013_v40 = vadd.f32 %v20323_v7, %v11877_v4  ;;  %17027 = vmatmul.msk.bf16.gmra.mxu3 %vm770_vm2, %v10235_v33  ;;  %v8555_v5 = vsel %vm2653_vm3, %v8550_v22, %v8554_v32 }
 0x756   : > { %17092 = vmatmul.msk.bf16.gmra.mxu0 %vm770_vm2, %v11223_v56  ;;  %v9139_v14 = vpop.f32.mrf.mxu2  ;;  %v10243_v31 = vsel %vm2653_vm3, %v10238_v45, %v10242_v1  ;;  %v6888_v49 = vshll.u32 %v20721_v59, 16 }
 0x757   : > { %v12840_v27 = vrot.slane %v12838_v10, 5  ;;  %v12843_v60 = vrot.slane %v12841_v17, 6  ;;  %v12145_v16 = vmax.f32 %v12013_v40, 0.0  ;;  %v9394_v26 = vadd.f32 %v9139_v14, %v7722_v39 }
 0x758   : > { %v7469_v38 = vpop.f32.mrf.mxu1  ;;  %v20688_v43 = vpop.f32.mrf.mxu3  ;;  %v11225_v10 = vsel %vm11154_vm4, %v11222_v53, %v11224_v63 }
 0x759   : > { %v12844_v30 = vor.u32 %v12843_v60, %v12840_v27  ;;  %v12277_v25 = vmin.f32 %v12145_v16, 6.0  ;;  %v11066_v18 = vadd.f32 %v20590_v15, %v9394_v26  ;;  %v7723_v35 = vadd.f32 %v7469_v38, %v22664_v54 }
 0x75b   : > { %v11625_v29 = vpop.f32.mrf.mxu0  ;;  %v12845_v48 = vsel %vm19782_vm14, %v12836_v37, %v12844_v30  ;;  %v12807_v3 = vpack.c.bf16 %v12277_v25, %v12277_v25  ;;  %v11878_v11 = vadd.f32 %v11623_v62, %v11066_v18  ;;  %v12846_v17 = vrot.slane %v12844_v30, 4 }
 0x75c   : > { %12862 = vst.msk [vmem:[%s19450_s15 + $0xb8] sm:$0xf] %vm12364_vm5, %v12845_v48  ;;  %v6884_v18 = vshrl.u32 %v20671_v24, 16 }
 0x75d   : > { %v12848_v15 = vshrl.u32 %v12807_v3, 16  ;;  %v12851_v21 = vshll.u32 %v12807_v3, 16  ;;  %v12014_v12 = vadd.f32 %v20323_v7, %v11878_v11  ;;  %v17130_v53 = vrot.slane %v12807_v3, 10 }
 0x75e   : > { %v9141_v56 = vpop.f32.mrf.mxu2  ;;  %v6886_v54 = vor.u32 %v6884_v18, %v6882_v20 }
 0x75f   : > { %v12850_v62 = vrot.slane %v12848_v15, 5  ;;  %v12853_v42 = vrot.slane %v12851_v21, 6  ;;  %v12146_v33 = vmax.f32 %v12014_v12, 0.0  ;;  %v9395_v34 = vadd.f32 %v9141_v56, %v7723_v35 }
 0x760   : > { %v7472_v4 = vpop.f32.mrf.mxu1  ;;  %v20709_v8 = vpop.f32.mrf.mxu3  ;;  %v10244_v15 = vshrl.u32 %v20683_v44, 16  ;;  %v6890_v35 = vrot.slane %v6888_v49, 1 }
 0x761   : > { %v12854_v40 = vor.u32 %v12853_v42, %v12850_v62  ;;  %v12278_v36 = vmin.f32 %v12146_v33, 6.0  ;;  %v11067_v39 = vadd.f32 %v20607_v2, %v9395_v34  ;;  %v20724_v2 = vld [vmem:[%s17763_s25 + $0x130] sm:$0xff]  ;;  %v7724_v13 = vadd.f32 %v7472_v4, %v22665_v46  ;;  %v22666_v34 = vld [vmem:[#allocation55_spill] sm:$0xff] }
 0x762   : > { %v8560_v48 = vshll.u32 %v20724_v2, 16  ;;  %v11226_v62 = vrot.slane %v20724_v2, 1 }
 0x763   : > { %v11628_v14 = vpop.f32.mrf.mxu0  ;;  %v12855_v27 = vsel %vm19782_vm14, %v12846_v17, %v12854_v40  ;;  %v12864_v60 = vpack.c.bf16 %v12278_v36, %v12278_v36  ;;  %v11879_v16 = vadd.f32 %v11625_v29, %v11067_v39  ;;  %16235 = vmatmul.msk.bf16.gmra.mxu1 %vm770_vm2, %v6883_v6  ;;  %16562 = vmatmul.msk.bf16.gmra.mxu2 %vm770_vm2, %v8555_v5  ;;  %v20733_v29 = vld [vmem:[%s17763_s25 + $0x374] sm:$0xff] }
 0x764   : > { %12863 = vst.msk [vmem:[%s19450_s15 + $0xbc] sm:$0xf] %vm12364_vm5, %v12855_v27  ;;  %v10248_v24 = vshll.u32 %v20733_v29, 16  ;;  %v8562_v45 = vrot.slane %v8560_v48, 1  ;;  %v10246_v5 = vor.u32 %v10244_v15, %v10242_v1  ;;  %v6891_v36 = vsel %vm2653_vm3, %v6886_v54, %v6890_v35 }
 0x765   : > { %v12875_v26 = vrot.slane %v12864_v60, 6  ;;  %v12015_v38 = vadd.f32 %v20323_v7, %v11879_v16  ;;  %17028 = vmatmul.msk.bf16.gmra.mxu3 %vm770_vm2, %v10243_v31  ;;  %v8556_v7 = vshrl.u32 %v20674_v58, 16  ;;  %v11227_v60 = vsel %vm11154_vm4, %v11224_v63, %v11226_v62 }
 0x766   : > { %17093 = vmatmul.msk.bf16.gmra.mxu0 %vm770_vm2, %v11225_v10  ;;  %v9144_v52 = vpop.f32.mrf.mxu2  ;;  %v10250_v20 = vrot.slane %v10248_v24, 1 }
 0x767   : > { %v12876_v37 = vsel %vm19896_vm6, %v17130_v53, %v12875_v26  ;;  %v12147_v30 = vmax.f32 %v12015_v38, 0.0  ;;  %v9396_v25 = vadd.f32 %v9144_v52, %v7724_v13  ;;  %v8558_v56 = vor.u32 %v8556_v7, %v8554_v32  ;;  %v20771_v38 = vld [vmem:[%s17763_s25 + $0x590] sm:$0xff]  ;;  %v22667_v13 = vld [vmem:[#allocation58_spill] sm:$0xff] }
 0x768   : > { %12890 = vst.msk [vmem:[%s19450_s15 + $0xc0] sm:$0xf] %vm12364_vm5, %v12876_v37  ;;  %v7474_v28 = vpop.f32.mrf.mxu1  ;;  %v20740_v3 = vpop.f32.mrf.mxu3  ;;  %v12877_v42 = vrot.slane %v12875_v26, 4  ;;  %v10251_v16 = vsel %vm2653_vm3, %v10246_v5, %v10250_v20  ;;  %v6896_v49 = vshll.u32 %v20771_v38, 16  ;;  %v20785_v7 = vld [vmem:[%s17763_s25 + $0x37c] sm:$0xff] }
 0x769   : > { %v12279_v11 = vmin.f32 %v12147_v30, 6.0  ;;  %v11068_v41 = vadd.f32 %v20635_v61, %v9396_v25  ;;  %v20749_v61 = vld [vmem:[%s22332_s2] ss:$0 sm:$0xff]  ;;  %v7725_v4 = vadd.f32 %v7474_v28, %v22666_v34  ;;  %v8563_v39 = vsel %vm2653_vm3, %v8558_v56, %v8562_v45 }
 0x76a   : > { %v6892_v30 = vshrl.u32 %v20721_v59, 16 }
 0x76b   : > { %v11630_v22 = vpop.f32.mrf.mxu0  ;;  %v12865_v21 = vpack.c.bf16 %v12279_v11, %v12279_v11  ;;  %v11880_v12 = vadd.f32 %v11628_v14, %v11068_v41  ;;  %v8564_v11 = vshrl.u32 %v20724_v2, 16 }
 0x76d   : > { %v12878_v33 = vrot.slane %v12865_v21, 6  ;;  %v12016_v44 = vadd.f32 %v20749_v61, %v11880_v12  ;;  %v10252_v21 = vshrl.u32 %v20733_v29, 16  ;;  %v10256_v12 = vshll.u32 %v20785_v7, 16 }
 0x76e   : > { %v9146_v6 = vpop.f32.mrf.mxu2  ;;  %v8566_v34 = vor.u32 %v8564_v11, %v8562_v45 }
 0x76f   : > { %v12879_v32 = vsel %vm19896_vm6, %v12877_v42, %v12878_v33  ;;  %v12148_v10 = vmax.f32 %v12016_v44, 0.0  ;;  %v9397_v17 = vadd.f32 %v9146_v6, %v7725_v4  ;;  %v12880_v46 = vrot.slane %v12878_v33, 4 }
 0x770   : > { %12891 = vst.msk [vmem:[%s19450_s15 + $0xc4] sm:$0xf] %vm12364_vm5, %v12879_v32  ;;  %v7477_v40 = vpop.f32.mrf.mxu1  ;;  %v20759_v14 = vpop.f32.mrf.mxu3  ;;  %v6894_v42 = vor.u32 %v6892_v30, %v6890_v35  ;;  %v6898_v33 = vrot.slane %v6896_v49, 1  ;;  %v20821_v30 = vld [vmem:[%s17763_s25 + $0x598] sm:$0xff] }
 0x771   : > { %v12280_v31 = vmin.f32 %v12148_v10, 6.0  ;;  %v11069_v1 = vadd.f32 %v20655_v19, %v9397_v17  ;;  %v20775_v19 = vld [vmem:[%s17763_s25 + $0x138] sm:$0xff]  ;;  %v7726_v52 = vadd.f32 %v7477_v40, %v22667_v13 }
 0x772   : > { %v8568_v41 = vshll.u32 %v20775_v19, 16  ;;  %v11228_v6 = vrot.slane %v20775_v19, 1  ;;  %v22668_v17 = vld [vmem:[#allocation61_spill] sm:$0xff] }
 0x773   : > { %v11633_v27 = vpop.f32.mrf.mxu0  ;;  %v12866_v53 = vpack.c.bf16 %v12280_v31, %v12280_v31  ;;  %v11881_v26 = vadd.f32 %v11630_v22, %v11069_v1  ;;  %16236 = vmatmul.msk.bf16.gmra.mxu1 %vm770_vm2, %v6891_v36  ;;  %16563 = vmatmul.msk.bf16.gmra.mxu2 %vm770_vm2, %v8563_v39  ;;  %v10254_v36 = vor.u32 %v10252_v21, %v10250_v20  ;;  %v10258_v39 = vrot.slane %v10256_v12, 1 }
 0x774   : > { %v20796_v4 = vrot.slane %v8568_v41, 1 }
 0x775   : > { %v12881_v58 = vrot.slane %v12866_v53, 6  ;;  %v12017_v63 = vadd.f32 %v20749_v61, %v11881_v26  ;;  %17029 = vmatmul.msk.bf16.gmra.mxu3 %vm770_vm2, %v10251_v16  ;;  %v10259_v13 = vsel %vm2653_vm3, %v10254_v36, %v10258_v39 }
 0x776   : > { %17094 = vmatmul.msk.bf16.gmra.mxu0 %vm770_vm2, %v11227_v60  ;;  %v9149_v37 = vpop.f32.mrf.mxu2  ;;  %v8571_v60 = vsel %vm2653_vm3, %v8566_v34, %v20796_v4 }
 0x777   : > { %v12882_v25 = vsel %vm19896_vm6, %v12880_v46, %v12881_v58  ;;  %v12149_v18 = vmax.f32 %v12017_v63, 0.0  ;;  %v9398_v28 = vadd.f32 %v9149_v37, %v7726_v52  ;;  %v12883_v44 = vrot.slane %v12881_v58, 4 }
 0x778   : > { %12892 = vst.msk [vmem:[%s19450_s15 + $0xc8] sm:$0xf] %vm12364_vm5, %v12882_v25  ;;  %v7479_v48 = vpop.f32.mrf.mxu1  ;;  %v20791_v22 = vpop.f32.mrf.mxu3  ;;  %v11229_v58 = vsel %vm11154_vm4, %v11226_v62, %v11228_v6  ;;  %v20824_v25 = vld [vmem:[%s17763_s25 + $0x140] sm:$0xff] }
 0x779   : > { %v12281_v15 = vmin.f32 %v12149_v18, 6.0  ;;  %v11070_v59 = vadd.f32 %v20688_v43, %v9398_v28  ;;  %v7727_v29 = vadd.f32 %v7479_v48, %v22668_v17  ;;  %v22669_v28 = vld [vmem:[#allocation64_spill] sm:$0xff] }
 0x77b   : > { %v11635_v24 = vpop.f32.mrf.mxu0  ;;  %v12867_v54 = vpack.c.bf16 %v12281_v15, %v12281_v15  ;;  %v11882_v56 = vadd.f32 %v11633_v27, %v11070_v59  ;;  %v6899_v27 = vsel %vm2653_vm3, %v6894_v42, %v6898_v33  ;;  %v6900_v59 = vshrl.u32 %v20771_v38, 16 }
 0x77c   : > { %v8576_v42 = vshll.u32 %v20824_v25, 16  ;;  %v10260_v38 = vshrl.u32 %v20785_v7, 16  ;;  %v11230_v7 = vrot.slane %v20824_v25, 1 }
 0x77d   : > { %v12884_v5 = vrot.slane %v12867_v54, 6  ;;  %v12899_v32 = vshrl.u32 %v12867_v54, 16  ;;  %v12902_v10 = vshll.u32 %v12867_v54, 16  ;;  %v12018_v43 = vadd.f32 %v20749_v61, %v11882_v56 }
 0x77e   : > { %v9151_v40 = vpop.f32.mrf.mxu2  ;;  %v6904_v54 = vshll.u32 %v20821_v30, 16  ;;  %v8572_v56 = vshrl.u32 %v20775_v19, 16  ;;  %v6902_v36 = vor.u32 %v6900_v59, %v6898_v33  ;;  %v20872_v19 = vld [vmem:[%s17763_s25 + $0x5a0] sm:$0xff] }
 0x77f   : > { %v12885_v35 = vsel %vm19896_vm6, %v12883_v44, %v12884_v5  ;;  %v12150_v31 = vmax.f32 %v12018_v43, 0.0  ;;  %v9399_v45 = vadd.f32 %v9151_v40, %v7727_v29  ;;  %v12901_v53 = vrot.slane %v12899_v32, 6 }
 0x780   : > { %12893 = vst.msk [vmem:[%s19450_s15 + $0xcc] sm:$0xf] %vm12364_vm5, %v12885_v35  ;;  %v7482_v1 = vpop.f32.mrf.mxu1  ;;  %v20808_v16 = vpop.f32.mrf.mxu3  ;;  %v12904_v20 = vrot.slane %v12902_v10, 7 }
 0x781   : > { %v12282_v26 = vmin.f32 %v12150_v31, 6.0  ;;  %v11071_v63 = vadd.f32 %v20709_v8, %v9399_v45  ;;  %v7728_v8 = vadd.f32 %v7482_v1, %v22669_v28  ;;  %v6906_v31 = vrot.slane %v6904_v54, 1  ;;  %v22671_v54 = vld [vmem:[#allocation70_spill] sm:$0xff] }
 0x782   : > { %v12905_v2 = vor.u32 %v12904_v20, %v12901_v53  ;;  %v8574_v45 = vor.u32 %v8572_v56, %v20796_v4  ;;  %v20846_v1 = vrot.slane %v8576_v42, 1 }
 0x783   : > { %v11638_v46 = vpop.f32.mrf.mxu0  ;;  %v12894_v52 = vpack.c.bf16 %v12282_v26, %v12282_v26  ;;  %16237 = vmatmul.msk.bf16.gmra.mxu1 %vm770_vm2, %v6899_v27  ;;  %16564 = vmatmul.msk.bf16.gmra.mxu2 %vm770_vm2, %v8571_v60  ;;  %v11883_v37 = vadd.f32 %v11635_v24, %v11071_v63  ;;  %v20831_v24 = vld [vmem:[%s17763_s25 + $0x384] sm:$0xff]  ;;  %v6907_v4 = vsel %vm2653_vm3, %v6902_v36, %v6906_v31 }
 0x784   : > { %v12906_v34 = vrot.slane %v12905_v2, 4  ;;  %v10264_v17 = vshll.u32 %v20831_v24, 16  ;;  %v22670_v27 = vld [vmem:[#allocation67_spill] sm:$0xff]  ;;  %v8579_v2 = vsel %vm2653_vm3, %v8574_v45, %v20846_v1 }
 0x785   : > { %v12908_v18 = vshrl.u32 %v12894_v52, 16  ;;  %v12911_v62 = vshll.u32 %v12894_v52, 16  ;;  %17030 = vmatmul.msk.bf16.gmra.mxu3 %vm770_vm2, %v10259_v13  ;;  %v12019_v49 = vadd.f32 %v20749_v61, %v11883_v37 }
 0x786   : > { %17095 = vmatmul.msk.bf16.gmra.mxu0 %vm770_vm2, %v11229_v58  ;;  %v9154_v48 = vpop.f32.mrf.mxu2  ;;  %v10262_v58 = vor.u32 %v10260_v38, %v10258_v39  ;;  %v20884_v38 = vld [vmem:[%s17763_s25 + $0x38c] sm:$0xff] }
 0x787   : > { %v12910_v11 = vrot.slane %v12908_v18, 6  ;;  %v12913_v41 = vrot.slane %v12911_v62, 7  ;;  %v9400_v15 = vadd.f32 %v9154_v48, %v7728_v8  ;;  %v12151_v21 = vmax.f32 %v12019_v49, 0.0 }
 0x788   : > { %v7484_v12 = vpop.f32.mrf.mxu1  ;;  %v20836_v44 = vpop.f32.mrf.mxu3  ;;  %v11231_v8 = vsel %vm11154_vm4, %v11228_v6, %v11230_v7  ;;  %v20875_v6 = vld [vmem:[%s17763_s25 + $0x148] sm:$0xff] }
 0x789   : > { %v12914_v5 = vor.u32 %v12913_v41, %v12910_v11  ;;  %v11072_v32 = vadd.f32 %v20740_v3, %v9400_v15  ;;  %v12283_v43 = vmin.f32 %v12151_v21, 6.0  ;;  %v7729_v60 = vadd.f32 %v7484_v12, %v22670_v27 }
 0x78a   : > { %v8584_v36 = vshll.u32 %v20875_v6, 16 }
 0x78b   : > { %v11640_v10 = vpop.f32.mrf.mxu0  ;;  %v12915_v29 = vsel %vm20007_vm9, %v12906_v34, %v12914_v5  ;;  %v11884_v40 = vadd.f32 %v11638_v46, %v11072_v32  ;;  %v12895_v35 = vpack.c.bf16 %v12283_v43, %v12283_v43  ;;  %v20851_v46 = vrot.slane %v10264_v17, 1 }
 0x78c   : > { %12950 = vst.msk [vmem:[%s19450_s15 + $0xd0] sm:$0xf] %vm12364_vm5, %v12915_v29  ;;  %v12916_v49 = vrot.slane %v12914_v5, 4  ;;  %v6908_v34 = vshrl.u32 %v20821_v30, 16  ;;  %v6912_v29 = vshll.u32 %v20872_v19, 16 }
 0x78d   : > { %v12020_v3 = vadd.f32 %v20749_v61, %v11884_v40  ;;  %v12918_v53 = vshrl.u32 %v12895_v35, 16  ;;  %v12921_v20 = vshll.u32 %v12895_v35, 16  ;;  %v10267_v11 = vsel %vm2653_vm3, %v10262_v58, %v20851_v46 }
 0x78e   : > { %v9156_v26 = vpop.f32.mrf.mxu2  ;;  %v8580_v40 = vshrl.u32 %v20824_v25, 16  ;;  %v20922_v25 = vld [vmem:[%s17763_s25 + $0x5a8] sm:$0xff] }
 0x78f   : > { %v12152_v33 = vmax.f32 %v12020_v3, 0.0  ;;  %v9401_v63 = vadd.f32 %v9156_v26, %v7729_v60  ;;  %v12920_v13 = vrot.slane %v12918_v53, 6  ;;  %v12923_v52 = vrot.slane %v12921_v20, 7 }
 0x790   : > { %v7487_v37 = vpop.f32.mrf.mxu1  ;;  %v20856_v18 = vpop.f32.mrf.mxu3  ;;  %v10268_v53 = vshrl.u32 %v20831_v24, 16  ;;  %v10272_v20 = vshll.u32 %v20884_v38, 16 }
 0x791   : > { %v12284_v62 = vmin.f32 %v12152_v33, 6.0  ;;  %v11073_v39 = vadd.f32 %v20759_v14, %v9401_v63  ;;  %v12924_v48 = vor.u32 %v12923_v52, %v12920_v13  ;;  %v7730_v56 = vadd.f32 %v7487_v37, %v22671_v54 }
 0x792   : > { %v6910_v63 = vor.u32 %v6908_v34, %v6906_v31  ;;  %v6914_v13 = vrot.slane %v6912_v29, 1  ;;  %v8582_v52 = vor.u32 %v8580_v40, %v20846_v1  ;;  %v8586_v37 = vrot.slane %v8584_v36, 1  ;;  %v22673_v29 = vld [vmem:[#allocation76_spill] sm:$0xff] }
 0x793   : > { %v11643_v28 = vpop.f32.mrf.mxu0  ;;  %v12896_v41 = vpack.c.bf16 %v12284_v62, %v12284_v62  ;;  %v11885_v15 = vadd.f32 %v11640_v10, %v11073_v39  ;;  %16238 = vmatmul.msk.bf16.gmra.mxu1 %vm770_vm2, %v6907_v4  ;;  %16565 = vmatmul.msk.bf16.gmra.mxu2 %vm770_vm2, %v8579_v2  ;;  %v12925_v14 = vsel %vm20007_vm9, %v12916_v49, %v12924_v48  ;;  %v12926_v45 = vrot.slane %v12924_v48, 4  ;;  %v22672_v62 = vld [vmem:[#allocation73_spill] sm:$0xff] }
 0x794   : > { %12951 = vst.msk [vmem:[%s19450_s15 + $0xd4] sm:$0xf] %vm12364_vm5, %v12925_v14  ;;  %v11232_v4 = vrot.slane %v20875_v6, 1  ;;  %v10270_v49 = vor.u32 %v10268_v53, %v20851_v46  ;;  %v10274_v48 = vrot.slane %v10272_v20, 1  ;;  %v6915_v1 = vsel %vm2653_vm3, %v6910_v63, %v6914_v13 }
 0x795   : > { %v12928_v59 = vshrl.u32 %v12896_v41, 16  ;;  %v12931_v21 = vshll.u32 %v12896_v41, 16  ;;  %v12021_v12 = vadd.f32 %v20749_v61, %v11885_v15  ;;  %17031 = vmatmul.msk.bf16.gmra.mxu3 %vm770_vm2, %v10267_v11  ;;  %v8587_v14 = vsel %vm2653_vm3, %v8582_v52, %v8586_v37 }
 0x796   : > { %17096 = vmatmul.msk.bf16.gmra.mxu0 %vm770_vm2, %v11231_v8  ;;  %v9159_v42 = vpop.f32.mrf.mxu2  ;;  %v10275_v34 = vsel %vm2653_vm3, %v10270_v49, %v10274_v48  ;;  %v6920_v20 = vshll.u32 %v20922_v25, 16 }
 0x797   : > { %v12930_v5 = vrot.slane %v12928_v59, 6  ;;  %v12933_v32 = vrot.slane %v12931_v21, 7  ;;  %v12153_v10 = vmax.f32 %v12021_v12, 0.0  ;;  %v9402_v43 = vadd.f32 %v9159_v42, %v7730_v56 }
 0x798   : > { %v7489_v17 = vpop.f32.mrf.mxu1  ;;  %v20889_v35 = vpop.f32.mrf.mxu3  ;;  %v11233_v59 = vsel %vm11154_vm4, %v11230_v7, %v11232_v4 }
 0x799   : > { %v12934_v3 = vor.u32 %v12933_v32, %v12930_v5  ;;  %v12285_v27 = vmin.f32 %v12153_v10, 6.0  ;;  %v11074_v30 = vadd.f32 %v20791_v22, %v9402_v43  ;;  %v7731_v39 = vadd.f32 %v7489_v17, %v22672_v62 }
 0x79b   : > { %v11645_v60 = vpop.f32.mrf.mxu0  ;;  %v12935_v26 = vsel %vm20007_vm9, %v12926_v45, %v12934_v3  ;;  %v12897_v58 = vpack.c.bf16 %v12285_v27, %v12285_v27  ;;  %v11886_v33 = vadd.f32 %v11643_v28, %v11074_v30  ;;  %v12936_v21 = vrot.slane %v12934_v3, 4 }
 0x79c   : > { %12952 = vst.msk [vmem:[%s19450_s15 + $0xd8] sm:$0xf] %vm12364_vm5, %v12935_v26  ;;  %v6916_v30 = vshrl.u32 %v20872_v19, 16  ;;  %v8588_v26 = vshrl.u32 %v20875_v6, 16 }
 0x79d   : > { %v12938_v22 = vshrl.u32 %v12897_v58, 16  ;;  %v12941_v2 = vshll.u32 %v12897_v58, 16  ;;  %v12022_v24 = vadd.f32 %v20749_v61, %v11886_v33  ;;  %v17131_v7 = vrot.slane %v12897_v58, 11 }
 0x79e   : > { %v9161_v8 = vpop.f32.mrf.mxu2  ;;  %v8590_v49 = vor.u32 %v8588_v26, %v8586_v37 }
 0x79f   : > { %v12940_v28 = vrot.slane %v12938_v22, 6  ;;  %v12943_v31 = vrot.slane %v12941_v2, 7  ;;  %v12154_v11 = vmax.f32 %v12022_v24, 0.0  ;;  %v9403_v41 = vadd.f32 %v9161_v8, %v7731_v39 }
 0x7a0   : > { %v7492_v15 = vpop.f32.mrf.mxu1  ;;  %v20910_v46 = vpop.f32.mrf.mxu3  ;;  %v10276_v2 = vshrl.u32 %v20884_v38, 16  ;;  %v6918_v39 = vor.u32 %v6916_v30, %v6914_v13  ;;  %v6922_v8 = vrot.slane %v6920_v20, 1  ;;  %v20980_v20 = vld [vmem:[%s17763_s25 + $0x39c] sm:$0xff] }
 0x7a1   : > { %v12944_v12 = vor.u32 %v12943_v31, %v12940_v28  ;;  %v12286_v54 = vmin.f32 %v12154_v11, 6.0  ;;  %v11075_v56 = vadd.f32 %v20808_v16, %v9403_v41  ;;  %v20925_v16 = vld [vmem:[%s17763_s25 + $0x150] sm:$0xff]  ;;  %v7732_v40 = vadd.f32 %v7492_v15, %v22673_v29 }
 0x7a2   : > { %v8592_v58 = vshll.u32 %v20925_v16, 16  ;;  %v11234_v31 = vrot.slane %v20925_v16, 1  ;;  %v6923_v37 = vsel %vm2653_vm3, %v6918_v39, %v6922_v8 }
 0x7a3   : > { %v11648_v42 = vpop.f32.mrf.mxu0  ;;  %v12945_v5 = vsel %vm20007_vm9, %v12936_v21, %v12944_v12  ;;  %v12954_v32 = vpack.c.bf16 %v12286_v54, %v12286_v54  ;;  %v11887_v10 = vadd.f32 %v11645_v60, %v11075_v56  ;;  %16239 = vmatmul.msk.bf16.gmra.mxu1 %vm770_vm2, %v6915_v1  ;;  %16566 = vmatmul.msk.bf16.gmra.mxu2 %vm770_vm2, %v8587_v14  ;;  %v20934_v60 = vld [vmem:[%s17763_s25 + $0x394] sm:$0xff]  ;;  %v22674_v1 = vld [vmem:[#allocation79_spill] sm:$0xff] }
 0x7a4   : > { %12953 = vst.msk [vmem:[%s19450_s15 + $0xdc] sm:$0xf] %vm12364_vm5, %v12945_v5  ;;  %v10280_v19 = vshll.u32 %v20934_v60, 16  ;;  %v8594_v28 = vrot.slane %v8592_v58, 1 }
 0x7a5   : > { %v12965_v43 = vrot.slane %v12954_v32, 7  ;;  %v12023_v17 = vadd.f32 %v20749_v61, %v11887_v10  ;;  %17032 = vmatmul.msk.bf16.gmra.mxu3 %vm770_vm2, %v10275_v34  ;;  %v11235_v32 = vsel %vm11154_vm4, %v11232_v4, %v11234_v31 }
 0x7a6   : > { %17097 = vmatmul.msk.bf16.gmra.mxu0 %vm770_vm2, %v11233_v59  ;;  %v9164_v36 = vpop.f32.mrf.mxu2  ;;  %v10278_v59 = vor.u32 %v10276_v2, %v10274_v48  ;;  %v10282_v38 = vrot.slane %v10280_v19, 1  ;;  %v8595_v56 = vsel %vm2653_vm3, %v8590_v49, %v8594_v28 }
 0x7a7   : > { %v12966_v45 = vsel %vm20116_vm12, %v17131_v7, %v12965_v43  ;;  %v12155_v3 = vmax.f32 %v12023_v17, 0.0  ;;  %v9404_v27 = vadd.f32 %v9164_v36, %v7732_v40  ;;  %v12967_v11 = vrot.slane %v12965_v43, 4  ;;  %v20971_v17 = vld [vmem:[%s17763_s25 + $0x158] sm:$0xff]  ;;  %v22675_v40 = vld [vmem:[#allocation82_spill] sm:$0xff] }
 0x7a8   : > { %12980 = vst.msk [vmem:[%s19450_s15 + $0xe0] sm:$0xf] %vm12364_vm5, %v12966_v45  ;;  %v7494_v53 = vpop.f32.mrf.mxu1  ;;  %v20941_v33 = vpop.f32.mrf.mxu3  ;;  %v10283_v10 = vsel %vm2653_vm3, %v10278_v59, %v10282_v38 }
 0x7a9   : > { %v12287_v63 = vmin.f32 %v12155_v3, 6.0  ;;  %v11076_v52 = vadd.f32 %v20836_v44, %v9404_v27  ;;  %v7733_v44 = vadd.f32 %v7494_v53, %v22674_v1  ;;  %v6924_v53 = vshrl.u32 %v20922_v25, 16 }
 0x7aa   : > { %v10288_v25 = vshll.u32 %v20980_v20, 16 }
 0x7ab   : > { %v11650_v22 = vpop.f32.mrf.mxu0  ;;  %v12955_v24 = vpack.c.bf16 %v12287_v63, %v12287_v63  ;;  %v11888_v62 = vadd.f32 %v11648_v42, %v11076_v52  ;;  %v8596_v63 = vshrl.u32 %v20925_v16, 16  ;;  %v8600_v52 = vshll.u32 %v20971_v17, 16 }
 0x7ad   : > { %v12968_v41 = vrot.slane %v12955_v24, 7  ;;  %v12024_v15 = vadd.f32 %v20749_v61, %v11888_v62  ;;  %v10284_v62 = vshrl.u32 %v20934_v60, 16  ;;  %v8602_v1 = vrot.slane %v8600_v52, 1 }
 0x7ae   : > { %v9166_v14 = vpop.f32.mrf.mxu2  ;;  %v10290_v60 = vrot.slane %v10288_v25, 1 }
 0x7af   : > { %v12969_v21 = vsel %vm20116_vm12, %v12967_v11, %v12968_v41  ;;  %v12156_v12 = vmax.f32 %v12024_v15, 0.0  ;;  %v9405_v54 = vadd.f32 %v9166_v14, %v7733_v44  ;;  %v12970_v29 = vrot.slane %v12968_v41, 4 }
 0x7b0   : > { %12981 = vst.msk [vmem:[%s19450_s15 + $0xe4] sm:$0xf] %vm12364_vm5, %v12969_v21  ;;  %v7497_v13 = vpop.f32.mrf.mxu1  ;;  %v20955_v42 = vpop.f32.mrf.mxu3  ;;  %v6926_v11 = vor.u32 %v6924_v53, %v6922_v8  ;;  %v8598_v15 = vor.u32 %v8596_v63, %v8594_v28  ;;  %v11236_v44 = vrot.slane %v20971_v17, 1  ;;  %v21024_v63 = vld [vmem:[%s17763_s25 + $0x3a4] sm:$0xff] }
 0x7b1   : > { %v12288_v34 = vmin.f32 %v12156_v12, 6.0  ;;  %v11077_v48 = vadd.f32 %v20856_v18, %v9405_v54  ;;  %v20968_v18 = vld [vmem:[%s17763_s25 + $0x5b0] sm:$0xff]  ;;  %v7734_v36 = vadd.f32 %v7497_v13, %v22675_v40  ;;  %v22676_v12 = vld [vmem:[#allocation85_spill] sm:$0xff]  ;;  %v10286_v13 = vor.u32 %v10284_v62, %v10282_v38 }
 0x7b2   : > { %v6928_v58 = vshll.u32 %v20968_v18, 16 }
 0x7b3   : > { %v11653_v5 = vpop.f32.mrf.mxu0  ;;  %v12956_v7 = vpack.c.bf16 %v12288_v34, %v12288_v34  ;;  %v11889_v43 = vadd.f32 %v11650_v22, %v11077_v48  ;;  %16240 = vmatmul.msk.bf16.gmra.mxu1 %vm770_vm2, %v6923_v37  ;;  %16567 = vmatmul.msk.bf16.gmra.mxu2 %vm770_vm2, %v8595_v56  ;;  %v8603_v48 = vsel %vm2653_vm3, %v8598_v15, %v8602_v1  ;;  %v10292_v15 = vshrl.u32 %v20980_v20, 16 }
 0x7b4   : > { %v6930_v41 = vrot.slane %v6928_v58, 1 }
 0x7b5   : > { %v12971_v6 = vrot.slane %v12956_v7, 7  ;;  %v12025_v4 = vadd.f32 %v20749_v61, %v11889_v43  ;;  %17033 = vmatmul.msk.bf16.gmra.mxu3 %vm770_vm2, %v10283_v10  ;;  %v11237_v7 = vsel %vm11154_vm4, %v11234_v31, %v11236_v44  ;;  %v10291_v43 = vsel %vm2653_vm3, %v10286_v13, %v10290_v60  ;;  %v22677_v31 = vld [vmem:[#allocation88_spill] sm:$0xff] }
 0x7b6   : > { %17098 = vmatmul.msk.bf16.gmra.mxu0 %vm770_vm2, %v11235_v32  ;;  %v9169_v45 = vpop.f32.mrf.mxu2  ;;  %v6931_v28 = vsel %vm2653_vm3, %v6926_v11, %v6930_v41 }
 0x7b7   : > { %v12972_v3 = vsel %vm20116_vm12, %v12970_v29, %v12971_v6  ;;  %v12157_v27 = vmax.f32 %v12025_v4, 0.0  ;;  %v9406_v30 = vadd.f32 %v9169_v45, %v7734_v36  ;;  %v12973_v14 = vrot.slane %v12971_v6, 4  ;;  %v21014_v4 = vld [vmem:[%s17763_s25 + $0x5b8] sm:$0xff] }
 0x7b8   : > { %12982 = vst.msk [vmem:[%s19450_s15 + $0xe8] sm:$0xf] %vm12364_vm5, %v12972_v3  ;;  %v7499_v26 = vpop.f32.mrf.mxu1  ;;  %v20987_v22 = vpop.f32.mrf.mxu3 }
 0x7b9   : > { %v12289_v2 = vmin.f32 %v12157_v27, 6.0  ;;  %v11078_v19 = vadd.f32 %v20889_v35, %v9406_v30  ;;  %v7735_v35 = vadd.f32 %v7499_v26, %v22676_v12  ;;  %v6932_v27 = vshrl.u32 %v20968_v18, 16 }
 0x7bb   : > { %v11655_v24 = vpop.f32.mrf.mxu0  ;;  %v12957_v39 = vpack.c.bf16 %v12289_v2, %v12289_v2  ;;  %v11890_v49 = vadd.f32 %v11653_v5, %v11078_v19  ;;  %v6936_v2 = vshll.u32 %v21014_v4, 16  ;;  %v8604_v19 = vshrl.u32 %v20971_v17, 16  ;;  %v21060_v17 = vld [vmem:[%s17763_s25 + $0x5c0] sm:$0xff] }
 0x7bd   : > { %v12974_v59 = vrot.slane %v12957_v39, 7  ;;  %v12026_v21 = vadd.f32 %v20749_v61, %v11890_v49  ;;  %v12989_v40 = vshrl.u32 %v12957_v39, 16  ;;  %v8606_v13 = vor.u32 %v8604_v19, %v8602_v1 }
 0x7be   : > { %v9171_v54 = vpop.f32.mrf.mxu2  ;;  %v6940_v19 = vshrl.u32 %v21014_v4, 16 }
 0x7bf   : > { %v12975_v37 = vsel %vm20116_vm12, %v12973_v14, %v12974_v59  ;;  %v12158_v56 = vmax.f32 %v12026_v21, 0.0  ;;  %v9407_v34 = vadd.f32 %v9171_v54, %v7735_v35  ;;  %v17132_v25 = vrot.slane %v12989_v40, 11 }
 0x7c0   : > { %12983 = vst.msk [vmem:[%s19450_s15 + $0xec] sm:$0xf] %vm12364_vm5, %v12975_v37  ;;  %v7502_v8 = vpop.f32.mrf.mxu1  ;;  %v21001_v5 = vpop.f32.mrf.mxu3  ;;  %v10296_v14 = vshll.u32 %v21024_v63, 16  ;;  %v6934_v35 = vor.u32 %v6932_v27, %v6930_v41  ;;  %v6938_v54 = vrot.slane %v6936_v2, 1 }
 0x7c1   : > { %v12290_v32 = vmin.f32 %v12158_v56, 6.0  ;;  %v11079_v38 = vadd.f32 %v20910_v46, %v9407_v34  ;;  %v21017_v46 = vld [vmem:[%s17763_s25 + $0x160] sm:$0xff]  ;;  %v7736_v45 = vadd.f32 %v7502_v8, %v22677_v31  ;;  %v22678_v8 = vld [vmem:[#allocation91_spill] sm:$0xff] }
 0x7c2   : > { %v11238_v56 = vrot.slane %v21017_v46, 1 }
 0x7c3   : > { %v11658_v10 = vpop.f32.mrf.mxu0  ;;  %v12984_v29 = vpack.c.bf16 %v12290_v32, %v12290_v32  ;;  %v11891_v6 = vadd.f32 %v11655_v24, %v11079_v38  ;;  %16241 = vmatmul.msk.bf16.gmra.mxu1 %vm770_vm2, %v6931_v28  ;;  %16568 = vmatmul.msk.bf16.gmra.mxu2 %vm770_vm2, %v8603_v48  ;;  %v8608_v24 = vshll.u32 %v21017_v46, 16  ;;  %v10294_v48 = vor.u32 %v10292_v15, %v10290_v60 }
 0x7c4   : > { %v10298_v32 = vrot.slane %v10296_v14, 1  ;;  %v6944_v15 = vshll.u32 %v21060_v17, 16  ;;  %v8612_v14 = vshrl.u32 %v21017_v46, 16 }
 0x7c5   : > { %v12994_v36 = vshrl.u32 %v12984_v29, 16  ;;  %v12027_v16 = vadd.f32 %v20749_v61, %v11891_v6  ;;  %17034 = vmatmul.msk.bf16.gmra.mxu3 %vm770_vm2, %v10291_v43  ;;  %v12997_v53 = vshll.u32 %v12984_v29, 16  ;;  %v8610_v37 = vrot.slane %v8608_v24, 1 }
 0x7c6   : > { %17099 = vmatmul.msk.bf16.gmra.mxu0 %vm770_vm2, %v11237_v7  ;;  %v9174_v3 = vpop.f32.mrf.mxu2  ;;  %v6939_v29 = vsel %vm2653_vm3, %v6934_v35, %v6938_v54  ;;  %v11239_v6 = vsel %vm11154_vm4, %v11236_v44, %v11238_v56 }
 0x7c7   : > { %v12996_v30 = vrot.slane %v12994_v36, 7  ;;  %v12159_v26 = vmax.f32 %v12027_v16, 0.0  ;;  %v9408_v58 = vadd.f32 %v9174_v3, %v7736_v45  ;;  %v8611_v1 = vsel %vm2653_vm3, %v8606_v13, %v8610_v37 }
 0x7c8   : > { %v7504_v52 = vpop.f32.mrf.mxu1  ;;  %v21029_v62 = vpop.f32.mrf.mxu3  ;;  %v10299_v3 = vsel %vm2653_vm3, %v10294_v48, %v10298_v32 }
 0x7c9   : > { %v12999_v39 = vor.u32 %v12997_v53, %v12996_v30  ;;  %v12291_v49 = vmin.f32 %v12159_v26, 6.0  ;;  %v11080_v18 = vadd.f32 %v20941_v33, %v9408_v58  ;;  %v7737_v20 = vadd.f32 %v7504_v52, %v22678_v8  ;;  %v22679_v58 = vld [vmem:[#allocation93_spill] sm:$0xff] }
 0x7ca   : > { %v13001_v40 = vrot.slane %v12996_v30, 4 }
 0x7cb   : > { %v11660_v11 = vpop.f32.mrf.mxu0  ;;  %v13000_v59 = vsel %vm20223_vm15, %v17132_v25, %v12999_v39  ;;  %v12985_v21 = vpack.c.bf16 %v12291_v49, %v12291_v49  ;;  %v11892_v12 = vadd.f32 %v11658_v10, %v11080_v18  ;;  %v21070_v18 = vld [vmem:[%s17763_s25 + $0x3ac] sm:$0xff] }
 0x7cc   : > { %13032 = vst.msk [vmem:[%s19450_s15 + $0xf0] sm:$0xf] %vm12364_vm5, %v13000_v59  ;;  %v10304_v8 = vshll.u32 %v21070_v18, 16 }
 0x7cd   : > { %v13003_v34 = vshrl.u32 %v12985_v21, 16  ;;  %v12028_v33 = vadd.f32 %v20749_v61, %v11892_v12  ;;  %v13006_v7 = vshll.u32 %v12985_v21, 16 }
 0x7ce   : > { %v9176_v28 = vpop.f32.mrf.mxu2 }
 0x7cf   : > { %v13005_v38 = vrot.slane %v13003_v34, 7  ;;  %v12160_v43 = vmax.f32 %v12028_v33, 0.0  ;;  %v9409_v10 = vadd.f32 %v9176_v28, %v7737_v20  ;;  %v10300_v33 = vshrl.u32 %v21024_v63, 16 }
 0x7d0   : > { %v7507_v41 = vpop.f32.mrf.mxu1  ;;  %v21048_v60 = vpop.f32.mrf.mxu3 }
 0x7d1   : > { %v13008_v36 = vor.u32 %v13006_v7, %v13005_v38  ;;  %v12292_v16 = vmin.f32 %v12160_v43, 6.0  ;;  %v11081_v31 = vadd.f32 %v20955_v42, %v9409_v10  ;;  %v21063_v42 = vld [vmem:[%s17763_s25 + $0x168] sm:$0xff]  ;;  %v7738_v52 = vadd.f32 %v7507_v41, %v22679_v58 }
 0x7d2   : > { %v8616_v59 = vshll.u32 %v21063_v42, 16  ;;  %v13010_v12 = vrot.slane %v13005_v38, 4  ;;  %v6942_v7 = vor.u32 %v6940_v19, %v6938_v54  ;;  %v6946_v43 = vrot.slane %v6944_v15, 1 }
 0x7d3   : > { %v11663_v45 = vpop.f32.mrf.mxu0  ;;  %v13009_v27 = vsel %vm20223_vm15, %v13001_v40, %v13008_v36  ;;  %v12986_v53 = vpack.c.bf16 %v12292_v16, %v12292_v16  ;;  %v11893_v26 = vadd.f32 %v11660_v11, %v11081_v31  ;;  %16242 = vmatmul.msk.bf16.gmra.mxu1 %vm770_vm2, %v6939_v29  ;;  %16569 = vmatmul.msk.bf16.gmra.mxu2 %vm770_vm2, %v8611_v1  ;;  %v11240_v41 = vrot.slane %v21063_v42, 1  ;;  %v22680_v1 = vld [vmem:[#allocation95_spill] sm:$0xff] }
 0x7d4   : > { %13033 = vst.msk [vmem:[%s19450_s15 + $0xf4] sm:$0xf] %vm12364_vm5, %v13009_v27  ;;  %v8614_v10 = vor.u32 %v8612_v14, %v8610_v37  ;;  %v8618_v38 = vrot.slane %v8616_v59, 1  ;;  %v10302_v40 = vor.u32 %v10300_v33, %v10298_v32  ;;  %v10306_v36 = vrot.slane %v10304_v8, 1  ;;  %v21117_v59 = vld [vmem:[%s17763_s25 + $0x3b4] sm:$0xff] }
 0x7d5   : > { %v13012_v44 = vshrl.u32 %v12986_v53, 16  ;;  %v12029_v30 = vadd.f32 %v20749_v61, %v11893_v26  ;;  %17035 = vmatmul.msk.bf16.gmra.mxu3 %vm770_vm2, %v10299_v3  ;;  %v13015_v25 = vshll.u32 %v12986_v53, 16  ;;  %v6947_v27 = vsel %vm2653_vm3, %v6942_v7, %v6946_v43 }
 0x7d6   : > { %17100 = vmatmul.msk.bf16.gmra.mxu0 %vm770_vm2, %v11239_v6  ;;  %v9179_v2 = vpop.f32.mrf.mxu2  ;;  %v8619_v37 = vsel %vm2653_vm3, %v8614_v10, %v8618_v38  ;;  %v11241_v53 = vsel %vm11154_vm4, %v11238_v56, %v11240_v41  ;;  %v21106_v56 = vld [vmem:[%s17763_s25 + $0x5c8] sm:$0xff]  ;;  %v10312_v7 = vshll.u32 %v21117_v59, 16 }
 0x7d7   : > { %v13014_v24 = vrot.slane %v13012_v44, 7  ;;  %v12161_v39 = vmax.f32 %v12029_v30, 0.0  ;;  %v9410_v49 = vadd.f32 %v9179_v2, %v7738_v52  ;;  %v10307_v2 = vsel %vm2653_vm3, %v10302_v40, %v10306_v36  ;;  %v22682_v40 = vld [vmem:[#allocation4_spill] sm:$0xff] }
 0x7d8   : > { %v7509_v11 = vpop.f32.mrf.mxu1  ;;  %v21075_v21 = vpop.f32.mrf.mxu3 }
 0x7d9   : > { %v13017_v35 = vor.u32 %v13015_v25, %v13014_v24  ;;  %v12293_v13 = vmin.f32 %v12161_v39, 6.0  ;;  %v11082_v4 = vadd.f32 %v20987_v22, %v9410_v49  ;;  %v7739_v63 = vadd.f32 %v7509_v11, %v22680_v1  ;;  %v22681_v39 = vld [vmem:[#allocation2_spill] sm:$0xff] }
 0x7da   : > { %v13019_v26 = vrot.slane %v13014_v24, 4 }
 0x7db   : > { %v11665_v34 = vpop.f32.mrf.mxu0  ;;  %v13018_v20 = vsel %vm20223_vm15, %v13010_v12, %v13017_v35  ;;  %v12987_v28 = vpack.c.bf16 %v12293_v13, %v12293_v13  ;;  %v11894_v48 = vadd.f32 %v11663_v45, %v11082_v4  ;;  %v6948_v35 = vshrl.u32 %v21060_v17, 16 }
 0x7dc   : > { %13034 = vst.msk [vmem:[%s19450_s15 + $0xf8] sm:$0xf] %vm12364_vm5, %v13018_v20  ;;  %v6952_v13 = vshll.u32 %v21106_v56, 16  ;;  %v8620_v4 = vshrl.u32 %v21063_v42, 16 }
 0x7dd   : > { %v13021_v29 = vshrl.u32 %v12987_v28, 16  ;;  %v12030_v22 = vadd.f32 %v20749_v61, %v11894_v48  ;;  %v13024_v31 = vshll.u32 %v12987_v28, 16  ;;  %v10308_v48 = vshrl.u32 %v21070_v18, 16 }
 0x7de   : > { %v9181_v6 = vpop.f32.mrf.mxu2  ;;  %v6950_v17 = vor.u32 %v6948_v35, %v6946_v43  ;;  %v8622_v1 = vor.u32 %v8620_v4, %v8618_v38 }
 0x7df   : > { %v13023_v16 = vrot.slane %v13021_v29, 7  ;;  %v12162_v3 = vmax.f32 %v12030_v22, 0.0  ;;  %v9411_v45 = vadd.f32 %v9181_v6, %v7739_v63  ;;  %v6954_v22 = vrot.slane %v6952_v13, 1 }
 0x7e0   : > { %v7512_v54 = vpop.f32.mrf.mxu1  ;;  %v21094_v32 = vpop.f32.mrf.mxu3 }
 0x7e1   : > { %v13026_v44 = vor.u32 %v13024_v31, %v13023_v16  ;;  %v12294_v30 = vmin.f32 %v12162_v3, 6.0  ;;  %v11083_v58 = vadd.f32 %v21001_v5, %v9411_v45  ;;  %v21109_v5 = vld [vmem:[%s17763_s25 + $0x170] sm:$0xff]  ;;  %v7740_v49 = vadd.f32 %v7512_v54, %v22681_v39  ;;  %v21159_v39 = vld [vmem:[%s17763_s25 + $0x3bc] sm:$0xff] }
 0x7e2   : > { %v11242_v31 = vrot.slane %v21109_v5, 1  ;;  %v10310_v3 = vor.u32 %v10308_v48, %v10306_v36  ;;  %v10314_v45 = vrot.slane %v10312_v7, 1  ;;  %v6955_v43 = vsel %vm2653_vm3, %v6950_v17, %v6954_v22  ;;  %v22684_v17 = vld [vmem:[#allocation9_spill] sm:$0xff] }
 0x7e3   : > { %v11668_v52 = vpop.f32.mrf.mxu0  ;;  %v13027_v19 = vsel %vm20223_vm15, %v13019_v26, %v13026_v44  ;;  %v13036_v46 = vpack.c.bf16 %v12294_v30, %v12294_v30  ;;  %v11895_v25 = vadd.f32 %v11665_v34, %v11083_v58  ;;  %16243 = vmatmul.msk.bf16.gmra.mxu1 %vm770_vm2, %v6947_v27  ;;  %16570 = vmatmul.msk.bf16.gmra.mxu2 %vm770_vm2, %v8619_v37  ;;  %v8624_v34 = vshll.u32 %v21109_v5, 16 }
 0x7e4   : > { %13035 = vst.msk [vmem:[%s19450_s15 + $0xfc] sm:$0xf] %vm12364_vm5, %v13027_v19  ;;  %v11243_v36 = vsel %vm11154_vm4, %v11240_v41, %v11242_v31  ;;  %v10315_v30 = vsel %vm2653_vm3, %v10310_v3, %v10314_v45  ;;  %v22683_v41 = vld [vmem:[#allocation6_spill] sm:$0xff] }
 0x7e5   : > { %13040 = vst.msk [vmem:[%s19450_s15 + $0x100] sm:$0xf] %vm12364_vm5, %v13036_v46  ;;  %v12031_v24 = vadd.f32 %v20749_v61, %v11895_v25  ;;  %17036 = vmatmul.msk.bf16.gmra.mxu3 %vm770_vm2, %v10307_v2  ;;  %v8626_v63 = vrot.slane %v8624_v34, 1  ;;  %v21148_v2 = vld [vmem:[%s17763_s25 + $0x5d0] sm:$0xff]  ;;  %v10316_v34 = vshrl.u32 %v21117_v59, 16 }
 0x7e6   : > { %17101 = vmatmul.msk.bf16.gmra.mxu0 %vm770_vm2, %v11241_v53  ;;  %v9184_v11 = vpop.f32.mrf.mxu2 }
 0x7e7   : > { %v12163_v15 = vmax.f32 %v12031_v24, 0.0  ;;  %v9412_v14 = vadd.f32 %v9184_v11, %v7740_v49  ;;  %v8627_v38 = vsel %vm2653_vm3, %v8622_v1, %v8626_v63  ;;  %v6956_v11 = vshrl.u32 %v21106_v56, 16 }
 0x7e8   : > { %v7514_v12 = vpop.f32.mrf.mxu1  ;;  %v21123_v33 = vpop.f32.mrf.mxu3 }
 0x7e9   : > { %v12295_v8 = vmin.f32 %v12163_v15, 6.0  ;;  %v11084_v20 = vadd.f32 %v21029_v62, %v9412_v14  ;;  %v7741_v16 = vadd.f32 %v7514_v12, %v22682_v40  ;;  %v6960_v15 = vshll.u32 %v21148_v2, 16 }
 0x7ea   : > { %v8628_v14 = vshrl.u32 %v21109_v5, 16  ;;  %v6958_v56 = vor.u32 %v6956_v11, %v6954_v22  ;;  %v10318_v40 = vor.u32 %v10316_v34, %v10314_v45 }
 0x7eb   : > { %v11670_v28 = vpop.f32.mrf.mxu0  ;;  %v13037_v10 = vpack.c.bf16 %v12295_v8, %v12295_v8  ;;  %v11896_v29 = vadd.f32 %v11668_v52, %v11084_v20  ;;  %v10320_v8 = vshll.u32 %v21159_v39, 16  ;;  %v6962_v48 = vrot.slane %v6960_v15, 1 }
 0x7ec   : > { %v8630_v7 = vor.u32 %v8628_v14, %v8626_v63 }
 0x7ed   : > { %13041 = vst.msk [vmem:[%s19450_s15 + $0x104] sm:$0xf] %vm12364_vm5, %v13037_v10  ;;  %v12032_v6 = vadd.f32 %v20749_v61, %v11896_v29  ;;  %v21175_v29 = vld [vmem:[%s22332_s2] ss:$0 sm:$0xff]  ;;  %v6963_v3 = vsel %vm2653_vm3, %v6958_v56, %v6962_v48 }
 0x7ee   : > { %v9186_v62 = vpop.f32.mrf.mxu2 }
 0x7ef   : > { %v12164_v18 = vmax.f32 %v12032_v6, 0.0  ;;  %v9413_v54 = vadd.f32 %v9186_v62, %v7741_v16  ;;  %v10322_v16 = vrot.slane %v10320_v8, 1  ;;  %v10324_v8 = vshrl.u32 %v21159_v39, 16 }
 0x7f0   : > { %v7517_v27 = vpop.f32.mrf.mxu1  ;;  %v21135_v37 = vpop.f32.mrf.mxu3 }
 0x7f1   : > { %v12296_v53 = vmin.f32 %v12164_v18, 6.0  ;;  %v11085_v26 = vadd.f32 %v21048_v60, %v9413_v54  ;;  %v21151_v60 = vld [vmem:[%s17763_s25 + $0x178] sm:$0xff]  ;;  %v7742_v19 = vadd.f32 %v7517_v27, %v22683_v41  ;;  %v6964_v41 = vshrl.u32 %v21148_v2, 16 }
 0x7f2   : > { %v8632_v12 = vshll.u32 %v21151_v60, 16  ;;  %v11244_v59 = vrot.slane %v21151_v60, 1  ;;  %v8636_v14 = vshrl.u32 %v21151_v60, 16  ;;  %v21249_v60 = vld [vmem:[%s17763_s25 + $0x188] sm:$0xff] }
 0x7f3   : > { %v11673_v44 = vpop.f32.mrf.mxu0  ;;  %v13038_v58 = vpack.c.bf16 %v12296_v53, %v12296_v53  ;;  %v11897_v52 = vadd.f32 %v11670_v28, %v11085_v26  ;;  %16244 = vmatmul.msk.bf16.gmra.mxu1 %vm770_vm2, %v6955_v43  ;;  %16571 = vmatmul.msk.bf16.gmra.mxu2 %vm770_vm2, %v8627_v38  ;;  %v10323_v53 = vsel %vm2653_vm3, %v10318_v40, %v10322_v16 }
 0x7f4   : > { %v8634_v10 = vrot.slane %v8632_v12, 1  ;;  %v11245_v45 = vsel %vm11154_vm4, %v11242_v31, %v11244_v59  ;;  %v22685_v31 = vld [vmem:[#allocation12_spill] sm:$0xff] }
 0x7f5   : > { %13042 = vst.msk [vmem:[%s19450_s15 + $0x108] sm:$0xf] %vm12364_vm5, %v13038_v58  ;;  %v12033_v42 = vadd.f32 %v20749_v61, %v11897_v52  ;;  %17037 = vmatmul.msk.bf16.gmra.mxu3 %vm770_vm2, %v10315_v30 }
 0x7f6   : > { %17102 = vmatmul.msk.bf16.gmra.mxu0 %vm770_vm2, %v11243_v36  ;;  %v9189_v46 = vpop.f32.mrf.mxu2  ;;  %v8635_v18 = vsel %vm2653_vm3, %v8630_v7, %v8634_v10  ;;  %v21195_v36 = vld [vmem:[%s17763_s25 + $0x5d8] sm:$0xff]  ;;  %v6966_v7 = vor.u32 %v6964_v41, %v6962_v48 }
 0x7f7   : > { %v12165_v25 = vmax.f32 %v12033_v42, 0.0  ;;  %v9414_v24 = vadd.f32 %v9189_v46, %v7742_v19  ;;  %v6968_v15 = vshll.u32 %v21195_v36, 16 }
 0x7f8   : > { %v7519_v49 = vpop.f32.mrf.mxu1  ;;  %v21165_v61 = vpop.f32.mrf.mxu3 }
 0x7f9   : > { %v12297_v35 = vmin.f32 %v12165_v25, 6.0  ;;  %v11086_v13 = vadd.f32 %v21075_v21, %v9414_v24  ;;  %v7743_v1 = vadd.f32 %v7519_v49, %v22684_v17  ;;  %v21205_v49 = vld [vmem:[%s17763_s25 + $0x3c4] sm:$0xff]  ;;  %v8638_v17 = vor.u32 %v8636_v14, %v8634_v10 }
 0x7fb   : > { %v11675_v4 = vpop.f32.mrf.mxu0  ;;  %v13039_v20 = vpack.c.bf16 %v12297_v35, %v12297_v35  ;;  %v11898_v28 = vadd.f32 %v11673_v44, %v11086_v13 }
 0x7fd   : > { %13043 = vst.msk [vmem:[%s19450_s15 + $0x10c] sm:$0xf] %vm12364_vm5, %v13039_v20  ;;  %v12034_v21 = vadd.f32 %v21175_v29, %v11898_v28  ;;  %v10328_v20 = vshll.u32 %v21205_v49, 16 }
 0x7fe   : > { %v9191_v6 = vpop.f32.mrf.mxu2 }
 0x7ff   : > { %v12166_v22 = vmax.f32 %v12034_v21, 0.0  ;;  %v9415_v63 = vadd.f32 %v9191_v6, %v7743_v1  ;;  %v21215_v21 = vrot.slane %v6968_v15, 1 }
 0x800   : > { %v7522_v62 = vpop.f32.mrf.mxu1  ;;  %v21182_v54 = vpop.f32.mrf.mxu3 }
 0x801   : > { %v12298_v27 = vmin.f32 %v12166_v22, 6.0  ;;  %v11087_v43 = vadd.f32 %v21094_v32, %v9415_v63  ;;  %v21198_v32 = vld [vmem:[%s17763_s25 + $0x180] sm:$0xff]  ;;  %v7744_v52 = vadd.f32 %v7522_v62, %v22685_v31  ;;  %v22686_v63 = vld [vmem:[#allocation15_spill] sm:$0xff] }
 0x802   : > { %v8640_v12 = vshll.u32 %v21198_v32, 16  ;;  %v11246_v6 = vrot.slane %v21198_v32, 1 }
 0x803   : > { %v11678_v38 = vpop.f32.mrf.mxu0  ;;  %v13044_v26 = vpack.c.bf16 %v12298_v27, %v12298_v27  ;;  %v11899_v44 = vadd.f32 %v11675_v4, %v11087_v43  ;;  %16245 = vmatmul.msk.bf16.gmra.mxu1 %vm770_vm2, %v6963_v3  ;;  %16572 = vmatmul.msk.bf16.gmra.mxu2 %vm770_vm2, %v8635_v18  ;;  %v10326_v18 = vor.u32 %v10324_v8, %v10322_v16  ;;  %v21222_v27 = vrot.slane %v10328_v20, 1  ;;  %v21256_v8 = vld [vmem:[%s17763_s25 + $0x3cc] sm:$0xff] }
 0x804   : > { %v21217_v1 = vrot.slane %v8640_v12, 1  ;;  %v11247_v31 = vsel %vm11154_vm4, %v11244_v59, %v11246_v6  ;;  %v6972_v12 = vshrl.u32 %v21195_v36, 16 }
 0x805   : > { %v13050_v30 = vshrl.u32 %v13044_v26, 16  ;;  %v13053_v58 = vshll.u32 %v13044_v26, 16  ;;  %v12035_v5 = vadd.f32 %v21175_v29, %v11899_v44  ;;  %17038 = vmatmul.msk.bf16.gmra.mxu3 %vm770_vm2, %v10323_v53  ;;  %v6971_v53 = vsel %vm2653_vm3, %v6966_v7, %v21215_v21 }
 0x806   : > { %17103 = vmatmul.msk.bf16.gmra.mxu0 %vm770_vm2, %v11245_v45  ;;  %v9194_v42 = vpop.f32.mrf.mxu2  ;;  %v8643_v26 = vsel %vm2653_vm3, %v8638_v17, %v21217_v1  ;;  %v8648_v7 = vshll.u32 %v21249_v60, 16 }
 0x807   : > { %v13052_v19 = vrot.slane %v13050_v30, 4  ;;  %v13055_v46 = vrot.slane %v13053_v58, 5  ;;  %v12167_v25 = vmax.f32 %v12035_v5, 0.0  ;;  %v9416_v24 = vadd.f32 %v9194_v42, %v7744_v52 }
 0x808   : > { %v7524_v11 = vpop.f32.mrf.mxu1  ;;  %v21210_v35 = vpop.f32.mrf.mxu3  ;;  %v10331_v42 = vsel %vm2653_vm3, %v10326_v18, %v21222_v27 }
 0x809   : > { %v12299_v13 = vmin.f32 %v12167_v25, 6.0  ;;  %v11088_v4 = vadd.f32 %v21123_v33, %v9416_v24  ;;  %v13056_v2 = vor.u32 %v13055_v46, %v13052_v19  ;;  %v7745_v62 = vadd.f32 %v7524_v11, %v22686_v63  ;;  %v22687_v24 = vld [vmem:[#allocation18_spill] sm:$0xff] }
 0x80b   : > { %v11680_v34 = vpop.f32.mrf.mxu0  ;;  %v13045_v28 = vpack.c.bf16 %v12299_v13, %v12299_v13  ;;  %v11900_v56 = vadd.f32 %v11678_v38, %v11088_v4  ;;  %v13057_v3 = vrot.slane %v13056_v2, 4 }
 0x80d   : > { %v13059_v40 = vshll.u32 %v13045_v28, 16  ;;  %v13063_v22 = vshrl.u32 %v13045_v28, 16  ;;  %v12036_v33 = vadd.f32 %v21175_v29, %v11900_v56  ;;  %v8644_v56 = vshrl.u32 %v21198_v32, 16 }
 0x80e   : > { %v9196_v39 = vpop.f32.mrf.mxu2 }
 0x80f   : > { %v13061_v48 = vrot.slane %v13059_v40, 5  ;;  %v13065_v43 = vrot.slane %v13063_v22, 4  ;;  %v12168_v38 = vmax.f32 %v12036_v33, 0.0  ;;  %v9417_v10 = vadd.f32 %v9196_v39, %v7745_v62 }
 0x810   : > { %v7527_v45 = vpop.f32.mrf.mxu1  ;;  %v21228_v44 = vpop.f32.mrf.mxu3  ;;  %v10332_v62 = vshrl.u32 %v21205_v49, 16 }
 0x811   : > { %v13062_v16 = vsel %vm19569_vm8, %v13057_v3, %v13061_v48  ;;  %v12300_v30 = vmin.f32 %v12168_v38, 6.0  ;;  %v11089_v58 = vadd.f32 %v21135_v37, %v9417_v10  ;;  %v13066_v52 = vor.u32 %v13065_v43, %v13061_v48  ;;  %v21246_v37 = vld [vmem:[%s17763_s25 + $0x5e0] sm:$0xff] }
 0x812   : > { %13097 = vst.msk [vmem:[%s19450_s15 + $0x110] sm:$0xf] %vm12364_vm5, %v13062_v16  ;;  %v7746_v11 = vadd.f32 %v7527_v45, %v22687_v24  ;;  %v6976_v28 = vshll.u32 %v21246_v37, 16  ;;  %v10336_v3 = vshll.u32 %v21256_v8, 16  ;;  %v6974_v48 = vor.u32 %v6972_v12, %v21215_v21  ;;  %v22688_v16 = vld [vmem:[#allocation21_spill] sm:$0xff] }
 0x813   : > { %v11683_v5 = vpop.f32.mrf.mxu0  ;;  %v13046_v41 = vpack.c.bf16 %v12300_v30, %v12300_v30  ;;  %v11901_v19 = vadd.f32 %v11680_v34, %v11089_v58  ;;  %16246 = vmatmul.msk.bf16.gmra.mxu1 %vm770_vm2, %v6971_v53  ;;  %16573 = vmatmul.msk.bf16.gmra.mxu2 %vm770_vm2, %v8643_v26  ;;  %v13067_v15 = vrot.slane %v13066_v52, 4  ;;  %v8646_v38 = vor.u32 %v8644_v56, %v21217_v1 }
 0x814   : > { %v6978_v43 = vrot.slane %v6976_v28, 1  ;;  %v8650_v10 = vrot.slane %v8648_v7, 1  ;;  %v11248_v45 = vrot.slane %v21249_v60, 1  ;;  %v6980_v56 = vshrl.u32 %v21246_v37, 16 }
 0x815   : > { %v13069_v59 = vshll.u32 %v13046_v41, 16  ;;  %v13073_v46 = vshrl.u32 %v13046_v41, 16  ;;  %v12037_v25 = vadd.f32 %v21175_v29, %v11901_v19  ;;  %17039 = vmatmul.msk.bf16.gmra.mxu3 %vm770_vm2, %v10331_v42 }
 0x816   : > { %17104 = vmatmul.msk.bf16.gmra.mxu0 %vm770_vm2, %v11247_v31  ;;  %v9199_v14 = vpop.f32.mrf.mxu2  ;;  %v10334_v31 = vor.u32 %v10332_v62, %v21222_v27  ;;  %v6979_v19 = vsel %vm2653_vm3, %v6974_v48, %v6978_v43 }
 0x817   : > { %v13071_v13 = vrot.slane %v13069_v59, 5  ;;  %v13075_v4 = vrot.slane %v13073_v46, 4  ;;  %v12169_v34 = vmax.f32 %v12037_v25, 0.0  ;;  %v9418_v2 = vadd.f32 %v9199_v14, %v7746_v11 }
 0x818   : > { %v7529_v20 = vpop.f32.mrf.mxu1  ;;  %v21261_v17 = vpop.f32.mrf.mxu3  ;;  %v8651_v59 = vsel %vm2653_vm3, %v8646_v38, %v8650_v10 }
 0x819   : > { %v13072_v40 = vsel %vm19569_vm8, %v13067_v15, %v13071_v13  ;;  %v12301_v36 = vmin.f32 %v12169_v34, 6.0  ;;  %v11090_v22 = vadd.f32 %v21165_v61, %v9418_v2  ;;  %v13076_v63 = vor.u32 %v13075_v4, %v13071_v13  ;;  %v21298_v34 = vld [vmem:[%s17763_s25 + $0x190] sm:$0xff] }
 0x81a   : > { %13098 = vst.msk [vmem:[%s19450_s15 + $0x114] sm:$0xf] %vm12364_vm5, %v13072_v40  ;;  %v7747_v30 = vadd.f32 %v7529_v20, %v22688_v16  ;;  %v11249_v15 = vsel %vm11154_vm4, %v11246_v6, %v11248_v45  ;;  %v22689_v2 = vld [vmem:[#allocation24_spill] sm:$0xff] }
 0x81b   : > { %v11685_v33 = vpop.f32.mrf.mxu0  ;;  %v13047_v39 = vpack.c.bf16 %v12301_v36, %v12301_v36  ;;  %v11902_v18 = vadd.f32 %v11683_v5, %v11090_v22  ;;  %v13077_v58 = vrot.slane %v13076_v63, 4  ;;  %v10338_v5 = vrot.slane %v10336_v3, 1 }
 0x81c   : > { %v8652_v3 = vshrl.u32 %v21249_v60, 16 }
 0x81d   : > { %v13079_v53 = vshll.u32 %v13047_v39, 16  ;;  %v13083_v61 = vshrl.u32 %v13047_v39, 16  ;;  %v12038_v26 = vadd.f32 %v21175_v29, %v11902_v18  ;;  %v10339_v14 = vsel %vm2653_vm3, %v10334_v31, %v10338_v5 }
 0x81e   : > { %v9201_v49 = vpop.f32.mrf.mxu2  ;;  %v8656_v39 = vshll.u32 %v21298_v34, 16  ;;  %v8654_v31 = vor.u32 %v8652_v3, %v8650_v10  ;;  %v21353_v3 = vld [vmem:[%s17763_s25 + $0x3dc] sm:$0xff] }
 0x81f   : > { %v13081_v52 = vrot.slane %v13079_v53, 5  ;;  %v13085_v21 = vrot.slane %v13083_v61, 4  ;;  %v12170_v42 = vmax.f32 %v12038_v26, 0.0  ;;  %v9419_v41 = vadd.f32 %v9201_v49, %v7747_v30 }
 0x820   : > { %v7532_v1 = vpop.f32.mrf.mxu1  ;;  %v21278_v46 = vpop.f32.mrf.mxu3  ;;  %v10340_v61 = vshrl.u32 %v21256_v8, 16 }
 0x821   : > { %v13082_v25 = vsel %vm19569_vm8, %v13077_v58, %v13081_v52  ;;  %v12302_v24 = vmin.f32 %v12170_v42, 6.0  ;;  %v11091_v27 = vadd.f32 %v21182_v54, %v9419_v41  ;;  %v13086_v12 = vor.u32 %v13085_v21, %v13081_v52  ;;  %v21295_v54 = vld [vmem:[%s17763_s25 + $0x5e8] sm:$0xff] }
 0x822   : > { %13099 = vst.msk [vmem:[%s19450_s15 + $0x118] sm:$0xf] %vm12364_vm5, %v13082_v25  ;;  %v7748_v20 = vadd.f32 %v7532_v1, %v22689_v2  ;;  %v6984_v62 = vshll.u32 %v21295_v54, 16  ;;  %v6982_v58 = vor.u32 %v6980_v56, %v6978_v43  ;;  %v8658_v52 = vrot.slane %v8656_v39, 1  ;;  %v22690_v1 = vld [vmem:[#allocation27_spill] sm:$0xff]  ;;  %v22691_v56 = vld [vmem:[#allocation30_spill] sm:$0xff] }
 0x823   : > { %v11688_v11 = vpop.f32.mrf.mxu0  ;;  %v13048_v13 = vpack.c.bf16 %v12302_v24, %v12302_v24  ;;  %v11903_v4 = vadd.f32 %v11685_v33, %v11091_v27  ;;  %16247 = vmatmul.msk.bf16.gmra.mxu1 %vm770_vm2, %v6979_v19  ;;  %16574 = vmatmul.msk.bf16.gmra.mxu2 %vm770_vm2, %v8651_v59  ;;  %v13087_v7 = vrot.slane %v13086_v12, 4  ;;  %v21305_v33 = vld [vmem:[%s17763_s25 + $0x3d4] sm:$0xff]  ;;  %v11250_v21 = vrot.slane %v21298_v34, 1 }
 0x824   : > { %v10344_v26 = vshll.u32 %v21305_v33, 16  ;;  %v6986_v49 = vrot.slane %v6984_v62, 1  ;;  %v10342_v25 = vor.u32 %v10340_v61, %v10338_v5  ;;  %v6988_v62 = vshrl.u32 %v21295_v54, 16 }
 0x825   : > { %v13089_v32 = vshll.u32 %v13048_v13, 16  ;;  %v12039_v6 = vadd.f32 %v21175_v29, %v11903_v4  ;;  %17040 = vmatmul.msk.bf16.gmra.mxu3 %vm770_vm2, %v10339_v14  ;;  %v17133_v42 = vrot.slane %v13048_v13, 9  ;;  %v11251_v4 = vsel %vm11154_vm4, %v11248_v45, %v11250_v21 }
 0x826   : > { %17105 = vmatmul.msk.bf16.gmra.mxu0 %vm770_vm2, %v11249_v15  ;;  %v9204_v28 = vpop.f32.mrf.mxu2  ;;  %v10346_v8 = vrot.slane %v10344_v26, 1  ;;  %v6987_v10 = vsel %vm2653_vm3, %v6982_v58, %v6986_v49  ;;  %v8659_v15 = vsel %vm2653_vm3, %v8654_v31, %v8658_v52  ;;  %v10352_v54 = vshll.u32 %v21353_v3, 16 }
 0x827   : > { %v13091_v40 = vrot.slane %v13089_v32, 5  ;;  %v12171_v36 = vmax.f32 %v12039_v6, 0.0  ;;  %v9420_v22 = vadd.f32 %v9204_v28, %v7748_v20  ;;  %v21344_v20 = vld [vmem:[%s17763_s25 + $0x198] sm:$0xff] }
 0x828   : > { %v7534_v63 = vpop.f32.mrf.mxu1  ;;  %v21310_v18 = vpop.f32.mrf.mxu3  ;;  %v10347_v32 = vsel %vm2653_vm3, %v10342_v25, %v10346_v8 }
 0x829   : > { %v13092_v48 = vsel %vm19569_vm8, %v13087_v7, %v13091_v40  ;;  %v12303_v38 = vmin.f32 %v12171_v36, 6.0  ;;  %v11092_v37 = vadd.f32 %v21210_v35, %v9420_v22  ;;  %v7749_v19 = vadd.f32 %v7534_v63, %v22690_v1 }
 0x82a   : > { %13100 = vst.msk [vmem:[%s19450_s15 + $0x11c] sm:$0xf] %vm12364_vm5, %v13092_v48 }
 0x82b   : > { %v11690_v53 = vpop.f32.mrf.mxu0  ;;  %v13101_v16 = vpack.c.bf16 %v12303_v38, %v12303_v38  ;;  %v11904_v30 = vadd.f32 %v11688_v11, %v11092_v37  ;;  %v8660_v38 = vshrl.u32 %v21298_v34, 16  ;;  %v8664_v37 = vshll.u32 %v21344_v20, 16 }
 0x82d   : > { %v13112_v41 = vrot.slane %v13101_v16, 5  ;;  %v12040_v35 = vadd.f32 %v21175_v29, %v11904_v30  ;;  %v10348_v30 = vshrl.u32 %v21305_v33, 16  ;;  %v8666_v1 = vrot.slane %v8664_v37, 1  ;;  %v21400_v37 = vld [vmem:[%s17763_s25 + $0x3e4] sm:$0xff] }
 0x82e   : > { %v9206_v59 = vpop.f32.mrf.mxu2  ;;  %v10354_v33 = vrot.slane %v10352_v54, 1 }
 0x82f   : > { %v13113_v24 = vsel %vm19674_vm11, %v17133_v42, %v13112_v41  ;;  %v12172_v27 = vmax.f32 %v12040_v35, 0.0  ;;  %v9421_v11 = vadd.f32 %v9206_v59, %v7749_v19  ;;  %v13114_v28 = vrot.slane %v13112_v41, 4 }
 0x830   : > { %13127 = vst.msk [vmem:[%s19450_s15 + $0x120] sm:$0xf] %vm12364_vm5, %v13113_v24  ;;  %v7537_v43 = vpop.f32.mrf.mxu1  ;;  %v21328_v14 = vpop.f32.mrf.mxu3  ;;  %v6990_v42 = vor.u32 %v6988_v62, %v6986_v49  ;;  %v8662_v35 = vor.u32 %v8660_v38, %v8658_v52  ;;  %v11252_v19 = vrot.slane %v21344_v20, 1 }
 0x831   : > { %v12304_v12 = vmin.f32 %v12172_v27, 6.0  ;;  %v11093_v5 = vadd.f32 %v21228_v44, %v9421_v11  ;;  %v21341_v44 = vld [vmem:[%s17763_s25 + $0x5f0] sm:$0xff]  ;;  %v7750_v7 = vadd.f32 %v7537_v43, %v22691_v56  ;;  %v22692_v27 = vld [vmem:[#allocation33_spill] sm:$0xff]  ;;  %v10350_v43 = vor.u32 %v10348_v30, %v10346_v8  ;;  %v21390_v56 = vld [vmem:[%s17763_s25 + $0x1a0] sm:$0xff] }
 0x832   : > { %v6992_v48 = vshll.u32 %v21341_v44, 16  ;;  %v8672_v30 = vshll.u32 %v21390_v56, 16 }
 0x833   : > { %v11693_v13 = vpop.f32.mrf.mxu0  ;;  %v13102_v6 = vpack.c.bf16 %v12304_v12, %v12304_v12  ;;  %v11905_v2 = vadd.f32 %v11690_v53, %v11093_v5  ;;  %16248 = vmatmul.msk.bf16.gmra.mxu1 %vm770_vm2, %v6987_v10  ;;  %16575 = vmatmul.msk.bf16.gmra.mxu2 %vm770_vm2, %v8659_v15  ;;  %v8667_v5 = vsel %vm2653_vm3, %v8662_v35, %v8666_v1 }
 0x834   : > { %v6994_v41 = vrot.slane %v6992_v48, 1  ;;  %v6996_v48 = vshrl.u32 %v21341_v44, 16 }
 0x835   : > { %v13115_v60 = vrot.slane %v13102_v6, 5  ;;  %v12041_v45 = vadd.f32 %v21175_v29, %v11905_v2  ;;  %17041 = vmatmul.msk.bf16.gmra.mxu3 %vm770_vm2, %v10347_v32  ;;  %v11253_v6 = vsel %vm11154_vm4, %v11250_v21, %v11252_v19  ;;  %v10355_v2 = vsel %vm2653_vm3, %v10350_v43, %v10354_v33 }
 0x836   : > { %17106 = vmatmul.msk.bf16.gmra.mxu0 %vm770_vm2, %v11251_v4  ;;  %v9209_v40 = vpop.f32.mrf.mxu2  ;;  %v6995_v12 = vsel %vm2653_vm3, %v6990_v42, %v6994_v41 }
 0x837   : > { %v13116_v36 = vsel %vm19674_vm11, %v13114_v28, %v13115_v60  ;;  %v12173_v22 = vmax.f32 %v12041_v45, 0.0  ;;  %v9422_v63 = vadd.f32 %v9209_v40, %v7750_v7  ;;  %v13117_v59 = vrot.slane %v13115_v60, 4  ;;  %v21386_v45 = vld [vmem:[%s17763_s25 + $0x5f8] sm:$0xff] }
 0x838   : > { %13128 = vst.msk [vmem:[%s19450_s15 + $0x124] sm:$0xf] %vm12364_vm5, %v13116_v36  ;;  %v7539_v39 = vpop.f32.mrf.mxu1  ;;  %v21360_v53 = vpop.f32.mrf.mxu3  ;;  %v22693_v36 = vld [vmem:[#allocation36_spill] sm:$0xff]  ;;  %v7000_v38 = vshll.u32 %v21386_v45, 16 }
 0x839   : > { %v12305_v61 = vmin.f32 %v12173_v22, 6.0  ;;  %v11094_v26 = vadd.f32 %v21261_v17, %v9422_v63  ;;  %v7751_v17 = vadd.f32 %v7539_v39, %v22692_v27  ;;  %v6998_v27 = vor.u32 %v6996_v48, %v6994_v41 }
 0x83b   : > { %v11695_v16 = vpop.f32.mrf.mxu0  ;;  %v13103_v58 = vpack.c.bf16 %v12305_v61, %v12305_v61  ;;  %v11906_v31 = vadd.f32 %v11693_v13, %v11094_v26 }
 0x83d   : > { %v13118_v25 = vrot.slane %v13103_v58, 5  ;;  %v12042_v24 = vadd.f32 %v21175_v29, %v11906_v31 }
 0x83e   : > { %v9211_v11 = vpop.f32.mrf.mxu2 }
 0x83f   : > { %v13119_v10 = vsel %vm19674_vm11, %v13117_v59, %v13118_v25  ;;  %v12174_v15 = vmax.f32 %v12042_v24, 0.0  ;;  %v9423_v49 = vadd.f32 %v9211_v11, %v7751_v17  ;;  %v10356_v59 = vshrl.u32 %v21353_v3, 16 }
 0x840   : > { %13129 = vst.msk [vmem:[%s19450_s15 + $0x128] sm:$0xf] %vm12364_vm5, %v13119_v10  ;;  %v7542_v52 = vpop.f32.mrf.mxu1  ;;  %v21374_v13 = vpop.f32.mrf.mxu3  ;;  %v21411_v17 = vrot.slane %v7000_v38, 1  ;;  %v21413_v10 = vrot.slane %v8672_v30, 1  ;;  %v22695_v38 = vld [vmem:[#allocation42_spill] sm:$0xff] }
 0x841   : > { %v12306_v4 = vmin.f32 %v12174_v15, 6.0  ;;  %v11095_v8 = vadd.f32 %v21278_v46, %v9423_v49  ;;  %v13120_v46 = vrot.slane %v13118_v25, 4  ;;  %v7752_v22 = vadd.f32 %v7542_v52, %v22693_v36 }
 0x842   : > { %v10360_v25 = vshll.u32 %v21400_v37, 16  ;;  %v11254_v15 = vrot.slane %v21390_v56, 1 }
 0x843   : > { %v11698_v32 = vpop.f32.mrf.mxu0  ;;  %v13104_v28 = vpack.c.bf16 %v12306_v4, %v12306_v4  ;;  %v11907_v60 = vadd.f32 %v11695_v16, %v11095_v8  ;;  %16249 = vmatmul.msk.bf16.gmra.mxu1 %vm770_vm2, %v6995_v12  ;;  %16576 = vmatmul.msk.bf16.gmra.mxu2 %vm770_vm2, %v8667_v5  ;;  %v8668_v16 = vshrl.u32 %v21344_v20, 16  ;;  %v22694_v5 = vld [vmem:[#allocation39_spill] sm:$0xff]  ;;  %v10358_v8 = vor.u32 %v10356_v59, %v10354_v33 }
 0x844   : > { %v11255_v36 = vsel %vm11154_vm4, %v11252_v19, %v11254_v15  ;;  %v21445_v19 = vld [vmem:[%s17763_s25 + $0x1a8] sm:$0xff] }
 0x845   : > { %v13121_v34 = vrot.slane %v13104_v28, 5  ;;  %v13136_v7 = vshrl.u32 %v13104_v28, 16  ;;  %v13139_v21 = vshll.u32 %v13104_v28, 16  ;;  %v12043_v40 = vadd.f32 %v21175_v29, %v11907_v60  ;;  %17042 = vmatmul.msk.bf16.gmra.mxu3 %vm770_vm2, %v10355_v2 }
 0x846   : > { %17107 = vmatmul.msk.bf16.gmra.mxu0 %vm770_vm2, %v11253_v6  ;;  %v9214_v63 = vpop.f32.mrf.mxu2  ;;  %v8670_v43 = vor.u32 %v8668_v16, %v8666_v1  ;;  %v21418_v6 = vrot.slane %v10360_v25, 1  ;;  %v7003_v60 = vsel %vm2653_vm3, %v6998_v27, %v21411_v17  ;;  %v8676_v27 = vshrl.u32 %v21390_v56, 16 }
 0x847   : > { %v13122_v62 = vsel %vm19674_vm11, %v13120_v46, %v13121_v34  ;;  %v12175_v39 = vmax.f32 %v12043_v40, 0.0  ;;  %v9424_v61 = vadd.f32 %v9214_v63, %v7752_v22  ;;  %v13138_v58 = vrot.slane %v13136_v7, 5 }
 0x848   : > { %13130 = vst.msk [vmem:[%s19450_s15 + $0x12c] sm:$0xf] %vm12364_vm5, %v13122_v62  ;;  %v7544_v26 = vpop.f32.mrf.mxu1  ;;  %v21406_v54 = vpop.f32.mrf.mxu3  ;;  %v13141_v31 = vrot.slane %v13139_v21, 6  ;;  %v8675_v46 = vsel %vm2653_vm3, %v8670_v43, %v21413_v10  ;;  %v10363_v63 = vsel %vm2653_vm3, %v10358_v8, %v21418_v6 }
 0x849   : > { %v12307_v42 = vmin.f32 %v12175_v39, 6.0  ;;  %v11096_v44 = vadd.f32 %v21310_v18, %v9424_v61  ;;  %v7753_v4 = vadd.f32 %v7544_v26, %v22694_v5 }
 0x84a   : > { %v13142_v49 = vor.u32 %v13141_v31, %v13138_v58 }
 0x84b   : > { %v11700_v35 = vpop.f32.mrf.mxu0  ;;  %v13131_v24 = vpack.c.bf16 %v12307_v42, %v12307_v42  ;;  %v11908_v11 = vadd.f32 %v11698_v32, %v11096_v44  ;;  %v7004_v42 = vshrl.u32 %v21386_v45, 16  ;;  %v21453_v44 = vld [vmem:[%s17763_s25 + $0x3ec] sm:$0xff] }
 0x84c   : > { %v13143_v7 = vrot.slane %v13142_v49, 4 }
 0x84d   : > { %v13145_v52 = vshrl.u32 %v13131_v24, 16  ;;  %v13148_v12 = vshll.u32 %v13131_v24, 16  ;;  %v12044_v18 = vadd.f32 %v21175_v29, %v11908_v11  ;;  %v8680_v11 = vshll.u32 %v21445_v19, 16 }
 0x84e   : > { %v9216_v3 = vpop.f32.mrf.mxu2 }
 0x84f   : > { %v13147_v41 = vrot.slane %v13145_v52, 5  ;;  %v13150_v2 = vrot.slane %v13148_v12, 6  ;;  %v9425_v28 = vadd.f32 %v9216_v3, %v7753_v4  ;;  %v12176_v32 = vmax.f32 %v12044_v18, 0.0 }
 0x850   : > { %v7547_v1 = vpop.f32.mrf.mxu1  ;;  %v21424_v34 = vpop.f32.mrf.mxu3  ;;  %v10364_v4 = vshrl.u32 %v21400_v37, 16  ;;  %v10368_v18 = vshll.u32 %v21453_v44, 16 }
 0x851   : > { %v13151_v33 = vor.u32 %v13150_v2, %v13147_v41  ;;  %v11097_v21 = vadd.f32 %v21328_v14, %v9425_v28  ;;  %v12308_v22 = vmin.f32 %v12176_v32, 6.0  ;;  %v21439_v14 = vld [vmem:[%s17763_s25 + $0x600] sm:$0xff]  ;;  %v7754_v61 = vadd.f32 %v7547_v1, %v22695_v38 }
 0x852   : > { %v7006_v41 = vor.u32 %v7004_v42, %v21411_v17  ;;  %v8678_v32 = vor.u32 %v8676_v27, %v21413_v10  ;;  %v21468_v1 = vrot.slane %v8680_v11, 1 }
 0x853   : > { %v11703_v40 = vpop.f32.mrf.mxu0  ;;  %v13152_v62 = vsel %vm19782_vm14, %v13143_v7, %v13151_v33  ;;  %v11909_v39 = vadd.f32 %v11700_v35, %v11097_v21  ;;  %16250 = vmatmul.msk.bf16.gmra.mxu1 %vm770_vm2, %v7003_v60  ;;  %16577 = vmatmul.msk.bf16.gmra.mxu2 %vm770_vm2, %v8675_v46  ;;  %v13132_v20 = vpack.c.bf16 %v12308_v22, %v12308_v22  ;;  %v7008_v35 = vshll.u32 %v21439_v14, 16  ;;  %v22696_v7 = vld [vmem:[#allocation45_spill] sm:$0xff] }
 0x854   : > { %13187 = vst.msk [vmem:[%s19450_s15 + $0x130] sm:$0xf] %vm12364_vm5, %v13152_v62  ;;  %v13153_v5 = vrot.slane %v13151_v33, 4  ;;  %v10366_v21 = vor.u32 %v10364_v4, %v21418_v6  ;;  %v21510_v4 = vld [vmem:[%s17763_s25 + $0x3f4] sm:$0xff] }
 0x855   : > { %v12045_v48 = vadd.f32 %v21175_v29, %v11909_v39  ;;  %17043 = vmatmul.msk.bf16.gmra.mxu3 %vm770_vm2, %v10363_v63  ;;  %v13155_v26 = vshrl.u32 %v13132_v20, 16  ;;  %v13158_v16 = vshll.u32 %v13132_v20, 16  ;;  %v21463_v2 = vrot.slane %v7008_v35, 1 }
 0x856   : > { %17108 = vmatmul.msk.bf16.gmra.mxu0 %vm770_vm2, %v11255_v36  ;;  %v9219_v30 = vpop.f32.mrf.mxu2  ;;  %v8683_v20 = vsel %vm2653_vm3, %v8678_v32, %v21468_v1 }
 0x857   : > { %v12177_v58 = vmax.f32 %v12045_v48, 0.0  ;;  %v9426_v31 = vadd.f32 %v9219_v30, %v7754_v61  ;;  %v13157_v59 = vrot.slane %v13155_v26, 5  ;;  %v13160_v25 = vrot.slane %v13158_v16, 6 }
 0x858   : > { %v7549_v24 = vpop.f32.mrf.mxu1  ;;  %v21457_v43 = vpop.f32.mrf.mxu3  ;;  %v7011_v39 = vsel %vm2653_vm3, %v7006_v41, %v21463_v2 }
 0x859   : > { %v12309_v49 = vmin.f32 %v12177_v58, 6.0  ;;  %v11098_v52 = vadd.f32 %v21360_v53, %v9426_v31  ;;  %v13161_v45 = vor.u32 %v13160_v25, %v13157_v59  ;;  %v11256_v53 = vrot.slane %v21445_v19, 1 }
 0x85a   : > { %v7755_v33 = vadd.f32 %v7549_v24, %v22696_v7  ;;  %v22697_v24 = vld [vmem:[#allocation48_spill] sm:$0xff]  ;;  %v10372_v7 = vshrl.u32 %v21453_v44, 16 }
 0x85b   : > { %v11705_v12 = vpop.f32.mrf.mxu0  ;;  %v13133_v3 = vpack.c.bf16 %v12309_v49, %v12309_v49  ;;  %v11910_v8 = vadd.f32 %v11703_v40, %v11098_v52  ;;  %v13162_v28 = vsel %vm19782_vm14, %v13153_v5, %v13161_v45  ;;  %v21476_v40 = vrot.slane %v10368_v18, 1 }
 0x85c   : > { %13188 = vst.msk [vmem:[%s19450_s15 + $0x134] sm:$0xf] %vm12364_vm5, %v13162_v28  ;;  %v11257_v6 = vsel %vm11154_vm4, %v11254_v15, %v11256_v53  ;;  %v13163_v38 = vrot.slane %v13161_v45, 4  ;;  %v21500_v15 = vld [vmem:[%s17763_s25 + $0x608] sm:$0xff]  ;;  %v7012_v49 = vshrl.u32 %v21439_v14, 16 }
 0x85d   : > { %v13165_v37 = vshrl.u32 %v13133_v3, 16  ;;  %v13168_v60 = vshll.u32 %v13133_v3, 16  ;;  %v12046_v46 = vadd.f32 %v21175_v29, %v11910_v8  ;;  %v10371_v58 = vsel %vm2653_vm3, %v10366_v21, %v21476_v40 }
 0x85e   : > { %v9221_v17 = vpop.f32.mrf.mxu2  ;;  %v7016_v3 = vshll.u32 %v21500_v15, 16  ;;  %v8684_v8 = vshrl.u32 %v21445_v19, 16 }
 0x85f   : > { %v13167_v36 = vrot.slane %v13165_v37, 5  ;;  %v13170_v22 = vrot.slane %v13168_v60, 6  ;;  %v12178_v10 = vmax.f32 %v12046_v46, 0.0  ;;  %v9427_v63 = vadd.f32 %v9221_v17, %v7755_v33 }
 0x860   : > { %v7552_v62 = vpop.f32.mrf.mxu1  ;;  %v21487_v48 = vpop.f32.mrf.mxu3  ;;  %v10376_v33 = vshll.u32 %v21510_v4, 16 }
 0x861   : > { %v13171_v61 = vor.u32 %v13170_v22, %v13167_v36  ;;  %v12310_v26 = vmin.f32 %v12178_v10, 6.0  ;;  %v11099_v16 = vadd.f32 %v21374_v13, %v9427_v63  ;;  %v21503_v13 = vld [vmem:[%s17763_s25 + $0x1b0] sm:$0xff]  ;;  %v7756_v27 = vadd.f32 %v7552_v62, %v22697_v24 }
 0x862   : > { %v8688_v41 = vshll.u32 %v21503_v13, 16  ;;  %v7014_v22 = vor.u32 %v7012_v49, %v21463_v2  ;;  %v7018_v10 = vrot.slane %v7016_v3, 1  ;;  %v8686_v63 = vor.u32 %v8684_v8, %v21468_v1  ;;  %v21552_v49 = vld [vmem:[%s17763_s25 + $0x1b8] sm:$0xff] }
 0x863   : > { %v11708_v30 = vpop.f32.mrf.mxu0  ;;  %v13172_v31 = vsel %vm19782_vm14, %v13163_v38, %v13171_v61  ;;  %v13134_v42 = vpack.c.bf16 %v12310_v26, %v12310_v26  ;;  %v11911_v56 = vadd.f32 %v11705_v12, %v11099_v16  ;;  %16251 = vmatmul.msk.bf16.gmra.mxu1 %vm770_vm2, %v7011_v39  ;;  %16578 = vmatmul.msk.bf16.gmra.mxu2 %vm770_vm2, %v8683_v20  ;;  %v13173_v32 = vrot.slane %v13171_v61, 4 }
 0x864   : > { %13189 = vst.msk [vmem:[%s19450_s15 + $0x138] sm:$0xf] %vm12364_vm5, %v13172_v31  ;;  %v8690_v62 = vrot.slane %v8688_v41, 1  ;;  %v10374_v26 = vor.u32 %v10372_v7, %v21476_v40  ;;  %v10378_v16 = vrot.slane %v10376_v33, 1  ;;  %v7019_v31 = vsel %vm2653_vm3, %v7014_v22, %v7018_v10 }
 0x865   : > { %v13175_v35 = vshrl.u32 %v13134_v42, 16  ;;  %v13178_v59 = vshll.u32 %v13134_v42, 16  ;;  %v12047_v25 = vadd.f32 %v21175_v29, %v11911_v56  ;;  %17044 = vmatmul.msk.bf16.gmra.mxu3 %vm770_vm2, %v10371_v58  ;;  %v17134_v39 = vrot.slane %v13134_v42, 10 }
 0x866   : > { %17109 = vmatmul.msk.bf16.gmra.mxu0 %vm770_vm2, %v11257_v6  ;;  %v9224_v11 = vpop.f32.mrf.mxu2  ;;  %v22698_v6 = vld [vmem:[#allocation51_spill] sm:$0xff]  ;;  %v8691_v42 = vsel %vm2653_vm3, %v8686_v63, %v8690_v62  ;;  %v10379_v24 = vsel %vm2653_vm3, %v10374_v26, %v10378_v16  ;;  %v7020_v41 = vshrl.u32 %v21500_v15, 16 }
 0x867   : > { %v13177_v52 = vrot.slane %v13175_v35, 5  ;;  %v13180_v12 = vrot.slane %v13178_v59, 6  ;;  %v12179_v5 = vmax.f32 %v12047_v25, 0.0  ;;  %v9428_v45 = vadd.f32 %v9224_v11, %v7756_v27 }
 0x868   : > { %v7554_v18 = vpop.f32.mrf.mxu1  ;;  %v21515_v28 = vpop.f32.mrf.mxu3 }
 0x869   : > { %v13181_v37 = vor.u32 %v13180_v12, %v13177_v52  ;;  %v12311_v60 = vmin.f32 %v12179_v5, 6.0  ;;  %v11100_v14 = vadd.f32 %v21406_v54, %v9428_v45  ;;  %v11258_v54 = vrot.slane %v21503_v13, 1  ;;  %v22699_v12 = vld [vmem:[#allocation54_spill] sm:$0xff] }
 0x86a   : > { %v7757_v38 = vadd.f32 %v7554_v18, %v22698_v6 }
 0x86b   : > { %v11710_v46 = vpop.f32.mrf.mxu0  ;;  %v13182_v17 = vsel %vm19782_vm14, %v13173_v32, %v13181_v37  ;;  %v13191_v21 = vpack.c.bf16 %v12311_v60, %v12311_v60  ;;  %v11912_v36 = vadd.f32 %v11708_v30, %v11100_v14  ;;  %v11259_v25 = vsel %vm11154_vm4, %v11256_v53, %v11258_v54  ;;  %v21561_v32 = vld [vmem:[%s17763_s25 + $0x3fc] sm:$0xff] }
 0x86c   : > { %13190 = vst.msk [vmem:[%s19450_s15 + $0x13c] sm:$0xf] %vm12364_vm5, %v13182_v17  ;;  %v8692_v14 = vshrl.u32 %v21503_v13, 16  ;;  %v10384_v15 = vshll.u32 %v21561_v32, 16 }
 0x86d   : > { %v13202_v44 = vrot.slane %v13191_v21, 6  ;;  %v12048_v20 = vadd.f32 %v21175_v29, %v11912_v36  ;;  %v10380_v36 = vshrl.u32 %v21510_v4, 16 }
 0x86e   : > { %v9226_v61 = vpop.f32.mrf.mxu2  ;;  %v10386_v4 = vrot.slane %v10384_v15, 1 }
 0x86f   : > { %v13203_v2 = vsel %vm19896_vm6, %v17134_v39, %v13202_v44  ;;  %v12180_v30 = vmax.f32 %v12048_v20, 0.0  ;;  %v9429_v58 = vadd.f32 %v9226_v61, %v7757_v38  ;;  %v13204_v52 = vrot.slane %v13202_v44, 4 }
 0x870   : > { %13217 = vst.msk [vmem:[%s19450_s15 + $0x140] sm:$0xf] %vm12364_vm5, %v13203_v2  ;;  %v7557_v1 = vpop.f32.mrf.mxu1  ;;  %v21536_v56 = vpop.f32.mrf.mxu3  ;;  %v7022_v39 = vor.u32 %v7020_v41, %v7018_v10  ;;  %v8694_v20 = vor.u32 %v8692_v14, %v8690_v62  ;;  %v11260_v38 = vrot.slane %v21552_v49, 1 }
 0x871   : > { %v12312_v35 = vmin.f32 %v12180_v30, 6.0  ;;  %v11101_v40 = vadd.f32 %v21424_v34, %v9429_v58  ;;  %v21549_v34 = vld [vmem:[%s17763_s25 + $0x610] sm:$0xff]  ;;  %v7758_v5 = vadd.f32 %v7557_v1, %v22699_v12  ;;  %v22700_v30 = vld [vmem:[#allocation57_spill] sm:$0xff]  ;;  %v10382_v1 = vor.u32 %v10380_v36, %v10378_v16  ;;  %v21598_v12 = vld [vmem:[%s17763_s25 + $0x1c0] sm:$0xff] }
 0x872   : > { %v7024_v60 = vshll.u32 %v21549_v34, 16 }
 0x873   : > { %v11713_v59 = vpop.f32.mrf.mxu0  ;;  %v13192_v27 = vpack.c.bf16 %v12312_v35, %v12312_v35  ;;  %v11913_v11 = vadd.f32 %v11710_v46, %v11101_v40  ;;  %16252 = vmatmul.msk.bf16.gmra.mxu1 %vm770_vm2, %v7019_v31  ;;  %16579 = vmatmul.msk.bf16.gmra.mxu2 %vm770_vm2, %v8691_v42  ;;  %v8696_v46 = vshll.u32 %v21552_v49, 16 }
 0x874   : > { %v7026_v44 = vrot.slane %v7024_v60, 1  ;;  %v7028_v60 = vshrl.u32 %v21549_v34, 16 }
 0x875   : > { %v13205_v19 = vrot.slane %v13192_v27, 6  ;;  %v12049_v53 = vadd.f32 %v21175_v29, %v11913_v11  ;;  %17045 = vmatmul.msk.bf16.gmra.mxu3 %vm770_vm2, %v10379_v24  ;;  %v8698_v6 = vrot.slane %v8696_v46, 1  ;;  %v11261_v27 = vsel %vm11154_vm4, %v11258_v54, %v11260_v38  ;;  %v21608_v46 = vld [vmem:[%s17763_s25 + $0x404] sm:$0xff] }
 0x876   : > { %17110 = vmatmul.msk.bf16.gmra.mxu0 %vm770_vm2, %v11259_v25  ;;  %v9229_v45 = vpop.f32.mrf.mxu2  ;;  %v7027_v35 = vsel %vm2653_vm3, %v7022_v39, %v7026_v44  ;;  %v10387_v11 = vsel %vm2653_vm3, %v10382_v1, %v10386_v4 }
 0x877   : > { %v13206_v18 = vsel %vm19896_vm6, %v13204_v52, %v13205_v19  ;;  %v12181_v3 = vmax.f32 %v12049_v53, 0.0  ;;  %v9430_v8 = vadd.f32 %v9229_v45, %v7758_v5  ;;  %v13207_v61 = vrot.slane %v13205_v19, 4  ;;  %v21594_v53 = vld [vmem:[%s17763_s25 + $0x618] sm:$0xff] }
 0x878   : > { %13218 = vst.msk [vmem:[%s19450_s15 + $0x144] sm:$0xf] %vm12364_vm5, %v13206_v18  ;;  %v7559_v37 = vpop.f32.mrf.mxu1  ;;  %v21568_v7 = vpop.f32.mrf.mxu3  ;;  %v8699_v40 = vsel %vm2653_vm3, %v8694_v20, %v8698_v6  ;;  %v22701_v18 = vld [vmem:[#allocation60_spill] sm:$0xff]  ;;  %v7032_v14 = vshll.u32 %v21594_v53, 16  ;;  %v10388_v20 = vshrl.u32 %v21561_v32, 16 }
 0x879   : > { %v12313_v33 = vmin.f32 %v12181_v3, 6.0  ;;  %v11102_v17 = vadd.f32 %v21457_v43, %v9430_v8  ;;  %v7759_v43 = vadd.f32 %v7559_v37, %v22700_v30 }
 0x87a   : > { %v21619_v30 = vrot.slane %v7032_v14, 1  ;;  %v22703_v14 = vld [vmem:[#allocation66_spill] sm:$0xff] }
 0x87b   : > { %v11715_v21 = vpop.f32.mrf.mxu0  ;;  %v13193_v22 = vpack.c.bf16 %v12313_v33, %v12313_v33  ;;  %v11914_v63 = vadd.f32 %v11713_v59, %v11102_v17 }
 0x87d   : > { %v13208_v26 = vrot.slane %v13193_v22, 6  ;;  %v12050_v2 = vadd.f32 %v21175_v29, %v11914_v63 }
 0x87e   : > { %v9231_v58 = vpop.f32.mrf.mxu2 }
 0x87f   : > { %v13209_v31 = vsel %vm19896_vm6, %v13207_v61, %v13208_v26  ;;  %v12182_v42 = vmax.f32 %v12050_v2, 0.0  ;;  %v9431_v10 = vadd.f32 %v9231_v58, %v7759_v43  ;;  %v10392_v61 = vshll.u32 %v21608_v46, 16 }
 0x880   : > { %13219 = vst.msk [vmem:[%s19450_s15 + $0x148] sm:$0xf] %vm12364_vm5, %v13209_v31  ;;  %v7562_v62 = vpop.f32.mrf.mxu1  ;;  %v21582_v59 = vpop.f32.mrf.mxu3  ;;  %v7030_v2 = vor.u32 %v7028_v60, %v7026_v44  ;;  %v11262_v31 = vrot.slane %v21598_v12, 1 }
 0x881   : > { %v12314_v25 = vmin.f32 %v12182_v42, 6.0  ;;  %v11103_v16 = vadd.f32 %v21487_v48, %v9431_v10  ;;  %v13210_v48 = vrot.slane %v13208_v26, 4  ;;  %v7760_v3 = vadd.f32 %v7562_v62, %v22701_v18 }
 0x882   : > { %v11263_v18 = vsel %vm11154_vm4, %v11260_v38, %v11262_v31  ;;  %v21658_v38 = vld [vmem:[%s17763_s25 + $0x1c8] sm:$0xff] }
 0x883   : > { %v11718_v24 = vpop.f32.mrf.mxu0  ;;  %v13194_v52 = vpack.c.bf16 %v12314_v25, %v12314_v25  ;;  %v11915_v19 = vadd.f32 %v11715_v21, %v11103_v16  ;;  %16253 = vmatmul.msk.bf16.gmra.mxu1 %vm770_vm2, %v7027_v35  ;;  %16580 = vmatmul.msk.bf16.gmra.mxu2 %vm770_vm2, %v8699_v40  ;;  %v8704_v21 = vshll.u32 %v21598_v12, 16  ;;  %v22702_v35 = vld [vmem:[#allocation63_spill] sm:$0xff]  ;;  %v10390_v25 = vor.u32 %v10388_v20, %v10386_v4 }
 0x884   : > { %v21631_v16 = vrot.slane %v10392_v61, 1 }
 0x885   : > { %v13211_v13 = vrot.slane %v13194_v52, 6  ;;  %v13226_v5 = vshrl.u32 %v13194_v52, 16  ;;  %v13229_v54 = vshll.u32 %v13194_v52, 16  ;;  %v12051_v45 = vadd.f32 %v21175_v29, %v11915_v19  ;;  %17046 = vmatmul.msk.bf16.gmra.mxu3 %vm770_vm2, %v10387_v11 }
 0x886   : > { %17111 = vmatmul.msk.bf16.gmra.mxu0 %vm770_vm2, %v11261_v27  ;;  %v9234_v8 = vpop.f32.mrf.mxu2  ;;  %v8700_v29 = vshrl.u32 %v21552_v49, 16  ;;  %v21621_v1 = vrot.slane %v8704_v21, 1  ;;  %v7035_v19 = vsel %vm2653_vm3, %v7030_v2, %v21619_v30  ;;  %v8708_v2 = vshrl.u32 %v21598_v12, 16 }
 0x887   : > { %v13212_v41 = vsel %vm19896_vm6, %v13210_v48, %v13211_v13  ;;  %v12183_v37 = vmax.f32 %v12051_v45, 0.0  ;;  %v9432_v33 = vadd.f32 %v9234_v8, %v7760_v3  ;;  %v13228_v15 = vrot.slane %v13226_v5, 6 }
 0x888   : > { %13220 = vst.msk [vmem:[%s19450_s15 + $0x14c] sm:$0xf] %vm12364_vm5, %v13212_v41  ;;  %v7564_v17 = vpop.f32.mrf.mxu1  ;;  %v21614_v36 = vpop.f32.mrf.mxu3  ;;  %v13231_v22 = vrot.slane %v13229_v54, 7  ;;  %v8702_v58 = vor.u32 %v8700_v29, %v8698_v6  ;;  %v10395_v8 = vsel %vm2653_vm3, %v10390_v25, %v21631_v16 }
 0x889   : > { %v12315_v63 = vmin.f32 %v12183_v37, 6.0  ;;  %v11104_v34 = vadd.f32 %v21515_v28, %v9432_v33  ;;  %v7761_v40 = vadd.f32 %v7564_v17, %v22702_v35  ;;  %v21628_v28 = vld [vmem:[%s22332_s2] ss:$0 sm:$0xff] }
 0x88a   : > { %v13232_v42 = vor.u32 %v13231_v22, %v13228_v15  ;;  %v8707_v48 = vsel %vm2653_vm3, %v8702_v58, %v21621_v1 }
 0x88b   : > { %v11720_v39 = vpop.f32.mrf.mxu0  ;;  %v13221_v26 = vpack.c.bf16 %v12315_v63, %v12315_v63  ;;  %v11916_v43 = vadd.f32 %v11718_v24, %v11104_v34  ;;  %v7036_v63 = vshrl.u32 %v21594_v53, 16  ;;  %v21666_v34 = vld [vmem:[%s17763_s25 + $0x40c] sm:$0xff] }
 0x88c   : > { %v13233_v5 = vrot.slane %v13232_v42, 4 }
 0x88d   : > { %v13235_v10 = vshrl.u32 %v13221_v26, 16  ;;  %v13238_v62 = vshll.u32 %v13221_v26, 16  ;;  %v12052_v32 = vadd.f32 %v21628_v28, %v11916_v43  ;;  %v8712_v43 = vshll.u32 %v21658_v38, 16 }
 0x88e   : > { %v9236_v44 = vpop.f32.mrf.mxu2 }
 0x88f   : > { %v13237_v6 = vrot.slane %v13235_v10, 6  ;;  %v13240_v24 = vrot.slane %v13238_v62, 7  ;;  %v9433_v27 = vadd.f32 %v9236_v44, %v7761_v40  ;;  %v12184_v11 = vmax.f32 %v12052_v32, 0.0 }
 0x890   : > { %v7567_v52 = vpop.f32.mrf.mxu1  ;;  %v21637_v13 = vpop.f32.mrf.mxu3  ;;  %v10396_v40 = vshrl.u32 %v21608_v46, 16  ;;  %v10400_v32 = vshll.u32 %v21666_v34, 16 }
 0x891   : > { %v13241_v4 = vor.u32 %v13240_v24, %v13237_v6  ;;  %v11105_v54 = vadd.f32 %v21536_v56, %v9433_v27  ;;  %v12316_v3 = vmin.f32 %v12184_v11, 6.0  ;;  %v21652_v56 = vld [vmem:[%s17763_s25 + $0x620] sm:$0xff]  ;;  %v7762_v33 = vadd.f32 %v7567_v52, %v22703_v14 }
 0x892   : > { %v7038_v6 = vor.u32 %v7036_v63, %v21619_v30  ;;  %v8710_v11 = vor.u32 %v8708_v2, %v21621_v1  ;;  %v21681_v52 = vrot.slane %v8712_v43, 1 }
 0x893   : > { %v11723_v45 = vpop.f32.mrf.mxu0  ;;  %v13242_v41 = vsel %vm20007_vm9, %v13233_v5, %v13241_v4  ;;  %v11917_v37 = vadd.f32 %v11720_v39, %v11105_v54  ;;  %16254 = vmatmul.msk.bf16.gmra.mxu1 %vm770_vm2, %v7035_v19  ;;  %16581 = vmatmul.msk.bf16.gmra.mxu2 %vm770_vm2, %v8707_v48  ;;  %v13222_v49 = vpack.c.bf16 %v12316_v3, %v12316_v3  ;;  %v7040_v39 = vshll.u32 %v21652_v56, 16  ;;  %v22704_v5 = vld [vmem:[#allocation69_spill] sm:$0xff] }
 0x894   : > { %13277 = vst.msk [vmem:[%s19450_s15 + $0x150] sm:$0xf] %vm12364_vm5, %v13242_v41  ;;  %v13243_v35 = vrot.slane %v13241_v4, 4  ;;  %v10398_v54 = vor.u32 %v10396_v40, %v21631_v16  ;;  %v21723_v40 = vld [vmem:[%s17763_s25 + $0x414] sm:$0xff] }
 0x895   : > { %v12053_v60 = vadd.f32 %v21628_v28, %v11917_v37  ;;  %17047 = vmatmul.msk.bf16.gmra.mxu3 %vm770_vm2, %v10395_v8  ;;  %v13245_v17 = vshrl.u32 %v13222_v49, 16  ;;  %v13248_v29 = vshll.u32 %v13222_v49, 16  ;;  %v21676_v24 = vrot.slane %v7040_v39, 1 }
 0x896   : > { %17112 = vmatmul.msk.bf16.gmra.mxu0 %vm770_vm2, %v11263_v18  ;;  %v9239_v21 = vpop.f32.mrf.mxu2  ;;  %v8715_v49 = vsel %vm2653_vm3, %v8710_v11, %v21681_v52 }
 0x897   : > { %v12185_v15 = vmax.f32 %v12053_v60, 0.0  ;;  %v9434_v22 = vadd.f32 %v9239_v21, %v7762_v33  ;;  %v13247_v20 = vrot.slane %v13245_v17, 6  ;;  %v13250_v61 = vrot.slane %v13248_v29, 7 }
 0x898   : > { %v7569_v26 = vpop.f32.mrf.mxu1  ;;  %v21670_v58 = vpop.f32.mrf.mxu3  ;;  %v7043_v37 = vsel %vm2653_vm3, %v7038_v6, %v21676_v24 }
 0x899   : > { %v12317_v42 = vmin.f32 %v12185_v15, 6.0  ;;  %v11106_v10 = vadd.f32 %v21568_v7, %v9434_v22  ;;  %v13251_v53 = vor.u32 %v13250_v61, %v13247_v20  ;;  %v11264_v7 = vrot.slane %v21658_v38, 1 }
 0x89a   : > { %v7763_v4 = vadd.f32 %v7569_v26, %v22704_v5  ;;  %v22705_v26 = vld [vmem:[#allocation72_spill] sm:$0xff]  ;;  %v10404_v5 = vshrl.u32 %v21666_v34, 16 }
 0x89b   : > { %v11725_v62 = vpop.f32.mrf.mxu0  ;;  %v13223_v44 = vpack.c.bf16 %v12317_v42, %v12317_v42  ;;  %v11918_v25 = vadd.f32 %v11723_v45, %v11106_v10  ;;  %v13252_v27 = vsel %vm20007_vm9, %v13243_v35, %v13251_v53  ;;  %v21689_v45 = vrot.slane %v10400_v32, 1 }
 0x89c   : > { %13278 = vst.msk [vmem:[%s19450_s15 + $0x154] sm:$0xf] %vm12364_vm5, %v13252_v27  ;;  %v11265_v16 = vsel %vm11154_vm4, %v11262_v31, %v11264_v7  ;;  %v13253_v14 = vrot.slane %v13251_v53, 4  ;;  %v21713_v31 = vld [vmem:[%s17763_s25 + $0x628] sm:$0xff]  ;;  %v7044_v42 = vshrl.u32 %v21652_v56, 16 }
 0x89d   : > { %v13255_v46 = vshrl.u32 %v13223_v44, 16  ;;  %v13258_v19 = vshll.u32 %v13223_v44, 16  ;;  %v12054_v48 = vadd.f32 %v21628_v28, %v11918_v25  ;;  %v10403_v15 = vsel %vm2653_vm3, %v10398_v54, %v21689_v45 }
 0x89e   : > { %v9241_v30 = vpop.f32.mrf.mxu2  ;;  %v7048_v44 = vshll.u32 %v21713_v31, 16  ;;  %v8716_v25 = vshrl.u32 %v21658_v38, 16 }
 0x89f   : > { %v13257_v18 = vrot.slane %v13255_v46, 6  ;;  %v13260_v3 = vrot.slane %v13258_v19, 7  ;;  %v12186_v1 = vmax.f32 %v12054_v48, 0.0  ;;  %v9435_v8 = vadd.f32 %v9241_v30, %v7763_v4 }
 0x8a0   : > { %v7572_v41 = vpop.f32.mrf.mxu1  ;;  %v21700_v60 = vpop.f32.mrf.mxu3  ;;  %v10408_v4 = vshll.u32 %v21723_v40, 16 }
 0x8a1   : > { %v13261_v33 = vor.u32 %v13260_v3, %v13257_v18  ;;  %v12318_v17 = vmin.f32 %v12186_v1, 6.0  ;;  %v11107_v29 = vadd.f32 %v21582_v59, %v9435_v8  ;;  %v21716_v59 = vld [vmem:[%s17763_s25 + $0x1d0] sm:$0xff]  ;;  %v7764_v2 = vadd.f32 %v7572_v41, %v22705_v26 }
 0x8a2   : > { %v8720_v6 = vshll.u32 %v21716_v59, 16  ;;  %v7046_v3 = vor.u32 %v7044_v42, %v21676_v24  ;;  %v7050_v1 = vrot.slane %v7048_v44, 1  ;;  %v8718_v8 = vor.u32 %v8716_v25, %v21681_v52  ;;  %v21765_v42 = vld [vmem:[%s17763_s25 + $0x1d8] sm:$0xff] }
 0x8a3   : > { %v11728_v21 = vpop.f32.mrf.mxu0  ;;  %v13262_v22 = vsel %vm20007_vm9, %v13253_v14, %v13261_v33  ;;  %v13224_v63 = vpack.c.bf16 %v12318_v17, %v12318_v17  ;;  %v11919_v12 = vadd.f32 %v11725_v62, %v11107_v29  ;;  %16255 = vmatmul.msk.bf16.gmra.mxu1 %vm770_vm2, %v7043_v37  ;;  %16582 = vmatmul.msk.bf16.gmra.mxu2 %vm770_vm2, %v8715_v49  ;;  %v13263_v11 = vrot.slane %v13261_v33, 4 }
 0x8a4   : > { %13279 = vst.msk [vmem:[%s19450_s15 + $0x158] sm:$0xf] %vm12364_vm5, %v13262_v22  ;;  %v8722_v41 = vrot.slane %v8720_v6, 1  ;;  %v10406_v17 = vor.u32 %v10404_v5, %v21689_v45  ;;  %v10410_v29 = vrot.slane %v10408_v4, 1  ;;  %v7051_v22 = vsel %vm2653_vm3, %v7046_v3, %v7050_v1 }
 0x8a5   : > { %v13265_v39 = vshrl.u32 %v13224_v63, 16  ;;  %v13268_v20 = vshll.u32 %v13224_v63, 16  ;;  %v12055_v61 = vadd.f32 %v21628_v28, %v11919_v12  ;;  %17048 = vmatmul.msk.bf16.gmra.mxu3 %vm770_vm2, %v10403_v15  ;;  %v17135_v37 = vrot.slane %v13224_v63, 11 }
 0x8a6   : > { %17113 = vmatmul.msk.bf16.gmra.mxu0 %vm770_vm2, %v11265_v16  ;;  %v9244_v43 = vpop.f32.mrf.mxu2  ;;  %v22706_v16 = vld [vmem:[#allocation75_spill] sm:$0xff]  ;;  %v8723_v63 = vsel %vm2653_vm3, %v8718_v8, %v8722_v41  ;;  %v10411_v26 = vsel %vm2653_vm3, %v10406_v17, %v10410_v29  ;;  %v7052_v6 = vshrl.u32 %v21713_v31, 16 }
 0x8a7   : > { %v13267_v10 = vrot.slane %v13265_v39, 6  ;;  %v13270_v62 = vrot.slane %v13268_v20, 7  ;;  %v12187_v35 = vmax.f32 %v12055_v61, 0.0  ;;  %v9436_v53 = vadd.f32 %v9244_v43, %v7764_v2 }
 0x8a8   : > { %v7574_v32 = vpop.f32.mrf.mxu1  ;;  %v21728_v27 = vpop.f32.mrf.mxu3 }
 0x8a9   : > { %v13271_v46 = vor.u32 %v13270_v62, %v13267_v10  ;;  %v12319_v19 = vmin.f32 %v12187_v35, 6.0  ;;  %v11108_v56 = vadd.f32 %v21614_v36, %v9436_v53  ;;  %v11266_v36 = vrot.slane %v21716_v59, 1  ;;  %v22707_v62 = vld [vmem:[#allocation78_spill] sm:$0xff] }
 0x8aa   : > { %v7765_v14 = vadd.f32 %v7574_v32, %v22706_v16 }
 0x8ab   : > { %v11730_v48 = vpop.f32.mrf.mxu0  ;;  %v13272_v30 = vsel %vm20007_vm9, %v13263_v11, %v13271_v46  ;;  %v13281_v54 = vpack.c.bf16 %v12319_v19, %v12319_v19  ;;  %v11920_v18 = vadd.f32 %v11728_v21, %v11108_v56  ;;  %v11267_v61 = vsel %vm11154_vm4, %v11264_v7, %v11266_v36  ;;  %v21774_v11 = vld [vmem:[%s17763_s25 + $0x41c] sm:$0xff] }
 0x8ac   : > { %13280 = vst.msk [vmem:[%s19450_s15 + $0x15c] sm:$0xf] %vm12364_vm5, %v13272_v30  ;;  %v8724_v56 = vshrl.u32 %v21716_v59, 16  ;;  %v10416_v31 = vshll.u32 %v21774_v11, 16 }
 0x8ad   : > { %v13292_v34 = vrot.slane %v13281_v54, 7  ;;  %v12056_v49 = vadd.f32 %v21628_v28, %v11920_v18  ;;  %v10412_v18 = vshrl.u32 %v21723_v40, 16 }
 0x8ae   : > { %v9246_v33 = vpop.f32.mrf.mxu2  ;;  %v10418_v40 = vrot.slane %v10416_v31, 1 }
 0x8af   : > { %v13293_v24 = vsel %vm20116_vm12, %v17135_v37, %v13292_v34  ;;  %v12188_v21 = vmax.f32 %v12056_v49, 0.0  ;;  %v9437_v15 = vadd.f32 %v9246_v33, %v7765_v14  ;;  %v13294_v10 = vrot.slane %v13292_v34, 4 }
 0x8b0   : > { %13307 = vst.msk [vmem:[%s19450_s15 + $0x160] sm:$0xf] %vm12364_vm5, %v13293_v24  ;;  %v7577_v52 = vpop.f32.mrf.mxu1  ;;  %v21749_v12 = vpop.f32.mrf.mxu3  ;;  %v7054_v37 = vor.u32 %v7052_v6, %v7050_v1  ;;  %v8726_v49 = vor.u32 %v8724_v56, %v8722_v41  ;;  %v11268_v14 = vrot.slane %v21765_v42, 1 }
 0x8b1   : > { %v12320_v39 = vmin.f32 %v12188_v21, 6.0  ;;  %v11109_v45 = vadd.f32 %v21637_v13, %v9437_v15  ;;  %v21762_v13 = vld [vmem:[%s17763_s25 + $0x630] sm:$0xff]  ;;  %v7766_v35 = vadd.f32 %v7577_v52, %v22707_v62  ;;  %v22708_v21 = vld [vmem:[#allocation81_spill] sm:$0xff]  ;;  %v10414_v52 = vor.u32 %v10412_v18, %v10410_v29 }
 0x8b2   : > { %v7056_v19 = vshll.u32 %v21762_v13, 16 }
 0x8b3   : > { %v11733_v20 = vpop.f32.mrf.mxu0  ;;  %v13282_v2 = vpack.c.bf16 %v12320_v39, %v12320_v39  ;;  %v11921_v43 = vadd.f32 %v11730_v48, %v11109_v45  ;;  %16256 = vmatmul.msk.bf16.gmra.mxu1 %vm770_vm2, %v7051_v22  ;;  %16583 = vmatmul.msk.bf16.gmra.mxu2 %vm770_vm2, %v8723_v63  ;;  %v8728_v48 = vshll.u32 %v21765_v42, 16 }
 0x8b4   : > { %v7058_v34 = vrot.slane %v7056_v19, 1  ;;  %v21820_v19 = vld [vmem:[%s17763_s25 + $0x424] sm:$0xff] }
 0x8b5   : > { %v13295_v38 = vrot.slane %v13282_v2, 7  ;;  %v12057_v7 = vadd.f32 %v21628_v28, %v11921_v43  ;;  %17049 = vmatmul.msk.bf16.gmra.mxu3 %vm770_vm2, %v10411_v26  ;;  %v8730_v16 = vrot.slane %v8728_v48, 1  ;;  %v11269_v2 = vsel %vm11154_vm4, %v11266_v36, %v11268_v14 }
 0x8b6   : > { %17114 = vmatmul.msk.bf16.gmra.mxu0 %vm770_vm2, %v11267_v61  ;;  %v9249_v53 = vpop.f32.mrf.mxu2  ;;  %v7059_v41 = vsel %vm2653_vm3, %v7054_v37, %v7058_v34  ;;  %v10419_v43 = vsel %vm2653_vm3, %v10414_v52, %v10418_v40 }
 0x8b7   : > { %v13296_v32 = vsel %vm20116_vm12, %v13294_v10, %v13295_v38  ;;  %v12189_v44 = vmax.f32 %v12057_v7, 0.0  ;;  %v9438_v25 = vadd.f32 %v9249_v53, %v7766_v35  ;;  %v13297_v33 = vrot.slane %v13295_v38, 4  ;;  %v21811_v7 = vld [vmem:[%s17763_s25 + $0x1e0] sm:$0xff]  ;;  %v22709_v35 = vld [vmem:[#allocation84_spill] sm:$0xff] }
 0x8b8   : > { %13308 = vst.msk [vmem:[%s19450_s15 + $0x164] sm:$0xf] %vm12364_vm5, %v13296_v32  ;;  %v7579_v46 = vpop.f32.mrf.mxu1  ;;  %v21781_v5 = vpop.f32.mrf.mxu3  ;;  %v8731_v45 = vsel %vm2653_vm3, %v8726_v49, %v8730_v16 }
 0x8b9   : > { %v12321_v4 = vmin.f32 %v12189_v44, 6.0  ;;  %v11110_v30 = vadd.f32 %v21670_v58, %v9438_v25  ;;  %v7767_v58 = vadd.f32 %v7579_v46, %v22708_v21  ;;  %v7060_v46 = vshrl.u32 %v21762_v13, 16 }
 0x8ba   : > { %v10424_v13 = vshll.u32 %v21820_v19, 16 }
 0x8bb   : > { %v11735_v54 = vpop.f32.mrf.mxu0  ;;  %v13283_v3 = vpack.c.bf16 %v12321_v4, %v12321_v4  ;;  %v11922_v8 = vadd.f32 %v11733_v20, %v11110_v30  ;;  %v8732_v4 = vshrl.u32 %v21765_v42, 16  ;;  %v8736_v30 = vshll.u32 %v21811_v7, 16  ;;  %v21854_v42 = vld [vmem:[%s17763_s25 + $0x640] sm:$0xff] }
 0x8bd   : > { %v13298_v17 = vrot.slane %v13283_v3, 7  ;;  %v12058_v24 = vadd.f32 %v21628_v28, %v11922_v8  ;;  %v10420_v8 = vshrl.u32 %v21774_v11, 16  ;;  %v8738_v21 = vrot.slane %v8736_v30, 1 }
 0x8be   : > { %v9251_v15 = vpop.f32.mrf.mxu2 }
 0x8bf   : > { %v13299_v22 = vsel %vm20116_vm12, %v13297_v33, %v13298_v17  ;;  %v12190_v63 = vmax.f32 %v12058_v24, 0.0  ;;  %v9439_v39 = vadd.f32 %v9251_v15, %v7767_v58  ;;  %v13300_v62 = vrot.slane %v13298_v17, 4 }
 0x8c0   : > { %13309 = vst.msk [vmem:[%s19450_s15 + $0x168] sm:$0xf] %vm12364_vm5, %v13299_v22  ;;  %v7582_v1 = vpop.f32.mrf.mxu1  ;;  %v21795_v20 = vpop.f32.mrf.mxu3  ;;  %v7062_v33 = vor.u32 %v7060_v46, %v7058_v34  ;;  %v8734_v24 = vor.u32 %v8732_v4, %v8730_v16  ;;  %v11270_v58 = vrot.slane %v21811_v7, 1 }
 0x8c1   : > { %v12322_v61 = vmin.f32 %v12190_v63, 6.0  ;;  %v11111_v29 = vadd.f32 %v21700_v60, %v9439_v39  ;;  %v21808_v60 = vld [vmem:[%s17763_s25 + $0x638] sm:$0xff]  ;;  %v7768_v53 = vadd.f32 %v7582_v1, %v22709_v35  ;;  %v22710_v63 = vld [vmem:[#allocation87_spill] sm:$0xff]  ;;  %v10422_v1 = vor.u32 %v10420_v8, %v10418_v40 }
 0x8c2   : > { %v7064_v48 = vshll.u32 %v21808_v60, 16  ;;  %v8739_v16 = vsel %vm2653_vm3, %v8734_v24, %v8738_v21  ;;  %v7072_v8 = vshll.u32 %v21854_v42, 16 }
 0x8c3   : > { %v11738_v26 = vpop.f32.mrf.mxu0  ;;  %v13284_v10 = vpack.c.bf16 %v12322_v61, %v12322_v61  ;;  %v11923_v38 = vadd.f32 %v11735_v54, %v11111_v29  ;;  %16257 = vmatmul.msk.bf16.gmra.mxu1 %vm770_vm2, %v7059_v41  ;;  %16584 = vmatmul.msk.bf16.gmra.mxu2 %vm770_vm2, %v8731_v45  ;;  %v10426_v41 = vrot.slane %v10424_v13, 1  ;;  %v8740_v13 = vshrl.u32 %v21811_v7, 16  ;;  %v21900_v7 = vld [vmem:[%s17763_s25 + $0x648] sm:$0xff] }
 0x8c4   : > { %v7066_v17 = vrot.slane %v7064_v48, 1 }
 0x8c5   : > { %v13301_v59 = vrot.slane %v13284_v10, 7  ;;  %v12059_v36 = vadd.f32 %v21628_v28, %v11923_v38  ;;  %17050 = vmatmul.msk.bf16.gmra.mxu3 %vm770_vm2, %v10419_v43  ;;  %v13316_v15 = vshrl.u32 %v13284_v10, 16 }
 0x8c6   : > { %17115 = vmatmul.msk.bf16.gmra.mxu0 %vm770_vm2, %v11269_v2  ;;  %v9254_v32 = vpop.f32.mrf.mxu2  ;;  %v7067_v34 = vsel %vm2653_vm3, %v7062_v33, %v7066_v17  ;;  %v11271_v2 = vsel %vm11154_vm4, %v11268_v14, %v11270_v58 }
 0x8c7   : > { %v13302_v44 = vsel %vm20116_vm12, %v13300_v62, %v13301_v59  ;;  %v12191_v25 = vmax.f32 %v12059_v36, 0.0  ;;  %v9440_v6 = vadd.f32 %v9254_v32, %v7768_v53  ;;  %v17136_v43 = vrot.slane %v13316_v15, 11 }
 0x8c8   : > { %13310 = vst.msk [vmem:[%s19450_s15 + $0x16c] sm:$0xf] %vm12364_vm5, %v13302_v44  ;;  %v7584_v56 = vpop.f32.mrf.mxu1  ;;  %v21827_v54 = vpop.f32.mrf.mxu3  ;;  %v10427_v36 = vsel %vm2653_vm3, %v10422_v1, %v10426_v41 }
 0x8c9   : > { %v12323_v18 = vmin.f32 %v12191_v25, 6.0  ;;  %v11112_v31 = vadd.f32 %v21728_v27, %v9440_v6  ;;  %v7769_v39 = vadd.f32 %v7584_v56, %v22710_v63  ;;  %v22711_v25 = vld [vmem:[#allocation90_spill] sm:$0xff]  ;;  %v7068_v56 = vshrl.u32 %v21808_v60, 16 }
 0x8cb   : > { %v11740_v3 = vpop.f32.mrf.mxu0  ;;  %v13311_v37 = vpack.c.bf16 %v12323_v18, %v12323_v18  ;;  %v11924_v49 = vadd.f32 %v11738_v26, %v11112_v31  ;;  %v21864_v31 = vld [vmem:[%s17763_s25 + $0x42c] sm:$0xff] }
 0x8cc   : > { %v10432_v63 = vshll.u32 %v21864_v31, 16 }
 0x8cd   : > { %v13321_v52 = vshrl.u32 %v13311_v37, 16  ;;  %v12060_v22 = vadd.f32 %v21628_v28, %v11924_v49  ;;  %v13324_v45 = vshll.u32 %v13311_v37, 16 }
 0x8ce   : > { %v9256_v27 = vpop.f32.mrf.mxu2 }
 0x8cf   : > { %v13323_v11 = vrot.slane %v13321_v52, 7  ;;  %v12192_v61 = vmax.f32 %v12060_v22, 0.0  ;;  %v9441_v29 = vadd.f32 %v9256_v27, %v7769_v39  ;;  %v10428_v22 = vshrl.u32 %v21820_v19, 16 }
 0x8d0   : > { %v7587_v26 = vpop.f32.mrf.mxu1  ;;  %v21842_v40 = vpop.f32.mrf.mxu3 }
 0x8d1   : > { %v13326_v10 = vor.u32 %v13324_v45, %v13323_v11  ;;  %v12324_v38 = vmin.f32 %v12192_v61, 6.0  ;;  %v11113_v62 = vadd.f32 %v21749_v12, %v9441_v29  ;;  %v21857_v12 = vld [vmem:[%s17763_s25 + $0x1e8] sm:$0xff]  ;;  %v7770_v6 = vadd.f32 %v7587_v26, %v22711_v25 }
 0x8d2   : > { %v8744_v37 = vshll.u32 %v21857_v12, 16  ;;  %v13328_v33 = vrot.slane %v13323_v11, 4  ;;  %v7070_v45 = vor.u32 %v7068_v56, %v7066_v17  ;;  %v7074_v61 = vrot.slane %v7072_v8, 1 }
 0x8d3   : > { %v11743_v59 = vpop.f32.mrf.mxu0  ;;  %v13327_v35 = vsel %vm20223_vm15, %v17136_v43, %v13326_v10  ;;  %v13312_v53 = vpack.c.bf16 %v12324_v38, %v12324_v38  ;;  %v11925_v32 = vadd.f32 %v11740_v3, %v11113_v62  ;;  %16258 = vmatmul.msk.bf16.gmra.mxu1 %vm770_vm2, %v7067_v34  ;;  %16585 = vmatmul.msk.bf16.gmra.mxu2 %vm770_vm2, %v8739_v16  ;;  %v11272_v26 = vrot.slane %v21857_v12, 1  ;;  %v22712_v16 = vld [vmem:[#allocation92_spill] sm:$0xff] }
 0x8d4   : > { %13359 = vst.msk [vmem:[%s19450_s15 + $0x170] sm:$0xf] %vm12364_vm5, %v13327_v35  ;;  %v8742_v29 = vor.u32 %v8740_v13, %v8738_v21  ;;  %v8746_v11 = vrot.slane %v8744_v37, 1  ;;  %v10430_v43 = vor.u32 %v10428_v22, %v10426_v41  ;;  %v10434_v10 = vrot.slane %v10432_v63, 1 }
 0x8d5   : > { %v13330_v14 = vshrl.u32 %v13312_v53, 16  ;;  %v12061_v44 = vadd.f32 %v21628_v28, %v11925_v32  ;;  %17051 = vmatmul.msk.bf16.gmra.mxu3 %vm770_vm2, %v10427_v36  ;;  %v13333_v4 = vshll.u32 %v13312_v53, 16  ;;  %v7075_v35 = vsel %vm2653_vm3, %v7070_v45, %v7074_v61 }
 0x8d6   : > { %17116 = vmatmul.msk.bf16.gmra.mxu0 %vm770_vm2, %v11271_v2  ;;  %v9259_v46 = vpop.f32.mrf.mxu2  ;;  %v8747_v21 = vsel %vm2653_vm3, %v8742_v29, %v8746_v11  ;;  %v11273_v53 = vsel %vm11154_vm4, %v11270_v58, %v11272_v26  ;;  %v7080_v22 = vshll.u32 %v21900_v7, 16  ;;  %v8748_v63 = vshrl.u32 %v21857_v12, 16 }
 0x8d7   : > { %v13332_v48 = vrot.slane %v13330_v14, 7  ;;  %v12193_v30 = vmax.f32 %v12061_v44, 0.0  ;;  %v9442_v18 = vadd.f32 %v9259_v46, %v7770_v6  ;;  %v10435_v46 = vsel %vm2653_vm3, %v10430_v43, %v10434_v10 }
 0x8d8   : > { %v7589_v3 = vpop.f32.mrf.mxu1  ;;  %v21869_v49 = vpop.f32.mrf.mxu3 }
 0x8d9   : > { %v13335_v24 = vor.u32 %v13333_v4, %v13332_v48  ;;  %v12325_v15 = vmin.f32 %v12193_v30, 6.0  ;;  %v11114_v60 = vadd.f32 %v21781_v5, %v9442_v18  ;;  %v7771_v19 = vadd.f32 %v7589_v3, %v22712_v16  ;;  %v22713_v18 = vld [vmem:[#allocation94_spill] sm:$0xff] }
 0x8da   : > { %v13337_v32 = vrot.slane %v13332_v48, 4  ;;  %v10436_v16 = vshrl.u32 %v21864_v31, 16 }
 0x8db   : > { %v11745_v52 = vpop.f32.mrf.mxu0  ;;  %v13336_v39 = vsel %vm20223_vm15, %v13328_v33, %v13335_v24  ;;  %v13313_v27 = vpack.c.bf16 %v12325_v15, %v12325_v15  ;;  %v11926_v1 = vadd.f32 %v11743_v59, %v11114_v60  ;;  %v21909_v15 = vld [vmem:[%s17763_s25 + $0x434] sm:$0xff] }
 0x8dc   : > { %13360 = vst.msk [vmem:[%s19450_s15 + $0x174] sm:$0xf] %vm12364_vm5, %v13336_v39 }
 0x8dd   : > { %v13339_v34 = vshrl.u32 %v13313_v27, 16  ;;  %v12062_v5 = vadd.f32 %v21628_v28, %v11926_v1  ;;  %v13342_v62 = vshll.u32 %v13313_v27, 16 }
 0x8de   : > { %v9261_v2 = vpop.f32.mrf.mxu2 }
 0x8df   : > { %v13341_v38 = vrot.slane %v13339_v34, 7  ;;  %v12194_v36 = vmax.f32 %v12062_v5, 0.0  ;;  %v9443_v59 = vadd.f32 %v9261_v2, %v7771_v19  ;;  %v10440_v19 = vshll.u32 %v21909_v15, 16 }
 0x8e0   : > { %v7592_v17 = vpop.f32.mrf.mxu1  ;;  %v21888_v41 = vpop.f32.mrf.mxu3 }
 0x8e1   : > { %v13344_v14 = vor.u32 %v13342_v62, %v13341_v38  ;;  %v12326_v44 = vmin.f32 %v12194_v36, 6.0  ;;  %v11115_v25 = vadd.f32 %v21795_v20, %v9443_v59  ;;  %v21903_v20 = vld [vmem:[%s17763_s25 + $0x1f0] sm:$0xff]  ;;  %v7772_v3 = vadd.f32 %v7592_v17, %v22713_v18 }
 0x8e2   : > { %v8752_v39 = vshll.u32 %v21903_v20, 16  ;;  %v13346_v1 = vrot.slane %v13341_v38, 4  ;;  %v7082_v36 = vrot.slane %v7080_v22, 1  ;;  %v8750_v59 = vor.u32 %v8748_v63, %v8746_v11  ;;  %v22714_v17 = vld [vmem:[#allocation96_spill] sm:$0xff] }
 0x8e3   : > { %v11748_v6 = vpop.f32.mrf.mxu0  ;;  %v13345_v56 = vsel %vm20223_vm15, %v13337_v32, %v13344_v14  ;;  %v13314_v4 = vpack.c.bf16 %v12326_v44, %v12326_v44  ;;  %v11927_v30 = vadd.f32 %v11745_v52, %v11115_v25  ;;  %16259 = vmatmul.msk.bf16.gmra.mxu1 %vm770_vm2, %v7075_v35  ;;  %16586 = vmatmul.msk.bf16.gmra.mxu2 %vm770_vm2, %v8747_v21  ;;  %v7076_v52 = vshrl.u32 %v21854_v42, 16  ;;  %v21944_v18 = vld [vmem:[%s17763_s25 + $0x650] sm:$0xff] }
 0x8e4   : > { %13361 = vst.msk [vmem:[%s19450_s15 + $0x178] sm:$0xf] %vm12364_vm5, %v13345_v56  ;;  %v8754_v38 = vrot.slane %v8752_v39, 1  ;;  %v11274_v31 = vrot.slane %v21903_v20, 1  ;;  %v10442_v32 = vrot.slane %v10440_v19, 1  ;;  %v8756_v22 = vshrl.u32 %v21903_v20, 16 }
 0x8e5   : > { %v13348_v58 = vshrl.u32 %v13314_v4, 16  ;;  %v12063_v48 = vadd.f32 %v21628_v28, %v11927_v30  ;;  %17052 = vmatmul.msk.bf16.gmra.mxu3 %vm770_vm2, %v10435_v46  ;;  %v13351_v37 = vshll.u32 %v13314_v4, 16  ;;  %v7078_v62 = vor.u32 %v7076_v52, %v7074_v61 }
 0x8e6   : > { %17117 = vmatmul.msk.bf16.gmra.mxu0 %vm770_vm2, %v11273_v53  ;;  %v9264_v8 = vpop.f32.mrf.mxu2  ;;  %v10438_v53 = vor.u32 %v10436_v16, %v10434_v10  ;;  %v8755_v11 = vsel %vm2653_vm3, %v8750_v59, %v8754_v38  ;;  %v11275_v10 = vsel %vm11154_vm4, %v11272_v26, %v11274_v31  ;;  %v22715_v26 = vld [vmem:[#allocation3_spill] sm:$0xff]  ;;  %v7088_v52 = vshll.u32 %v21944_v18, 16  ;;  %v22716_v59 = vld [vmem:[#allocation5_spill] sm:$0xff] }
 0x8e7   : > { %v13350_v13 = vrot.slane %v13348_v58, 7  ;;  %v12195_v33 = vmax.f32 %v12063_v48, 0.0  ;;  %v9444_v24 = vadd.f32 %v9264_v8, %v7772_v3  ;;  %v7083_v61 = vsel %vm2653_vm3, %v7078_v62, %v7082_v36 }
 0x8e8   : > { %v7594_v60 = vpop.f32.mrf.mxu1  ;;  %v21915_v27 = vpop.f32.mrf.mxu3  ;;  %v10443_v30 = vsel %vm2653_vm3, %v10438_v53, %v10442_v32 }
 0x8e9   : > { %v13353_v45 = vor.u32 %v13351_v37, %v13350_v13  ;;  %v12327_v29 = vmin.f32 %v12195_v33, 6.0  ;;  %v11116_v34 = vadd.f32 %v21827_v54, %v9444_v24  ;;  %v7773_v35 = vadd.f32 %v7594_v60, %v22714_v17  ;;  %v21955_v33 = vld [vmem:[%s17763_s25 + $0x43c] sm:$0xff] }
 0x8ea   : > { %v7084_v60 = vshrl.u32 %v21900_v7, 16 }
 0x8eb   : > { %v11750_v5 = vpop.f32.mrf.mxu0  ;;  %v13354_v42 = vsel %vm20223_vm15, %v13346_v1, %v13353_v45  ;;  %v13363_v2 = vpack.c.bf16 %v12327_v29, %v12327_v29  ;;  %v11928_v43 = vadd.f32 %v11748_v6, %v11116_v34  ;;  %v10444_v34 = vshrl.u32 %v21909_v15, 16 }
 0x8ec   : > { %13362 = vst.msk [vmem:[%s19450_s15 + $0x17c] sm:$0xf] %vm12364_vm5, %v13354_v42  ;;  %v7086_v7 = vor.u32 %v7084_v60, %v7082_v36  ;;  %v7090_v42 = vrot.slane %v7088_v52, 1 }
 0x8ed   : > { %13367 = vst.msk [vmem:[%s19450_s15 + $0x180] sm:$0xf] %vm12364_vm5, %v13363_v2  ;;  %v12064_v54 = vadd.f32 %v21628_v28, %v11928_v43  ;;  %v8758_v2 = vor.u32 %v8756_v22, %v8754_v38 }
 0x8ee   : > { %v9266_v21 = vpop.f32.mrf.mxu2  ;;  %v7091_v36 = vsel %vm2653_vm3, %v7086_v7, %v7090_v42 }
 0x8ef   : > { %v12196_v14 = vmax.f32 %v12064_v54, 0.0  ;;  %v9445_v44 = vadd.f32 %v9266_v21, %v7773_v35  ;;  %v10446_v35 = vor.u32 %v10444_v34, %v10442_v32 }
 0x8f0   : > { %v7597_v25 = vpop.f32.mrf.mxu1  ;;  %v21931_v6 = vpop.f32.mrf.mxu3 }
 0x8f1   : > { %v12328_v46 = vmin.f32 %v12196_v14, 6.0  ;;  %v11117_v56 = vadd.f32 %v21842_v40, %v9445_v44  ;;  %v21947_v40 = vld [vmem:[%s17763_s25 + $0x1f8] sm:$0xff]  ;;  %v7774_v3 = vadd.f32 %v7597_v25, %v22715_v26  ;;  %v7092_v26 = vshrl.u32 %v21944_v18, 16 }
 0x8f2   : > { %v8760_v63 = vshll.u32 %v21947_v40, 16  ;;  %v11276_v17 = vrot.slane %v21947_v40, 1 }
 0x8f3   : > { %v11753_v4 = vpop.f32.mrf.mxu0  ;;  %v13364_v58 = vpack.c.bf16 %v12328_v46, %v12328_v46  ;;  %v11929_v48 = vadd.f32 %v11750_v5, %v11117_v56  ;;  %16260 = vmatmul.msk.bf16.gmra.mxu1 %vm770_vm2, %v7083_v61  ;;  %16587 = vmatmul.msk.bf16.gmra.mxu2 %vm770_vm2, %v8755_v11  ;;  %v10448_v5 = vshll.u32 %v21955_v33, 16  ;;  %v7094_v34 = vor.u32 %v7092_v26, %v7090_v42 }
 0x8f4   : > { %v8762_v43 = vrot.slane %v8760_v63, 1  ;;  %v11277_v32 = vsel %vm11154_vm4, %v11274_v31, %v11276_v17  ;;  %v22717_v31 = vld [vmem:[#allocation8_spill] sm:$0xff] }
 0x8f5   : > { %13368 = vst.msk [vmem:[%s19450_s15 + $0x184] sm:$0xf] %vm12364_vm5, %v13364_v58  ;;  %v12065_v12 = vadd.f32 %v21628_v28, %v11929_v48  ;;  %17053 = vmatmul.msk.bf16.gmra.mxu3 %vm770_vm2, %v10443_v30  ;;  %v10450_v21 = vrot.slane %v10448_v5, 1 }
 0x8f6   : > { %17118 = vmatmul.msk.bf16.gmra.mxu0 %vm770_vm2, %v11275_v10  ;;  %v9269_v8 = vpop.f32.mrf.mxu2  ;;  %v8763_v38 = vsel %vm2653_vm3, %v8758_v2, %v8762_v43  ;;  %v21986_v10 = vld [vmem:[%s17763_s25 + $0x658] sm:$0xff] }
 0x8f7   : > { %v12197_v13 = vmax.f32 %v12065_v12, 0.0  ;;  %v9446_v37 = vadd.f32 %v9269_v8, %v7774_v3  ;;  %v10451_v46 = vsel %vm2653_vm3, %v10446_v35, %v10450_v21  ;;  %v21998_v3 = vld [vmem:[%s17763_s25 + $0x444] sm:$0xff] }
 0x8f8   : > { %v7599_v24 = vpop.f32.mrf.mxu1  ;;  %v21961_v39 = vpop.f32.mrf.mxu3 }
 0x8f9   : > { %v12329_v1 = vmin.f32 %v12197_v13, 6.0  ;;  %v11118_v45 = vadd.f32 %v21869_v49, %v9446_v37  ;;  %v7775_v54 = vadd.f32 %v7599_v24, %v22716_v59  ;;  %v7096_v13 = vshll.u32 %v21986_v10, 16 }
 0x8fa   : > { %v8764_v37 = vshrl.u32 %v21947_v40, 16 }
 0x8fb   : > { %v11755_v29 = vpop.f32.mrf.mxu0  ;;  %v13365_v16 = vpack.c.bf16 %v12329_v1, %v12329_v1  ;;  %v11930_v19 = vadd.f32 %v11753_v4, %v11118_v45  ;;  %v10452_v1 = vshrl.u32 %v21955_v33, 16  ;;  %v10456_v45 = vshll.u32 %v21998_v3, 16 }
 0x8fc   : > { %v7098_v5 = vrot.slane %v7096_v13, 1 }
 0x8fd   : > { %13369 = vst.msk [vmem:[%s19450_s15 + $0x188] sm:$0xf] %vm12364_vm5, %v13365_v16  ;;  %v12066_v62 = vadd.f32 %v21628_v28, %v11930_v19  ;;  %v8766_v16 = vor.u32 %v8764_v37, %v8762_v43  ;;  %v10454_v35 = vor.u32 %v10452_v1, %v10450_v21 }
 0x8fe   : > { %v9271_v49 = vpop.f32.mrf.mxu2  ;;  %v7099_v43 = vsel %vm2653_vm3, %v7094_v34, %v7098_v5 }
 0x8ff   : > { %v12198_v15 = vmax.f32 %v12066_v62, 0.0  ;;  %v9447_v53 = vadd.f32 %v9271_v49, %v7775_v54  ;;  %v22718_v54 = vld [vmem:[#allocation11_spill] sm:$0xff] }
 0x900   : > { %v7602_v14 = vpop.f32.mrf.mxu1  ;;  %v21973_v44 = vpop.f32.mrf.mxu3 }
 0x901   : > { %v12330_v25 = vmin.f32 %v12198_v15, 6.0  ;;  %v11119_v61 = vadd.f32 %v21888_v41, %v9447_v53  ;;  %v21989_v41 = vld [vmem:[%s17763_s25 + $0x200] sm:$0xff]  ;;  %v7776_v30 = vadd.f32 %v7602_v14, %v22717_v31  ;;  %v10458_v15 = vrot.slane %v10456_v45, 1  ;;  %v22029_v31 = vld [vmem:[%s17763_s25 + $0x208] sm:$0xff] }
 0x902   : > { %v8768_v24 = vshll.u32 %v21989_v41, 16  ;;  %v11278_v7 = vrot.slane %v21989_v41, 1  ;;  %v8776_v45 = vshll.u32 %v22029_v31, 16 }
 0x903   : > { %v11758_v11 = vpop.f32.mrf.mxu0  ;;  %v13366_v56 = vpack.c.bf16 %v12330_v25, %v12330_v25  ;;  %v11931_v4 = vadd.f32 %v11755_v29, %v11119_v61  ;;  %16261 = vmatmul.msk.bf16.gmra.mxu1 %vm770_vm2, %v7091_v36  ;;  %16588 = vmatmul.msk.bf16.gmra.mxu2 %vm770_vm2, %v8763_v38 }
 0x904   : > { %v8770_v19 = vrot.slane %v8768_v24, 1  ;;  %v11279_v21 = vsel %vm11154_vm4, %v11276_v17, %v11278_v7 }
 0x905   : > { %13370 = vst.msk [vmem:[%s19450_s15 + $0x18c] sm:$0xf] %vm12364_vm5, %v13366_v56  ;;  %v12067_v20 = vadd.f32 %v21628_v28, %v11931_v4  ;;  %17054 = vmatmul.msk.bf16.gmra.mxu3 %vm770_vm2, %v10451_v46  ;;  %v10459_v56 = vsel %vm2653_vm3, %v10454_v35, %v10458_v15 }
 0x906   : > { %17119 = vmatmul.msk.bf16.gmra.mxu0 %vm770_vm2, %v11277_v32  ;;  %v9274_v58 = vpop.f32.mrf.mxu2  ;;  %v8771_v38 = vsel %vm2653_vm3, %v8766_v16, %v8770_v19 }
 0x907   : > { %v12199_v48 = vmax.f32 %v12067_v20, 0.0  ;;  %v9448_v12 = vadd.f32 %v9274_v58, %v7776_v30  ;;  %v22719_v58 = vld [vmem:[#allocation14_spill] sm:$0xff] }
 0x908   : > { %v7604_v8 = vpop.f32.mrf.mxu1  ;;  %v22003_v60 = vpop.f32.mrf.mxu3 }
 0x909   : > { %v12331_v52 = vmin.f32 %v12199_v48, 6.0  ;;  %v11120_v22 = vadd.f32 %v21915_v27, %v9448_v12  ;;  %v7777_v49 = vadd.f32 %v7604_v8, %v22718_v54  ;;  %v7100_v8 = vshrl.u32 %v21986_v10, 16 }
 0x90b   : > { %v11760_v63 = vpop.f32.mrf.mxu0  ;;  %v13371_v18 = vpack.c.bf16 %v12331_v52, %v12331_v52  ;;  %v11932_v29 = vadd.f32 %v11758_v11, %v11120_v22  ;;  %v22036_v22 = vld [vmem:[%s17763_s25 + $0x44c] sm:$0xff] }
 0x90d   : > { %v13377_v2 = vshrl.u32 %v13371_v18, 16  ;;  %v13380_v62 = vshll.u32 %v13371_v18, 16  ;;  %v12068_v59 = vadd.f32 %v21628_v28, %v11932_v29 }
 0x90e   : > { %v9276_v27 = vpop.f32.mrf.mxu2 }
 0x90f   : > { %v13379_v33 = vrot.slane %v13377_v2, 4  ;;  %v13382_v53 = vrot.slane %v13380_v62, 5  ;;  %v12200_v14 = vmax.f32 %v12068_v59, 0.0  ;;  %v9449_v36 = vadd.f32 %v9276_v27, %v7777_v49 }
 0x910   : > { %v7607_v42 = vpop.f32.mrf.mxu1  ;;  %v22013_v25 = vpop.f32.mrf.mxu3  ;;  %v10460_v62 = vshrl.u32 %v21998_v3, 16  ;;  %v10464_v59 = vshll.u32 %v22036_v22, 16  ;;  %v7102_v27 = vor.u32 %v7100_v8, %v7098_v5 }
 0x911   : > { %v12332_v61 = vmin.f32 %v12200_v14, 6.0  ;;  %v11121_v11 = vadd.f32 %v21931_v6, %v9449_v36  ;;  %v13383_v46 = vor.u32 %v13382_v53, %v13379_v33  ;;  %v22026_v6 = vld [vmem:[%s17763_s25 + $0x660] sm:$0xff]  ;;  %v7778_v48 = vadd.f32 %v7607_v42, %v22719_v58 }
 0x912   : > { %v7104_v1 = vshll.u32 %v22026_v6, 16  ;;  %v22052_v53 = vrot.slane %v8776_v45, 1  ;;  %v11280_v14 = vrot.slane %v22029_v31, 1  ;;  %v22058_v42 = vld [vmem:[%s22332_s2] ss:$0 sm:$0xff] }
 0x913   : > { %v11763_v32 = vpop.f32.mrf.mxu0  ;;  %v13372_v4 = vpack.c.bf16 %v12332_v61, %v12332_v61  ;;  %v11933_v20 = vadd.f32 %v11760_v63, %v11121_v11  ;;  %16262 = vmatmul.msk.bf16.gmra.mxu1 %vm770_vm2, %v7099_v43  ;;  %16589 = vmatmul.msk.bf16.gmra.mxu2 %vm770_vm2, %v8771_v38  ;;  %v13384_v12 = vrot.slane %v13383_v46, 4  ;;  %v22720_v43 = vld [vmem:[#allocation17_spill] sm:$0xff]  ;;  %v10462_v11 = vor.u32 %v10460_v62, %v10458_v15 }
 0x914   : > { %v22050_v35 = vrot.slane %v7104_v1, 1  ;;  %v22721_v1 = vld [vmem:[#allocation20_spill] sm:$0xff] }
 0x915   : > { %v13386_v30 = vshll.u32 %v13372_v4, 16  ;;  %v13390_v40 = vshrl.u32 %v13372_v4, 16  ;;  %v12069_v17 = vadd.f32 %v21628_v28, %v11933_v20  ;;  %17055 = vmatmul.msk.bf16.gmra.mxu3 %vm770_vm2, %v10459_v56  ;;  %v8772_v28 = vshrl.u32 %v21989_v41, 16  ;;  %v16726_v41 = vld [vmem:[%s17763_s25 + $0x454] sm:$0x1] }
 0x916   : > { %17120 = vmatmul.msk.bf16.gmra.mxu0 %vm770_vm2, %v11279_v21  ;;  %v9279_v26 = vpop.f32.mrf.mxu2  ;;  %v7107_v20 = vsel %vm2653_vm3, %v7102_v27, %v22050_v35  ;;  %v8780_v27 = vshrl.u32 %v22029_v31, 16 }
 0x917   : > { %v13388_v13 = vrot.slane %v13386_v30, 5  ;;  %v13392_v37 = vrot.slane %v13390_v40, 4  ;;  %v12201_v24 = vmax.f32 %v12069_v17, 0.0  ;;  %v9450_v52 = vadd.f32 %v9279_v26, %v7778_v48 }
 0x918   : > { %v7609_v63 = vpop.f32.mrf.mxu1  ;;  %v22041_v18 = vpop.f32.mrf.mxu3  ;;  %v8774_v33 = vor.u32 %v8772_v28, %v8770_v19  ;;  %v22062_v19 = vrot.slane %v10464_v59, 1 }
 0x919   : > { %v13389_v29 = vsel %vm19569_vm8, %v13384_v12, %v13388_v13  ;;  %v12333_v10 = vmin.f32 %v12201_v24, 6.0  ;;  %v11122_v34 = vadd.f32 %v21961_v39, %v9450_v52  ;;  %v13393_v2 = vor.u32 %v13392_v37, %v13388_v13  ;;  %v22089_v24 = vld [vmem:[%s17763_s25 + $0x210] sm:$0xff] }
 0x91a   : > { %13424 = vst.msk [vmem:[%s19450_s15 + $0x190] sm:$0xf] %vm12364_vm5, %v13389_v29  ;;  %v7779_v38 = vadd.f32 %v7609_v63, %v22720_v43  ;;  %v8779_v30 = vsel %vm2653_vm3, %v8774_v33, %v22052_v53  ;;  %v11281_v12 = vsel %vm11154_vm4, %v11278_v7, %v11280_v14  ;;  %v10467_v8 = vsel %vm2653_vm3, %v10462_v11, %v22062_v19 }
 0x91b   : > { %v11765_v16 = vpop.f32.mrf.mxu0  ;;  %v13373_v54 = vpack.c.bf16 %v12333_v10, %v12333_v10  ;;  %v11934_v49 = vadd.f32 %v11763_v32, %v11122_v34  ;;  %v13394_v61 = vrot.slane %v13393_v2, 4  ;;  %v7108_v10 = vshrl.u32 %v22026_v6, 16 }
 0x91c   : > { %v9876_v34 = vunpack.c.l.b16 %v16726_v41  ;;  %v8784_v33 = vshll.u32 %v22089_v24, 16 }
 0x91d   : > { %v13396_v36 = vshll.u32 %v13373_v54, 16  ;;  %v13400_v39 = vshrl.u32 %v13373_v54, 16  ;;  %v12070_v3 = vadd.f32 %v22058_v42, %v11934_v49 }
 0x91e   : > { %v9281_v5 = vpop.f32.mrf.mxu2 }
 0x91f   : > { %v13398_v32 = vrot.slane %v13396_v36, 5  ;;  %v13402_v21 = vrot.slane %v13400_v39, 4  ;;  %v12202_v46 = vmax.f32 %v12070_v3, 0.0  ;;  %v9451_v56 = vadd.f32 %v9281_v5, %v7779_v38 }
 0x920   : > { %v7612_v4 = vpop.f32.mrf.mxu1  ;;  %v22068_v40 = vpop.f32.mrf.mxu3  ;;  %v9943_v39 = vpack.c.b16 %v9876_v34, %v9876_v34 }
 0x921   : > { %v13399_v15 = vsel %vm19569_vm8, %v13394_v61, %v13398_v32  ;;  %v12334_v17 = vmin.f32 %v12202_v46, 6.0  ;;  %v11123_v58 = vadd.f32 %v21973_v44, %v9451_v56  ;;  %v13403_v26 = vor.u32 %v13402_v21, %v13398_v32  ;;  %v22086_v44 = vld [vmem:[%s17763_s25 + $0x668] sm:$0xff] }
 0x922   : > { %13425 = vst.msk [vmem:[%s19450_s15 + $0x194] sm:$0xf] %vm12364_vm5, %v13399_v15  ;;  %v7780_v28 = vadd.f32 %v7612_v4, %v22721_v1  ;;  %v7112_v49 = vshll.u32 %v22086_v44, 16  ;;  %v10468_v61 = vshrl.u32 %v22036_v22, 16  ;;  %v10472_v5 = vshll.u32 %v9943_v39, 16 }
 0x923   : > { %v11768_v48 = vpop.f32.mrf.mxu0  ;;  %v13374_v13 = vpack.c.bf16 %v12334_v17, %v12334_v17  ;;  %v11935_v37 = vadd.f32 %v11765_v16, %v11123_v58  ;;  %16263 = vmatmul.msk.bf16.gmra.mxu1 %vm770_vm2, %v7107_v20  ;;  %16590 = vmatmul.msk.bf16.gmra.mxu2 %vm770_vm2, %v8779_v30  ;;  %v13404_v45 = vrot.slane %v13403_v26, 4  ;;  %v7110_v46 = vor.u32 %v7108_v10, %v22050_v35  ;;  %v22722_v17 = vld [vmem:[#allocation23_spill] sm:$0xff] }
 0x924   : > { %v7114_v56 = vrot.slane %v7112_v49, 1  ;;  %v8782_v4 = vor.u32 %v8780_v27, %v22052_v53  ;;  %v8786_v20 = vrot.slane %v8784_v33, 1  ;;  %v11282_v58 = vrot.slane %v22089_v24, 1 }
 0x925   : > { %v13406_v7 = vshll.u32 %v13374_v13, 16  ;;  %v13410_v52 = vshrl.u32 %v13374_v13, 16  ;;  %v12071_v63 = vadd.f32 %v22058_v42, %v11935_v37  ;;  %17056 = vmatmul.msk.bf16.gmra.mxu3 %vm770_vm2, %v10467_v8  ;;  %v10470_v22 = vor.u32 %v10468_v61, %v22062_v19 }
 0x926   : > { %17121 = vmatmul.msk.bf16.gmra.mxu0 %vm770_vm2, %v11281_v12  ;;  %v9284_v29 = vpop.f32.mrf.mxu2  ;;  %v10474_v26 = vrot.slane %v10472_v5, 1  ;;  %v7115_v53 = vsel %vm2653_vm3, %v7110_v46, %v7114_v56  ;;  %v8787_v41 = vsel %vm2653_vm3, %v8782_v4, %v8786_v20  ;;  %v7116_v27 = vshrl.u32 %v22086_v44, 16 }
 0x927   : > { %v13408_v16 = vrot.slane %v13406_v7, 5  ;;  %v13412_v2 = vrot.slane %v13410_v52, 4  ;;  %v12203_v62 = vmax.f32 %v12071_v63, 0.0  ;;  %v9452_v59 = vadd.f32 %v9284_v29, %v7780_v28 }
 0x928   : > { %v7614_v54 = vpop.f32.mrf.mxu1  ;;  %v22099_v36 = vpop.f32.mrf.mxu3  ;;  %v11283_v28 = vsel %vm11154_vm4, %v11280_v14, %v11282_v58  ;;  %v7120_v39 = vshll.u32 %v22132_v9, 16  ;;  %v7118_v44 = vor.u32 %v7116_v27, %v7114_v56 }
 0x929   : > { %v13409_v3 = vsel %vm19569_vm8, %v13404_v45, %v13408_v16  ;;  %v12335_v6 = vmin.f32 %v12203_v62, 6.0  ;;  %v11124_v43 = vadd.f32 %v22003_v60, %v9452_v59  ;;  %v13413_v11 = vor.u32 %v13412_v2, %v13408_v16  ;;  %v22723_v16 = vld [vmem:[#allocation26_spill] sm:$0xff] }
 0x92a   : > { %13426 = vst.msk [vmem:[%s19450_s15 + $0x198] sm:$0xf] %vm12364_vm5, %v13409_v3  ;;  %v7781_v60 = vadd.f32 %v7614_v54, %v22722_v17  ;;  %v10475_v45 = vsel %vm2653_vm3, %v10470_v22, %v10474_v26  ;;  %v8788_v3 = vshrl.u32 %v22089_v24, 16  ;;  %v22724_v22 = vld [vmem:[#allocation29_spill] sm:$0xff] }
 0x92b   : > { %v11770_v38 = vpop.f32.mrf.mxu0  ;;  %v13375_v32 = vpack.c.bf16 %v12335_v6, %v12335_v6  ;;  %v11936_v21 = vadd.f32 %v11768_v48, %v11124_v43  ;;  %v13414_v8 = vrot.slane %v13413_v11, 4 }
 0x92c   : > { %v8790_v46 = vor.u32 %v8788_v3, %v8786_v20 }
 0x92d   : > { %v13416_v30 = vshll.u32 %v13375_v32, 16  ;;  %v12072_v15 = vadd.f32 %v22058_v42, %v11936_v21  ;;  %v17137_v31 = vrot.slane %v13375_v32, 9  ;;  %v7122_v21 = vrot.slane %v7120_v39, 1 }
 0x92e   : > { %v9286_v12 = vpop.f32.mrf.mxu2 }
 0x92f   : > { %v13418_v48 = vrot.slane %v13416_v30, 5  ;;  %v12204_v13 = vmax.f32 %v12072_v15, 0.0  ;;  %v9453_v35 = vadd.f32 %v9286_v12, %v7781_v60  ;;  %v15935_v15 = vld [vmem:[%s17763_s25 + $0x678] sm:$0x1] }
 0x930   : > { %v7617_v37 = vpop.f32.mrf.mxu1  ;;  %v22115_v7 = vpop.f32.mrf.mxu3 }
 0x931   : > { %v13419_v52 = vsel %vm19569_vm8, %v13414_v8, %v13418_v48  ;;  %v12336_v63 = vmin.f32 %v12204_v13, 6.0  ;;  %v11125_v19 = vadd.f32 %v22013_v25, %v9453_v35  ;;  %v22135_v25 = vld [vmem:[%s17763_s25 + $0x218] sm:$0xff]  ;;  %v7782_v2 = vadd.f32 %v7617_v37, %v22723_v16  ;;  %v7936_v8 = vld [vmem:[%s17763_s25 + $0x220] sm:$0x1]  ;;  %v22725_v16 = vld [vmem:[#allocation32_spill] sm:$0xff] }
 0x932   : > { %13427 = vst.msk [vmem:[%s19450_s15 + $0x19c] sm:$0xf] %vm12364_vm5, %v13419_v52  ;;  %v8792_v6 = vshll.u32 %v22135_v25, 16  ;;  %v11284_v30 = vrot.slane %v22135_v25, 1  ;;  %v6532_v35 = vunpack.c.l.b16 %v15935_v15  ;;  %v7123_v37 = vsel %vm2653_vm3, %v7118_v44, %v7122_v21 }
 0x933   : > { %v11773_v1 = vpop.f32.mrf.mxu0  ;;  %v13428_v29 = vpack.c.bf16 %v12336_v63, %v12336_v63  ;;  %v11937_v10 = vadd.f32 %v11770_v38, %v11125_v19  ;;  %16264 = vmatmul.msk.bf16.gmra.mxu1 %vm770_vm2, %v7115_v53  ;;  %16591 = vmatmul.msk.bf16.gmra.mxu2 %vm770_vm2, %v8787_v41  ;;  %v8204_v41 = vunpack.c.l.b16 %v7936_v8  ;;  %v22726_v8 = vld [vmem:[#allocation35_spill] sm:$0xff] }
 0x934   : > { %v8794_v4 = vrot.slane %v8792_v6, 1 }
 0x935   : > { %v13439_v34 = vrot.slane %v13428_v29, 5  ;;  %v12073_v14 = vadd.f32 %v22058_v42, %v11937_v10  ;;  %17057 = vmatmul.msk.bf16.gmra.mxu3 %vm770_vm2, %v10475_v45  ;;  %v6599_v10 = vpack.c.b16 %v6532_v35, %v6532_v35 }
 0x936   : > { %17122 = vmatmul.msk.bf16.gmra.mxu0 %vm770_vm2, %v11283_v28  ;;  %v9289_v62 = vpop.f32.mrf.mxu2  ;;  %v8795_v53 = vsel %vm2653_vm3, %v8790_v46, %v8794_v4  ;;  %v11285_v28 = vsel %vm11154_vm4, %v11282_v58, %v11284_v30  ;;  %v7124_v58 = vshrl.u32 %v22132_v9, 16 }
 0x937   : > { %v13440_v59 = vsel %vm19674_vm11, %v17137_v31, %v13439_v34  ;;  %v12205_v54 = vmax.f32 %v12073_v14, 0.0  ;;  %v9454_v49 = vadd.f32 %v9289_v62, %v7782_v2  ;;  %v13441_v17 = vrot.slane %v13439_v34, 4 }
 0x938   : > { %13454 = vst.msk [vmem:[%s19450_s15 + $0x1a0] sm:$0xf] %vm12364_vm5, %v13440_v59  ;;  %v7619_v33 = vpop.f32.mrf.mxu1  ;;  %v22148_v43 = vpop.f32.mrf.mxu3  ;;  %v8271_v31 = vpack.c.b16 %v8204_v41, %v8204_v41 }
 0x939   : > { %v12337_v38 = vmin.f32 %v12205_v54, 6.0  ;;  %v11126_v61 = vadd.f32 %v22041_v18, %v9454_v49  ;;  %v7783_v26 = vadd.f32 %v7619_v33, %v22724_v22  ;;  %v7128_v49 = vshll.u32 %v6599_v10, 16 }
 0x93a   : > { %v8796_v33 = vshrl.u32 %v22135_v25, 16  ;;  %v8800_v39 = vshll.u32 %v8271_v31, 16 }
 0x93b   : > { %v11775_v5 = vpop.f32.mrf.mxu0  ;;  %v13429_v11 = vpack.c.bf16 %v12337_v38, %v12337_v38  ;;  %v11938_v32 = vadd.f32 %v11773_v1, %v11126_v61 }
 0x93c   : > { %v8798_v46 = vor.u32 %v8796_v33, %v8794_v4  ;;  %v8802_v15 = vrot.slane %v8800_v39, 1 }
 0x93d   : > { %v13442_v60 = vrot.slane %v13429_v11, 5  ;;  %v12074_v12 = vadd.f32 %v22058_v42, %v11938_v32  ;;  %v7126_v11 = vor.u32 %v7124_v58, %v7122_v21  ;;  %v7130_v32 = vrot.slane %v7128_v49, 1 }
 0x93e   : > { %v9291_v48 = vpop.f32.mrf.mxu2  ;;  %v8803_v35 = vsel %vm2653_vm3, %v8798_v46, %v8802_v15 }
 0x93f   : > { %v13443_v18 = vsel %vm19674_vm11, %v13441_v17, %v13442_v60  ;;  %v12206_v13 = vmax.f32 %v12074_v12, 0.0  ;;  %v9455_v56 = vadd.f32 %v9291_v48, %v7783_v26  ;;  %v13444_v34 = vrot.slane %v13442_v60, 4 }
 0x940   : > { %13455 = vst.msk [vmem:[%s19450_s15 + $0x1a4] sm:$0xf] %vm12364_vm5, %v13443_v18  ;;  %v7622_v20 = vpop.f32.mrf.mxu1  ;;  %v22162_v52 = vpop.f32.mrf.mxu3  ;;  %v11286_v17 = vrot.slane %v8271_v31, 1  ;;  %v7131_v4 = vsel %vm2653_vm3, %v7126_v11, %v7130_v32  ;;  %v22727_v31 = vld [vmem:[#allocation38_spill] sm:$0xff] }
 0x941   : > { %v12338_v63 = vmin.f32 %v12206_v13, 6.0  ;;  %v11127_v19 = vadd.f32 %v22068_v40, %v9455_v56  ;;  %v7784_v2 = vadd.f32 %v7622_v20, %v22725_v16 }
 0x943   : > { %v11778_v1 = vpop.f32.mrf.mxu0  ;;  %v13430_v45 = vpack.c.bf16 %v12338_v63, %v12338_v63  ;;  %v11939_v29 = vadd.f32 %v11775_v5, %v11127_v19  ;;  %16265 = vmatmul.msk.bf16.gmra.mxu1 %vm770_vm2, %v7123_v37  ;;  %16592 = vmatmul.msk.bf16.gmra.mxu2 %vm770_vm2, %v8795_v53  ;;  %v11287_v63 = vsel %vm11154_vm4, %v11284_v30, %v11286_v17 }
 0x945   : > { %v13445_v40 = vrot.slane %v13430_v45, 5  ;;  %v12075_v14 = vadd.f32 %v22058_v42, %v11939_v29 }
 0x946   : > { %17123 = vmatmul.msk.bf16.gmra.mxu0 %vm770_vm2, %v11285_v28  ;;  %v9294_v24 = vpop.f32.mrf.mxu2 }
 0x947   : > { %v13446_v62 = vsel %vm19674_vm11, %v13444_v34, %v13445_v40  ;;  %v12207_v59 = vmax.f32 %v12075_v14, 0.0  ;;  %v9456_v54 = vadd.f32 %v9294_v24, %v7784_v2  ;;  %v13447_v44 = vrot.slane %v13445_v40, 4 }
 0x948   : > { %13456 = vst.msk [vmem:[%s19450_s15 + $0x1a8] sm:$0xf] %vm12364_vm5, %v13446_v62  ;;  %v7624_v27 = vpop.f32.mrf.mxu1  ;;  %v22182_v61 = vpop.f32.mrf.mxu3 }
 0x949   : > { %v12339_v3 = vmin.f32 %v12207_v59, 6.0  ;;  %v11128_v6 = vadd.f32 %v22099_v36, %v9456_v54  ;;  %v7785_v48 = vadd.f32 %v7624_v27, %v22726_v8 }
 0x94b   : > { %v11780_v38 = vpop.f32.mrf.mxu0  ;;  %v13431_v5 = vpack.c.bf16 %v12339_v3, %v12339_v3  ;;  %v11940_v9 = vadd.f32 %v11778_v1, %v11128_v6  ;;  %v22728_v3 = vld [vmem:[#allocation41_spill] sm:$0xff] }
 0x94d   : > { %v13448_v60 = vrot.slane %v13431_v5, 5  ;;  %v13463_v12 = vshrl.u32 %v13431_v5, 16  ;;  %v13466_v22 = vshll.u32 %v13431_v5, 16  ;;  %v12076_v26 = vadd.f32 %v22058_v42, %v11940_v9 }
 0x94e   : > { %v9296_v36 = vpop.f32.mrf.mxu2 }
 0x94f   : > { %v13449_v18 = vsel %vm19674_vm11, %v13447_v44, %v13448_v60  ;;  %v12208_v13 = vmax.f32 %v12076_v26, 0.0  ;;  %v9457_v21 = vadd.f32 %v9296_v36, %v7785_v48  ;;  %v13465_v20 = vrot.slane %v13463_v12, 5 }
 0x950   : > { %13457 = vst.msk [vmem:[%s19450_s15 + $0x1ac] sm:$0xf] %vm12364_vm5, %v13449_v18  ;;  %v7627_v56 = vpop.f32.mrf.mxu1  ;;  %v13468_v37 = vrot.slane %v13466_v22, 6  ;;  %v22199_v28 = vpop.f32.mrf.mxu3 }
 0x951   : > { %v12340_v53 = vmin.f32 %v12208_v13, 6.0  ;;  %v11129_v50 = vadd.f32 %v22115_v7, %v9457_v21  ;;  %v7786_v25 = vadd.f32 %v7627_v56, %v22727_v31  ;;  %v22729_v56 = vld [vmem:[#allocation44_spill] sm:$0xff] }
 0x952   : > { %v13469_v45 = vor.u32 %v13468_v37, %v13465_v20 }
 0x953   : > { %v11783_v41 = vpop.f32.mrf.mxu0  ;;  %v13458_v19 = vpack.c.bf16 %v12340_v53, %v12340_v53  ;;  %16266 = vmatmul.msk.bf16.gmra.mxu1 %vm770_vm2, %v7131_v4  ;;  %16593 = vmatmul.msk.bf16.gmra.mxu2 %vm770_vm2, %v8803_v35  ;;  %v11941_v1 = vadd.f32 %v11780_v38, %v11129_v50 }
 0x954   : > { %v13470_v24 = vrot.slane %v13469_v45, 4 }
 0x955   : > { %v13472_v29 = vshrl.u32 %v13458_v19, 16  ;;  %v13475_v10 = vshll.u32 %v13458_v19, 16  ;;  %v12077_v30 = vadd.f32 %v22058_v42, %v11941_v1 }
 0x956   : > { %17124 = vmatmul.msk.bf16.gmra.mxu0 %vm770_vm2, %v11287_v63  ;;  %v9299_v34 = vpop.f32.mrf.mxu2 }
 0x957   : > { %v13474_v7 = vrot.slane %v13472_v29, 5  ;;  %v13477_v40 = vrot.slane %v13475_v10, 6  ;;  %v9458_v14 = vadd.f32 %v9299_v34, %v7786_v25  ;;  %v12209_v16 = vmax.f32 %v12077_v30, 0.0 }
 0x958   : > { %v7629_v2 = vpop.f32.mrf.mxu1  ;;  %v22210_v11 = vpop.f32.mrf.mxu3 }
 0x959   : > { %v13478_v58 = vor.u32 %v13477_v40, %v13474_v7  ;;  %v11130_v62 = vadd.f32 %v22148_v43, %v9458_v14  ;;  %v12341_v54 = vmin.f32 %v12209_v16, 6.0  ;;  %v7787_v6 = vadd.f32 %v7629_v2, %v22728_v3  ;;  %v22730_v40 = vld [vmem:[#allocation47_spill] sm:$0xff] }
 0x95b   : > { %v11785_v59 = vpop.f32.mrf.mxu0  ;;  %v13479_v49 = vsel %vm19782_vm14, %v13470_v24, %v13478_v58  ;;  %v11942_v27 = vadd.f32 %v11783_v41, %v11130_v62  ;;  %v13459_v33 = vpack.c.bf16 %v12341_v54, %v12341_v54  ;;  %v13480_v22 = vrot.slane %v13478_v58, 4 }
 0x95c   : > { %13514 = vst.msk [vmem:[%s19450_s15 + $0x1b0] sm:$0xf] %vm12364_vm5, %v13479_v49 }
 0x95d   : > { %v12078_v39 = vadd.f32 %v22058_v42, %v11942_v27  ;;  %v13482_v38 = vshrl.u32 %v13459_v33, 16  ;;  %v13485_v5 = vshll.u32 %v13459_v33, 16 }
 0x95e   : > { %v9301_v9 = vpop.f32.mrf.mxu2 }
 0x95f   : > { %v12210_v43 = vmax.f32 %v12078_v39, 0.0  ;;  %v9459_v32 = vadd.f32 %v9301_v9, %v7787_v6  ;;  %v13484_v44 = vrot.slane %v13482_v38, 5  ;;  %v13487_v46 = vrot.slane %v13485_v5, 6 }
 0x960   : > { %v7632_v15 = vpop.f32.mrf.mxu1  ;;  %v10983_v63 = vpop.f32.mrf.mxu3 }
 0x961   : > { %v12342_v17 = vmin.f32 %v12210_v43, 6.0  ;;  %v11131_v60 = vadd.f32 %v22162_v52, %v9459_v32  ;;  %v13488_v26 = vor.u32 %v13487_v46, %v13484_v44  ;;  %v7788_v4 = vadd.f32 %v7632_v15, %v22729_v56  ;;  %v22731_v32 = vld [vmem:[#allocation50_spill] sm:$0xff] }
 0x963   : > { %v11788_v12 = vpop.f32.mrf.mxu0  ;;  %v13460_v8 = vpack.c.bf16 %v12342_v17, %v12342_v17  ;;  %v11943_v48 = vadd.f32 %v11785_v59, %v11131_v60  ;;  %v13489_v36 = vsel %vm19782_vm14, %v13480_v22, %v13488_v26  ;;  %v13490_v50 = vrot.slane %v13488_v26, 4 }
 0x964   : > { %13515 = vst.msk [vmem:[%s19450_s15 + $0x1b4] sm:$0xf] %vm12364_vm5, %v13489_v36 }
 0x965   : > { %v13492_v18 = vshrl.u32 %v13460_v8, 16  ;;  %v13495_v13 = vshll.u32 %v13460_v8, 16  ;;  %v12079_v21 = vadd.f32 %v22058_v42, %v11943_v48 }
 0x966   : > { %v9304_v35 = vpop.f32.mrf.mxu2 }
 0x967   : > { %v13494_v20 = vrot.slane %v13492_v18, 5  ;;  %v13497_v52 = vrot.slane %v13495_v13, 6  ;;  %v12211_v37 = vmax.f32 %v12079_v21, 0.0  ;;  %v9460_v53 = vadd.f32 %v9304_v35, %v7788_v4  ;;  %v22732_v21 = vld [vmem:[#allocation53_spill] sm:$0xff] }
 0x968   : > { %v7634_v41 = vpop.f32.mrf.mxu1  ;;  %v10986_v39 = vpop.f32.mrf.mxu3 }
 0x969   : > { %v13498_v19 = vor.u32 %v13497_v52, %v13494_v20  ;;  %v12343_v1 = vmin.f32 %v12211_v37, 6.0  ;;  %v11132_v45 = vadd.f32 %v22182_v61, %v9460_v53  ;;  %v7789_v14 = vadd.f32 %v7634_v41, %v22730_v40 }
 0x96b   : > { %v11790_v29 = vpop.f32.mrf.mxu0  ;;  %v13499_v10 = vsel %vm19782_vm14, %v13490_v50, %v13498_v19  ;;  %v13461_v31 = vpack.c.bf16 %v12343_v1, %v12343_v1  ;;  %v11944_v25 = vadd.f32 %v11788_v12, %v11132_v45  ;;  %v13500_v59 = vrot.slane %v13498_v19, 4 }
 0x96c   : > { %13516 = vst.msk [vmem:[%s19450_s15 + $0x1b8] sm:$0xf] %vm12364_vm5, %v13499_v10  ;;  %v22733_v10 = vld [vmem:[#allocation56_spill] sm:$0xff] }
 0x96d   : > { %v13502_v30 = vshrl.u32 %v13461_v31, 16  ;;  %v13505_v34 = vshll.u32 %v13461_v31, 16  ;;  %v12080_v7 = vadd.f32 %v22058_v42, %v11944_v25  ;;  %v17138_v5 = vrot.slane %v13461_v31, 10 }
 0x96e   : > { %v9306_v16 = vpop.f32.mrf.mxu2 }
 0x96f   : > { %v13504_v2 = vrot.slane %v13502_v30, 5  ;;  %v13507_v24 = vrot.slane %v13505_v34, 6  ;;  %v12212_v58 = vmax.f32 %v12080_v7, 0.0  ;;  %v9461_v61 = vadd.f32 %v9306_v16, %v7789_v14 }
 0x970   : > { %v7637_v62 = vpop.f32.mrf.mxu1  ;;  %v10988_v48 = vpop.f32.mrf.mxu3 }
 0x971   : > { %v13508_v54 = vor.u32 %v13507_v24, %v13504_v2  ;;  %v12344_v49 = vmin.f32 %v12212_v58, 6.0  ;;  %v11133_v27 = vadd.f32 %v22199_v28, %v9461_v61  ;;  %v7790_v44 = vadd.f32 %v7637_v62, %v22731_v32 }
 0x973   : > { %v11793_v33 = vpop.f32.mrf.mxu0  ;;  %v13509_v3 = vsel %vm19782_vm14, %v13500_v59, %v13508_v54  ;;  %v13518_v6 = vpack.c.bf16 %v12344_v49, %v12344_v49  ;;  %v11945_v38 = vadd.f32 %v11790_v29, %v11133_v27  ;;  %v22734_v27 = vld [vmem:[#allocation59_spill] sm:$0xff] }
 0x974   : > { %13517 = vst.msk [vmem:[%s19450_s15 + $0x1bc] sm:$0xf] %vm12364_vm5, %v13509_v3 }
 0x975   : > { %v13529_v9 = vrot.slane %v13518_v6, 6  ;;  %v12081_v43 = vadd.f32 %v22058_v42, %v11945_v38 }
 0x976   : > { %v9309_v46 = vpop.f32.mrf.mxu2 }
 0x977   : > { %v13530_v15 = vsel %vm19896_vm6, %v17138_v5, %v13529_v9  ;;  %v12213_v28 = vmax.f32 %v12081_v43, 0.0  ;;  %v9462_v17 = vadd.f32 %v9309_v46, %v7790_v44  ;;  %v13531_v36 = vrot.slane %v13529_v9, 4 }
 0x978   : > { %13544 = vst.msk [vmem:[%s19450_s15 + $0x1c0] sm:$0xf] %vm12364_vm5, %v13530_v15  ;;  %v7639_v0 = vpop.f32.mrf.mxu1  ;;  %v10991_v30 = vpop.f32.mrf.mxu3 }
 0x979   : > { %v12345_v60 = vmin.f32 %v12213_v28, 6.0  ;;  %v11134_v12 = vadd.f32 %v22210_v11, %v9462_v17  ;;  %v7791_v56 = vadd.f32 %v7639_v0, %v22732_v21 }
 0x97b   : > { %v11795_v22 = vpop.f32.mrf.mxu0  ;;  %v13519_v26 = vpack.c.bf16 %v12345_v60, %v12345_v60  ;;  %v11946_v8 = vadd.f32 %v11793_v33, %v11134_v12 }
 0x97d   : > { %v13532_v18 = vrot.slane %v13519_v26, 6  ;;  %v12082_v13 = vadd.f32 %v22058_v42, %v11946_v8 }
 0x97e   : > { %v9311_v4 = vpop.f32.mrf.mxu2 }
 0x97f   : > { %v13533_v35 = vsel %vm19896_vm6, %v13531_v36, %v13532_v18  ;;  %v12214_v20 = vmax.f32 %v12082_v13, 0.0  ;;  %v9463_v52 = vadd.f32 %v9311_v4, %v7791_v56  ;;  %v13534_v1 = vrot.slane %v13532_v18, 4 }
 0x980   : > { %13545 = vst.msk [vmem:[%s19450_s15 + $0x1c4] sm:$0xf] %vm12364_vm5, %v13533_v35  ;;  %v7642_v11 = vpop.f32.mrf.mxu1  ;;  %v10993_v9 = vpop.f32.mrf.mxu3 }
 0x981   : > { %v12346_v37 = vmin.f32 %v12214_v20, 6.0  ;;  %v11135_v53 = vadd.f32 %v10983_v63, %v9463_v52  ;;  %v7792_v31 = vadd.f32 %v7642_v11, %v22733_v10 }
 0x983   : > { %v11798_v41 = vpop.f32.mrf.mxu0  ;;  %v13520_v50 = vpack.c.bf16 %v12346_v37, %v12346_v37  ;;  %v11947_v19 = vadd.f32 %v11795_v22, %v11135_v53  ;;  %v22735_v22 = vld [vmem:[#allocation62_spill] sm:$0xff] }
 0x985   : > { %v13535_v45 = vrot.slane %v13520_v50, 6  ;;  %v12083_v29 = vadd.f32 %v22058_v42, %v11947_v19  ;;  %v22736_v19 = vld [vmem:[#allocation65_spill] sm:$0xff] }
 0x986   : > { %v9314_v25 = vpop.f32.mrf.mxu2 }
 0x987   : > { %v13536_v34 = vsel %vm19896_vm6, %v13534_v1, %v13535_v45  ;;  %v12215_v7 = vmax.f32 %v12083_v29, 0.0  ;;  %v9464_v40 = vadd.f32 %v9314_v25, %v7792_v31  ;;  %v13537_v61 = vrot.slane %v13535_v45, 4 }
 0x988   : > { %13546 = vst.msk [vmem:[%s19450_s15 + $0x1c8] sm:$0xf] %vm12364_vm5, %v13536_v34  ;;  %v7644_v63 = vpop.f32.mrf.mxu1  ;;  %v10996_v11 = vpop.f32.mrf.mxu3 }
 0x989   : > { %v12347_v14 = vmin.f32 %v12215_v7, 6.0  ;;  %v11136_v16 = vadd.f32 %v10986_v39, %v9464_v40  ;;  %v7793_v33 = vadd.f32 %v7644_v63, %v22734_v27  ;;  %v22737_v27 = vld [vmem:[#allocation68_spill] sm:$0xff] }
 0x98b   : > { %v11800_v2 = vpop.f32.mrf.mxu0  ;;  %v13521_v24 = vpack.c.bf16 %v12347_v14, %v12347_v14  ;;  %v11948_v58 = vadd.f32 %v11798_v41, %v11136_v16 }
 0x98d   : > { %v13538_v62 = vrot.slane %v13521_v24, 6  ;;  %v13553_v59 = vshrl.u32 %v13521_v24, 16  ;;  %v13556_v54 = vshll.u32 %v13521_v24, 16  ;;  %v12084_v49 = vadd.f32 %v22058_v42, %v11948_v58 }
 0x98e   : > { %v9316_v3 = vpop.f32.mrf.mxu2 }
 0x98f   : > { %v13539_v6 = vsel %vm19896_vm6, %v13537_v61, %v13538_v62  ;;  %v12216_v38 = vmax.f32 %v12084_v49, 0.0  ;;  %v9465_v5 = vadd.f32 %v9316_v3, %v7793_v33  ;;  %v13555_v43 = vrot.slane %v13553_v59, 6 }
 0x990   : > { %13547 = vst.msk [vmem:[%s19450_s15 + $0x1cc] sm:$0xf] %vm12364_vm5, %v13539_v6  ;;  %v7647_v39 = vpop.f32.mrf.mxu1  ;;  %v13558_v32 = vrot.slane %v13556_v54, 7  ;;  %v10998_v62 = vpop.f32.mrf.mxu3 }
 0x991   : > { %v12348_v44 = vmin.f32 %v12216_v38, 6.0  ;;  %v11137_v15 = vadd.f32 %v10988_v48, %v9465_v5  ;;  %v7794_v26 = vadd.f32 %v7647_v39, %v22735_v22 }
 0x992   : > { %v13559_v0 = vor.u32 %v13558_v32, %v13555_v43 }
 0x993   : > { %v11803_v46 = vpop.f32.mrf.mxu0  ;;  %v13548_v28 = vpack.c.bf16 %v12348_v44, %v12348_v44  ;;  %v11949_v17 = vadd.f32 %v11800_v2, %v11137_v15 }
 0x994   : > { %v13560_v4 = vrot.slane %v13559_v0, 4 }
 0x995   : > { %v13562_v60 = vshrl.u32 %v13548_v28, 16  ;;  %v13565_v12 = vshll.u32 %v13548_v28, 16  ;;  %v12085_v51 = vadd.f32 %v22058_v42, %v11949_v17 }
 0x996   : > { %v9319_v8 = vpop.f32.mrf.mxu2 }
 0x997   : > { %v13564_v36 = vrot.slane %v13562_v60, 6  ;;  %v13567_v18 = vrot.slane %v13565_v12, 7  ;;  %v9466_v13 = vadd.f32 %v9319_v8, %v7794_v26  ;;  %v12217_v21 = vmax.f32 %v12085_v51, 0.0  ;;  %v22738_v26 = vld [vmem:[#allocation71_spill] sm:$0xff] }
 0x998   : > { %v7649_v56 = vpop.f32.mrf.mxu1 }
 0x999   : > { %v13568_v35 = vor.u32 %v13567_v18, %v13564_v36  ;;  %v11138_v20 = vadd.f32 %v10991_v30, %v9466_v13  ;;  %v12349_v52 = vmin.f32 %v12217_v21, 6.0  ;;  %v7795_v1 = vadd.f32 %v7649_v56, %v22736_v19  ;;  %v11001_v36 = vpop.f32.mrf.mxu3 }
 0x99b   : > { %v11805_v48 = vpop.f32.mrf.mxu0  ;;  %v13569_v37 = vsel %vm20007_vm9, %v13560_v4, %v13568_v35  ;;  %v11950_v53 = vadd.f32 %v11803_v46, %v11138_v20  ;;  %v13549_v41 = vpack.c.bf16 %v12349_v52, %v12349_v52  ;;  %v13570_v16 = vrot.slane %v13568_v35, 4 }
 0x99c   : > { %13604 = vst.msk [vmem:[%s19450_s15 + $0x1d0] sm:$0xf] %vm12364_vm5, %v13569_v37 }
 0x99d   : > { %v12086_v50 = vadd.f32 %v22058_v42, %v11950_v53  ;;  %v13572_v45 = vshrl.u32 %v13549_v41, 16  ;;  %v13575_v29 = vshll.u32 %v13549_v41, 16 }
 0x99e   : > { %v9321_v10 = vpop.f32.mrf.mxu2 }
 0x99f   : > { %v12218_v31 = vmax.f32 %v12086_v50, 0.0  ;;  %v9467_v25 = vadd.f32 %v9321_v10, %v7795_v1  ;;  %v13574_v30 = vrot.slane %v13572_v45, 6  ;;  %v13577_v34 = vrot.slane %v13575_v29, 7  ;;  %v22739_v45 = vld [vmem:[#allocation74_spill] sm:$0xff] }
 0x9a0   : > { %v7652_v7 = vpop.f32.mrf.mxu1 }
 0x9a1   : > { %v12350_v40 = vmin.f32 %v12218_v31, 6.0  ;;  %v11139_v63 = vadd.f32 %v10993_v9, %v9467_v25  ;;  %v13578_v2 = vor.u32 %v13577_v34, %v13574_v30  ;;  %v7796_v33 = vadd.f32 %v7652_v7, %v22737_v27  ;;  %v11003_v34 = vpop.f32.mrf.mxu3 }
 0x9a3   : > { %v11808_v14 = vpop.f32.mrf.mxu0  ;;  %v13550_v24 = vpack.c.bf16 %v12350_v40, %v12350_v40  ;;  %v11951_v58 = vadd.f32 %v11805_v48, %v11139_v63  ;;  %v13579_v61 = vsel %vm20007_vm9, %v13570_v16, %v13578_v2  ;;  %v13580_v43 = vrot.slane %v13578_v2, 4 }
 0x9a4   : > { %13605 = vst.msk [vmem:[%s19450_s15 + $0x1d4] sm:$0xf] %vm12364_vm5, %v13579_v61  ;;  %v22740_v61 = vld [vmem:[#allocation77_spill] sm:$0xff] }
 0x9a5   : > { %v13582_v59 = vshrl.u32 %v13550_v24, 16  ;;  %v13585_v54 = vshll.u32 %v13550_v24, 16  ;;  %v12087_v49 = vadd.f32 %v22058_v42, %v11951_v58 }
 0x9a6   : > { %v9324_v3 = vpop.f32.mrf.mxu2 }
 0x9a7   : > { %v13584_v6 = vrot.slane %v13582_v59, 6  ;;  %v13587_v38 = vrot.slane %v13585_v54, 7  ;;  %v12219_v5 = vmax.f32 %v12087_v49, 0.0  ;;  %v9468_v39 = vadd.f32 %v9324_v3, %v7796_v33 }
 0x9a8   : > { %v7654_v9 = vpop.f32.mrf.mxu1 }
 0x9a9   : > { %v13588_v32 = vor.u32 %v13587_v38, %v13584_v6  ;;  %v12351_v44 = vmin.f32 %v12219_v5, 6.0  ;;  %v11140_v46 = vadd.f32 %v10996_v11, %v9468_v39  ;;  %v7797_v51 = vadd.f32 %v7654_v9, %v22738_v26  ;;  %v11006_v38 = vpop.f32.mrf.mxu3 }
 0x9ab   : > { %v11810_v15 = vpop.f32.mrf.mxu0  ;;  %v13589_v28 = vsel %vm20007_vm9, %v13580_v43, %v13588_v32  ;;  %v13551_v17 = vpack.c.bf16 %v12351_v44, %v12351_v44  ;;  %v11952_v0 = vadd.f32 %v11808_v14, %v11140_v46  ;;  %v13590_v35 = vrot.slane %v13588_v32, 4 }
 0x9ac   : > { %13606 = vst.msk [vmem:[%s19450_s15 + $0x1d8] sm:$0xf] %vm12364_vm5, %v13589_v28 }
 0x9ad   : > { %v13592_v60 = vshrl.u32 %v13551_v17, 16  ;;  %v13595_v12 = vshll.u32 %v13551_v17, 16  ;;  %v12088_v22 = vadd.f32 %v22058_v42, %v11952_v0  ;;  %v17139_v50 = vrot.slane %v13551_v17, 11 }
 0x9ae   : > { %v9326_v8 = vpop.f32.mrf.mxu2 }
 0x9af   : > { %v13594_v18 = vrot.slane %v13592_v60, 6  ;;  %v13597_v13 = vrot.slane %v13595_v12, 7  ;;  %v12220_v21 = vmax.f32 %v12088_v22, 0.0  ;;  %v9469_v56 = vadd.f32 %v9326_v8, %v7797_v51 }
 0x9b0   : > { %v7657_v4 = vpop.f32.mrf.mxu1 }
 0x9b1   : > { %v13598_v20 = vor.u32 %v13597_v13, %v13594_v18  ;;  %v12352_v48 = vmin.f32 %v12220_v21, 6.0  ;;  %v11141_v52 = vadd.f32 %v10998_v62, %v9469_v56  ;;  %v7798_v29 = vadd.f32 %v7657_v4, %v22739_v45  ;;  %v11008_v8 = vpop.f32.mrf.mxu3  ;;  %v22742_v45 = vld [vmem:[#allocation83_spill] sm:$0xff] }
 0x9b3   : > { %v11813_v11 = vpop.f32.mrf.mxu0  ;;  %v13599_v37 = vsel %vm20007_vm9, %v13590_v35, %v13598_v20  ;;  %v13608_v53 = vpack.c.bf16 %v12352_v48, %v12352_v48  ;;  %v11953_v41 = vadd.f32 %v11810_v15, %v11141_v52 }
 0x9b4   : > { %13607 = vst.msk [vmem:[%s19450_s15 + $0x1dc] sm:$0xf] %vm12364_vm5, %v13599_v37 }
 0x9b5   : > { %v13619_v19 = vrot.slane %v13608_v53, 7  ;;  %v12089_v1 = vadd.f32 %v22058_v42, %v11953_v41 }
 0x9b6   : > { %v9329_v10 = vpop.f32.mrf.mxu2 }
 0x9b7   : > { %v13620_v31 = vsel %vm20116_vm12, %v17139_v50, %v13619_v19  ;;  %v12221_v25 = vmax.f32 %v12089_v1, 0.0  ;;  %v9470_v30 = vadd.f32 %v9329_v10, %v7798_v29  ;;  %v13621_v2 = vrot.slane %v13619_v19, 4 }
 0x9b8   : > { %13634 = vst.msk [vmem:[%s19450_s15 + $0x1e0] sm:$0xf] %vm12364_vm5, %v13620_v31  ;;  %v7659_v57 = vpop.f32.mrf.mxu1 }
 0x9b9   : > { %v12353_v7 = vmin.f32 %v12221_v25, 6.0  ;;  %v11142_v40 = vadd.f32 %v11001_v36, %v9470_v30  ;;  %v7799_v62 = vadd.f32 %v7659_v57, %v22740_v61  ;;  %v11011_v10 = vpop.f32.mrf.mxu3 }
 0x9bb   : > { %v11815_v63 = vpop.f32.mrf.mxu0  ;;  %v13609_v14 = vpack.c.bf16 %v12353_v7, %v12353_v7  ;;  %v11954_v16 = vadd.f32 %v11813_v11, %v11142_v40 }
 0x9bd   : > { %v13622_v24 = vrot.slane %v13609_v14, 7  ;;  %v12090_v58 = vadd.f32 %v22058_v42, %v11954_v16 }
 0x9be   : > { %v9331_v59 = vpop.f32.mrf.mxu2 }
 0x9bf   : > { %v13623_v54 = vsel %vm20116_vm12, %v13621_v2, %v13622_v24  ;;  %v12222_v49 = vmax.f32 %v12090_v58, 0.0  ;;  %v9471_v27 = vadd.f32 %v9331_v59, %v7799_v62  ;;  %v13624_v43 = vrot.slane %v13622_v24, 4  ;;  %v22743_v59 = vld [vmem:[#allocation86_spill] sm:$0xff] }
 0x9c0   : > { %13635 = vst.msk [vmem:[%s19450_s15 + $0x1e4] sm:$0xf] %vm12364_vm5, %v13623_v54  ;;  %v7662_v33 = vpop.f32.mrf.mxu1 }
 0x9c1   : > { %v12354_v3 = vmin.f32 %v12222_v49, 6.0  ;;  %v11143_v6 = vadd.f32 %v11003_v34, %v9471_v27  ;;  %v7800_v46 = vadd.f32 %v7662_v33, %v19364_v47  ;;  %v22741_v47 = vld [vmem:[#allocation80_spill] sm:$0xff] }
 0x9c3   : > { %v13610_v5 = vpack.c.bf16 %v12354_v3, %v12354_v3  ;;  %v11955_v39 = vadd.f32 %v11815_v63, %v11143_v6  ;;  %v11818_v9 = vpop.f32.mrf.mxu0 }
 0x9c5   : > { %v13625_v32 = vrot.slane %v13610_v5, 7  ;;  %v12091_v44 = vadd.f32 %v22058_v42, %v11955_v39 }
 0x9c6   : > { %v9334_v15 = vpop.f32.mrf.mxu2 }
 0x9c7   : > { %v13626_v28 = vsel %vm20116_vm12, %v13624_v43, %v13625_v32  ;;  %v12223_v17 = vmax.f32 %v12091_v44, 0.0  ;;  %v9472_v0 = vadd.f32 %v9334_v15, %v7800_v46  ;;  %v13627_v36 = vrot.slane %v13625_v32, 4 }
 0x9c8   : > { %13636 = vst.msk [vmem:[%s19450_s15 + $0x1e8] sm:$0xf] %vm12364_vm5, %v13626_v28  ;;  %v7664_v60 = vpop.f32.mrf.mxu1  ;;  %v17699_v28 = vld [vmem:[%s22332_s2] ss:$0 sm:$0xff] }
 0x9c9   : > { %v12355_v12 = vmin.f32 %v12223_v17, 6.0  ;;  %v11144_v22 = vadd.f32 %v11006_v38, %v9472_v0  ;;  %v7801_v21 = vadd.f32 %v7664_v60, %v22741_v47  ;;  %v11013_v38 = vpop.f32.mrf.mxu3 }
 0x9cb   : > { %v13611_v26 = vpack.c.bf16 %v12355_v12, %v12355_v12  ;;  %v11956_v51 = vadd.f32 %v11818_v9, %v11144_v22  ;;  %v11820_v56 = vpop.f32.mrf.mxu0 }
 0x9cd   : > { %v13628_v18 = vrot.slane %v13611_v26, 7  ;;  %v12092_v13 = vadd.f32 %v22058_v42, %v11956_v51  ;;  %v13643_v50 = vshrl.u32 %v13611_v26, 16 }
 0x9ce   : > { %v9336_v4 = vpop.f32.mrf.mxu2 }
 0x9cf   : > { %v13629_v35 = vsel %vm20116_vm12, %v13627_v36, %v13628_v18  ;;  %v12224_v20 = vmax.f32 %v12092_v13, 0.0  ;;  %v9473_v48 = vadd.f32 %v9336_v4, %v7801_v21  ;;  %v17140_v7 = vrot.slane %v13643_v50, 11 }
 0x9d0   : > { %13637 = vst.msk [vmem:[%s19450_s15 + $0x1ec] sm:$0xf] %vm12364_vm5, %v13629_v35  ;;  %v7667_v52 = vpop.f32.mrf.mxu1 }
 0x9d1   : > { %v12356_v11 = vmin.f32 %v12224_v20, 6.0  ;;  %v11145_v37 = vadd.f32 %v11008_v8, %v9473_v48  ;;  %v7802_v29 = vadd.f32 %v7667_v52, %v22742_v45 }
 0x9d3   : > { %v13638_v53 = vpack.c.bf16 %v12356_v11, %v12356_v11  ;;  %v11957_v41 = vadd.f32 %v11820_v56, %v11145_v37  ;;  %v11823_v34 = vpop.f32.mrf.mxu0 }
 0x9d5   : > { %v13648_v19 = vshrl.u32 %v13638_v53, 16  ;;  %v12093_v1 = vadd.f32 %v22058_v42, %v11957_v41  ;;  %v13651_v25 = vshll.u32 %v13638_v53, 16 }
 0x9d6   : > { %v9339_v31 = vpop.f32.mrf.mxu2 }
 0x9d7   : > { %v13650_v23 = vrot.slane %v13648_v19, 7  ;;  %v12225_v30 = vmax.f32 %v12093_v1, 0.0  ;;  %v9474_v57 = vadd.f32 %v9339_v31, %v7802_v29 }
 0x9d8   : > { %v7669_v16 = vpop.f32.mrf.mxu1 }
 0x9d9   : > { %v13653_v40 = vor.u32 %v13651_v25, %v13650_v23  ;;  %v12357_v63 = vmin.f32 %v12225_v30, 6.0  ;;  %v11146_v14 = vadd.f32 %v11011_v10, %v9474_v57  ;;  %v7803_v54 = vadd.f32 %v7669_v16, %v22743_v59 }
 0x9da   : > { %v13655_v5 = vrot.slane %v13650_v23, 4 }
 0x9db   : > { %v13654_v2 = vsel %vm20223_vm15, %v17140_v7, %v13653_v40  ;;  %v13639_v24 = vpack.c.bf16 %v12357_v63, %v12357_v63  ;;  %v11958_v58 = vadd.f32 %v11823_v34, %v11146_v14  ;;  %v11825_v32 = vpop.f32.mrf.mxu0 }
 0x9dc   : > { %13686 = vst.msk [vmem:[%s19450_s15 + $0x1f0] sm:$0xf] %vm12364_vm5, %v13654_v2 }
 0x9dd   : > { %v13657_v61 = vshrl.u32 %v13639_v24, 16  ;;  %v12094_v62 = vadd.f32 %v22058_v42, %v11958_v58  ;;  %v13660_v33 = vshll.u32 %v13639_v24, 16 }
 0x9de   : > { %v9341_v49 = vpop.f32.mrf.mxu2 }
 0x9df   : > { %v13659_v27 = vrot.slane %v13657_v61, 7  ;;  %v12226_v3 = vmax.f32 %v12094_v62, 0.0  ;;  %v9475_v6 = vadd.f32 %v9341_v49, %v7803_v54 }
 0x9e1   : > { %v13662_v39 = vor.u32 %v13660_v33, %v13659_v27  ;;  %v12358_v9 = vmin.f32 %v12226_v3, 6.0  ;;  %v11147_v43 = vadd.f32 %v11013_v38, %v9475_v6  ;;  %v13664_v22 = vrot.slane %v13659_v27, 4 }
 0x9e3   : > { %v13663_v44 = vsel %vm20223_vm15, %v13655_v5, %v13662_v39  ;;  %v13640_v46 = vpack.c.bf16 %v12358_v9, %v12358_v9  ;;  %v11959_v42 = vadd.f32 %v11825_v32, %v11147_v43 }
 0x9e4   : > { %13687 = vst.msk [vmem:[%s19450_s15 + $0x1f4] sm:$0xf] %vm12364_vm5, %v13663_v44 }
 0x9e5   : > { %v13666_v15 = vshrl.u32 %v13640_v46, 16  ;;  %v12095_v17 = vadd.f32 %v17699_v28, %v11959_v42  ;;  %v13669_v60 = vshll.u32 %v13640_v46, 16 }
 0x9e7   : > { %v13668_v0 = vrot.slane %v13666_v15, 7  ;;  %v12227_v12 = vmax.f32 %v12095_v17, 0.0 }
 0x9e9   : > { %v13671_v26 = vor.u32 %v13669_v60, %v13668_v0  ;;  %v12359_v51 = vmin.f32 %v12227_v12, 6.0  ;;  %v13673_v21 = vrot.slane %v13668_v0, 4 }
 0x9eb   : > { %v13672_v8 = vsel %vm20223_vm15, %v13664_v22, %v13671_v26  ;;  %v13641_v36 = vpack.c.bf16 %v12359_v51, %v12359_v51 }
 0x9ec   : > { %13688 = vst.msk [vmem:[%s19450_s15 + $0x1f8] sm:$0xf] %vm12364_vm5, %v13672_v8 }
 0x9ed   : > { %v13675_v18 = vshrl.u32 %v13641_v36, 16  ;;  %v13678_v47 = vshll.u32 %v13641_v36, 16 }
 0x9ef   : > { %v13677_v13 = vrot.slane %v13675_v18, 7 }
 0x9f1   : > { %v13680_v56 = vor.u32 %v13678_v47, %v13677_v13 }
 0x9f3   : > { %v13681_v4 = vsel %vm20223_vm15, %v13673_v21, %v13680_v56 }
 0x9f4   : > { %13689 = vst.msk [vmem:[%s19450_s15 + $0x1fc] sm:$0xf] %vm12364_vm5, %v13681_v4 }
 0x9f5 PF: > { %s13_s12 = sadd.s32 1, %s17706_s12  }
 0x9f6   : > { %p10_p4 = scmp.ge.s32.totalorder %s13_s12, 4  }
 0x9f8   :  { %12 = sbr.rel (!%p10_p4) target bundleno = 1 (0x1), region = 73 }

</bundles_post_ra>
